<compile_context>
chip_gen: v7x
topology: tpu7x:2x2x1
jax: 0.10.0
libtpu: 0.0.40
codegen_flags: <defaults>
</compile_context>

<pallas_src>
import math
import functools

import numpy as np
import jax
import jax.numpy as jnp
from jax.experimental import pallas as pl
from jax.experimental.pallas import tpu as pltpu

# ----- model hyperparameters (faithful to the module defaults) -----
VOCAB = 64             # vocab_size
VOCAB_PAD = 128        # lane-dense padded vocab for the final projection / store
EMBED = 32             # embed_dim (d_model)
NUM_LAYERS = 2         # num_layers
NUM_HEADS = 4          # num_heads
HEAD_DIM = EMBED // NUM_HEADS
DIM_FF = 2048          # nn.TransformerDecoderLayer default dim_feedforward
SEQ = 16               # SEQUENCE_LENGTH (max_len of PositionalEncoding)
BATCH = 2
LN_EPS = 1e-5          # nn.LayerNorm default eps


# --------------------------- shared math helpers -----------------------------

def _mxu_dot(a, b):
    """bf16 multiply, f32 accumulate (MXU fast path); used by kernel & reference."""
    return jnp.dot(a.astype(jnp.bfloat16), b.astype(jnp.bfloat16),
                   preferred_element_type=jnp.float32)


def _layer_norm(x, w, b):
    mu = jnp.mean(x, axis=-1, keepdims=True)
    var = jnp.mean(jnp.square(x - mu), axis=-1, keepdims=True)
    return (x - mu) * jax.lax.rsqrt(var + LN_EPS) * w + b


# ------------------------------- Pallas kernel --------------------------------

def decoder_kernel(emb_ref, pe_ref, mask_ref,
                   sa_qkv_w, ca_qkv_w, sa_out_w, ca_out_w, ff1_w, ff2_w,
                   qkv_b, vec_b, ff1_b, fin_w, fin_b,
                   out_ref):
    BB, S, E = emb_ref.shape
    H, D = NUM_HEADS, HEAD_DIM
    N = BB * S
    scale = 1.0 / math.sqrt(D)

    # positional encoding add (dropout = identity at inference); also the "memory"
    x0 = (emb_ref[...] + pe_ref[...]).reshape(N, E)           # [N, E]
    mask = mask_ref[...]                                      # [S, S] additive causal

    def attn(q_src, kv_src, w_qkv, b_qkv, w_out, b_out, is_self):
        # fused Q/K/V projection: [N, E] @ [E, 3E]  (weights pre-transposed host-side)
        qkv_q = _mxu_dot(q_src, w_qkv) + b_qkv
        qkv_kv = qkv_q if is_self else _mxu_dot(kv_src, w_qkv) + b_qkv
        # batch (batch, head) pairs into one leading axis: [BB*H, S, D]
        q = jnp.stack([qkv_q[b * S:(b + 1) * S, h * D:(h + 1) * D]
                       for b in range(BB) for h in range(H)])
        k = jnp.stack([qkv_kv[b * S:(b + 1) * S, E + h * D:E + (h + 1) * D]
                       for b in range(BB) for h in range(H)])
        v = jnp.stack([qkv_kv[b * S:(b + 1) * S, 2 * E + h * D:2 * E + (h + 1) * D]
                       for b in range(BB) for h in range(H)])
        s = jnp.einsum('nqd,nkd->nqk',
                       q.astype(jnp.bfloat16), k.astype(jnp.bfloat16),
                       preferred_element_type=jnp.float32) * scale + mask
        s = s - jnp.max(s, axis=-1, keepdims=True)
        p = jnp.exp(s)
        p = p / jnp.sum(p, axis=-1, keepdims=True)
        o = jnp.einsum('nqk,nkd->nqd',
                       p.astype(jnp.bfloat16), v.astype(jnp.bfloat16),
                       preferred_element_type=jnp.float32)
        # merge heads back to [N, E]; single [N,E]@[E,E] output projection
        o_cat = jnp.concatenate(
            [jnp.concatenate([o[b * H + h] for h in range(H)], axis=-1)
             for b in range(BB)], axis=0)
        return _mxu_dot(o_cat, w_out) + b_out

    x = x0
    for l in range(NUM_LAYERS):
        vb = vec_b[l]            # [9, E]: sa_out_b, ca_out_b, ln1_w/b, ln2_w/b, ln3_w/b, ff2_b
        qb = qkv_b[l]            # [2, 3E]: sa_in_b, ca_in_b
        # post-norm TransformerDecoderLayer (norm_first=False, relu, eval-mode dropout)
        sa = attn(x, x, sa_qkv_w[l], qb[0], sa_out_w[l], vb[0], True)
        x = _layer_norm(x + sa, vb[2], vb[3])
        ca = attn(x, x0, ca_qkv_w[l], qb[1], ca_out_w[l], vb[1], False)
        x = _layer_norm(x + ca, vb[4], vb[5])
        h1 = jnp.maximum(_mxu_dot(x, ff1_w[l]) + ff1_b[l], 0.0)
        ff = _mxu_dot(h1, ff2_w[l]) + vb[8]
        x = _layer_norm(x + ff, vb[6], vb[7])

    # final dropout(0.3) = identity at inference; vocab projection (padded to 128 lanes)
    logits = _mxu_dot(x, fin_w[...]) + fin_b[0]
    out_ref[...] = logits.reshape(BB, S, VOCAB_PAD)


# ------------------------------- JAX wrapper -----------------------------------

def _full_spec(shape):
    nd = len(shape)
    return pl.BlockSpec(shape, lambda b, _nd=nd: (0,) * _nd)


def _pack_params(p):
    """Wrapper-side layout plumbing: transpose to x@W form, pack the small vectors,
    cast matmul weights to bf16, pad the vocab projection to 128 lanes."""
    bf = jnp.bfloat16
    sa_qkv_w = jnp.transpose(p["sa_in_w"], (0, 2, 1)).astype(bf)      # [L, E, 3E]
    ca_qkv_w = jnp.transpose(p["ca_in_w"], (0, 2, 1)).astype(bf)      # [L, E, 3E]
    sa_out_w = jnp.transpose(p["sa_out_w"], (0, 2, 1)).astype(bf)     # [L, E, E]
    ca_out_w = jnp.transpose(p["ca_out_w"], (0, 2, 1)).astype(bf)     # [L, E, E]
    ff1_w = jnp.transpose(p["ff1_w"], (0, 2, 1)).astype(bf)           # [L, E, F]
    ff2_w = jnp.transpose(p["ff2_w"], (0, 2, 1)).astype(bf)           # [L, F, E]
    qkv_b = jnp.stack([p["sa_in_b"], p["ca_in_b"]], axis=1)           # [L, 2, 3E]
    vec_b = jnp.stack([p["sa_out_b"], p["ca_out_b"],
                       p["ln1_w"], p["ln1_b"],
                       p["ln2_w"], p["ln2_b"],
                       p["ln3_w"], p["ln3_b"],
                       p["ff2_b"]], axis=1)                           # [L, 9, E]
    ff1_b = p["ff1_b"]                                                # [L, F]
    fin_w = jnp.pad(p["fin_w"].T, ((0, 0), (0, VOCAB_PAD - VOCAB))).astype(bf)  # [E, 128]
    fin_b = jnp.pad(p["fin_b"], (0, VOCAB_PAD - VOCAB)).reshape(1, VOCAB_PAD)   # [1, 128]
    return (sa_qkv_w, ca_qkv_w, sa_out_w, ca_out_w, ff1_w, ff2_w,
            qkv_b, vec_b, ff1_b, fin_w, fin_b)


def _batch_block(batch):
    """Batch rows per grid step: keep a parallel batch grid on dual-TensorCore
    chips (v7x) so the batch shards across cores; fold the whole batch into a
    single grid step on single-TC chips (v5e/v6e)."""
    try:
        kind = jax.devices()[0].device_kind.lower()
    except Exception:
        kind = ""
    if "v7" in kind and batch % 2 == 0:
        return batch // 2
    return batch


@functools.partial(jax.jit, static_argnames=("batch_block",))
def transformer_forward(tokens, params, batch_block):
    B, S = tokens.shape
    BB = batch_block
    # Embedding gather + PE slice + mask are glue; the decoder stack runs in the kernel.
    emb = jnp.take(params["emb"], tokens, axis=0)             # [B, S, E]
    pe = params["pe"][:S]                                     # [S, E]
    row = jax.lax.broadcasted_iota(jnp.int32, (S, S), 0)
    col = jax.lax.broadcasted_iota(jnp.int32, (S, S), 1)
    mask = jnp.where(col <= row, 0.0, -jnp.inf).astype(jnp.float32)
    weights = _pack_params(params)

    in_specs = [pl.BlockSpec((BB, S, EMBED), lambda b: (b, 0, 0)),
                _full_spec(pe.shape),
                _full_spec(mask.shape)]
    in_specs += [_full_spec(w.shape) for w in weights]

    out = pl.pallas_call(
        decoder_kernel,
        out_shape=jax.ShapeDtypeStruct((B, S, VOCAB_PAD), jnp.float32),
        grid=(B // BB,),
        in_specs=in_specs,
        out_specs=pl.BlockSpec((BB, S, VOCAB_PAD), lambda b: (b, 0, 0)),
        compiler_params=pltpu.CompilerParams(
            dimension_semantics=("parallel",)),
    )(emb, pe, mask, *weights)
    return out[:, :, :VOCAB]


# --------------------------- pure-JAX reference --------------------------------

def _mha_ref(q_in, kv_in, in_w, in_b, out_w, out_b, mask):
    B, S, E = q_in.shape
    H, D = NUM_HEADS, HEAD_DIM
    q = _mxu_dot(q_in, in_w[0:E].T) + in_b[0:E]
    k = _mxu_dot(kv_in, in_w[E:2 * E].T) + in_b[E:2 * E]
    v = _mxu_dot(kv_in, in_w[2 * E:].T) + in_b[2 * E:]
    q = q.reshape(B, S, H, D).transpose(0, 2, 1, 3)
    k = k.reshape(B, S, H, D).transpose(0, 2, 1, 3)
    v = v.reshape(B, S, H, D).transpose(0, 2, 1, 3)
    s = jnp.einsum('bhqd,bhkd->bhqk',
                   q.astype(jnp.bfloat16), k.astype(jnp.bfloat16),
                   preferred_element_type=jnp.float32) * (1.0 / math.sqrt(D)) + mask
    s = s - jnp.max(s, axis=-1, keepdims=True)
    p = jnp.exp(s)
    p = p / jnp.sum(p, axis=-1, keepdims=True)
    o = jnp.einsum('bhqk,bhkd->bhqd',
                   p.astype(jnp.bfloat16), v.astype(jnp.bfloat16),
                   preferred_element_type=jnp.float32)
    o = o.transpose(0, 2, 1, 3).reshape(B, S, E)
    return _mxu_dot(o, out_w.T) + out_b


def reference_forward(tokens, params):
    S = tokens.shape[1]
    emb = jnp.take(params["emb"], tokens, axis=0)
    x0 = emb + params["pe"][:S]
    row = np.arange(S)[:, None]
    col = np.arange(S)[None, :]
    mask = jnp.asarray(np.where(col <= row, 0.0, -np.inf), jnp.float32)
    x = x0
    for l in range(NUM_LAYERS):
        sa = _mha_ref(x, x, params["sa_in_w"][l], params["sa_in_b"][l],
                      params["sa_out_w"][l], params["sa_out_b"][l], mask)
        x = _layer_norm(x + sa, params["ln1_w"][l], params["ln1_b"][l])
        ca = _mha_ref(x, x0, params["ca_in_w"][l], params["ca_in_b"][l],
                      params["ca_out_w"][l], params["ca_out_b"][l], mask)
        x = _layer_norm(x + ca, params["ln2_w"][l], params["ln2_b"][l])
        h1 = jnp.maximum(_mxu_dot(x, params["ff1_w"][l].T) + params["ff1_b"][l], 0.0)
        ff = _mxu_dot(h1, params["ff2_w"][l].T) + params["ff2_b"][l]
        x = _layer_norm(x + ff, params["ln3_w"][l], params["ln3_b"][l])
    return _mxu_dot(x, params["fin_w"].T) + params["fin_b"]


# ------------------------------ parameter init ---------------------------------

def init_params(key):
    keys = iter(jax.random.split(key, 64))

    def nrm(shape, scale=0.05):
        return (scale * jax.random.normal(next(keys), shape)).astype(jnp.float32)

    def stacked(shape, scale=0.05):
        return jnp.stack([nrm(shape, scale) for _ in range(NUM_LAYERS)])

    p = {}
    p["emb"] = nrm((VOCAB, EMBED), 0.1)

    # PositionalEncoding buffer (sin/cos), computed exactly as in the module.
    pos = np.arange(SEQ, dtype=np.float32)[:, None]
    div = np.exp(np.arange(0, EMBED, 2, dtype=np.float32) * (-math.log(10000.0) / EMBED))
    pe = np.zeros((SEQ, EMBED), np.float32)
    pe[:, 0::2] = np.sin(pos * div)
    pe[:, 1::2] = np.cos(pos * div)
    p["pe"] = jnp.asarray(pe)

    # PyTorch-layout parameters (the wrapper does all layout plumbing).
    p["sa_in_w"] = stacked((3 * EMBED, EMBED))
    p["sa_in_b"] = stacked((3 * EMBED,), 0.02)
    p["sa_out_w"] = stacked((EMBED, EMBED))
    p["sa_out_b"] = stacked((EMBED,), 0.02)
    p["ca_in_w"] = stacked((3 * EMBED, EMBED))
    p["ca_in_b"] = stacked((3 * EMBED,), 0.02)
    p["ca_out_w"] = stacked((EMBED, EMBED))
    p["ca_out_b"] = stacked((EMBED,), 0.02)
    for i in (1, 2, 3):
        p[f"ln{i}_w"] = 1.0 + stacked((EMBED,), 0.02)
        p[f"ln{i}_b"] = stacked((EMBED,), 0.02)
    p["ff1_w"] = stacked((DIM_FF, EMBED), 0.02)
    p["ff1_b"] = stacked((DIM_FF,), 0.02)
    p["ff2_w"] = stacked((EMBED, DIM_FF), 0.02)
    p["ff2_b"] = stacked((EMBED,), 0.02)
    p["fin_w"] = nrm((VOCAB, EMBED))
    p["fin_b"] = nrm((VOCAB,), 0.02)
    return p


if __name__ == "__main__":
    key = jax.random.PRNGKey(0)
    pkey, tkey = jax.random.split(key)
    params = init_params(pkey)
    tokens = jax.random.randint(tkey, (BATCH, SEQ), 0, VOCAB, dtype=jnp.int32)

    out = transformer_forward(tokens, params, _batch_block(BATCH))
    out = jax.block_until_ready(out)
    assert out.shape == (BATCH, SEQ, VOCAB), out.shape
    assert out.dtype == jnp.float32

    ref = jax.block_until_ready(reference_forward(tokens, params))
    err = float(np.max(np.abs(np.asarray(out) - np.asarray(ref))))
    if not np.allclose(np.asarray(out), np.asarray(ref), rtol=2e-3, atol=2e-3):
        raise AssertionError(f"mismatch: max abs diff = {err}")
    print("KERNEL_OK")
</pallas_src>

<mosaic_0001>
module attributes {stable_mosaic.version = 11 : i64} {
  func.func @decoder_kernel(%arg0: i32, %arg1: memref<2x16x32xf32, #tpu.memory_space<vmem>>, %arg2: memref<16x32xf32, #tpu.memory_space<vmem>>, %arg3: memref<16x16xf32, #tpu.memory_space<vmem>>, %arg4: memref<2x32x96xbf16, #tpu.memory_space<vmem>>, %arg5: memref<2x32x96xbf16, #tpu.memory_space<vmem>>, %arg6: memref<2x32x32xbf16, #tpu.memory_space<vmem>>, %arg7: memref<2x32x32xbf16, #tpu.memory_space<vmem>>, %arg8: memref<2x32x2048xbf16, #tpu.memory_space<vmem>>, %arg9: memref<2x2048x32xbf16, #tpu.memory_space<vmem>>, %arg10: memref<2x2x96xf32, #tpu.memory_space<vmem>>, %arg11: memref<2x9x32xf32, #tpu.memory_space<vmem>>, %arg12: memref<2x2048xf32, #tpu.memory_space<vmem>>, %arg13: memref<32x128xbf16, #tpu.memory_space<vmem>>, %arg14: memref<1x128xf32, #tpu.memory_space<vmem>>, %arg15: memref<2x16x128xf32, #tpu.memory_space<vmem>>) attributes {dimension_semantics = [#tpu.dimension_semantics<parallel>], iteration_bounds = array<i64: 1>, scalar_prefetch = 0 : i64, scratch_operands = 0 : i64, tpu.core_type = #tpu.core_type<tc>, window_params = [{transform_indices = @transform_0, window_bounds = array<i64: 2, 16, 32>}, {pipeline_mode = #tpu.pipeline_mode<synchronous>, transform_indices = @transform_1, window_bounds = array<i64: 16, 32>}, {pipeline_mode = #tpu.pipeline_mode<synchronous>, transform_indices = @transform_2, window_bounds = array<i64: 16, 16>}, {pipeline_mode = #tpu.pipeline_mode<synchronous>, transform_indices = @transform_3, window_bounds = array<i64: 2, 32, 96>}, {pipeline_mode = #tpu.pipeline_mode<synchronous>, transform_indices = @transform_4, window_bounds = array<i64: 2, 32, 96>}, {pipeline_mode = #tpu.pipeline_mode<synchronous>, transform_indices = @transform_5, window_bounds = array<i64: 2, 32, 32>}, {pipeline_mode = #tpu.pipeline_mode<synchronous>, transform_indices = @transform_6, window_bounds = array<i64: 2, 32, 32>}, {pipeline_mode = #tpu.pipeline_mode<synchronous>, transform_indices = @transform_7, window_bounds = array<i64: 2, 32, 2048>}, {pipeline_mode = #tpu.pipeline_mode<synchronous>, transform_indices = @transform_8, window_bounds = array<i64: 2, 2048, 32>}, {pipeline_mode = #tpu.pipeline_mode<synchronous>, transform_indices = @transform_9, window_bounds = array<i64: 2, 2, 96>}, {pipeline_mode = #tpu.pipeline_mode<synchronous>, transform_indices = @transform_10, window_bounds = array<i64: 2, 9, 32>}, {pipeline_mode = #tpu.pipeline_mode<synchronous>, transform_indices = @transform_11, window_bounds = array<i64: 2, 2048>}, {pipeline_mode = #tpu.pipeline_mode<synchronous>, transform_indices = @transform_12, window_bounds = array<i64: 32, 128>}, {pipeline_mode = #tpu.pipeline_mode<synchronous>, transform_indices = @transform_13, window_bounds = array<i64: 1, 128>}, {transform_indices = @transform_14, window_bounds = array<i64: 2, 16, 128>}]} {
    %c0 = arith.constant 0 : index
    %c0_0 = arith.constant 0 : index
    %c0_1 = arith.constant 0 : index
    %0 = vector.load %arg1[%c0, %c0_0, %c0_1] : memref<2x16x32xf32, #tpu.memory_space<vmem>>, vector<2x16x32xf32>
    %c0_2 = arith.constant 0 : index
    %c0_3 = arith.constant 0 : index
    %1 = vector.load %arg2[%c0_2, %c0_3] : memref<16x32xf32, #tpu.memory_space<vmem>>, vector<16x32xf32>
    %2 = vector.shape_cast %1 : vector<16x32xf32> to vector<1x16x32xf32>
    %3 = vector.broadcast %2 : vector<1x16x32xf32> to vector<2x16x32xf32>
    %4 = arith.addf %0, %3 : vector<2x16x32xf32>
    %5 = vector.shape_cast %4 : vector<2x16x32xf32> to vector<32x32xf32>
    %c0_4 = arith.constant 0 : index
    %c0_5 = arith.constant 0 : index
    %6 = vector.load %arg3[%c0_4, %c0_5] : memref<16x16xf32, #tpu.memory_space<vmem>>, vector<16x16xf32>
    %c0_6 = arith.constant 0 : index
    %c0_7 = arith.constant 0 : index
    %c0_8 = arith.constant 0 : index
    %7 = vector.load %arg11[%c0_6, %c0_7, %c0_8] : memref<2x9x32xf32, #tpu.memory_space<vmem>>, vector<1x9x32xf32>
    %8 = vector.shape_cast %7 : vector<1x9x32xf32> to vector<9x32xf32>
    %c0_9 = arith.constant 0 : index
    %c0_10 = arith.constant 0 : index
    %c0_11 = arith.constant 0 : index
    %9 = vector.load %arg10[%c0_9, %c0_10, %c0_11] : memref<2x2x96xf32, #tpu.memory_space<vmem>>, vector<1x2x96xf32>
    %10 = vector.shape_cast %9 : vector<1x2x96xf32> to vector<2x96xf32>
    %c0_12 = arith.constant 0 : index
    %c0_13 = arith.constant 0 : index
    %c0_14 = arith.constant 0 : index
    %11 = vector.load %arg4[%c0_12, %c0_13, %c0_14] : memref<2x32x96xbf16, #tpu.memory_space<vmem>>, vector<1x32x96xbf16>
    %12 = vector.shape_cast %11 : vector<1x32x96xbf16> to vector<32x96xbf16>
    %13 = vector.extract_strided_slice %10 {offsets = [0, 0], sizes = [1, 96], strides = [1, 1]} : vector<2x96xf32> to vector<1x96xf32>
    %14 = vector.shape_cast %13 : vector<1x96xf32> to vector<96xf32>
    %c0_15 = arith.constant 0 : index
    %c0_16 = arith.constant 0 : index
    %c0_17 = arith.constant 0 : index
    %15 = vector.load %arg6[%c0_15, %c0_16, %c0_17] : memref<2x32x32xbf16, #tpu.memory_space<vmem>>, vector<1x32x32xbf16>
    %16 = vector.shape_cast %15 : vector<1x32x32xbf16> to vector<32x32xbf16>
    %17 = vector.extract_strided_slice %8 {offsets = [0, 0], sizes = [1, 32], strides = [1, 1]} : vector<9x32xf32> to vector<1x32xf32>
    %18 = vector.shape_cast %17 : vector<1x32xf32> to vector<32xf32>
    %19 = arith.truncf %5 : vector<32x32xf32> to vector<32x32xbf16>
    %cst = arith.constant dense<0.000000e+00> : vector<32x96xf32>
    %20 = tpu.matmul %19, %12, %cst {dimension_numbers = #tpu.dot_dimension_numbers<[1], [0], [0], [1], [0, 0, 1, 1], [], []>} : vector<32x32xbf16>, vector<32x96xbf16>, vector<32x96xf32> -> vector<32x96xf32>
    %21 = vector.shape_cast %14 : vector<96xf32> to vector<1x96xf32>
    %22 = vector.broadcast %21 : vector<1x96xf32> to vector<32x96xf32>
    %23 = arith.addf %20, %22 : vector<32x96xf32>
    %24 = vector.extract_strided_slice %23 {offsets = [0, 0], sizes = [16, 8], strides = [1, 1]} : vector<32x96xf32> to vector<16x8xf32>
    %25 = vector.extract_strided_slice %23 {offsets = [0, 8], sizes = [16, 8], strides = [1, 1]} : vector<32x96xf32> to vector<16x8xf32>
    %26 = vector.extract_strided_slice %23 {offsets = [0, 16], sizes = [16, 8], strides = [1, 1]} : vector<32x96xf32> to vector<16x8xf32>
    %27 = vector.extract_strided_slice %23 {offsets = [0, 24], sizes = [16, 8], strides = [1, 1]} : vector<32x96xf32> to vector<16x8xf32>
    %28 = vector.extract_strided_slice %23 {offsets = [16, 0], sizes = [16, 8], strides = [1, 1]} : vector<32x96xf32> to vector<16x8xf32>
    %29 = vector.extract_strided_slice %23 {offsets = [16, 8], sizes = [16, 8], strides = [1, 1]} : vector<32x96xf32> to vector<16x8xf32>
    %30 = vector.extract_strided_slice %23 {offsets = [16, 16], sizes = [16, 8], strides = [1, 1]} : vector<32x96xf32> to vector<16x8xf32>
    %31 = vector.extract_strided_slice %23 {offsets = [16, 24], sizes = [16, 8], strides = [1, 1]} : vector<32x96xf32> to vector<16x8xf32>
    %32 = vector.shape_cast %24 : vector<16x8xf32> to vector<1x16x8xf32>
    %33 = vector.shape_cast %25 : vector<16x8xf32> to vector<1x16x8xf32>
    %34 = vector.shape_cast %26 : vector<16x8xf32> to vector<1x16x8xf32>
    %35 = vector.shape_cast %27 : vector<16x8xf32> to vector<1x16x8xf32>
    %36 = vector.shape_cast %28 : vector<16x8xf32> to vector<1x16x8xf32>
    %37 = vector.shape_cast %29 : vector<16x8xf32> to vector<1x16x8xf32>
    %38 = vector.shape_cast %30 : vector<16x8xf32> to vector<1x16x8xf32>
    %39 = vector.shape_cast %31 : vector<16x8xf32> to vector<1x16x8xf32>
    %40 = tpu.concatenate %32, %33, %34, %35, %36, %37, %38, %39 in 0 : vector<1x16x8xf32>, vector<1x16x8xf32>, vector<1x16x8xf32>, vector<1x16x8xf32>, vector<1x16x8xf32>, vector<1x16x8xf32>, vector<1x16x8xf32>, vector<1x16x8xf32> -> vector<8x16x8xf32>
    %41 = vector.extract_strided_slice %23 {offsets = [0, 32], sizes = [16, 8], strides = [1, 1]} : vector<32x96xf32> to vector<16x8xf32>
    %42 = vector.extract_strided_slice %23 {offsets = [0, 40], sizes = [16, 8], strides = [1, 1]} : vector<32x96xf32> to vector<16x8xf32>
    %43 = vector.extract_strided_slice %23 {offsets = [0, 48], sizes = [16, 8], strides = [1, 1]} : vector<32x96xf32> to vector<16x8xf32>
    %44 = vector.extract_strided_slice %23 {offsets = [0, 56], sizes = [16, 8], strides = [1, 1]} : vector<32x96xf32> to vector<16x8xf32>
    %45 = vector.extract_strided_slice %23 {offsets = [16, 32], sizes = [16, 8], strides = [1, 1]} : vector<32x96xf32> to vector<16x8xf32>
    %46 = vector.extract_strided_slice %23 {offsets = [16, 40], sizes = [16, 8], strides = [1, 1]} : vector<32x96xf32> to vector<16x8xf32>
    %47 = vector.extract_strided_slice %23 {offsets = [16, 48], sizes = [16, 8], strides = [1, 1]} : vector<32x96xf32> to vector<16x8xf32>
    %48 = vector.extract_strided_slice %23 {offsets = [16, 56], sizes = [16, 8], strides = [1, 1]} : vector<32x96xf32> to vector<16x8xf32>
    %49 = vector.shape_cast %41 : vector<16x8xf32> to vector<1x16x8xf32>
    %50 = vector.shape_cast %42 : vector<16x8xf32> to vector<1x16x8xf32>
    %51 = vector.shape_cast %43 : vector<16x8xf32> to vector<1x16x8xf32>
    %52 = vector.shape_cast %44 : vector<16x8xf32> to vector<1x16x8xf32>
    %53 = vector.shape_cast %45 : vector<16x8xf32> to vector<1x16x8xf32>
    %54 = vector.shape_cast %46 : vector<16x8xf32> to vector<1x16x8xf32>
    %55 = vector.shape_cast %47 : vector<16x8xf32> to vector<1x16x8xf32>
    %56 = vector.shape_cast %48 : vector<16x8xf32> to vector<1x16x8xf32>
    %57 = tpu.concatenate %49, %50, %51, %52, %53, %54, %55, %56 in 0 : vector<1x16x8xf32>, vector<1x16x8xf32>, vector<1x16x8xf32>, vector<1x16x8xf32>, vector<1x16x8xf32>, vector<1x16x8xf32>, vector<1x16x8xf32>, vector<1x16x8xf32> -> vector<8x16x8xf32>
    %58 = vector.extract_strided_slice %23 {offsets = [0, 64], sizes = [16, 8], strides = [1, 1]} : vector<32x96xf32> to vector<16x8xf32>
    %59 = vector.extract_strided_slice %23 {offsets = [0, 72], sizes = [16, 8], strides = [1, 1]} : vector<32x96xf32> to vector<16x8xf32>
    %60 = vector.extract_strided_slice %23 {offsets = [0, 80], sizes = [16, 8], strides = [1, 1]} : vector<32x96xf32> to vector<16x8xf32>
    %61 = vector.extract_strided_slice %23 {offsets = [0, 88], sizes = [16, 8], strides = [1, 1]} : vector<32x96xf32> to vector<16x8xf32>
    %62 = vector.extract_strided_slice %23 {offsets = [16, 64], sizes = [16, 8], strides = [1, 1]} : vector<32x96xf32> to vector<16x8xf32>
    %63 = vector.extract_strided_slice %23 {offsets = [16, 72], sizes = [16, 8], strides = [1, 1]} : vector<32x96xf32> to vector<16x8xf32>
    %64 = vector.extract_strided_slice %23 {offsets = [16, 80], sizes = [16, 8], strides = [1, 1]} : vector<32x96xf32> to vector<16x8xf32>
    %65 = vector.extract_strided_slice %23 {offsets = [16, 88], sizes = [16, 8], strides = [1, 1]} : vector<32x96xf32> to vector<16x8xf32>
    %66 = vector.shape_cast %58 : vector<16x8xf32> to vector<1x16x8xf32>
    %67 = vector.shape_cast %59 : vector<16x8xf32> to vector<1x16x8xf32>
    %68 = vector.shape_cast %60 : vector<16x8xf32> to vector<1x16x8xf32>
    %69 = vector.shape_cast %61 : vector<16x8xf32> to vector<1x16x8xf32>
    %70 = vector.shape_cast %62 : vector<16x8xf32> to vector<1x16x8xf32>
    %71 = vector.shape_cast %63 : vector<16x8xf32> to vector<1x16x8xf32>
    %72 = vector.shape_cast %64 : vector<16x8xf32> to vector<1x16x8xf32>
    %73 = vector.shape_cast %65 : vector<16x8xf32> to vector<1x16x8xf32>
    %74 = tpu.concatenate %66, %67, %68, %69, %70, %71, %72, %73 in 0 : vector<1x16x8xf32>, vector<1x16x8xf32>, vector<1x16x8xf32>, vector<1x16x8xf32>, vector<1x16x8xf32>, vector<1x16x8xf32>, vector<1x16x8xf32>, vector<1x16x8xf32> -> vector<8x16x8xf32>
    %75 = arith.truncf %40 : vector<8x16x8xf32> to vector<8x16x8xbf16>
    %76 = arith.truncf %57 : vector<8x16x8xf32> to vector<8x16x8xbf16>
    "tpu.trace_start"() <{level = 10 : i32, message = "nqd,nkd->nqk"}> : () -> ()
    %cst_18 = arith.constant dense<0.000000e+00> : vector<8x16x16xf32>
    %77 = tpu.matmul %75, %76, %cst_18 {dimension_numbers = #tpu.dot_dimension_numbers<[2], [2], [1], [1], [0, 0, 0, 1, 1, 1], [0], [0]>} : vector<8x16x8xbf16>, vector<8x16x8xbf16>, vector<8x16x16xf32> -> vector<8x16x16xf32>
    "tpu.trace_stop"() : () -> ()
    %cst_19 = arith.constant 0.353553385 : f32
    %78 = vector.broadcast %cst_19 : f32 to vector<8x16x16xf32>
    %79 = arith.mulf %77, %78 : vector<8x16x16xf32>
    %80 = vector.shape_cast %6 : vector<16x16xf32> to vector<1x16x16xf32>
    %81 = vector.broadcast %80 : vector<1x16x16xf32> to vector<8x16x16xf32>
    %82 = arith.addf %79, %81 : vector<8x16x16xf32>
    %cst_20 = arith.constant dense<0xFF800000> : vector<8x16xf32>
    %83 = vector.multi_reduction <maximumf>, %82, %cst_20 [2] : vector<8x16x16xf32> to vector<8x16xf32>
    %84 = vector.shape_cast %83 : vector<8x16xf32> to vector<8x16x1xf32>
    %85 = vector.broadcast %84 : vector<8x16x1xf32> to vector<8x16x16xf32>
    %86 = arith.subf %82, %85 : vector<8x16x16xf32>
    %87 = math.exp %86 : vector<8x16x16xf32>
    %cst_21 = arith.constant dense<0.000000e+00> : vector<8x16xf32>
    %88 = vector.multi_reduction <add>, %87, %cst_21 [2] : vector<8x16x16xf32> to vector<8x16xf32>
    %89 = vector.shape_cast %88 : vector<8x16xf32> to vector<8x16x1xf32>
    %90 = vector.broadcast %89 : vector<8x16x1xf32> to vector<8x16x16xf32>
    %91 = arith.divf %87, %90 : vector<8x16x16xf32>
    %92 = arith.truncf %91 : vector<8x16x16xf32> to vector<8x16x16xbf16>
    %93 = arith.truncf %74 : vector<8x16x8xf32> to vector<8x16x8xbf16>
    "tpu.trace_start"() <{level = 10 : i32, message = "nqk,nkd->nqd"}> : () -> ()
    %cst_22 = arith.constant dense<0.000000e+00> : vector<8x16x8xf32>
    %94 = tpu.matmul %92, %93, %cst_22 {dimension_numbers = #tpu.dot_dimension_numbers<[2], [1], [1], [2], [0, 0, 0, 1, 1, 2], [0], [0]>} : vector<8x16x16xbf16>, vector<8x16x8xbf16>, vector<8x16x8xf32> -> vector<8x16x8xf32>
    "tpu.trace_stop"() : () -> ()
    %95 = vector.extract_strided_slice %94 {offsets = [0, 0, 0], sizes = [1, 16, 8], strides = [1, 1, 1]} : vector<8x16x8xf32> to vector<1x16x8xf32>
    %96 = vector.shape_cast %95 : vector<1x16x8xf32> to vector<16x8xf32>
    %97 = vector.extract_strided_slice %94 {offsets = [1, 0, 0], sizes = [1, 16, 8], strides = [1, 1, 1]} : vector<8x16x8xf32> to vector<1x16x8xf32>
    %98 = vector.shape_cast %97 : vector<1x16x8xf32> to vector<16x8xf32>
    %99 = vector.extract_strided_slice %94 {offsets = [2, 0, 0], sizes = [1, 16, 8], strides = [1, 1, 1]} : vector<8x16x8xf32> to vector<1x16x8xf32>
    %100 = vector.shape_cast %99 : vector<1x16x8xf32> to vector<16x8xf32>
    %101 = vector.extract_strided_slice %94 {offsets = [3, 0, 0], sizes = [1, 16, 8], strides = [1, 1, 1]} : vector<8x16x8xf32> to vector<1x16x8xf32>
    %102 = vector.shape_cast %101 : vector<1x16x8xf32> to vector<16x8xf32>
    %103 = tpu.concatenate %96, %98, %100, %102 in 1 : vector<16x8xf32>, vector<16x8xf32>, vector<16x8xf32>, vector<16x8xf32> -> vector<16x32xf32>
    %104 = vector.extract_strided_slice %94 {offsets = [4, 0, 0], sizes = [1, 16, 8], strides = [1, 1, 1]} : vector<8x16x8xf32> to vector<1x16x8xf32>
    %105 = vector.shape_cast %104 : vector<1x16x8xf32> to vector<16x8xf32>
    %106 = vector.extract_strided_slice %94 {offsets = [5, 0, 0], sizes = [1, 16, 8], strides = [1, 1, 1]} : vector<8x16x8xf32> to vector<1x16x8xf32>
    %107 = vector.shape_cast %106 : vector<1x16x8xf32> to vector<16x8xf32>
    %108 = vector.extract_strided_slice %94 {offsets = [6, 0, 0], sizes = [1, 16, 8], strides = [1, 1, 1]} : vector<8x16x8xf32> to vector<1x16x8xf32>
    %109 = vector.shape_cast %108 : vector<1x16x8xf32> to vector<16x8xf32>
    %110 = vector.extract_strided_slice %94 {offsets = [7, 0, 0], sizes = [1, 16, 8], strides = [1, 1, 1]} : vector<8x16x8xf32> to vector<1x16x8xf32>
    %111 = vector.shape_cast %110 : vector<1x16x8xf32> to vector<16x8xf32>
    %112 = tpu.concatenate %105, %107, %109, %111 in 1 : vector<16x8xf32>, vector<16x8xf32>, vector<16x8xf32>, vector<16x8xf32> -> vector<16x32xf32>
    %113 = tpu.concatenate %103, %112 in 0 : vector<16x32xf32>, vector<16x32xf32> -> vector<32x32xf32>
    %114 = arith.truncf %113 : vector<32x32xf32> to vector<32x32xbf16>
    %cst_23 = arith.constant dense<0.000000e+00> : vector<32x32xf32>
    %115 = tpu.matmul %114, %16, %cst_23 {dimension_numbers = #tpu.dot_dimension_numbers<[1], [0], [0], [1], [0, 0, 1, 1], [], []>} : vector<32x32xbf16>, vector<32x32xbf16>, vector<32x32xf32> -> vector<32x32xf32>
    %116 = vector.shape_cast %18 : vector<32xf32> to vector<1x32xf32>
    %117 = vector.broadcast %116 : vector<1x32xf32> to vector<32x32xf32>
    %118 = arith.addf %115, %117 : vector<32x32xf32>
    %119 = arith.addf %5, %118 : vector<32x32xf32>
    %120 = vector.extract_strided_slice %8 {offsets = [2, 0], sizes = [1, 32], strides = [1, 1]} : vector<9x32xf32> to vector<1x32xf32>
    %121 = vector.shape_cast %120 : vector<1x32xf32> to vector<32xf32>
    %122 = vector.extract_strided_slice %8 {offsets = [3, 0], sizes = [1, 32], strides = [1, 1]} : vector<9x32xf32> to vector<1x32xf32>
    %123 = vector.shape_cast %122 : vector<1x32xf32> to vector<32xf32>
    %cst_24 = arith.constant dense<0.000000e+00> : vector<32xf32>
    %124 = vector.multi_reduction <add>, %119, %cst_24 [1] : vector<32x32xf32> to vector<32xf32>
    %125 = vector.shape_cast %124 : vector<32xf32> to vector<32x1xf32>
    %cst_25 = arith.constant 3.200000e+01 : f32
    %126 = vector.broadcast %cst_25 : f32 to vector<32x1xf32>
    %127 = arith.divf %125, %126 : vector<32x1xf32>
    %128 = vector.broadcast %127 : vector<32x1xf32> to vector<32x32xf32>
    %129 = arith.subf %119, %128 : vector<32x32xf32>
    %130 = arith.mulf %129, %129 : vector<32x32xf32>
    %cst_26 = arith.constant dense<0.000000e+00> : vector<32xf32>
    %131 = vector.multi_reduction <add>, %130, %cst_26 [1] : vector<32x32xf32> to vector<32xf32>
    %132 = vector.shape_cast %131 : vector<32xf32> to vector<32x1xf32>
    %cst_27 = arith.constant 3.200000e+01 : f32
    %133 = vector.broadcast %cst_27 : f32 to vector<32x1xf32>
    %134 = arith.divf %132, %133 : vector<32x1xf32>
    %135 = vector.broadcast %127 : vector<32x1xf32> to vector<32x32xf32>
    %136 = arith.subf %119, %135 : vector<32x32xf32>
    %cst_28 = arith.constant 9.99999974E-6 : f32
    %137 = vector.broadcast %cst_28 : f32 to vector<32x1xf32>
    %138 = arith.addf %134, %137 : vector<32x1xf32>
    %139 = math.rsqrt %138 : vector<32x1xf32>
    %140 = vector.broadcast %139 : vector<32x1xf32> to vector<32x32xf32>
    %141 = arith.mulf %136, %140 : vector<32x32xf32>
    %142 = vector.shape_cast %121 : vector<32xf32> to vector<1x32xf32>
    %143 = vector.broadcast %142 : vector<1x32xf32> to vector<32x32xf32>
    %144 = arith.mulf %141, %143 : vector<32x32xf32>
    %145 = vector.shape_cast %123 : vector<32xf32> to vector<1x32xf32>
    %146 = vector.broadcast %145 : vector<1x32xf32> to vector<32x32xf32>
    %147 = arith.addf %144, %146 : vector<32x32xf32>
    %c0_29 = arith.constant 0 : index
    %c0_30 = arith.constant 0 : index
    %c0_31 = arith.constant 0 : index
    %148 = vector.load %arg5[%c0_29, %c0_30, %c0_31] : memref<2x32x96xbf16, #tpu.memory_space<vmem>>, vector<1x32x96xbf16>
    %149 = vector.shape_cast %148 : vector<1x32x96xbf16> to vector<32x96xbf16>
    %150 = vector.extract_strided_slice %10 {offsets = [1, 0], sizes = [1, 96], strides = [1, 1]} : vector<2x96xf32> to vector<1x96xf32>
    %151 = vector.shape_cast %150 : vector<1x96xf32> to vector<96xf32>
    %c0_32 = arith.constant 0 : index
    %c0_33 = arith.constant 0 : index
    %c0_34 = arith.constant 0 : index
    %152 = vector.load %arg7[%c0_32, %c0_33, %c0_34] : memref<2x32x32xbf16, #tpu.memory_space<vmem>>, vector<1x32x32xbf16>
    %153 = vector.shape_cast %152 : vector<1x32x32xbf16> to vector<32x32xbf16>
    %154 = vector.extract_strided_slice %8 {offsets = [1, 0], sizes = [1, 32], strides = [1, 1]} : vector<9x32xf32> to vector<1x32xf32>
    %155 = vector.shape_cast %154 : vector<1x32xf32> to vector<32xf32>
    %156 = arith.truncf %147 : vector<32x32xf32> to vector<32x32xbf16>
    %cst_35 = arith.constant dense<0.000000e+00> : vector<32x96xf32>
    %157 = tpu.matmul %156, %149, %cst_35 {dimension_numbers = #tpu.dot_dimension_numbers<[1], [0], [0], [1], [0, 0, 1, 1], [], []>} : vector<32x32xbf16>, vector<32x96xbf16>, vector<32x96xf32> -> vector<32x96xf32>
    %158 = vector.shape_cast %151 : vector<96xf32> to vector<1x96xf32>
    %159 = vector.broadcast %158 : vector<1x96xf32> to vector<32x96xf32>
    %160 = arith.addf %157, %159 : vector<32x96xf32>
    %161 = arith.truncf %5 : vector<32x32xf32> to vector<32x32xbf16>
    %cst_36 = arith.constant dense<0.000000e+00> : vector<32x96xf32>
    %162 = tpu.matmul %161, %149, %cst_36 {dimension_numbers = #tpu.dot_dimension_numbers<[1], [0], [0], [1], [0, 0, 1, 1], [], []>} : vector<32x32xbf16>, vector<32x96xbf16>, vector<32x96xf32> -> vector<32x96xf32>
    %163 = vector.shape_cast %151 : vector<96xf32> to vector<1x96xf32>
    %164 = vector.broadcast %163 : vector<1x96xf32> to vector<32x96xf32>
    %165 = arith.addf %162, %164 : vector<32x96xf32>
    %166 = vector.extract_strided_slice %160 {offsets = [0, 0], sizes = [16, 8], strides = [1, 1]} : vector<32x96xf32> to vector<16x8xf32>
    %167 = vector.extract_strided_slice %160 {offsets = [0, 8], sizes = [16, 8], strides = [1, 1]} : vector<32x96xf32> to vector<16x8xf32>
    %168 = vector.extract_strided_slice %160 {offsets = [0, 16], sizes = [16, 8], strides = [1, 1]} : vector<32x96xf32> to vector<16x8xf32>
    %169 = vector.extract_strided_slice %160 {offsets = [0, 24], sizes = [16, 8], strides = [1, 1]} : vector<32x96xf32> to vector<16x8xf32>
    %170 = vector.extract_strided_slice %160 {offsets = [16, 0], sizes = [16, 8], strides = [1, 1]} : vector<32x96xf32> to vector<16x8xf32>
    %171 = vector.extract_strided_slice %160 {offsets = [16, 8], sizes = [16, 8], strides = [1, 1]} : vector<32x96xf32> to vector<16x8xf32>
    %172 = vector.extract_strided_slice %160 {offsets = [16, 16], sizes = [16, 8], strides = [1, 1]} : vector<32x96xf32> to vector<16x8xf32>
    %173 = vector.extract_strided_slice %160 {offsets = [16, 24], sizes = [16, 8], strides = [1, 1]} : vector<32x96xf32> to vector<16x8xf32>
    %174 = vector.shape_cast %166 : vector<16x8xf32> to vector<1x16x8xf32>
    %175 = vector.shape_cast %167 : vector<16x8xf32> to vector<1x16x8xf32>
    %176 = vector.shape_cast %168 : vector<16x8xf32> to vector<1x16x8xf32>
    %177 = vector.shape_cast %169 : vector<16x8xf32> to vector<1x16x8xf32>
    %178 = vector.shape_cast %170 : vector<16x8xf32> to vector<1x16x8xf32>
    %179 = vector.shape_cast %171 : vector<16x8xf32> to vector<1x16x8xf32>
    %180 = vector.shape_cast %172 : vector<16x8xf32> to vector<1x16x8xf32>
    %181 = vector.shape_cast %173 : vector<16x8xf32> to vector<1x16x8xf32>
    %182 = tpu.concatenate %174, %175, %176, %177, %178, %179, %180, %181 in 0 : vector<1x16x8xf32>, vector<1x16x8xf32>, vector<1x16x8xf32>, vector<1x16x8xf32>, vector<1x16x8xf32>, vector<1x16x8xf32>, vector<1x16x8xf32>, vector<1x16x8xf32> -> vector<8x16x8xf32>
    %183 = vector.extract_strided_slice %165 {offsets = [0, 32], sizes = [16, 8], strides = [1, 1]} : vector<32x96xf32> to vector<16x8xf32>
    %184 = vector.extract_strided_slice %165 {offsets = [0, 40], sizes = [16, 8], strides = [1, 1]} : vector<32x96xf32> to vector<16x8xf32>
    %185 = vector.extract_strided_slice %165 {offsets = [0, 48], sizes = [16, 8], strides = [1, 1]} : vector<32x96xf32> to vector<16x8xf32>
    %186 = vector.extract_strided_slice %165 {offsets = [0, 56], sizes = [16, 8], strides = [1, 1]} : vector<32x96xf32> to vector<16x8xf32>
    %187 = vector.extract_strided_slice %165 {offsets = [16, 32], sizes = [16, 8], strides = [1, 1]} : vector<32x96xf32> to vector<16x8xf32>
    %188 = vector.extract_strided_slice %165 {offsets = [16, 40], sizes = [16, 8], strides = [1, 1]} : vector<32x96xf32> to vector<16x8xf32>
    %189 = vector.extract_strided_slice %165 {offsets = [16, 48], sizes = [16, 8], strides = [1, 1]} : vector<32x96xf32> to vector<16x8xf32>
    %190 = vector.extract_strided_slice %165 {offsets = [16, 56], sizes = [16, 8], strides = [1, 1]} : vector<32x96xf32> to vector<16x8xf32>
    %191 = vector.shape_cast %183 : vector<16x8xf32> to vector<1x16x8xf32>
    %192 = vector.shape_cast %184 : vector<16x8xf32> to vector<1x16x8xf32>
    %193 = vector.shape_cast %185 : vector<16x8xf32> to vector<1x16x8xf32>
    %194 = vector.shape_cast %186 : vector<16x8xf32> to vector<1x16x8xf32>
    %195 = vector.shape_cast %187 : vector<16x8xf32> to vector<1x16x8xf32>
    %196 = vector.shape_cast %188 : vector<16x8xf32> to vector<1x16x8xf32>
    %197 = vector.shape_cast %189 : vector<16x8xf32> to vector<1x16x8xf32>
    %198 = vector.shape_cast %190 : vector<16x8xf32> to vector<1x16x8xf32>
    %199 = tpu.concatenate %191, %192, %193, %194, %195, %196, %197, %198 in 0 : vector<1x16x8xf32>, vector<1x16x8xf32>, vector<1x16x8xf32>, vector<1x16x8xf32>, vector<1x16x8xf32>, vector<1x16x8xf32>, vector<1x16x8xf32>, vector<1x16x8xf32> -> vector<8x16x8xf32>
    %200 = vector.extract_strided_slice %165 {offsets = [0, 64], sizes = [16, 8], strides = [1, 1]} : vector<32x96xf32> to vector<16x8xf32>
    %201 = vector.extract_strided_slice %165 {offsets = [0, 72], sizes = [16, 8], strides = [1, 1]} : vector<32x96xf32> to vector<16x8xf32>
    %202 = vector.extract_strided_slice %165 {offsets = [0, 80], sizes = [16, 8], strides = [1, 1]} : vector<32x96xf32> to vector<16x8xf32>
    %203 = vector.extract_strided_slice %165 {offsets = [0, 88], sizes = [16, 8], strides = [1, 1]} : vector<32x96xf32> to vector<16x8xf32>
    %204 = vector.extract_strided_slice %165 {offsets = [16, 64], sizes = [16, 8], strides = [1, 1]} : vector<32x96xf32> to vector<16x8xf32>
    %205 = vector.extract_strided_slice %165 {offsets = [16, 72], sizes = [16, 8], strides = [1, 1]} : vector<32x96xf32> to vector<16x8xf32>
    %206 = vector.extract_strided_slice %165 {offsets = [16, 80], sizes = [16, 8], strides = [1, 1]} : vector<32x96xf32> to vector<16x8xf32>
    %207 = vector.extract_strided_slice %165 {offsets = [16, 88], sizes = [16, 8], strides = [1, 1]} : vector<32x96xf32> to vector<16x8xf32>
    %208 = vector.shape_cast %200 : vector<16x8xf32> to vector<1x16x8xf32>
    %209 = vector.shape_cast %201 : vector<16x8xf32> to vector<1x16x8xf32>
    %210 = vector.shape_cast %202 : vector<16x8xf32> to vector<1x16x8xf32>
    %211 = vector.shape_cast %203 : vector<16x8xf32> to vector<1x16x8xf32>
    %212 = vector.shape_cast %204 : vector<16x8xf32> to vector<1x16x8xf32>
    %213 = vector.shape_cast %205 : vector<16x8xf32> to vector<1x16x8xf32>
    %214 = vector.shape_cast %206 : vector<16x8xf32> to vector<1x16x8xf32>
    %215 = vector.shape_cast %207 : vector<16x8xf32> to vector<1x16x8xf32>
    %216 = tpu.concatenate %208, %209, %210, %211, %212, %213, %214, %215 in 0 : vector<1x16x8xf32>, vector<1x16x8xf32>, vector<1x16x8xf32>, vector<1x16x8xf32>, vector<1x16x8xf32>, vector<1x16x8xf32>, vector<1x16x8xf32>, vector<1x16x8xf32> -> vector<8x16x8xf32>
    %217 = arith.truncf %182 : vector<8x16x8xf32> to vector<8x16x8xbf16>
    %218 = arith.truncf %199 : vector<8x16x8xf32> to vector<8x16x8xbf16>
    "tpu.trace_start"() <{level = 10 : i32, message = "nqd,nkd->nqk"}> : () -> ()
    %cst_37 = arith.constant dense<0.000000e+00> : vector<8x16x16xf32>
    %219 = tpu.matmul %217, %218, %cst_37 {dimension_numbers = #tpu.dot_dimension_numbers<[2], [2], [1], [1], [0, 0, 0, 1, 1, 1], [0], [0]>} : vector<8x16x8xbf16>, vector<8x16x8xbf16>, vector<8x16x16xf32> -> vector<8x16x16xf32>
    "tpu.trace_stop"() : () -> ()
    %cst_38 = arith.constant 0.353553385 : f32
    %220 = vector.broadcast %cst_38 : f32 to vector<8x16x16xf32>
    %221 = arith.mulf %219, %220 : vector<8x16x16xf32>
    %222 = vector.shape_cast %6 : vector<16x16xf32> to vector<1x16x16xf32>
    %223 = vector.broadcast %222 : vector<1x16x16xf32> to vector<8x16x16xf32>
    %224 = arith.addf %221, %223 : vector<8x16x16xf32>
    %cst_39 = arith.constant dense<0xFF800000> : vector<8x16xf32>
    %225 = vector.multi_reduction <maximumf>, %224, %cst_39 [2] : vector<8x16x16xf32> to vector<8x16xf32>
    %226 = vector.shape_cast %225 : vector<8x16xf32> to vector<8x16x1xf32>
    %227 = vector.broadcast %226 : vector<8x16x1xf32> to vector<8x16x16xf32>
    %228 = arith.subf %224, %227 : vector<8x16x16xf32>
    %229 = math.exp %228 : vector<8x16x16xf32>
    %cst_40 = arith.constant dense<0.000000e+00> : vector<8x16xf32>
    %230 = vector.multi_reduction <add>, %229, %cst_40 [2] : vector<8x16x16xf32> to vector<8x16xf32>
    %231 = vector.shape_cast %230 : vector<8x16xf32> to vector<8x16x1xf32>
    %232 = vector.broadcast %231 : vector<8x16x1xf32> to vector<8x16x16xf32>
    %233 = arith.divf %229, %232 : vector<8x16x16xf32>
    %234 = arith.truncf %233 : vector<8x16x16xf32> to vector<8x16x16xbf16>
    %235 = arith.truncf %216 : vector<8x16x8xf32> to vector<8x16x8xbf16>
    "tpu.trace_start"() <{level = 10 : i32, message = "nqk,nkd->nqd"}> : () -> ()
    %cst_41 = arith.constant dense<0.000000e+00> : vector<8x16x8xf32>
    %236 = tpu.matmul %234, %235, %cst_41 {dimension_numbers = #tpu.dot_dimension_numbers<[2], [1], [1], [2], [0, 0, 0, 1, 1, 2], [0], [0]>} : vector<8x16x16xbf16>, vector<8x16x8xbf16>, vector<8x16x8xf32> -> vector<8x16x8xf32>
    "tpu.trace_stop"() : () -> ()
    %237 = vector.extract_strided_slice %236 {offsets = [0, 0, 0], sizes = [1, 16, 8], strides = [1, 1, 1]} : vector<8x16x8xf32> to vector<1x16x8xf32>
    %238 = vector.shape_cast %237 : vector<1x16x8xf32> to vector<16x8xf32>
    %239 = vector.extract_strided_slice %236 {offsets = [1, 0, 0], sizes = [1, 16, 8], strides = [1, 1, 1]} : vector<8x16x8xf32> to vector<1x16x8xf32>
    %240 = vector.shape_cast %239 : vector<1x16x8xf32> to vector<16x8xf32>
    %241 = vector.extract_strided_slice %236 {offsets = [2, 0, 0], sizes = [1, 16, 8], strides = [1, 1, 1]} : vector<8x16x8xf32> to vector<1x16x8xf32>
    %242 = vector.shape_cast %241 : vector<1x16x8xf32> to vector<16x8xf32>
    %243 = vector.extract_strided_slice %236 {offsets = [3, 0, 0], sizes = [1, 16, 8], strides = [1, 1, 1]} : vector<8x16x8xf32> to vector<1x16x8xf32>
    %244 = vector.shape_cast %243 : vector<1x16x8xf32> to vector<16x8xf32>
    %245 = tpu.concatenate %238, %240, %242, %244 in 1 : vector<16x8xf32>, vector<16x8xf32>, vector<16x8xf32>, vector<16x8xf32> -> vector<16x32xf32>
    %246 = vector.extract_strided_slice %236 {offsets = [4, 0, 0], sizes = [1, 16, 8], strides = [1, 1, 1]} : vector<8x16x8xf32> to vector<1x16x8xf32>
    %247 = vector.shape_cast %246 : vector<1x16x8xf32> to vector<16x8xf32>
    %248 = vector.extract_strided_slice %236 {offsets = [5, 0, 0], sizes = [1, 16, 8], strides = [1, 1, 1]} : vector<8x16x8xf32> to vector<1x16x8xf32>
    %249 = vector.shape_cast %248 : vector<1x16x8xf32> to vector<16x8xf32>
    %250 = vector.extract_strided_slice %236 {offsets = [6, 0, 0], sizes = [1, 16, 8], strides = [1, 1, 1]} : vector<8x16x8xf32> to vector<1x16x8xf32>
    %251 = vector.shape_cast %250 : vector<1x16x8xf32> to vector<16x8xf32>
    %252 = vector.extract_strided_slice %236 {offsets = [7, 0, 0], sizes = [1, 16, 8], strides = [1, 1, 1]} : vector<8x16x8xf32> to vector<1x16x8xf32>
    %253 = vector.shape_cast %252 : vector<1x16x8xf32> to vector<16x8xf32>
    %254 = tpu.concatenate %247, %249, %251, %253 in 1 : vector<16x8xf32>, vector<16x8xf32>, vector<16x8xf32>, vector<16x8xf32> -> vector<16x32xf32>
    %255 = tpu.concatenate %245, %254 in 0 : vector<16x32xf32>, vector<16x32xf32> -> vector<32x32xf32>
    %256 = arith.truncf %255 : vector<32x32xf32> to vector<32x32xbf16>
    %cst_42 = arith.constant dense<0.000000e+00> : vector<32x32xf32>
    %257 = tpu.matmul %256, %153, %cst_42 {dimension_numbers = #tpu.dot_dimension_numbers<[1], [0], [0], [1], [0, 0, 1, 1], [], []>} : vector<32x32xbf16>, vector<32x32xbf16>, vector<32x32xf32> -> vector<32x32xf32>
    %258 = vector.shape_cast %155 : vector<32xf32> to vector<1x32xf32>
    %259 = vector.broadcast %258 : vector<1x32xf32> to vector<32x32xf32>
    %260 = arith.addf %257, %259 : vector<32x32xf32>
    %261 = arith.addf %147, %260 : vector<32x32xf32>
    %262 = vector.extract_strided_slice %8 {offsets = [4, 0], sizes = [1, 32], strides = [1, 1]} : vector<9x32xf32> to vector<1x32xf32>
    %263 = vector.shape_cast %262 : vector<1x32xf32> to vector<32xf32>
    %264 = vector.extract_strided_slice %8 {offsets = [5, 0], sizes = [1, 32], strides = [1, 1]} : vector<9x32xf32> to vector<1x32xf32>
    %265 = vector.shape_cast %264 : vector<1x32xf32> to vector<32xf32>
    %cst_43 = arith.constant dense<0.000000e+00> : vector<32xf32>
    %266 = vector.multi_reduction <add>, %261, %cst_43 [1] : vector<32x32xf32> to vector<32xf32>
    %267 = vector.shape_cast %266 : vector<32xf32> to vector<32x1xf32>
    %cst_44 = arith.constant 3.200000e+01 : f32
    %268 = vector.broadcast %cst_44 : f32 to vector<32x1xf32>
    %269 = arith.divf %267, %268 : vector<32x1xf32>
    %270 = vector.broadcast %269 : vector<32x1xf32> to vector<32x32xf32>
    %271 = arith.subf %261, %270 : vector<32x32xf32>
    %272 = arith.mulf %271, %271 : vector<32x32xf32>
    %cst_45 = arith.constant dense<0.000000e+00> : vector<32xf32>
    %273 = vector.multi_reduction <add>, %272, %cst_45 [1] : vector<32x32xf32> to vector<32xf32>
    %274 = vector.shape_cast %273 : vector<32xf32> to vector<32x1xf32>
    %cst_46 = arith.constant 3.200000e+01 : f32
    %275 = vector.broadcast %cst_46 : f32 to vector<32x1xf32>
    %276 = arith.divf %274, %275 : vector<32x1xf32>
    %277 = vector.broadcast %269 : vector<32x1xf32> to vector<32x32xf32>
    %278 = arith.subf %261, %277 : vector<32x32xf32>
    %cst_47 = arith.constant 9.99999974E-6 : f32
    %279 = vector.broadcast %cst_47 : f32 to vector<32x1xf32>
    %280 = arith.addf %276, %279 : vector<32x1xf32>
    %281 = math.rsqrt %280 : vector<32x1xf32>
    %282 = vector.broadcast %281 : vector<32x1xf32> to vector<32x32xf32>
    %283 = arith.mulf %278, %282 : vector<32x32xf32>
    %284 = vector.shape_cast %263 : vector<32xf32> to vector<1x32xf32>
    %285 = vector.broadcast %284 : vector<1x32xf32> to vector<32x32xf32>
    %286 = arith.mulf %283, %285 : vector<32x32xf32>
    %287 = vector.shape_cast %265 : vector<32xf32> to vector<1x32xf32>
    %288 = vector.broadcast %287 : vector<1x32xf32> to vector<32x32xf32>
    %289 = arith.addf %286, %288 : vector<32x32xf32>
    %c0_48 = arith.constant 0 : index
    %c0_49 = arith.constant 0 : index
    %c0_50 = arith.constant 0 : index
    %290 = vector.load %arg8[%c0_48, %c0_49, %c0_50] : memref<2x32x2048xbf16, #tpu.memory_space<vmem>>, vector<1x32x2048xbf16>
    %291 = vector.shape_cast %290 : vector<1x32x2048xbf16> to vector<32x2048xbf16>
    %292 = arith.truncf %289 : vector<32x32xf32> to vector<32x32xbf16>
    %cst_51 = arith.constant dense<0.000000e+00> : vector<32x2048xf32>
    %293 = tpu.matmul %292, %291, %cst_51 {dimension_numbers = #tpu.dot_dimension_numbers<[1], [0], [0], [1], [0, 0, 1, 1], [], []>} : vector<32x32xbf16>, vector<32x2048xbf16>, vector<32x2048xf32> -> vector<32x2048xf32>
    %c0_52 = arith.constant 0 : index
    %c0_53 = arith.constant 0 : index
    %294 = vector.load %arg12[%c0_52, %c0_53] : memref<2x2048xf32, #tpu.memory_space<vmem>>, vector<1x2048xf32>
    %295 = vector.shape_cast %294 : vector<1x2048xf32> to vector<2048xf32>
    %296 = vector.shape_cast %295 : vector<2048xf32> to vector<1x2048xf32>
    %297 = vector.broadcast %296 : vector<1x2048xf32> to vector<32x2048xf32>
    %298 = arith.addf %293, %297 : vector<32x2048xf32>
    %cst_54 = arith.constant 0.000000e+00 : f32
    %299 = vector.broadcast %cst_54 : f32 to vector<32x2048xf32>
    %300 = arith.maximumf %298, %299 : vector<32x2048xf32>
    %c0_55 = arith.constant 0 : index
    %c0_56 = arith.constant 0 : index
    %c0_57 = arith.constant 0 : index
    %301 = vector.load %arg9[%c0_55, %c0_56, %c0_57] : memref<2x2048x32xbf16, #tpu.memory_space<vmem>>, vector<1x2048x32xbf16>
    %302 = vector.shape_cast %301 : vector<1x2048x32xbf16> to vector<2048x32xbf16>
    %303 = arith.truncf %300 : vector<32x2048xf32> to vector<32x2048xbf16>
    %cst_58 = arith.constant dense<0.000000e+00> : vector<32x32xf32>
    %304 = tpu.matmul %303, %302, %cst_58 {dimension_numbers = #tpu.dot_dimension_numbers<[1], [0], [0], [1], [0, 0, 1, 1], [], []>} : vector<32x2048xbf16>, vector<2048x32xbf16>, vector<32x32xf32> -> vector<32x32xf32>
    %305 = vector.extract_strided_slice %8 {offsets = [8, 0], sizes = [1, 32], strides = [1, 1]} : vector<9x32xf32> to vector<1x32xf32>
    %306 = vector.shape_cast %305 : vector<1x32xf32> to vector<32xf32>
    %307 = vector.shape_cast %306 : vector<32xf32> to vector<1x32xf32>
    %308 = vector.broadcast %307 : vector<1x32xf32> to vector<32x32xf32>
    %309 = arith.addf %304, %308 : vector<32x32xf32>
    %310 = arith.addf %289, %309 : vector<32x32xf32>
    %311 = vector.extract_strided_slice %8 {offsets = [6, 0], sizes = [1, 32], strides = [1, 1]} : vector<9x32xf32> to vector<1x32xf32>
    %312 = vector.shape_cast %311 : vector<1x32xf32> to vector<32xf32>
    %313 = vector.extract_strided_slice %8 {offsets = [7, 0], sizes = [1, 32], strides = [1, 1]} : vector<9x32xf32> to vector<1x32xf32>
    %314 = vector.shape_cast %313 : vector<1x32xf32> to vector<32xf32>
    %cst_59 = arith.constant dense<0.000000e+00> : vector<32xf32>
    %315 = vector.multi_reduction <add>, %310, %cst_59 [1] : vector<32x32xf32> to vector<32xf32>
    %316 = vector.shape_cast %315 : vector<32xf32> to vector<32x1xf32>
    %cst_60 = arith.constant 3.200000e+01 : f32
    %317 = vector.broadcast %cst_60 : f32 to vector<32x1xf32>
    %318 = arith.divf %316, %317 : vector<32x1xf32>
    %319 = vector.broadcast %318 : vector<32x1xf32> to vector<32x32xf32>
    %320 = arith.subf %310, %319 : vector<32x32xf32>
    %321 = arith.mulf %320, %320 : vector<32x32xf32>
    %cst_61 = arith.constant dense<0.000000e+00> : vector<32xf32>
    %322 = vector.multi_reduction <add>, %321, %cst_61 [1] : vector<32x32xf32> to vector<32xf32>
    %323 = vector.shape_cast %322 : vector<32xf32> to vector<32x1xf32>
    %cst_62 = arith.constant 3.200000e+01 : f32
    %324 = vector.broadcast %cst_62 : f32 to vector<32x1xf32>
    %325 = arith.divf %323, %324 : vector<32x1xf32>
    %326 = vector.broadcast %318 : vector<32x1xf32> to vector<32x32xf32>
    %327 = arith.subf %310, %326 : vector<32x32xf32>
    %cst_63 = arith.constant 9.99999974E-6 : f32
    %328 = vector.broadcast %cst_63 : f32 to vector<32x1xf32>
    %329 = arith.addf %325, %328 : vector<32x1xf32>
    %330 = math.rsqrt %329 : vector<32x1xf32>
    %331 = vector.broadcast %330 : vector<32x1xf32> to vector<32x32xf32>
    %332 = arith.mulf %327, %331 : vector<32x32xf32>
    %333 = vector.shape_cast %312 : vector<32xf32> to vector<1x32xf32>
    %334 = vector.broadcast %333 : vector<1x32xf32> to vector<32x32xf32>
    %335 = arith.mulf %332, %334 : vector<32x32xf32>
    %336 = vector.shape_cast %314 : vector<32xf32> to vector<1x32xf32>
    %337 = vector.broadcast %336 : vector<1x32xf32> to vector<32x32xf32>
    %338 = arith.addf %335, %337 : vector<32x32xf32>
    %c1 = arith.constant 1 : index
    %c0_64 = arith.constant 0 : index
    %c0_65 = arith.constant 0 : index
    %339 = vector.load %arg11[%c1, %c0_64, %c0_65] : memref<2x9x32xf32, #tpu.memory_space<vmem>>, vector<1x9x32xf32>
    %340 = vector.shape_cast %339 : vector<1x9x32xf32> to vector<9x32xf32>
    %c1_66 = arith.constant 1 : index
    %c0_67 = arith.constant 0 : index
    %c0_68 = arith.constant 0 : index
    %341 = vector.load %arg10[%c1_66, %c0_67, %c0_68] : memref<2x2x96xf32, #tpu.memory_space<vmem>>, vector<1x2x96xf32>
    %342 = vector.shape_cast %341 : vector<1x2x96xf32> to vector<2x96xf32>
    %c1_69 = arith.constant 1 : index
    %c0_70 = arith.constant 0 : index
    %c0_71 = arith.constant 0 : index
    %343 = vector.load %arg4[%c1_69, %c0_70, %c0_71] : memref<2x32x96xbf16, #tpu.memory_space<vmem>>, vector<1x32x96xbf16>
    %344 = vector.shape_cast %343 : vector<1x32x96xbf16> to vector<32x96xbf16>
    %345 = vector.extract_strided_slice %342 {offsets = [0, 0], sizes = [1, 96], strides = [1, 1]} : vector<2x96xf32> to vector<1x96xf32>
    %346 = vector.shape_cast %345 : vector<1x96xf32> to vector<96xf32>
    %c1_72 = arith.constant 1 : index
    %c0_73 = arith.constant 0 : index
    %c0_74 = arith.constant 0 : index
    %347 = vector.load %arg6[%c1_72, %c0_73, %c0_74] : memref<2x32x32xbf16, #tpu.memory_space<vmem>>, vector<1x32x32xbf16>
    %348 = vector.shape_cast %347 : vector<1x32x32xbf16> to vector<32x32xbf16>
    %349 = vector.extract_strided_slice %340 {offsets = [0, 0], sizes = [1, 32], strides = [1, 1]} : vector<9x32xf32> to vector<1x32xf32>
    %350 = vector.shape_cast %349 : vector<1x32xf32> to vector<32xf32>
    %351 = arith.truncf %338 : vector<32x32xf32> to vector<32x32xbf16>
    %cst_75 = arith.constant dense<0.000000e+00> : vector<32x96xf32>
    %352 = tpu.matmul %351, %344, %cst_75 {dimension_numbers = #tpu.dot_dimension_numbers<[1], [0], [0], [1], [0, 0, 1, 1], [], []>} : vector<32x32xbf16>, vector<32x96xbf16>, vector<32x96xf32> -> vector<32x96xf32>
    %353 = vector.shape_cast %346 : vector<96xf32> to vector<1x96xf32>
    %354 = vector.broadcast %353 : vector<1x96xf32> to vector<32x96xf32>
    %355 = arith.addf %352, %354 : vector<32x96xf32>
    %356 = vector.extract_strided_slice %355 {offsets = [0, 0], sizes = [16, 8], strides = [1, 1]} : vector<32x96xf32> to vector<16x8xf32>
    %357 = vector.extract_strided_slice %355 {offsets = [0, 8], sizes = [16, 8], strides = [1, 1]} : vector<32x96xf32> to vector<16x8xf32>
    %358 = vector.extract_strided_slice %355 {offsets = [0, 16], sizes = [16, 8], strides = [1, 1]} : vector<32x96xf32> to vector<16x8xf32>
    %359 = vector.extract_strided_slice %355 {offsets = [0, 24], sizes = [16, 8], strides = [1, 1]} : vector<32x96xf32> to vector<16x8xf32>
    %360 = vector.extract_strided_slice %355 {offsets = [16, 0], sizes = [16, 8], strides = [1, 1]} : vector<32x96xf32> to vector<16x8xf32>
    %361 = vector.extract_strided_slice %355 {offsets = [16, 8], sizes = [16, 8], strides = [1, 1]} : vector<32x96xf32> to vector<16x8xf32>
    %362 = vector.extract_strided_slice %355 {offsets = [16, 16], sizes = [16, 8], strides = [1, 1]} : vector<32x96xf32> to vector<16x8xf32>
    %363 = vector.extract_strided_slice %355 {offsets = [16, 24], sizes = [16, 8], strides = [1, 1]} : vector<32x96xf32> to vector<16x8xf32>
    %364 = vector.shape_cast %356 : vector<16x8xf32> to vector<1x16x8xf32>
    %365 = vector.shape_cast %357 : vector<16x8xf32> to vector<1x16x8xf32>
    %366 = vector.shape_cast %358 : vector<16x8xf32> to vector<1x16x8xf32>
    %367 = vector.shape_cast %359 : vector<16x8xf32> to vector<1x16x8xf32>
    %368 = vector.shape_cast %360 : vector<16x8xf32> to vector<1x16x8xf32>
    %369 = vector.shape_cast %361 : vector<16x8xf32> to vector<1x16x8xf32>
    %370 = vector.shape_cast %362 : vector<16x8xf32> to vector<1x16x8xf32>
    %371 = vector.shape_cast %363 : vector<16x8xf32> to vector<1x16x8xf32>
    %372 = tpu.concatenate %364, %365, %366, %367, %368, %369, %370, %371 in 0 : vector<1x16x8xf32>, vector<1x16x8xf32>, vector<1x16x8xf32>, vector<1x16x8xf32>, vector<1x16x8xf32>, vector<1x16x8xf32>, vector<1x16x8xf32>, vector<1x16x8xf32> -> vector<8x16x8xf32>
    %373 = vector.extract_strided_slice %355 {offsets = [0, 32], sizes = [16, 8], strides = [1, 1]} : vector<32x96xf32> to vector<16x8xf32>
    %374 = vector.extract_strided_slice %355 {offsets = [0, 40], sizes = [16, 8], strides = [1, 1]} : vector<32x96xf32> to vector<16x8xf32>
    %375 = vector.extract_strided_slice %355 {offsets = [0, 48], sizes = [16, 8], strides = [1, 1]} : vector<32x96xf32> to vector<16x8xf32>
    %376 = vector.extract_strided_slice %355 {offsets = [0, 56], sizes = [16, 8], strides = [1, 1]} : vector<32x96xf32> to vector<16x8xf32>
    %377 = vector.extract_strided_slice %355 {offsets = [16, 32], sizes = [16, 8], strides = [1, 1]} : vector<32x96xf32> to vector<16x8xf32>
    %378 = vector.extract_strided_slice %355 {offsets = [16, 40], sizes = [16, 8], strides = [1, 1]} : vector<32x96xf32> to vector<16x8xf32>
    %379 = vector.extract_strided_slice %355 {offsets = [16, 48], sizes = [16, 8], strides = [1, 1]} : vector<32x96xf32> to vector<16x8xf32>
    %380 = vector.extract_strided_slice %355 {offsets = [16, 56], sizes = [16, 8], strides = [1, 1]} : vector<32x96xf32> to vector<16x8xf32>
    %381 = vector.shape_cast %373 : vector<16x8xf32> to vector<1x16x8xf32>
    %382 = vector.shape_cast %374 : vector<16x8xf32> to vector<1x16x8xf32>
    %383 = vector.shape_cast %375 : vector<16x8xf32> to vector<1x16x8xf32>
    %384 = vector.shape_cast %376 : vector<16x8xf32> to vector<1x16x8xf32>
    %385 = vector.shape_cast %377 : vector<16x8xf32> to vector<1x16x8xf32>
    %386 = vector.shape_cast %378 : vector<16x8xf32> to vector<1x16x8xf32>
    %387 = vector.shape_cast %379 : vector<16x8xf32> to vector<1x16x8xf32>
    %388 = vector.shape_cast %380 : vector<16x8xf32> to vector<1x16x8xf32>
    %389 = tpu.concatenate %381, %382, %383, %384, %385, %386, %387, %388 in 0 : vector<1x16x8xf32>, vector<1x16x8xf32>, vector<1x16x8xf32>, vector<1x16x8xf32>, vector<1x16x8xf32>, vector<1x16x8xf32>, vector<1x16x8xf32>, vector<1x16x8xf32> -> vector<8x16x8xf32>
    %390 = vector.extract_strided_slice %355 {offsets = [0, 64], sizes = [16, 8], strides = [1, 1]} : vector<32x96xf32> to vector<16x8xf32>
    %391 = vector.extract_strided_slice %355 {offsets = [0, 72], sizes = [16, 8], strides = [1, 1]} : vector<32x96xf32> to vector<16x8xf32>
    %392 = vector.extract_strided_slice %355 {offsets = [0, 80], sizes = [16, 8], strides = [1, 1]} : vector<32x96xf32> to vector<16x8xf32>
    %393 = vector.extract_strided_slice %355 {offsets = [0, 88], sizes = [16, 8], strides = [1, 1]} : vector<32x96xf32> to vector<16x8xf32>
    %394 = vector.extract_strided_slice %355 {offsets = [16, 64], sizes = [16, 8], strides = [1, 1]} : vector<32x96xf32> to vector<16x8xf32>
    %395 = vector.extract_strided_slice %355 {offsets = [16, 72], sizes = [16, 8], strides = [1, 1]} : vector<32x96xf32> to vector<16x8xf32>
    %396 = vector.extract_strided_slice %355 {offsets = [16, 80], sizes = [16, 8], strides = [1, 1]} : vector<32x96xf32> to vector<16x8xf32>
    %397 = vector.extract_strided_slice %355 {offsets = [16, 88], sizes = [16, 8], strides = [1, 1]} : vector<32x96xf32> to vector<16x8xf32>
    %398 = vector.shape_cast %390 : vector<16x8xf32> to vector<1x16x8xf32>
    %399 = vector.shape_cast %391 : vector<16x8xf32> to vector<1x16x8xf32>
    %400 = vector.shape_cast %392 : vector<16x8xf32> to vector<1x16x8xf32>
    %401 = vector.shape_cast %393 : vector<16x8xf32> to vector<1x16x8xf32>
    %402 = vector.shape_cast %394 : vector<16x8xf32> to vector<1x16x8xf32>
    %403 = vector.shape_cast %395 : vector<16x8xf32> to vector<1x16x8xf32>
    %404 = vector.shape_cast %396 : vector<16x8xf32> to vector<1x16x8xf32>
    %405 = vector.shape_cast %397 : vector<16x8xf32> to vector<1x16x8xf32>
    %406 = tpu.concatenate %398, %399, %400, %401, %402, %403, %404, %405 in 0 : vector<1x16x8xf32>, vector<1x16x8xf32>, vector<1x16x8xf32>, vector<1x16x8xf32>, vector<1x16x8xf32>, vector<1x16x8xf32>, vector<1x16x8xf32>, vector<1x16x8xf32> -> vector<8x16x8xf32>
    %407 = arith.truncf %372 : vector<8x16x8xf32> to vector<8x16x8xbf16>
    %408 = arith.truncf %389 : vector<8x16x8xf32> to vector<8x16x8xbf16>
    "tpu.trace_start"() <{level = 10 : i32, message = "nqd,nkd->nqk"}> : () -> ()
    %cst_76 = arith.constant dense<0.000000e+00> : vector<8x16x16xf32>
    %409 = tpu.matmul %407, %408, %cst_76 {dimension_numbers = #tpu.dot_dimension_numbers<[2], [2], [1], [1], [0, 0, 0, 1, 1, 1], [0], [0]>} : vector<8x16x8xbf16>, vector<8x16x8xbf16>, vector<8x16x16xf32> -> vector<8x16x16xf32>
    "tpu.trace_stop"() : () -> ()
    %cst_77 = arith.constant 0.353553385 : f32
    %410 = vector.broadcast %cst_77 : f32 to vector<8x16x16xf32>
    %411 = arith.mulf %409, %410 : vector<8x16x16xf32>
    %412 = vector.shape_cast %6 : vector<16x16xf32> to vector<1x16x16xf32>
    %413 = vector.broadcast %412 : vector<1x16x16xf32> to vector<8x16x16xf32>
    %414 = arith.addf %411, %413 : vector<8x16x16xf32>
    %cst_78 = arith.constant dense<0xFF800000> : vector<8x16xf32>
    %415 = vector.multi_reduction <maximumf>, %414, %cst_78 [2] : vector<8x16x16xf32> to vector<8x16xf32>
    %416 = vector.shape_cast %415 : vector<8x16xf32> to vector<8x16x1xf32>
    %417 = vector.broadcast %416 : vector<8x16x1xf32> to vector<8x16x16xf32>
    %418 = arith.subf %414, %417 : vector<8x16x16xf32>
    %419 = math.exp %418 : vector<8x16x16xf32>
    %cst_79 = arith.constant dense<0.000000e+00> : vector<8x16xf32>
    %420 = vector.multi_reduction <add>, %419, %cst_79 [2] : vector<8x16x16xf32> to vector<8x16xf32>
    %421 = vector.shape_cast %420 : vector<8x16xf32> to vector<8x16x1xf32>
    %422 = vector.broadcast %421 : vector<8x16x1xf32> to vector<8x16x16xf32>
    %423 = arith.divf %419, %422 : vector<8x16x16xf32>
    %424 = arith.truncf %423 : vector<8x16x16xf32> to vector<8x16x16xbf16>
    %425 = arith.truncf %406 : vector<8x16x8xf32> to vector<8x16x8xbf16>
    "tpu.trace_start"() <{level = 10 : i32, message = "nqk,nkd->nqd"}> : () -> ()
    %cst_80 = arith.constant dense<0.000000e+00> : vector<8x16x8xf32>
    %426 = tpu.matmul %424, %425, %cst_80 {dimension_numbers = #tpu.dot_dimension_numbers<[2], [1], [1], [2], [0, 0, 0, 1, 1, 2], [0], [0]>} : vector<8x16x16xbf16>, vector<8x16x8xbf16>, vector<8x16x8xf32> -> vector<8x16x8xf32>
    "tpu.trace_stop"() : () -> ()
    %427 = vector.extract_strided_slice %426 {offsets = [0, 0, 0], sizes = [1, 16, 8], strides = [1, 1, 1]} : vector<8x16x8xf32> to vector<1x16x8xf32>
    %428 = vector.shape_cast %427 : vector<1x16x8xf32> to vector<16x8xf32>
    %429 = vector.extract_strided_slice %426 {offsets = [1, 0, 0], sizes = [1, 16, 8], strides = [1, 1, 1]} : vector<8x16x8xf32> to vector<1x16x8xf32>
    %430 = vector.shape_cast %429 : vector<1x16x8xf32> to vector<16x8xf32>
    %431 = vector.extract_strided_slice %426 {offsets = [2, 0, 0], sizes = [1, 16, 8], strides = [1, 1, 1]} : vector<8x16x8xf32> to vector<1x16x8xf32>
    %432 = vector.shape_cast %431 : vector<1x16x8xf32> to vector<16x8xf32>
    %433 = vector.extract_strided_slice %426 {offsets = [3, 0, 0], sizes = [1, 16, 8], strides = [1, 1, 1]} : vector<8x16x8xf32> to vector<1x16x8xf32>
    %434 = vector.shape_cast %433 : vector<1x16x8xf32> to vector<16x8xf32>
    %435 = tpu.concatenate %428, %430, %432, %434 in 1 : vector<16x8xf32>, vector<16x8xf32>, vector<16x8xf32>, vector<16x8xf32> -> vector<16x32xf32>
    %436 = vector.extract_strided_slice %426 {offsets = [4, 0, 0], sizes = [1, 16, 8], strides = [1, 1, 1]} : vector<8x16x8xf32> to vector<1x16x8xf32>
    %437 = vector.shape_cast %436 : vector<1x16x8xf32> to vector<16x8xf32>
    %438 = vector.extract_strided_slice %426 {offsets = [5, 0, 0], sizes = [1, 16, 8], strides = [1, 1, 1]} : vector<8x16x8xf32> to vector<1x16x8xf32>
    %439 = vector.shape_cast %438 : vector<1x16x8xf32> to vector<16x8xf32>
    %440 = vector.extract_strided_slice %426 {offsets = [6, 0, 0], sizes = [1, 16, 8], strides = [1, 1, 1]} : vector<8x16x8xf32> to vector<1x16x8xf32>
    %441 = vector.shape_cast %440 : vector<1x16x8xf32> to vector<16x8xf32>
    %442 = vector.extract_strided_slice %426 {offsets = [7, 0, 0], sizes = [1, 16, 8], strides = [1, 1, 1]} : vector<8x16x8xf32> to vector<1x16x8xf32>
    %443 = vector.shape_cast %442 : vector<1x16x8xf32> to vector<16x8xf32>
    %444 = tpu.concatenate %437, %439, %441, %443 in 1 : vector<16x8xf32>, vector<16x8xf32>, vector<16x8xf32>, vector<16x8xf32> -> vector<16x32xf32>
    %445 = tpu.concatenate %435, %444 in 0 : vector<16x32xf32>, vector<16x32xf32> -> vector<32x32xf32>
    %446 = arith.truncf %445 : vector<32x32xf32> to vector<32x32xbf16>
    %cst_81 = arith.constant dense<0.000000e+00> : vector<32x32xf32>
    %447 = tpu.matmul %446, %348, %cst_81 {dimension_numbers = #tpu.dot_dimension_numbers<[1], [0], [0], [1], [0, 0, 1, 1], [], []>} : vector<32x32xbf16>, vector<32x32xbf16>, vector<32x32xf32> -> vector<32x32xf32>
    %448 = vector.shape_cast %350 : vector<32xf32> to vector<1x32xf32>
    %449 = vector.broadcast %448 : vector<1x32xf32> to vector<32x32xf32>
    %450 = arith.addf %447, %449 : vector<32x32xf32>
    %451 = arith.addf %338, %450 : vector<32x32xf32>
    %452 = vector.extract_strided_slice %340 {offsets = [2, 0], sizes = [1, 32], strides = [1, 1]} : vector<9x32xf32> to vector<1x32xf32>
    %453 = vector.shape_cast %452 : vector<1x32xf32> to vector<32xf32>
    %454 = vector.extract_strided_slice %340 {offsets = [3, 0], sizes = [1, 32], strides = [1, 1]} : vector<9x32xf32> to vector<1x32xf32>
    %455 = vector.shape_cast %454 : vector<1x32xf32> to vector<32xf32>
    %cst_82 = arith.constant dense<0.000000e+00> : vector<32xf32>
    %456 = vector.multi_reduction <add>, %451, %cst_82 [1] : vector<32x32xf32> to vector<32xf32>
    %457 = vector.shape_cast %456 : vector<32xf32> to vector<32x1xf32>
    %cst_83 = arith.constant 3.200000e+01 : f32
    %458 = vector.broadcast %cst_83 : f32 to vector<32x1xf32>
    %459 = arith.divf %457, %458 : vector<32x1xf32>
    %460 = vector.broadcast %459 : vector<32x1xf32> to vector<32x32xf32>
    %461 = arith.subf %451, %460 : vector<32x32xf32>
    %462 = arith.mulf %461, %461 : vector<32x32xf32>
    %cst_84 = arith.constant dense<0.000000e+00> : vector<32xf32>
    %463 = vector.multi_reduction <add>, %462, %cst_84 [1] : vector<32x32xf32> to vector<32xf32>
    %464 = vector.shape_cast %463 : vector<32xf32> to vector<32x1xf32>
    %cst_85 = arith.constant 3.200000e+01 : f32
    %465 = vector.broadcast %cst_85 : f32 to vector<32x1xf32>
    %466 = arith.divf %464, %465 : vector<32x1xf32>
    %467 = vector.broadcast %459 : vector<32x1xf32> to vector<32x32xf32>
    %468 = arith.subf %451, %467 : vector<32x32xf32>
    %cst_86 = arith.constant 9.99999974E-6 : f32
    %469 = vector.broadcast %cst_86 : f32 to vector<32x1xf32>
    %470 = arith.addf %466, %469 : vector<32x1xf32>
    %471 = math.rsqrt %470 : vector<32x1xf32>
    %472 = vector.broadcast %471 : vector<32x1xf32> to vector<32x32xf32>
    %473 = arith.mulf %468, %472 : vector<32x32xf32>
    %474 = vector.shape_cast %453 : vector<32xf32> to vector<1x32xf32>
    %475 = vector.broadcast %474 : vector<1x32xf32> to vector<32x32xf32>
    %476 = arith.mulf %473, %475 : vector<32x32xf32>
    %477 = vector.shape_cast %455 : vector<32xf32> to vector<1x32xf32>
    %478 = vector.broadcast %477 : vector<1x32xf32> to vector<32x32xf32>
    %479 = arith.addf %476, %478 : vector<32x32xf32>
    %c1_87 = arith.constant 1 : index
    %c0_88 = arith.constant 0 : index
    %c0_89 = arith.constant 0 : index
    %480 = vector.load %arg5[%c1_87, %c0_88, %c0_89] : memref<2x32x96xbf16, #tpu.memory_space<vmem>>, vector<1x32x96xbf16>
    %481 = vector.shape_cast %480 : vector<1x32x96xbf16> to vector<32x96xbf16>
    %482 = vector.extract_strided_slice %342 {offsets = [1, 0], sizes = [1, 96], strides = [1, 1]} : vector<2x96xf32> to vector<1x96xf32>
    %483 = vector.shape_cast %482 : vector<1x96xf32> to vector<96xf32>
    %c1_90 = arith.constant 1 : index
    %c0_91 = arith.constant 0 : index
    %c0_92 = arith.constant 0 : index
    %484 = vector.load %arg7[%c1_90, %c0_91, %c0_92] : memref<2x32x32xbf16, #tpu.memory_space<vmem>>, vector<1x32x32xbf16>
    %485 = vector.shape_cast %484 : vector<1x32x32xbf16> to vector<32x32xbf16>
    %486 = vector.extract_strided_slice %340 {offsets = [1, 0], sizes = [1, 32], strides = [1, 1]} : vector<9x32xf32> to vector<1x32xf32>
    %487 = vector.shape_cast %486 : vector<1x32xf32> to vector<32xf32>
    %488 = arith.truncf %479 : vector<32x32xf32> to vector<32x32xbf16>
    %cst_93 = arith.constant dense<0.000000e+00> : vector<32x96xf32>
    %489 = tpu.matmul %488, %481, %cst_93 {dimension_numbers = #tpu.dot_dimension_numbers<[1], [0], [0], [1], [0, 0, 1, 1], [], []>} : vector<32x32xbf16>, vector<32x96xbf16>, vector<32x96xf32> -> vector<32x96xf32>
    %490 = vector.shape_cast %483 : vector<96xf32> to vector<1x96xf32>
    %491 = vector.broadcast %490 : vector<1x96xf32> to vector<32x96xf32>
    %492 = arith.addf %489, %491 : vector<32x96xf32>
    %493 = arith.truncf %5 : vector<32x32xf32> to vector<32x32xbf16>
    %cst_94 = arith.constant dense<0.000000e+00> : vector<32x96xf32>
    %494 = tpu.matmul %493, %481, %cst_94 {dimension_numbers = #tpu.dot_dimension_numbers<[1], [0], [0], [1], [0, 0, 1, 1], [], []>} : vector<32x32xbf16>, vector<32x96xbf16>, vector<32x96xf32> -> vector<32x96xf32>
    %495 = vector.shape_cast %483 : vector<96xf32> to vector<1x96xf32>
    %496 = vector.broadcast %495 : vector<1x96xf32> to vector<32x96xf32>
    %497 = arith.addf %494, %496 : vector<32x96xf32>
    %498 = vector.extract_strided_slice %492 {offsets = [0, 0], sizes = [16, 8], strides = [1, 1]} : vector<32x96xf32> to vector<16x8xf32>
    %499 = vector.extract_strided_slice %492 {offsets = [0, 8], sizes = [16, 8], strides = [1, 1]} : vector<32x96xf32> to vector<16x8xf32>
    %500 = vector.extract_strided_slice %492 {offsets = [0, 16], sizes = [16, 8], strides = [1, 1]} : vector<32x96xf32> to vector<16x8xf32>
    %501 = vector.extract_strided_slice %492 {offsets = [0, 24], sizes = [16, 8], strides = [1, 1]} : vector<32x96xf32> to vector<16x8xf32>
    %502 = vector.extract_strided_slice %492 {offsets = [16, 0], sizes = [16, 8], strides = [1, 1]} : vector<32x96xf32> to vector<16x8xf32>
    %503 = vector.extract_strided_slice %492 {offsets = [16, 8], sizes = [16, 8], strides = [1, 1]} : vector<32x96xf32> to vector<16x8xf32>
    %504 = vector.extract_strided_slice %492 {offsets = [16, 16], sizes = [16, 8], strides = [1, 1]} : vector<32x96xf32> to vector<16x8xf32>
    %505 = vector.extract_strided_slice %492 {offsets = [16, 24], sizes = [16, 8], strides = [1, 1]} : vector<32x96xf32> to vector<16x8xf32>
    %506 = vector.shape_cast %498 : vector<16x8xf32> to vector<1x16x8xf32>
    %507 = vector.shape_cast %499 : vector<16x8xf32> to vector<1x16x8xf32>
    %508 = vector.shape_cast %500 : vector<16x8xf32> to vector<1x16x8xf32>
    %509 = vector.shape_cast %501 : vector<16x8xf32> to vector<1x16x8xf32>
    %510 = vector.shape_cast %502 : vector<16x8xf32> to vector<1x16x8xf32>
    %511 = vector.shape_cast %503 : vector<16x8xf32> to vector<1x16x8xf32>
    %512 = vector.shape_cast %504 : vector<16x8xf32> to vector<1x16x8xf32>
    %513 = vector.shape_cast %505 : vector<16x8xf32> to vector<1x16x8xf32>
    %514 = tpu.concatenate %506, %507, %508, %509, %510, %511, %512, %513 in 0 : vector<1x16x8xf32>, vector<1x16x8xf32>, vector<1x16x8xf32>, vector<1x16x8xf32>, vector<1x16x8xf32>, vector<1x16x8xf32>, vector<1x16x8xf32>, vector<1x16x8xf32> -> vector<8x16x8xf32>
    %515 = vector.extract_strided_slice %497 {offsets = [0, 32], sizes = [16, 8], strides = [1, 1]} : vector<32x96xf32> to vector<16x8xf32>
    %516 = vector.extract_strided_slice %497 {offsets = [0, 40], sizes = [16, 8], strides = [1, 1]} : vector<32x96xf32> to vector<16x8xf32>
    %517 = vector.extract_strided_slice %497 {offsets = [0, 48], sizes = [16, 8], strides = [1, 1]} : vector<32x96xf32> to vector<16x8xf32>
    %518 = vector.extract_strided_slice %497 {offsets = [0, 56], sizes = [16, 8], strides = [1, 1]} : vector<32x96xf32> to vector<16x8xf32>
    %519 = vector.extract_strided_slice %497 {offsets = [16, 32], sizes = [16, 8], strides = [1, 1]} : vector<32x96xf32> to vector<16x8xf32>
    %520 = vector.extract_strided_slice %497 {offsets = [16, 40], sizes = [16, 8], strides = [1, 1]} : vector<32x96xf32> to vector<16x8xf32>
    %521 = vector.extract_strided_slice %497 {offsets = [16, 48], sizes = [16, 8], strides = [1, 1]} : vector<32x96xf32> to vector<16x8xf32>
    %522 = vector.extract_strided_slice %497 {offsets = [16, 56], sizes = [16, 8], strides = [1, 1]} : vector<32x96xf32> to vector<16x8xf32>
    %523 = vector.shape_cast %515 : vector<16x8xf32> to vector<1x16x8xf32>
    %524 = vector.shape_cast %516 : vector<16x8xf32> to vector<1x16x8xf32>
    %525 = vector.shape_cast %517 : vector<16x8xf32> to vector<1x16x8xf32>
    %526 = vector.shape_cast %518 : vector<16x8xf32> to vector<1x16x8xf32>
    %527 = vector.shape_cast %519 : vector<16x8xf32> to vector<1x16x8xf32>
    %528 = vector.shape_cast %520 : vector<16x8xf32> to vector<1x16x8xf32>
    %529 = vector.shape_cast %521 : vector<16x8xf32> to vector<1x16x8xf32>
    %530 = vector.shape_cast %522 : vector<16x8xf32> to vector<1x16x8xf32>
    %531 = tpu.concatenate %523, %524, %525, %526, %527, %528, %529, %530 in 0 : vector<1x16x8xf32>, vector<1x16x8xf32>, vector<1x16x8xf32>, vector<1x16x8xf32>, vector<1x16x8xf32>, vector<1x16x8xf32>, vector<1x16x8xf32>, vector<1x16x8xf32> -> vector<8x16x8xf32>
    %532 = vector.extract_strided_slice %497 {offsets = [0, 64], sizes = [16, 8], strides = [1, 1]} : vector<32x96xf32> to vector<16x8xf32>
    %533 = vector.extract_strided_slice %497 {offsets = [0, 72], sizes = [16, 8], strides = [1, 1]} : vector<32x96xf32> to vector<16x8xf32>
    %534 = vector.extract_strided_slice %497 {offsets = [0, 80], sizes = [16, 8], strides = [1, 1]} : vector<32x96xf32> to vector<16x8xf32>
    %535 = vector.extract_strided_slice %497 {offsets = [0, 88], sizes = [16, 8], strides = [1, 1]} : vector<32x96xf32> to vector<16x8xf32>
    %536 = vector.extract_strided_slice %497 {offsets = [16, 64], sizes = [16, 8], strides = [1, 1]} : vector<32x96xf32> to vector<16x8xf32>
    %537 = vector.extract_strided_slice %497 {offsets = [16, 72], sizes = [16, 8], strides = [1, 1]} : vector<32x96xf32> to vector<16x8xf32>
    %538 = vector.extract_strided_slice %497 {offsets = [16, 80], sizes = [16, 8], strides = [1, 1]} : vector<32x96xf32> to vector<16x8xf32>
    %539 = vector.extract_strided_slice %497 {offsets = [16, 88], sizes = [16, 8], strides = [1, 1]} : vector<32x96xf32> to vector<16x8xf32>
    %540 = vector.shape_cast %532 : vector<16x8xf32> to vector<1x16x8xf32>
    %541 = vector.shape_cast %533 : vector<16x8xf32> to vector<1x16x8xf32>
    %542 = vector.shape_cast %534 : vector<16x8xf32> to vector<1x16x8xf32>
    %543 = vector.shape_cast %535 : vector<16x8xf32> to vector<1x16x8xf32>
    %544 = vector.shape_cast %536 : vector<16x8xf32> to vector<1x16x8xf32>
    %545 = vector.shape_cast %537 : vector<16x8xf32> to vector<1x16x8xf32>
    %546 = vector.shape_cast %538 : vector<16x8xf32> to vector<1x16x8xf32>
    %547 = vector.shape_cast %539 : vector<16x8xf32> to vector<1x16x8xf32>
    %548 = tpu.concatenate %540, %541, %542, %543, %544, %545, %546, %547 in 0 : vector<1x16x8xf32>, vector<1x16x8xf32>, vector<1x16x8xf32>, vector<1x16x8xf32>, vector<1x16x8xf32>, vector<1x16x8xf32>, vector<1x16x8xf32>, vector<1x16x8xf32> -> vector<8x16x8xf32>
    %549 = arith.truncf %514 : vector<8x16x8xf32> to vector<8x16x8xbf16>
    %550 = arith.truncf %531 : vector<8x16x8xf32> to vector<8x16x8xbf16>
    "tpu.trace_start"() <{level = 10 : i32, message = "nqd,nkd->nqk"}> : () -> ()
    %cst_95 = arith.constant dense<0.000000e+00> : vector<8x16x16xf32>
    %551 = tpu.matmul %549, %550, %cst_95 {dimension_numbers = #tpu.dot_dimension_numbers<[2], [2], [1], [1], [0, 0, 0, 1, 1, 1], [0], [0]>} : vector<8x16x8xbf16>, vector<8x16x8xbf16>, vector<8x16x16xf32> -> vector<8x16x16xf32>
    "tpu.trace_stop"() : () -> ()
    %cst_96 = arith.constant 0.353553385 : f32
    %552 = vector.broadcast %cst_96 : f32 to vector<8x16x16xf32>
    %553 = arith.mulf %551, %552 : vector<8x16x16xf32>
    %554 = vector.shape_cast %6 : vector<16x16xf32> to vector<1x16x16xf32>
    %555 = vector.broadcast %554 : vector<1x16x16xf32> to vector<8x16x16xf32>
    %556 = arith.addf %553, %555 : vector<8x16x16xf32>
    %cst_97 = arith.constant dense<0xFF800000> : vector<8x16xf32>
    %557 = vector.multi_reduction <maximumf>, %556, %cst_97 [2] : vector<8x16x16xf32> to vector<8x16xf32>
    %558 = vector.shape_cast %557 : vector<8x16xf32> to vector<8x16x1xf32>
    %559 = vector.broadcast %558 : vector<8x16x1xf32> to vector<8x16x16xf32>
    %560 = arith.subf %556, %559 : vector<8x16x16xf32>
    %561 = math.exp %560 : vector<8x16x16xf32>
    %cst_98 = arith.constant dense<0.000000e+00> : vector<8x16xf32>
    %562 = vector.multi_reduction <add>, %561, %cst_98 [2] : vector<8x16x16xf32> to vector<8x16xf32>
    %563 = vector.shape_cast %562 : vector<8x16xf32> to vector<8x16x1xf32>
    %564 = vector.broadcast %563 : vector<8x16x1xf32> to vector<8x16x16xf32>
    %565 = arith.divf %561, %564 : vector<8x16x16xf32>
    %566 = arith.truncf %565 : vector<8x16x16xf32> to vector<8x16x16xbf16>
    %567 = arith.truncf %548 : vector<8x16x8xf32> to vector<8x16x8xbf16>
    "tpu.trace_start"() <{level = 10 : i32, message = "nqk,nkd->nqd"}> : () -> ()
    %cst_99 = arith.constant dense<0.000000e+00> : vector<8x16x8xf32>
    %568 = tpu.matmul %566, %567, %cst_99 {dimension_numbers = #tpu.dot_dimension_numbers<[2], [1], [1], [2], [0, 0, 0, 1, 1, 2], [0], [0]>} : vector<8x16x16xbf16>, vector<8x16x8xbf16>, vector<8x16x8xf32> -> vector<8x16x8xf32>
    "tpu.trace_stop"() : () -> ()
    %569 = vector.extract_strided_slice %568 {offsets = [0, 0, 0], sizes = [1, 16, 8], strides = [1, 1, 1]} : vector<8x16x8xf32> to vector<1x16x8xf32>
    %570 = vector.shape_cast %569 : vector<1x16x8xf32> to vector<16x8xf32>
    %571 = vector.extract_strided_slice %568 {offsets = [1, 0, 0], sizes = [1, 16, 8], strides = [1, 1, 1]} : vector<8x16x8xf32> to vector<1x16x8xf32>
    %572 = vector.shape_cast %571 : vector<1x16x8xf32> to vector<16x8xf32>
    %573 = vector.extract_strided_slice %568 {offsets = [2, 0, 0], sizes = [1, 16, 8], strides = [1, 1, 1]} : vector<8x16x8xf32> to vector<1x16x8xf32>
    %574 = vector.shape_cast %573 : vector<1x16x8xf32> to vector<16x8xf32>
    %575 = vector.extract_strided_slice %568 {offsets = [3, 0, 0], sizes = [1, 16, 8], strides = [1, 1, 1]} : vector<8x16x8xf32> to vector<1x16x8xf32>
    %576 = vector.shape_cast %575 : vector<1x16x8xf32> to vector<16x8xf32>
    %577 = tpu.concatenate %570, %572, %574, %576 in 1 : vector<16x8xf32>, vector<16x8xf32>, vector<16x8xf32>, vector<16x8xf32> -> vector<16x32xf32>
    %578 = vector.extract_strided_slice %568 {offsets = [4, 0, 0], sizes = [1, 16, 8], strides = [1, 1, 1]} : vector<8x16x8xf32> to vector<1x16x8xf32>
    %579 = vector.shape_cast %578 : vector<1x16x8xf32> to vector<16x8xf32>
    %580 = vector.extract_strided_slice %568 {offsets = [5, 0, 0], sizes = [1, 16, 8], strides = [1, 1, 1]} : vector<8x16x8xf32> to vector<1x16x8xf32>
    %581 = vector.shape_cast %580 : vector<1x16x8xf32> to vector<16x8xf32>
    %582 = vector.extract_strided_slice %568 {offsets = [6, 0, 0], sizes = [1, 16, 8], strides = [1, 1, 1]} : vector<8x16x8xf32> to vector<1x16x8xf32>
    %583 = vector.shape_cast %582 : vector<1x16x8xf32> to vector<16x8xf32>
    %584 = vector.extract_strided_slice %568 {offsets = [7, 0, 0], sizes = [1, 16, 8], strides = [1, 1, 1]} : vector<8x16x8xf32> to vector<1x16x8xf32>
    %585 = vector.shape_cast %584 : vector<1x16x8xf32> to vector<16x8xf32>
    %586 = tpu.concatenate %579, %581, %583, %585 in 1 : vector<16x8xf32>, vector<16x8xf32>, vector<16x8xf32>, vector<16x8xf32> -> vector<16x32xf32>
    %587 = tpu.concatenate %577, %586 in 0 : vector<16x32xf32>, vector<16x32xf32> -> vector<32x32xf32>
    %588 = arith.truncf %587 : vector<32x32xf32> to vector<32x32xbf16>
    %cst_100 = arith.constant dense<0.000000e+00> : vector<32x32xf32>
    %589 = tpu.matmul %588, %485, %cst_100 {dimension_numbers = #tpu.dot_dimension_numbers<[1], [0], [0], [1], [0, 0, 1, 1], [], []>} : vector<32x32xbf16>, vector<32x32xbf16>, vector<32x32xf32> -> vector<32x32xf32>
    %590 = vector.shape_cast %487 : vector<32xf32> to vector<1x32xf32>
    %591 = vector.broadcast %590 : vector<1x32xf32> to vector<32x32xf32>
    %592 = arith.addf %589, %591 : vector<32x32xf32>
    %593 = arith.addf %479, %592 : vector<32x32xf32>
    %594 = vector.extract_strided_slice %340 {offsets = [4, 0], sizes = [1, 32], strides = [1, 1]} : vector<9x32xf32> to vector<1x32xf32>
    %595 = vector.shape_cast %594 : vector<1x32xf32> to vector<32xf32>
    %596 = vector.extract_strided_slice %340 {offsets = [5, 0], sizes = [1, 32], strides = [1, 1]} : vector<9x32xf32> to vector<1x32xf32>
    %597 = vector.shape_cast %596 : vector<1x32xf32> to vector<32xf32>
    %cst_101 = arith.constant dense<0.000000e+00> : vector<32xf32>
    %598 = vector.multi_reduction <add>, %593, %cst_101 [1] : vector<32x32xf32> to vector<32xf32>
    %599 = vector.shape_cast %598 : vector<32xf32> to vector<32x1xf32>
    %cst_102 = arith.constant 3.200000e+01 : f32
    %600 = vector.broadcast %cst_102 : f32 to vector<32x1xf32>
    %601 = arith.divf %599, %600 : vector<32x1xf32>
    %602 = vector.broadcast %601 : vector<32x1xf32> to vector<32x32xf32>
    %603 = arith.subf %593, %602 : vector<32x32xf32>
    %604 = arith.mulf %603, %603 : vector<32x32xf32>
    %cst_103 = arith.constant dense<0.000000e+00> : vector<32xf32>
    %605 = vector.multi_reduction <add>, %604, %cst_103 [1] : vector<32x32xf32> to vector<32xf32>
    %606 = vector.shape_cast %605 : vector<32xf32> to vector<32x1xf32>
    %cst_104 = arith.constant 3.200000e+01 : f32
    %607 = vector.broadcast %cst_104 : f32 to vector<32x1xf32>
    %608 = arith.divf %606, %607 : vector<32x1xf32>
    %609 = vector.broadcast %601 : vector<32x1xf32> to vector<32x32xf32>
    %610 = arith.subf %593, %609 : vector<32x32xf32>
    %cst_105 = arith.constant 9.99999974E-6 : f32
    %611 = vector.broadcast %cst_105 : f32 to vector<32x1xf32>
    %612 = arith.addf %608, %611 : vector<32x1xf32>
    %613 = math.rsqrt %612 : vector<32x1xf32>
    %614 = vector.broadcast %613 : vector<32x1xf32> to vector<32x32xf32>
    %615 = arith.mulf %610, %614 : vector<32x32xf32>
    %616 = vector.shape_cast %595 : vector<32xf32> to vector<1x32xf32>
    %617 = vector.broadcast %616 : vector<1x32xf32> to vector<32x32xf32>
    %618 = arith.mulf %615, %617 : vector<32x32xf32>
    %619 = vector.shape_cast %597 : vector<32xf32> to vector<1x32xf32>
    %620 = vector.broadcast %619 : vector<1x32xf32> to vector<32x32xf32>
    %621 = arith.addf %618, %620 : vector<32x32xf32>
    %c1_106 = arith.constant 1 : index
    %c0_107 = arith.constant 0 : index
    %c0_108 = arith.constant 0 : index
    %622 = vector.load %arg8[%c1_106, %c0_107, %c0_108] : memref<2x32x2048xbf16, #tpu.memory_space<vmem>>, vector<1x32x2048xbf16>
    %623 = vector.shape_cast %622 : vector<1x32x2048xbf16> to vector<32x2048xbf16>
    %624 = arith.truncf %621 : vector<32x32xf32> to vector<32x32xbf16>
    %cst_109 = arith.constant dense<0.000000e+00> : vector<32x2048xf32>
    %625 = tpu.matmul %624, %623, %cst_109 {dimension_numbers = #tpu.dot_dimension_numbers<[1], [0], [0], [1], [0, 0, 1, 1], [], []>} : vector<32x32xbf16>, vector<32x2048xbf16>, vector<32x2048xf32> -> vector<32x2048xf32>
    %c1_110 = arith.constant 1 : index
    %c0_111 = arith.constant 0 : index
    %626 = vector.load %arg12[%c1_110, %c0_111] : memref<2x2048xf32, #tpu.memory_space<vmem>>, vector<1x2048xf32>
    %627 = vector.shape_cast %626 : vector<1x2048xf32> to vector<2048xf32>
    %628 = vector.shape_cast %627 : vector<2048xf32> to vector<1x2048xf32>
    %629 = vector.broadcast %628 : vector<1x2048xf32> to vector<32x2048xf32>
    %630 = arith.addf %625, %629 : vector<32x2048xf32>
    %cst_112 = arith.constant 0.000000e+00 : f32
    %631 = vector.broadcast %cst_112 : f32 to vector<32x2048xf32>
    %632 = arith.maximumf %630, %631 : vector<32x2048xf32>
    %c1_113 = arith.constant 1 : index
    %c0_114 = arith.constant 0 : index
    %c0_115 = arith.constant 0 : index
    %633 = vector.load %arg9[%c1_113, %c0_114, %c0_115] : memref<2x2048x32xbf16, #tpu.memory_space<vmem>>, vector<1x2048x32xbf16>
    %634 = vector.shape_cast %633 : vector<1x2048x32xbf16> to vector<2048x32xbf16>
    %635 = arith.truncf %632 : vector<32x2048xf32> to vector<32x2048xbf16>
    %cst_116 = arith.constant dense<0.000000e+00> : vector<32x32xf32>
    %636 = tpu.matmul %635, %634, %cst_116 {dimension_numbers = #tpu.dot_dimension_numbers<[1], [0], [0], [1], [0, 0, 1, 1], [], []>} : vector<32x2048xbf16>, vector<2048x32xbf16>, vector<32x32xf32> -> vector<32x32xf32>
    %637 = vector.extract_strided_slice %340 {offsets = [8, 0], sizes = [1, 32], strides = [1, 1]} : vector<9x32xf32> to vector<1x32xf32>
    %638 = vector.shape_cast %637 : vector<1x32xf32> to vector<32xf32>
    %639 = vector.shape_cast %638 : vector<32xf32> to vector<1x32xf32>
    %640 = vector.broadcast %639 : vector<1x32xf32> to vector<32x32xf32>
    %641 = arith.addf %636, %640 : vector<32x32xf32>
    %642 = arith.addf %621, %641 : vector<32x32xf32>
    %643 = vector.extract_strided_slice %340 {offsets = [6, 0], sizes = [1, 32], strides = [1, 1]} : vector<9x32xf32> to vector<1x32xf32>
    %644 = vector.shape_cast %643 : vector<1x32xf32> to vector<32xf32>
    %645 = vector.extract_strided_slice %340 {offsets = [7, 0], sizes = [1, 32], strides = [1, 1]} : vector<9x32xf32> to vector<1x32xf32>
    %646 = vector.shape_cast %645 : vector<1x32xf32> to vector<32xf32>
    %cst_117 = arith.constant dense<0.000000e+00> : vector<32xf32>
    %647 = vector.multi_reduction <add>, %642, %cst_117 [1] : vector<32x32xf32> to vector<32xf32>
    %648 = vector.shape_cast %647 : vector<32xf32> to vector<32x1xf32>
    %cst_118 = arith.constant 3.200000e+01 : f32
    %649 = vector.broadcast %cst_118 : f32 to vector<32x1xf32>
    %650 = arith.divf %648, %649 : vector<32x1xf32>
    %651 = vector.broadcast %650 : vector<32x1xf32> to vector<32x32xf32>
    %652 = arith.subf %642, %651 : vector<32x32xf32>
    %653 = arith.mulf %652, %652 : vector<32x32xf32>
    %cst_119 = arith.constant dense<0.000000e+00> : vector<32xf32>
    %654 = vector.multi_reduction <add>, %653, %cst_119 [1] : vector<32x32xf32> to vector<32xf32>
    %655 = vector.shape_cast %654 : vector<32xf32> to vector<32x1xf32>
    %cst_120 = arith.constant 3.200000e+01 : f32
    %656 = vector.broadcast %cst_120 : f32 to vector<32x1xf32>
    %657 = arith.divf %655, %656 : vector<32x1xf32>
    %658 = vector.broadcast %650 : vector<32x1xf32> to vector<32x32xf32>
    %659 = arith.subf %642, %658 : vector<32x32xf32>
    %cst_121 = arith.constant 9.99999974E-6 : f32
    %660 = vector.broadcast %cst_121 : f32 to vector<32x1xf32>
    %661 = arith.addf %657, %660 : vector<32x1xf32>
    %662 = math.rsqrt %661 : vector<32x1xf32>
    %663 = vector.broadcast %662 : vector<32x1xf32> to vector<32x32xf32>
    %664 = arith.mulf %659, %663 : vector<32x32xf32>
    %665 = vector.shape_cast %644 : vector<32xf32> to vector<1x32xf32>
    %666 = vector.broadcast %665 : vector<1x32xf32> to vector<32x32xf32>
    %667 = arith.mulf %664, %666 : vector<32x32xf32>
    %668 = vector.shape_cast %646 : vector<32xf32> to vector<1x32xf32>
    %669 = vector.broadcast %668 : vector<1x32xf32> to vector<32x32xf32>
    %670 = arith.addf %667, %669 : vector<32x32xf32>
    %c0_122 = arith.constant 0 : index
    %c0_123 = arith.constant 0 : index
    %671 = vector.load %arg13[%c0_122, %c0_123] : memref<32x128xbf16, #tpu.memory_space<vmem>>, vector<32x128xbf16>
    %672 = arith.truncf %670 : vector<32x32xf32> to vector<32x32xbf16>
    %cst_124 = arith.constant dense<0.000000e+00> : vector<32x128xf32>
    %673 = tpu.matmul %672, %671, %cst_124 {dimension_numbers = #tpu.dot_dimension_numbers<[1], [0], [0], [1], [0, 0, 1, 1], [], []>} : vector<32x32xbf16>, vector<32x128xbf16>, vector<32x128xf32> -> vector<32x128xf32>
    %c0_125 = arith.constant 0 : index
    %c0_126 = arith.constant 0 : index
    %674 = vector.load %arg14[%c0_125, %c0_126] : memref<1x128xf32, #tpu.memory_space<vmem>>, vector<1x128xf32>
    %675 = vector.shape_cast %674 : vector<1x128xf32> to vector<128xf32>
    %676 = vector.shape_cast %675 : vector<128xf32> to vector<1x128xf32>
    %677 = vector.broadcast %676 : vector<1x128xf32> to vector<32x128xf32>
    %678 = arith.addf %673, %677 : vector<32x128xf32>
    %679 = vector.shape_cast %678 : vector<32x128xf32> to vector<2x16x128xf32>
    %c0_127 = arith.constant 0 : index
    %c0_128 = arith.constant 0 : index
    %c0_129 = arith.constant 0 : index
    %680 = vector.load %arg15[%c0_127, %c0_128, %c0_129] : memref<2x16x128xf32, #tpu.memory_space<vmem>>, vector<2x16x128xf32>
    tpu.vector_store %arg15[%c0_127, %c0_128, %c0_129], %679 {strides = array<i32>} : memref<2x16x128xf32, #tpu.memory_space<vmem>>, vector<2x16x128xf32>,
    return
  }
  func.func @transform_0(%arg0: i32) -> (i32, i32, i32) {
    %c0_i32 = arith.constant 0 : i32
    %c0_i32_0 = arith.constant 0 : i32
    %c0_i32_1 = arith.constant 0 : i32
    return %arg0, %c0_i32, %c0_i32_0 : i32, i32, i32
  }
  func.func @transform_1(%arg0: i32) -> (i32, i32) {
    %c0_i32 = arith.constant 0 : i32
    %c0_i32_0 = arith.constant 0 : i32
    %c0_i32_1 = arith.constant 0 : i32
    return %c0_i32, %c0_i32_0 : i32, i32
  }
  func.func @transform_2(%arg0: i32) -> (i32, i32) {
    %c0_i32 = arith.constant 0 : i32
    %c0_i32_0 = arith.constant 0 : i32
    %c0_i32_1 = arith.constant 0 : i32
    return %c0_i32, %c0_i32_0 : i32, i32
  }
  func.func @transform_3(%arg0: i32) -> (i32, i32, i32) {
    %c0_i32 = arith.constant 0 : i32
    %c0_i32_0 = arith.constant 0 : i32
    %c0_i32_1 = arith.constant 0 : i32
    %c0_i32_2 = arith.constant 0 : i32
    return %c0_i32, %c0_i32_0, %c0_i32_1 : i32, i32, i32
  }
  func.func @transform_4(%arg0: i32) -> (i32, i32, i32) {
    %c0_i32 = arith.constant 0 : i32
    %c0_i32_0 = arith.constant 0 : i32
    %c0_i32_1 = arith.constant 0 : i32
    %c0_i32_2 = arith.constant 0 : i32
    return %c0_i32, %c0_i32_0, %c0_i32_1 : i32, i32, i32
  }
  func.func @transform_5(%arg0: i32) -> (i32, i32, i32) {
    %c0_i32 = arith.constant 0 : i32
    %c0_i32_0 = arith.constant 0 : i32
    %c0_i32_1 = arith.constant 0 : i32
    %c0_i32_2 = arith.constant 0 : i32
    return %c0_i32, %c0_i32_0, %c0_i32_1 : i32, i32, i32
  }
  func.func @transform_6(%arg0: i32) -> (i32, i32, i32) {
    %c0_i32 = arith.constant 0 : i32
    %c0_i32_0 = arith.constant 0 : i32
    %c0_i32_1 = arith.constant 0 : i32
    %c0_i32_2 = arith.constant 0 : i32
    return %c0_i32, %c0_i32_0, %c0_i32_1 : i32, i32, i32
  }
  func.func @transform_7(%arg0: i32) -> (i32, i32, i32) {
    %c0_i32 = arith.constant 0 : i32
    %c0_i32_0 = arith.constant 0 : i32
    %c0_i32_1 = arith.constant 0 : i32
    %c0_i32_2 = arith.constant 0 : i32
    return %c0_i32, %c0_i32_0, %c0_i32_1 : i32, i32, i32
  }
  func.func @transform_8(%arg0: i32) -> (i32, i32, i32) {
    %c0_i32 = arith.constant 0 : i32
    %c0_i32_0 = arith.constant 0 : i32
    %c0_i32_1 = arith.constant 0 : i32
    %c0_i32_2 = arith.constant 0 : i32
    return %c0_i32, %c0_i32_0, %c0_i32_1 : i32, i32, i32
  }
  func.func @transform_9(%arg0: i32) -> (i32, i32, i32) {
    %c0_i32 = arith.constant 0 : i32
    %c0_i32_0 = arith.constant 0 : i32
    %c0_i32_1 = arith.constant 0 : i32
    %c0_i32_2 = arith.constant 0 : i32
    return %c0_i32, %c0_i32_0, %c0_i32_1 : i32, i32, i32
  }
  func.func @transform_10(%arg0: i32) -> (i32, i32, i32) {
    %c0_i32 = arith.constant 0 : i32
    %c0_i32_0 = arith.constant 0 : i32
    %c0_i32_1 = arith.constant 0 : i32
    %c0_i32_2 = arith.constant 0 : i32
    return %c0_i32, %c0_i32_0, %c0_i32_1 : i32, i32, i32
  }
  func.func @transform_11(%arg0: i32) -> (i32, i32) {
    %c0_i32 = arith.constant 0 : i32
    %c0_i32_0 = arith.constant 0 : i32
    %c0_i32_1 = arith.constant 0 : i32
    return %c0_i32, %c0_i32_0 : i32, i32
  }
  func.func @transform_12(%arg0: i32) -> (i32, i32) {
    %c0_i32 = arith.constant 0 : i32
    %c0_i32_0 = arith.constant 0 : i32
    %c0_i32_1 = arith.constant 0 : i32
    return %c0_i32, %c0_i32_0 : i32, i32
  }
  func.func @transform_13(%arg0: i32) -> (i32, i32) {
    %c0_i32 = arith.constant 0 : i32
    %c0_i32_0 = arith.constant 0 : i32
    %c0_i32_1 = arith.constant 0 : i32
    return %c0_i32, %c0_i32_0 : i32, i32
  }
  func.func @transform_14(%arg0: i32) -> (i32, i32, i32) {
    %c0_i32 = arith.constant 0 : i32
    %c0_i32_0 = arith.constant 0 : i32
    %c0_i32_1 = arith.constant 0 : i32
    return %arg0, %c0_i32, %c0_i32_0 : i32, i32, i32
  }
}

</mosaic_0001>

<bundles_post_ra>
// kernel: transformer_forward.1
= control target key start
LH: loop header
LB: loop body
LE: loop exit
PB: predicated region body
PF: predicated region fallthrough
CT: control target
= control target key end

     0   :  { %vm90_vm0 = vcmask 261120   ;;  %s16378_s0 = inlined_call_operand.vmem [shape: f32[2,16,32], index: 0, kind: input, shape index: {}]   ;;  %s16379_s1 = inlined_call_operand.vmem [shape: f32[16,32], index: 1, kind: input, shape index: {}]   ;;  %s16380_s2 = inlined_call_operand.vmem [shape: f32[16,16], index: 2, kind: input, shape index: {}]   ;;  %s16381_s3 = inlined_call_operand.vmem [shape: bf16[2,32,96], index: 3, kind: input, shape index: {}]   ;;  %s16382_s4 = inlined_call_operand.vmem [shape: bf16[2,32,96], index: 4, kind: input, shape index: {}]   ;;  %s16383_s5 = inlined_call_operand.vmem [shape: bf16[2,32,32], index: 5, kind: input, shape index: {}]   ;;  %s16384_s6 = inlined_call_operand.vmem [shape: bf16[2,32,32], index: 6, kind: input, shape index: {}]   ;;  %s16385_s7 = inlined_call_operand.vmem [shape: bf16[2,32,2048], index: 7, kind: input, shape index: {}]   ;;  %s16386_s8 = inlined_call_operand.vmem [shape: bf16[2,2048,32], index: 8, kind: input, shape index: {}]   ;;  %s16387_s9 = inlined_call_operand.vmem [shape: f32[2,2,96], index: 9, kind: input, shape index: {}]   ;;  %s16388_s10 = inlined_call_operand.vmem [shape: f32[2,9,32], index: 10, kind: input, shape index: {}]   ;;  %s16389_s11 = inlined_call_operand.vmem [shape: f32[2,2048], index: 11, kind: input, shape index: {}]   ;;  %s16390_s12 = inlined_call_operand.vmem [shape: bf16[32,128], index: 12, kind: input, shape index: {}]   ;;  %s16391_s13 = inlined_call_operand.vmem [shape: f32[1,128], index: 13, kind: input, shape index: {}]   ;;  %s16392_s14 = inlined_call_operand.hbm [shape: f32[2,16,128], index: 14, kind: output, shape index: {}]  }
   0x1   :  { %v12447_v0 = vld [vmem:[%s16381_s3] sm:$0xff]   ;;  %v12448_v1 = vld [vmem:[%s16381_s3 + $0x8] sm:$0xff]   ;;  %v51_v4 = vld [vmem:[%s16378_s0 + $0x10] sm:$0xff] }
   0x2   :  { %11662 = vmatprep.subr.bf16.mxu0 %v12447_v0  ;;  %v49_v2 = vld [vmem:[%s16378_s0] sm:$0xff]  ;;  %v50_v3 = vld [vmem:[%s16378_s0 + $0x8] sm:$0xff]  ;;  %v52_v5 = vld [vmem:[%s16378_s0 + $0x18] sm:$0xff] }
   0x3   :  { %11663 = vmatpush3.bf16.msra.mxu0 %v12447_v0  ;;  %v53_v6 = vld [vmem:[%s16379_s1] sm:$0xff]  ;;  %v54_v7 = vld [vmem:[%s16379_s1 + $0x8] sm:$0xff] }
   0x4   :  { %11664 = vmatprep.subr.bf16.mxu0 %v12448_v1  ;;  %v13173_v8 = vadd.f32 %v53_v6, %v49_v2  ;;  %v13175_v9 = vadd.f32 %v54_v7, %v50_v3  ;;  %v13177_v10 = vadd.f32 %v53_v6, %v51_v4  ;;  %v13179_v11 = vadd.f32 %v54_v7, %v52_v5 }
   0x6   :  { %v13183_v12 = vpack.c.bf16 %v13175_v9, %v13173_v8  ;;  %v13187_v13 = vpack.c.bf16 %v13179_v11, %v13177_v10 }
   0x7   :  { %11665 = vmatpush3.bf16.msra.mxu0 %v12448_v1 }
   0x8   :  { %11666 = vmatprep.mubr.msk.bf16.mxu0 %vm90_vm0, %v13183_v12 }
   0xa   :  { %11667 = vmatmul.mubr.msk.bf16.vlgmr.msra.gmra.mrb[0].mxu0 %vm90_vm0, %v13187_v13 }
   0xb   :  { %19 = vsyncpa [#allocation3], 0  ;;  %v74_v14 = vlaneseq  ;;  %v63_v17 = vld [vmem:[%s16387_s9] sm:$0x3]  ;;  %s13061_s29 = smov 104   ;;  %s13062_s30 = smov 120  }
   0xc   :  { %v13063_v31 = vmov 0.0   ;;  %s13064_s15 = smov 112   ;;  %vm13065_vm1 = vmmov 0   ;;  %s13066_s16 = smov 96   ;;  %vm197_vm2 = vcmask 64512   ;;  %vm627_vm3 = vcmask 130048  }
   0xd   :  { %v13193_v15 = vshrl.u32 %v74_v14, 7  ;;  %11670 = vmatprep.subr.bf16.mxu1 %v13063_v31  ;;  %11676 = vmatprep.subr.bf16.mxu0 %v13063_v31  ;;  %s13067_s17 = smov 64   ;;  %s13068_s22 = smov 8   ;;  %vm1216_vm4 = vcmask 195584  }
   0xe   :  { %11672 = vmatprep.mubr.msk.bf16.mxu1 %vm13065_vm1, %v13063_v31  ;;  %11678 = vmatprep.mubr.msk.bf16.mxu0 %vm13065_vm1, %v13063_v31  ;;  %s13069_s23 = smov 16   ;;  %s13070_s26 = smov 24  }
   0xf   :  { %v13196_v16 = vsub.s32 0, %v13193_v15 }
  0x11   :  { %v77_v18 = vrot.slane %v63_v17, %v13196_v16 }
  0xdd   :  { %v11668_v19 = vpop.f32.mrb[0].mxu0 }
  0xde   :  { %v131_v20 = vpop.f32.mrb[1].mxu0  ;;  %v140_v22 = vadd.f32 %v11668_v19, %v77_v18 }
  0xdf   :  { %v11669_v21 = vpop.f32.mrb[2].mxu0  ;;  %v132_v25 = vadd.f32 %v131_v20, %v77_v18 }
  0xe0   :  { %v143_v23 = vadd.f32 %v11669_v21, %v77_v18  ;;  %v134_v24 = vpop.f32.mrb[3].mxu0 }
  0xe1   :  { %v135_v26 = vadd.f32 %v134_v24, %v77_v18  ;;  %v13295_v18 = vld [vmem:[%s16380_s2] sm:$0xff] }
  0xe2   :  { %v12162_v27 = vpack.i.bf16 %v143_v23, %v140_v22  ;;  %v13202_v28 = vpack.c.bf16 %v143_v23, %v140_v22  ;;  %v13300_v22 = vld [vmem:[%s16380_s2 + $0x8] sm:$0xff] }
  0xe3   :  { %v12157_v29 = vpack.i.bf16 %v135_v26, %v132_v25  ;;  %v186_v30 = vpack.c.bf16 %v135_v26, %v132_v25 }
  0xe5   :  { %12158 = vrot.lane.b32.xlu1 %v12157_v29, %s13061_s29  ;;  %12148 = vrot.lane.b32.xlu0 %v12157_v29, %s13062_s30 }
  0xe9   :  { %12163 = vrot.lane.b32.xlu1 %v12162_v27, %s13062_s30  ;;  %12153 = vrot.lane.b32.xlu0 %v12157_v29, %s13064_s15 }
  0xed   :  { %12173 = vrot.lane.b32.xlu1 %v12162_v27, %s13061_s29  ;;  %12168 = vrot.lane.b32.xlu0 %v12162_v27, %s13064_s15 }
  0xf1   :  { %195 = vrot.lane.b32.xlu0 %v186_v30, %s13066_s16 }
 0x157   :  { %v12159_v32 = vpop.permute.xlu1 %12158  ;;  %v12149_v33 = vpop.permute.xlu0 %12148 }
 0x158   :  { %v12151_v34 = vunpack.i.h.bf16 %v12149_v33  ;;  %v12150_v35 = vunpack.i.l.bf16 %v12149_v33  ;;  %v12161_v36 = vunpack.i.h.bf16 %v12159_v32  ;;  %v12160_v37 = vunpack.i.l.bf16 %v12159_v32 }
 0x15a   :  { %v13217_v38 = vpack.c.bf16 %v12151_v34, %v12150_v35  ;;  %v13221_v45 = vpack.c.bf16 %v12161_v36, %v12160_v37 }
 0x15b   :  { %v12164_v39 = vpop.permute.xlu1 %12163  ;;  %v12154_v40 = vpop.permute.xlu0 %12153 }
 0x15c   :  { %v12156_v41 = vunpack.i.h.bf16 %v12154_v40  ;;  %v12155_v42 = vunpack.i.l.bf16 %v12154_v40  ;;  %246 = vrot.lane.b32.xlu1 %v13217_v38, %s13066_s16  ;;  %v12166_v43 = vunpack.i.h.bf16 %v12164_v39  ;;  %v12165_v44 = vunpack.i.l.bf16 %v12164_v39 }
 0x15e   :  { %v13223_v46 = vpack.c.bf16 %v12156_v41, %v12155_v42  ;;  %v13229_v49 = vpack.c.bf16 %v12166_v43, %v12165_v44 }
 0x15f   :  { %v12174_v47 = vpop.permute.xlu1 %12173  ;;  %v12169_v48 = vpop.permute.xlu0 %12168 }
 0x160   :  { %346 = vrot.lane.b32.xlu1 %v13221_v45, %s13066_s16  ;;  %296 = vrot.lane.b32.xlu0 %v13223_v46, %s13066_s16  ;;  %v12176_v50 = vunpack.i.h.bf16 %v12174_v47  ;;  %v12175_v51 = vunpack.i.l.bf16 %v12174_v47  ;;  %v12171_v52 = vunpack.i.h.bf16 %v12169_v48  ;;  %v12170_v53 = vunpack.i.l.bf16 %v12169_v48 }
 0x162   :  { %v13236_v56 = vpack.c.bf16 %v12176_v50, %v12175_v51  ;;  %v13238_v57 = vpack.c.bf16 %v12171_v52, %v12170_v53 }
 0x163   :  { %v196_v54 = vpop.permute.xlu0 %195 }
 0x164   :  { %446 = vrot.lane.b32.xlu1 %v13229_v49, %s13066_s16  ;;  %396 = vrot.lane.b32.xlu0 %v13202_v28, %s13066_s16  ;;  %v202_v55 = vsel %vm197_vm2, %v196_v54, 0 }
 0x165   :  { %11671 = vmatpush3.bf16.xpose.msra.mxu1 %v202_v55 }
 0x166   :  { %11682 = vmatprep.subr.bf16.mxu1 %v13063_v31 }
 0x168   :  { %546 = vrot.lane.b32.xlu1 %v13236_v56, %s13066_s16  ;;  %496 = vrot.lane.b32.xlu0 %v13238_v57, %s13066_s16 }
 0x16c   :  { %812 = vrot.lane.b32.xlu1 %v186_v30, %s13067_s17  ;;  %11673 = vmatmul.mubr.msk.bf16.vlgmr.msra.gmra.mrb[0].mxu1 %vm197_vm2, %v186_v30 }
 0x16d   :  { %11684 = vmatprep.mubr.msk.bf16.mxu1 %vm13065_vm1, %v13063_v31 }
 0x1ce   :  { %v247_v58 = vpop.permute.xlu1 %246 }
 0x1cf   :  { %v252_v59 = vsel %vm197_vm2, %v247_v58, 0 }
 0x1d0   :  { %11677 = vmatpush3.bf16.xpose.msra.mxu0 %v252_v59 }
 0x1d1   :  { %11688 = vmatprep.subr.bf16.mxu0 %v13063_v31 }
 0x1d2   :  { %v297_v60 = vpop.permute.xlu0 %296  ;;  %v347_v62 = vpop.permute.xlu1 %346 }
 0x1d3   :  { %v302_v61 = vsel %vm197_vm2, %v297_v60, 0  ;;  %v352_v63 = vsel %vm197_vm2, %v347_v62, 0 }
 0x1d4   :  { %11683 = vmatpush3.bf16.xpose.msra.mxu1 %v302_v61 }
 0x1d5   :  { %11694 = vmatprep.subr.bf16.mxu1 %v13063_v31 }
 0x1d6   :  { %v397_v0 = vpop.permute.xlu0 %396  ;;  %v447_v2 = vpop.permute.xlu1 %446 }
 0x1d7   :  { %11679 = vmatmul.mubr.msk.bf16.vlgmr.msra.gmra.mrb[4].mxu0 %vm197_vm2, %v13217_v38  ;;  %v402_v1 = vsel %vm197_vm2, %v397_v0, 0  ;;  %v452_v3 = vsel %vm197_vm2, %v447_v2, 0 }
 0x1d8   :  { %11689 = vmatpush3.bf16.xpose.msra.mxu0 %v352_v63  ;;  %11690 = vmatprep.mubr.msk.bf16.mxu0 %vm13065_vm1, %v13063_v31 }
 0x1d9   :  { %11700 = vmatprep.subr.bf16.mxu0 %v13063_v31 }
 0x1da   :  { %v497_v4 = vpop.permute.xlu0 %496  ;;  %v547_v6 = vpop.permute.xlu1 %546 }
 0x1db   :  { %11685 = vmatmul.mubr.msk.bf16.vlgmr.msra.gmra.mrb[4].mxu1 %vm197_vm2, %v13223_v46  ;;  %v502_v5 = vsel %vm197_vm2, %v497_v4, 0  ;;  %v552_v7 = vsel %vm197_vm2, %v547_v6, 0 }
 0x1dc   :  { %11695 = vmatpush3.bf16.xpose.msra.mxu1 %v402_v1  ;;  %11696 = vmatprep.mubr.msk.bf16.mxu1 %vm13065_vm1, %v13063_v31 }
 0x1dd   :  { %11706 = vmatprep.subr.bf16.mxu1 %v13063_v31 }
 0x1de   :  { %v813_v14 = vpop.permute.xlu1 %812 }
 0x1df   :  { %11691 = vmatmul.mubr.msk.bf16.vlgmr.msra.gmra.mrb[8].mxu0 %vm197_vm2, %v13221_v45 }
 0x1e0   :  { %11701 = vmatpush3.bf16.xpose.msra.mxu0 %v452_v3  ;;  %11702 = vmatprep.mubr.msk.bf16.mxu0 %vm13065_vm1, %v13063_v31 }
 0x1e1   :  { %11712 = vmatprep.subr.bf16.mxu0 %v13063_v31 }
 0x1e3   :  { %11697 = vmatmul.mubr.msk.bf16.vlgmr.msra.gmra.mrb[8].mxu1 %vm197_vm2, %v13202_v28 }
 0x1e4   :  { %11707 = vmatpush3.bf16.xpose.msra.mxu1 %v502_v5  ;;  %11708 = vmatprep.mubr.msk.bf16.mxu1 %vm13065_vm1, %v13063_v31 }
 0x1e5   :  { %11718 = vmatprep.subr.bf16.mxu1 %v13063_v31 }
 0x1e7   :  { %11703 = vmatmul.mubr.msk.bf16.vlgmr.msra.gmra.mrb[12].mxu0 %vm197_vm2, %v13229_v49 }
 0x1e8   :  { %11713 = vmatpush3.bf16.xpose.msra.mxu0 %v552_v7  ;;  %11714 = vmatprep.mubr.msk.bf16.mxu0 %vm13065_vm1, %v13063_v31 }
 0x1e9   :  { %11724 = vmatprep.subr.bf16.mxu0 %v13063_v31 }
 0x1eb   :  { %11709 = vmatmul.mubr.msk.bf16.vlgmr.msra.gmra.mrb[12].mxu1 %vm197_vm2, %v13238_v57 }
 0x1ec   :  { %11719 = vmatpush3.bf16.msra.mxu1 %v813_v14  ;;  %11720 = vmatprep.mubr.msk.bf16.mxu1 %vm13065_vm1, %v13063_v31 }
 0x1ed   :  { %11730 = vmatprep.subr.bf16.mxu1 %v13063_v31 }
 0x1ef   :  { %11715 = vmatmul.mubr.msk.bf16.vlgmr.msra.gmra.mrb[16].mxu0 %vm197_vm2, %v13236_v56 }
 0x1f0   :  { %11726 = vmatprep.mubr.msk.bf16.mxu0 %vm13065_vm1, %v13063_v31 }
 0x23f   :  { %v238_v17 = vpop.f32.mrb[0].mxu1 }
 0x240   :  { %v595_v19 = vmul.f32 0.35355338, %v238_v17  ;;  %v11674_v20 = vpop.f32.mrb[1].mxu1 }
 0x241   :  { %v241_v21 = vpop.f32.mrb[2].mxu1 }
 0x242   :  { %v596_v23 = vmul.f32 0.35355338, %v241_v21  ;;  %v11675_v24 = vpop.f32.mrb[3].mxu1  ;;  %v13303_v25 = vadd.f32 %v595_v19, %v13295_v18 }
 0x244   :  { %v628_v26 = vsel %vm627_vm3, %v13303_v25, -inf  ;;  %v13308_v27 = vadd.f32 %v596_v23, %v13300_v22 }
 0x245   :  { %629 = vmax.xlane.f32.xlu0 %v628_v26 }
 0x246   :  { %v631_v29 = vsel %vm627_vm3, %v13308_v27, -inf }
 0x247   :  { %632 = vmax.xlane.f32.xlu1 %v631_v29 }
 0x2aa   :  { %v288_v30 = vpop.f32.mrb[4].mxu0 }
 0x2ab   :  { %v597_v32 = vmul.f32 0.35355338, %v288_v30  ;;  %v11680_v33 = vpop.f32.mrb[5].mxu0 }
 0x2ac   :  { %v291_v34 = vpop.f32.mrb[6].mxu0 }
 0x2ad   :  { %v598_v35 = vmul.f32 0.35355338, %v291_v34  ;;  %v11681_v36 = vpop.f32.mrb[7].mxu0  ;;  %v13313_v37 = vadd.f32 %v597_v32, %v13295_v18 }
 0x2ae   :  { %v338_v39 = vpop.f32.mrb[4].mxu1 }
 0x2af   :  { %v599_v40 = vmul.f32 0.35355338, %v338_v39  ;;  %v11686_v41 = vpop.f32.mrb[5].mxu1  ;;  %v634_v42 = vsel %vm627_vm3, %v13313_v37, -inf  ;;  %v13318_v43 = vadd.f32 %v598_v35, %v13300_v22 }
 0x2b0   :  { %635 = vmax.xlane.f32.xlu0 %v634_v42  ;;  %v341_v44 = vpop.f32.mrb[6].mxu1 }
 0x2b1   :  { %v600_v47 = vmul.f32 0.35355338, %v341_v44  ;;  %v11687_v48 = vpop.f32.mrb[7].mxu1  ;;  %v13321_v50 = vadd.f32 %v599_v40, %v13295_v18  ;;  %v637_v54 = vsel %vm627_vm3, %v13318_v43, -inf }
 0x2b2   :  { %v388_v51 = vpop.f32.mrb[8].mxu0 }
 0x2b3   :  { %v601_v52 = vmul.f32 0.35355338, %v388_v51  ;;  %v11692_v53 = vpop.f32.mrb[9].mxu0  ;;  %v640_v55 = vsel %vm627_vm3, %v13321_v50, -inf  ;;  %v13328_v58 = vadd.f32 %v600_v47, %v13300_v22 }
 0x2b4   :  { %v391_v59 = vpop.f32.mrb[10].mxu0  ;;  %638 = vmax.xlane.f32.xlu0 %v637_v54  ;;  %641 = vmax.xlane.f32.xlu1 %v640_v55 }
 0x2b5   :  { %v602_v60 = vmul.f32 0.35355338, %v391_v59  ;;  %v11693_v61 = vpop.f32.mrb[11].mxu0  ;;  %v13331_v62 = vadd.f32 %v601_v52, %v13295_v18  ;;  %v643_v3 = vsel %vm627_vm3, %v13328_v58, -inf }
 0x2b6   :  { %v438_v63 = vpop.f32.mrb[8].mxu1 }
 0x2b7   :  { %v603_v0 = vmul.f32 0.35355338, %v438_v63  ;;  %v11698_v1 = vpop.f32.mrb[9].mxu1  ;;  %v646_v2 = vsel %vm627_vm3, %v13331_v62, -inf  ;;  %v13338_v4 = vadd.f32 %v602_v60, %v13300_v22 }
 0x2b8   :  { %647 = vmax.xlane.f32.xlu1 %v646_v2  ;;  %644 = vmax.xlane.f32.xlu0 %v643_v3  ;;  %v441_v5 = vpop.f32.mrb[10].mxu1 }
 0x2b9   :  { %v604_v6 = vmul.f32 0.35355338, %v441_v5  ;;  %v11699_v7 = vpop.f32.mrb[11].mxu1  ;;  %v13341_v14 = vadd.f32 %v603_v0, %v13295_v18  ;;  %v649_v21 = vsel %vm627_vm3, %v13338_v4, -inf }
 0x2ba   :  { %v488_v17 = vpop.f32.mrb[12].mxu0 }
 0x2bb   :  { %v605_v19 = vmul.f32 0.35355338, %v488_v17  ;;  %v11704_v20 = vpop.f32.mrb[13].mxu0  ;;  %v652_v23 = vsel %vm627_vm3, %v13341_v14, -inf  ;;  %v13348_v24 = vadd.f32 %v604_v6, %v13300_v22 }
 0x2bc   :  { %v491_v26 = vpop.f32.mrb[14].mxu0  ;;  %650 = vmax.xlane.f32.xlu0 %v649_v21  ;;  %653 = vmax.xlane.f32.xlu1 %v652_v23 }
 0x2bd   :  { %v606_v29 = vmul.f32 0.35355338, %v491_v26  ;;  %v11705_v30 = vpop.f32.mrb[15].mxu0  ;;  %v13351_v32 = vadd.f32 %v605_v19, %v13295_v18  ;;  %v655_v39 = vsel %vm627_vm3, %v13348_v24, -inf }
 0x2be   :  { %v538_v33 = vpop.f32.mrb[12].mxu1 }
 0x2bf   :  { %v607_v34 = vmul.f32 0.35355338, %v538_v33  ;;  %v11710_v35 = vpop.f32.mrb[13].mxu1  ;;  %v658_v36 = vsel %vm627_vm3, %v13351_v32, -inf  ;;  %v13358_v40 = vadd.f32 %v606_v29, %v13300_v22 }
 0x2c0   :  { %659 = vmax.xlane.f32.xlu1 %v658_v36  ;;  %656 = vmax.xlane.f32.xlu0 %v655_v39  ;;  %v541_v41 = vpop.f32.mrb[14].mxu1 }
 0x2c1   :  { %v608_v42 = vmul.f32 0.35355338, %v541_v41  ;;  %v11711_v44 = vpop.f32.mrb[15].mxu1  ;;  %v13361_v47 = vadd.f32 %v607_v34, %v13295_v18  ;;  %v661_v53 = vsel %vm627_vm3, %v13358_v40, -inf }
 0x2c2   :  { %v588_v48 = vpop.f32.mrb[16].mxu0 }
 0x2c3   :  { %v609_v51 = vmul.f32 0.35355338, %v588_v48  ;;  %v11716_v52 = vpop.f32.mrb[17].mxu0  ;;  %v664_v54 = vsel %vm627_vm3, %v13361_v47, -inf  ;;  %v13368_v55 = vadd.f32 %v608_v42, %v13300_v22 }
 0x2c4   :  { %v591_v59 = vpop.f32.mrb[18].mxu0  ;;  %662 = vmax.xlane.f32.xlu0 %v661_v53  ;;  %665 = vmax.xlane.f32.xlu1 %v664_v54 }
 0x2c5   :  { %v610_v60 = vmul.f32 0.35355338, %v591_v59  ;;  %v11717_v61 = vpop.f32.mrb[19].mxu0  ;;  %v13371_v63 = vadd.f32 %v609_v51, %v13295_v18  ;;  %v667_v1 = vsel %vm627_vm3, %v13368_v55, -inf }
 0x2c7   :  { %v670_v0 = vsel %vm627_vm3, %v13371_v63, -inf  ;;  %v13378_v2 = vadd.f32 %v610_v60, %v13300_v22 }
 0x2c8   :  { %671 = vmax.xlane.f32.xlu1 %v670_v0  ;;  %668 = vmax.xlane.f32.xlu0 %v667_v1 }
 0x2c9   :  { %v673_v3 = vsel %vm627_vm3, %v13378_v2, -inf }
 0x2cc   :  { %674 = vmax.xlane.f32.xlu0 %v673_v3 }
 0x2d2   :  { %v630_v18 = vpop.xlane.xlu0 %629 }
 0x2d3   :  { %v676_v5 = vsub.f32 %v13303_v25, %v630_v18 }
 0x2d4   :  { %v633_v22 = vpop.xlane.xlu1 %632 }
 0x2d5   :  { %v677_v6 = vsub.f32 %v13308_v27, %v633_v22  ;;  %v692_v7 = vmul.f32 1.442695, %v676_v5 }
 0x2d7   :  { %12721 = vpow2.f32 %v692_v7 }
 0x2d9   :  { %906 = vrot.lane.b32.xlu1 %v13223_v46, %s13067_s17  ;;  %v694_v46 = vmul.f32 1.442695, %v677_v6 }
 0x2db   :  { %12723 = vpow2.f32 %v694_v46 }
 0x2dd   :  { %953 = vrot.lane.b32.xlu1 %v13221_v45, %s13067_s17 }
 0x2e1   :  { %1047 = vrot.lane.b32.xlu1 %v13229_v49, %s13067_s17  ;;  %v13394_v45 = vpop.eup %12721 }
 0x2e2   :  { %859 = vrot.lane.b32.xlu0 %v13217_v38, %s13067_s17 }
 0x2e5   :  { %v13396_v17 = vpop.eup %12723 }
 0x2e6   :  { %1000 = vrot.lane.b32.xlu0 %v13202_v28, %s13067_s17  ;;  %v727_v38 = vsel %vm627_vm3, %v13396_v17, 0.0  ;;  %v724_v28 = vsel %vm627_vm3, %v13394_v45, 0.0 }
 0x305   :  { %728 = vadd.xlane.f32.xlu0 %v727_v38  ;;  %725 = vadd.xlane.f32.xlu1 %v724_v28 }
 0x33d   :  { %v636_v49 = vpop.xlane.xlu0 %635 }
 0x33e   :  { %v678_v25 = vsub.f32 %v13313_v37, %v636_v49 }
 0x340   :  { %v696_v27 = vmul.f32 1.442695, %v678_v25 }
 0x341   :  { %v642_v19 = vpop.xlane.xlu1 %641  ;;  %v639_v20 = vpop.xlane.xlu0 %638 }
 0x342   :  { %12725 = vpow2.f32 %v696_v27  ;;  %v680_v21 = vsub.f32 %v13321_v50, %v642_v19  ;;  %v679_v23 = vsub.f32 %v13318_v43, %v639_v20 }
 0x344   :  { %v700_v26 = vmul.f32 1.442695, %v680_v21  ;;  %v698_v29 = vmul.f32 1.442695, %v679_v23 }
 0x345   :  { %v648_v30 = vpop.xlane.xlu1 %647  ;;  %v645_v33 = vpop.xlane.xlu0 %644 }
 0x346   :  { %12727 = vpow2.f32 %v700_v26  ;;  %v682_v34 = vsub.f32 %v13331_v62, %v648_v30  ;;  %v681_v35 = vsub.f32 %v13328_v58, %v645_v33 }
 0x347   :  { %12729 = vpow2.f32 %v698_v29 }
 0x348   :  { %v704_v36 = vmul.f32 1.442695, %v682_v34  ;;  %v702_v37 = vmul.f32 1.442695, %v681_v35 }
 0x349   :  { %v654_v39 = vpop.xlane.xlu1 %653  ;;  %v651_v41 = vpop.xlane.xlu0 %650 }
 0x34a   :  { %12731 = vpow2.f32 %v704_v36  ;;  %v684_v42 = vsub.f32 %v13341_v14, %v654_v39  ;;  %v683_v50 = vsub.f32 %v13338_v4, %v651_v41 }
 0x34b   :  { %12733 = vpow2.f32 %v702_v37 }
 0x34c   :  { %v13409_v43 = vpop.eup %12725  ;;  %v708_v44 = vmul.f32 1.442695, %v684_v42  ;;  %v706_v48 = vmul.f32 1.442695, %v683_v50 }
 0x34d   :  { %v660_v51 = vpop.xlane.xlu1 %659  ;;  %v657_v52 = vpop.xlane.xlu0 %656  ;;  %v730_v58 = vsel %vm627_vm3, %v13409_v43, 0.0 }
 0x34e   :  { %12735 = vpow2.f32 %v708_v44  ;;  %v686_v62 = vsub.f32 %v13351_v32, %v660_v51  ;;  %v685_v53 = vsub.f32 %v13348_v24, %v657_v52  ;;  %731 = vadd.xlane.f32.xlu1 %v730_v58 }
 0x34f   :  { %12737 = vpow2.f32 %v706_v48 }
 0x350   :  { %v13415_v14 = vpop.eup %12727  ;;  %v712_v4 = vmul.f32 1.442695, %v686_v62  ;;  %v710_v54 = vmul.f32 1.442695, %v685_v53 }
 0x351   :  { %v13417_v59 = vpop.eup %12729  ;;  %v666_v60 = vpop.xlane.xlu1 %665  ;;  %v736_v0 = vsel %vm627_vm3, %v13415_v14, 0.0 }
 0x352   :  { %v663_v61 = vpop.xlane.xlu0 %662  ;;  %12739 = vpow2.f32 %v712_v4  ;;  %v688_v1 = vsub.f32 %v13361_v47, %v666_v60  ;;  %737 = vadd.xlane.f32.xlu1 %v736_v0  ;;  %v733_v24 = vsel %vm627_vm3, %v13417_v59, 0.0 }
 0x353   :  { %v687_v32 = vsub.f32 %v13358_v40, %v663_v61  ;;  %12741 = vpow2.f32 %v710_v54  ;;  %734 = vadd.xlane.f32.xlu0 %v733_v24 }
 0x354   :  { %v13425_v3 = vpop.eup %12731  ;;  %v716_v18 = vmul.f32 1.442695, %v688_v1 }
 0x355   :  { %v714_v22 = vmul.f32 1.442695, %v687_v32  ;;  %v13427_v5 = vpop.eup %12733  ;;  %v672_v6 = vpop.xlane.xlu1 %671  ;;  %v742_v46 = vsel %vm627_vm3, %v13425_v3, 0.0 }
 0x356   :  { %v669_v7 = vpop.xlane.xlu0 %668  ;;  %12743 = vpow2.f32 %v716_v18  ;;  %v690_v40 = vsub.f32 %v13371_v63, %v672_v6  ;;  %743 = vadd.xlane.f32.xlu1 %v742_v46  ;;  %v739_v38 = vsel %vm627_vm3, %v13427_v5, 0.0 }
 0x357   :  { %v689_v47 = vsub.f32 %v13368_v55, %v669_v7  ;;  %12745 = vpow2.f32 %v714_v22  ;;  %740 = vadd.xlane.f32.xlu0 %v739_v38 }
 0x358   :  { %v13435_v28 = vpop.eup %12735  ;;  %v720_v49 = vmul.f32 1.442695, %v690_v40 }
 0x359   :  { %v718_v25 = vmul.f32 1.442695, %v689_v47  ;;  %v13437_v27 = vpop.eup %12737  ;;  %v748_v20 = vsel %vm627_vm3, %v13435_v28, 0.0  ;;  %v907_v48 = vpop.permute.xlu1 %906 }
 0x35a   :  { %v675_v19 = vpop.xlane.xlu0 %674  ;;  %12747 = vpow2.f32 %v720_v49  ;;  %749 = vadd.xlane.f32.xlu1 %v748_v20  ;;  %v745_v55 = vsel %vm627_vm3, %v13437_v27, 0.0 }
 0x35b   :  { %v691_v63 = vsub.f32 %v13378_v2, %v675_v19  ;;  %12749 = vpow2.f32 %v718_v25  ;;  %746 = vadd.xlane.f32.xlu0 %v745_v55 }
 0x35c   :  { %v13444_v21 = vpop.eup %12739 }
 0x35d   :  { %v722_v23 = vmul.f32 1.442695, %v691_v63  ;;  %v13446_v26 = vpop.eup %12741  ;;  %v754_v30 = vsel %vm627_vm3, %v13444_v21, 0.0  ;;  %v954_v51 = vpop.permute.xlu1 %953 }
 0x35e   :  { %v860_v29 = vpop.permute.xlu0 %859  ;;  %755 = vadd.xlane.f32.xlu1 %v754_v30  ;;  %v751_v2 = vsel %vm627_vm3, %v13446_v26, 0.0 }
 0x35f   :  { %12751 = vpow2.f32 %v722_v23  ;;  %11725 = vmatpush3.bf16.msra.mxu0 %v860_v29  ;;  %752 = vadd.xlane.f32.xlu0 %v751_v2 }
 0x360   :  { %11736 = vmatprep.subr.bf16.mxu0 %v13063_v31  ;;  %v13453_v33 = vpop.eup %12743 }
 0x361   :  { %v13455_v34 = vpop.eup %12745  ;;  %v760_v35 = vsel %vm627_vm3, %v13453_v33, 0.0  ;;  %v13477_v52 = vpop.permute.xlu1 %1047 }
 0x362   :  { %761 = vadd.xlane.f32.xlu1 %v760_v35  ;;  %v757_v36 = vsel %vm627_vm3, %v13455_v34, 0.0  ;;  %v1001_v58 = vpop.permute.xlu0 %1000 }
 0x363   :  { %758 = vadd.xlane.f32.xlu0 %v757_v36 }
 0x364   :  { %v13461_v37 = vpop.eup %12747 }
 0x365   :  { %v13463_v39 = vpop.eup %12749  ;;  %v766_v41 = vsel %vm627_vm3, %v13461_v37, 0.0 }
 0x366   :  { %767 = vadd.xlane.f32.xlu1 %v766_v41  ;;  %v763_v42 = vsel %vm627_vm3, %v13463_v39, 0.0 }
 0x367   :  { %764 = vadd.xlane.f32.xlu0 %v763_v42 }
 0x369   :  { %v13469_v50 = vpop.eup %12751 }
 0x36a   :  { %v769_v44 = vsel %vm627_vm3, %v13469_v50, 0.0 }
 0x36b   :  { %770 = vadd.xlane.f32.xlu0 %v769_v44 }
 0x377   :  { %1141 = vrot.lane.b32.xlu1 %v13236_v56, %s13067_s17 }
 0x381   :  { %1094 = vrot.lane.b32.xlu0 %v13238_v57, %s13067_s17 }
 0x392   :  { %v726_v62 = vpop.xlane.xlu1 %725  ;;  %v729_v53 = vpop.xlane.xlu0 %728 }
 0x393   :  { %12753 = vrcp.f32 %v726_v62 }
 0x394   :  { %12755 = vrcp.f32 %v729_v53 }
 0x39d   :  { %v12754_v4 = vpop.eup %12753 }
 0x39e   :  { %v12756_v54 = vpop.eup %12755  ;;  %v773_v60 = vmul.f32 %v12754_v4, %v13394_v45 }
 0x39f   :  { %v775_v61 = vmul.f32 %v12756_v54, %v13396_v17 }
 0x3a1   :  { %v804_v0 = vpack.c.bf16 %v775_v61, %v773_v60 }
 0x3a3   :  { %11721 = vmatmul.mubr.msk.bf16.vlgmr.msra.gmra.mrb[16].mxu1 %vm627_vm3, %v804_v0 }
 0x3a4   :  { %11731 = vmatpush3.bf16.msra.mxu1 %v907_v48  ;;  %11732 = vmatprep.mubr.msk.bf16.mxu1 %vm13065_vm1, %v13063_v31 }
 0x3a5   :  { %11742 = vmatprep.subr.bf16.mxu1 %v13063_v31 }
 0x3db   :  { %v732_v56 = vpop.xlane.xlu1 %731 }
 0x3dc   :  { %12757 = vrcp.f32 %v732_v56 }
 0x3df   :  { %v738_v57 = vpop.xlane.xlu1 %737 }
 0x3e0   :  { %v735_v1 = vpop.xlane.xlu0 %734 }
 0x3e1   :  { %12759 = vrcp.f32 %v735_v1 }
 0x3e2   :  { %12761 = vrcp.f32 %v738_v57 }
 0x3e3   :  { %v744_v32 = vpop.xlane.xlu1 %743 }
 0x3e4   :  { %v741_v24 = vpop.xlane.xlu0 %740 }
 0x3e5   :  { %12763 = vrcp.f32 %v741_v24 }
 0x3e6   :  { %12765 = vrcp.f32 %v744_v32  ;;  %v12758_v18 = vpop.eup %12757 }
 0x3e7   :  { %v750_v45 = vpop.xlane.xlu1 %749  ;;  %v777_v7 = vmul.f32 %v12758_v18, %v13409_v43 }
 0x3e8   :  { %v747_v17 = vpop.xlane.xlu0 %746 }
 0x3e9   :  { %12767 = vrcp.f32 %v747_v17 }
 0x3ea   :  { %12769 = vrcp.f32 %v750_v45 }
 0x3eb   :  { %v12760_v22 = vpop.eup %12759  ;;  %v756_v6 = vpop.xlane.xlu1 %755 }
 0x3ec   :  { %v779_v46 = vmul.f32 %v12760_v22, %v13417_v59  ;;  %v753_v40 = vpop.xlane.xlu0 %752  ;;  %v12762_v47 = vpop.eup %12761 }
 0x3ed   :  { %12771 = vrcp.f32 %v753_v40  ;;  %v781_v19 = vmul.f32 %v12762_v47, %v13415_v14 }
 0x3ee   :  { %v805_v38 = vpack.c.bf16 %v779_v46, %v777_v7  ;;  %12773 = vrcp.f32 %v756_v6 }
 0x3ef   :  { %v12764_v49 = vpop.eup %12763  ;;  %v762_v25 = vpop.xlane.xlu1 %761 }
 0x3f0   :  { %v783_v20 = vmul.f32 %v12764_v49, %v13427_v5  ;;  %11727 = vmatmul.mubr.msk.bf16.vlgmr.msra.gmra.mrb[20].mxu0 %vm627_vm3, %v805_v38  ;;  %v759_v63 = vpop.xlane.xlu0 %758  ;;  %v12766_v55 = vpop.eup %12765 }
 0x3f1   :  { %11737 = vmatpush3.bf16.msra.mxu0 %v954_v51  ;;  %12775 = vrcp.f32 %v759_v63  ;;  %11738 = vmatprep.mubr.msk.bf16.mxu0 %vm13065_vm1, %v13063_v31  ;;  %v785_v23 = vmul.f32 %v12766_v55, %v13425_v3 }
 0x3f2   :  { %v806_v43 = vpack.c.bf16 %v783_v20, %v781_v19  ;;  %11748 = vmatprep.subr.bf16.mxu0 %v13063_v31  ;;  %12777 = vrcp.f32 %v762_v25  ;;  %v12449_v25 = vld [vmem:[%s16383_s5] sm:$0xff]  }
 0x3f3   :  { %v12768_v59 = vpop.eup %12767  ;;  %v768_v29 = vpop.xlane.xlu1 %767 }
 0x3f4   :  { %v787_v14 = vmul.f32 %v12768_v59, %v13437_v27  ;;  %11733 = vmatmul.mubr.msk.bf16.vlgmr.msra.gmra.mrb[20].mxu1 %vm627_vm3, %v806_v43  ;;  %v765_v5 = vpop.xlane.xlu0 %764  ;;  %v12770_v30 = vpop.eup %12769  ;;  %v12450_v43 = vld [vmem:[%s16383_s5 + $0x8] sm:$0xff]  }
 0x3f5   :  { %11743 = vmatpush3.bf16.msra.mxu1 %v1001_v58  ;;  %12779 = vrcp.f32 %v765_v5  ;;  %11744 = vmatprep.mubr.msk.bf16.mxu1 %vm13065_vm1, %v13063_v31  ;;  %v789_v36 = vmul.f32 %v12770_v30, %v13435_v28 }
 0x3f6   :  { %v807_v2 = vpack.c.bf16 %v787_v14, %v785_v23  ;;  %11754 = vmatprep.subr.bf16.mxu1 %v13063_v31  ;;  %12781 = vrcp.f32 %v768_v29 }
 0x3f7   :  { %v12772_v35 = vpop.eup %12771  ;;  %v1142_v4 = vpop.permute.xlu1 %1141 }
 0x3f8   :  { %v791_v3 = vmul.f32 %v12772_v35, %v13446_v26  ;;  %11739 = vmatmul.mubr.msk.bf16.vlgmr.msra.gmra.mrb[24].mxu0 %vm627_vm3, %v807_v2  ;;  %v771_v27 = vpop.xlane.xlu0 %770  ;;  %v12774_v41 = vpop.eup %12773 }
 0x3f9   :  { %11749 = vmatpush3.bf16.msra.mxu0 %v13477_v52  ;;  %12783 = vrcp.f32 %v771_v27  ;;  %11750 = vmatprep.mubr.msk.bf16.mxu0 %vm13065_vm1, %v13063_v31  ;;  %v793_v48 = vmul.f32 %v12774_v41, %v13444_v21 }
 0x3fa   :  { %v808_v42 = vpack.c.bf16 %v791_v3, %v789_v36  ;;  %11760 = vmatprep.subr.bf16.mxu0 %v13063_v31 }
 0x3fb   :  { %v12776_v44 = vpop.eup %12775 }
 0x3fc   :  { %v795_v28 = vmul.f32 %v12776_v44, %v13455_v34  ;;  %11745 = vmatmul.mubr.msk.bf16.vlgmr.msra.gmra.mrb[24].mxu1 %vm627_vm3, %v808_v42  ;;  %v1095_v26 = vpop.permute.xlu0 %1094  ;;  %v12778_v51 = vpop.eup %12777 }
 0x3fd   :  { %11755 = vmatpush3.bf16.msra.mxu1 %v1095_v26  ;;  %11756 = vmatprep.mubr.msk.bf16.mxu1 %vm13065_vm1, %v13063_v31  ;;  %v797_v62 = vmul.f32 %v12778_v51, %v13453_v33 }
 0x3fe   :  { %v809_v52 = vpack.c.bf16 %v795_v28, %v793_v48  ;;  %11766 = vmatprep.subr.bf16.mxu1 %v12449_v25 }
 0x3ff   :  { %v12780_v58 = vpop.eup %12779 }
 0x400   :  { %v799_v53 = vmul.f32 %v12780_v58, %v13463_v39  ;;  %11751 = vmatmul.mubr.msk.bf16.vlgmr.msra.gmra.mrb[28].mxu0 %vm627_vm3, %v809_v52  ;;  %v12782_v21 = vpop.eup %12781 }
 0x401   :  { %11761 = vmatpush3.bf16.msra.mxu0 %v1142_v4  ;;  %11762 = vmatprep.mubr.msk.bf16.mxu0 %vm13065_vm1, %v13063_v31  ;;  %v801_v60 = vmul.f32 %v12782_v21, %v13461_v37 }
 0x402   :  { %v810_v34 = vpack.c.bf16 %v799_v53, %v797_v62 }
 0x403   :  { %v12784_v54 = vpop.eup %12783 }
 0x404   :  { %v803_v61 = vmul.f32 %v12784_v54, %v13469_v50  ;;  %11757 = vmatmul.mubr.msk.bf16.vlgmr.msra.gmra.mrb[28].mxu1 %vm627_vm3, %v810_v34 }
 0x405   :  { %11767 = vmatpush3.bf16.msra.mxu1 %v12449_v25 }
 0x406   :  { %v811_v0 = vpack.c.bf16 %v803_v61, %v801_v60  ;;  %11768 = vmatprep.subr.bf16.mxu1 %v12450_v43 }
 0x408   :  { %11763 = vmatmul.mubr.msk.bf16.vlgmr.msra.gmra.mrb[32].mxu0 %vm627_vm3, %v811_v0 }
 0x409   :  { %11769 = vmatpush3.bf16.msra.mxu1 %v12450_v43 }
 0x476   :  { %v13520_v33 = vpop.f32.mrb[16].mxu1 }
 0x477   :  { %v11722_v39 = vpop.f32.mrb[17].mxu1 }
 0x478   :  { %v855_v56 = vpop.f32.mrb[18].mxu1 }
 0x479   :  { %v11723_v57 = vpop.f32.mrb[19].mxu1 }
 0x4c3   :  { %v899_v1 = vpop.f32.mrb[20].mxu0 }
 0x4c4   :  { %v11728_v32 = vpop.f32.mrb[21].mxu0 }
 0x4c5   :  { %v902_v24 = vpop.f32.mrb[22].mxu0 }
 0x4c6   :  { %v12177_v45 = vpack.i.bf16 %v902_v24, %v899_v1  ;;  %v11729_v17 = vpop.f32.mrb[23].mxu0 }
 0x4c7   :  { %v946_v18 = vpop.f32.mrb[20].mxu1 }
 0x4c8   :  { %12178 = vrot.lane.b32.xlu0 %v12177_v45, %s13068_s22  ;;  %v11734_v37 = vpop.f32.mrb[21].mxu1 }
 0x4c9   :  { %v949_v50 = vpop.f32.mrb[22].mxu1 }
 0x4ca   :  { %v12182_v22 = vpack.i.bf16 %v949_v50, %v946_v18  ;;  %v11735_v6 = vpop.f32.mrb[23].mxu1 }
 0x4cb   :  { %v993_v7 = vpop.f32.mrb[24].mxu0 }
 0x4cc   :  { %12183 = vrot.lane.b32.xlu1 %v12182_v22, %s13069_s23  ;;  %v11740_v46 = vpop.f32.mrb[25].mxu0 }
 0x4cd   :  { %v996_v40 = vpop.f32.mrb[26].mxu0 }
 0x4ce   :  { %v12187_v47 = vpack.i.bf16 %v996_v40, %v993_v7  ;;  %v11741_v38 = vpop.f32.mrb[27].mxu0 }
 0x4cf   :  { %v1040_v49 = vpop.f32.mrb[24].mxu1 }
 0x4d0   :  { %12188 = vrot.lane.b32.xlu1 %v12187_v47, %s13070_s26  ;;  %v11746_v19 = vpop.f32.mrb[25].mxu1  ;;  %v13554_v47 = vld [vmem:[%s16388_s10] sm:$0xff] }
 0x4d1   :  { %v1043_v20 = vpop.f32.mrb[26].mxu1  ;;  %v1254_v38 = vrot.slane %v13554_v47, %v13196_v16 }
 0x4d2   :  { %v11747_v63 = vpop.f32.mrb[27].mxu1 }
 0x4d3   :  { %v1087_v55 = vpop.f32.mrb[28].mxu0 }
 0x4d4   :  { %v11752_v59 = vpop.f32.mrb[29].mxu0 }
 0x4d5   :  { %v1090_v23 = vpop.f32.mrb[30].mxu0 }
 0x4d6   :  { %v12192_v14 = vpack.i.bf16 %v1090_v23, %v1087_v55  ;;  %v11753_v29 = vpop.f32.mrb[31].mxu0 }
 0x4d7   :  { %v1134_v5 = vpop.f32.mrb[28].mxu1 }
 0x4d8   :  { %12193 = vrot.lane.b32.xlu0 %v12192_v14, %s13068_s22  ;;  %v11758_v30 = vpop.f32.mrb[29].mxu1 }
 0x4d9   :  { %v1137_v2 = vpop.f32.mrb[30].mxu1 }
 0x4da   :  { %v12197_v35 = vpack.i.bf16 %v1137_v2, %v1134_v5  ;;  %v11759_v36 = vpop.f32.mrb[31].mxu1 }
 0x4db   :  { %v1181_v3 = vpop.f32.mrb[32].mxu0 }
 0x4dc   :  { %v11764_v27 = vpop.f32.mrb[33].mxu0  ;;  %12198 = vrot.lane.b32.xlu0 %v12197_v35, %s13069_s23 }
 0x4dd   :  { %v1184_v41 = vpop.f32.mrb[34].mxu0 }
 0x4de   :  { %v12202_v42 = vpack.i.bf16 %v1184_v41, %v1181_v3  ;;  %v11765_v44 = vpop.f32.mrb[35].mxu0 }
 0x4e0   :  { %12203 = vrot.lane.b32.xlu1 %v12202_v42, %s13070_s26 }
 0x53a   :  { %v12179_v48 = vpop.permute.xlu0 %12178 }
 0x53b   :  { %v12181_v26 = vunpack.i.h.bf16 %v12179_v48  ;;  %v12180_v51 = vunpack.i.l.bf16 %v12179_v48 }
 0x53d   :  { %v1213_v53 = vsel %vm197_vm2, %v855_v56, %v12181_v26  ;;  %v1212_v4 = vsel %vm197_vm2, %v13520_v33, %v12180_v51 }
 0x53e   :  { %v12184_v28 = vpop.permute.xlu1 %12183 }
 0x53f   :  { %v12186_v52 = vunpack.i.h.bf16 %v12184_v28  ;;  %v12185_v58 = vunpack.i.l.bf16 %v12184_v28 }
 0x541   :  { %v1214_v54 = vsel %vm627_vm3, %v1212_v4, %v12185_v58  ;;  %v1215_v60 = vsel %vm627_vm3, %v1213_v53, %v12186_v52 }
 0x542   :  { %v12189_v62 = vpop.permute.xlu1 %12188 }
 0x543   :  { %v12191_v21 = vunpack.i.h.bf16 %v12189_v62  ;;  %v12190_v34 = vunpack.i.l.bf16 %v12189_v62 }
 0x545   :  { %v1217_v61 = vsel %vm1216_vm4, %v1214_v54, %v12190_v34  ;;  %v1218_v0 = vsel %vm1216_vm4, %v1215_v60, %v12191_v21 }
 0x546   :  { %v1249_v39 = vpack.c.bf16 %v1218_v0, %v1217_v61  ;;  %v13591_v61 = vsub.s32 1, %v13193_v15  ;;  %v13025_v0 = vld [vmem:[%s16387_s9] sm:$0x3] }
 0x548   :  { %11770 = vmatprep.mubr.msk.bf16.mxu1 %vm90_vm0, %v1249_v39  ;;  %v13597_v39 = vrot.slane %v13025_v0, %v13591_v61 }
 0x54a   :  { %v12194_v57 = vpop.permute.xlu0 %12193 }
 0x54b   :  { %v12196_v32 = vunpack.i.h.bf16 %v12194_v57  ;;  %v12195_v56 = vunpack.i.l.bf16 %v12194_v57 }
 0x54d   :  { %v1244_v17 = vsel %vm197_vm2, %v1043_v20, %v12196_v32  ;;  %v1243_v18 = vsel %vm197_vm2, %v1040_v49, %v12195_v56 }
 0x54e   :  { %v12199_v1 = vpop.permute.xlu0 %12198 }
 0x54f   :  { %v12201_v24 = vunpack.i.h.bf16 %v12199_v1  ;;  %v12200_v45 = vunpack.i.l.bf16 %v12199_v1 }
 0x551   :  { %v1245_v22 = vsel %vm627_vm3, %v1243_v18, %v12200_v45  ;;  %v1246_v6 = vsel %vm627_vm3, %v1244_v17, %v12201_v24 }
 0x552   :  { %v12204_v33 = vpop.permute.xlu1 %12203 }
 0x553   :  { %v12206_v37 = vunpack.i.h.bf16 %v12204_v33  ;;  %v12205_v50 = vunpack.i.l.bf16 %v12204_v33 }
 0x555   :  { %v1247_v7 = vsel %vm1216_vm4, %v1245_v22, %v12205_v50  ;;  %v1248_v46 = vsel %vm1216_vm4, %v1246_v6, %v12206_v37 }
 0x556   :  { %v1250_v40 = vpack.c.bf16 %v1248_v46, %v1247_v7 }
 0x558   :  { %11771 = vmatmul.mubr.msk.bf16.vlgmr.msra.gmra.mrb[32].mxu1 %vm90_vm0, %v1250_v40 }
 0x559   :  { %11786 = vmatprep.mubr.msk.bf16.mxu1 %vm90_vm0, %v13183_v12 }
 0x62b   :  { %v11772_v49 = vpop.f32.mrb[32].mxu1 }
 0x62c   :  { %v1307_v25 = vpop.f32.mrb[33].mxu1  ;;  %v1316_v19 = vadd.f32 %v11772_v49, %v1254_v38 }
 0x62d   :  { %v1308_v20 = vadd.f32 %v1307_v25, %v1254_v38  ;;  %v11773_v63 = vpop.f32.mrb[34].mxu1 }
 0x62e   :  { %v1310_v55 = vpop.f32.mrb[35].mxu1  ;;  %v1319_v23 = vadd.f32 %v11773_v63, %v1254_v38  ;;  %v1324_v5 = vadd.f32 %v1316_v19, %v13177_v10 }
 0x62f   :  { %v1311_v43 = vadd.f32 %v1310_v55, %v1254_v38  ;;  %v1322_v59 = vadd.f32 %v1308_v20, %v13173_v8  ;;  %v12451_v8 = vld [vmem:[%s16382_s4] sm:$0xff]  }
 0x630   :  { %v1332_v2 = vsel %vm90_vm0, %v1324_v5, 0.0  ;;  %v1325_v35 = vadd.f32 %v1319_v23, %v13179_v11  ;;  %11782 = vmatprep.subr.bf16.mxu1 %v12451_v8  ;;  %11774 = vmatprep.subr.bf16.mxu0 %v12451_v8 }
 0x631   :  { %v1326_v14 = vsel %vm90_vm0, %v1322_v59, 0.0  ;;  %v1323_v29 = vadd.f32 %v1311_v43, %v13175_v9  ;;  %v12452_v9 = vld [vmem:[%s16382_s4 + $0x8] sm:$0xff]   ;;  %11783 = vmatpush3.bf16.msra.mxu1 %v12451_v8  ;;  %11775 = vmatpush3.bf16.msra.mxu0 %v12451_v8  ;;  %v13616_v43 = vsub.s32 2, %v13193_v15 }
 0x632   :  { %1327 = vadd.xlane.f32.xlu0 %v1326_v14  ;;  %v1335_v36 = vsel %vm90_vm0, %v1325_v35, 0.0  ;;  %11784 = vmatprep.subr.bf16.mxu1 %v12452_v9  ;;  %v13621_v14 = vsub.s32 3, %v13193_v15 }
 0x633   :  { %v1329_v30 = vsel %vm90_vm0, %v1323_v29, 0.0  ;;  %11776 = vmatprep.subr.bf16.mxu0 %v12452_v9  ;;  %v1382_v23 = vrot.slane %v13554_v47, %v13616_v43 }
 0x634   :  { %1330 = vadd.xlane.f32.xlu1 %v1329_v30 }
 0x635   :  { %11785 = vmatpush3.bf16.msra.mxu1 %v12452_v9  ;;  %11777 = vmatpush3.bf16.msra.mxu0 %v12452_v9 }
 0x636   :  { %1333 = vadd.xlane.f32.xlu0 %v1332_v2  ;;  %11790 = vmatprep.subr.bf16.mxu0 %v13063_v31 }
 0x637   :  { %11796 = vmatprep.subr.bf16.mxu1 %v13063_v31 }
 0x638   :  { %11787 = vmatmul.mubr.msk.bf16.vlgmr.msra.gmra.mrb[36].mxu1 %vm90_vm0, %v13187_v13 }
 0x639   :  { %11798 = vmatprep.mubr.msk.bf16.mxu1 %vm13065_vm1, %v13063_v31 }
 0x63a   :  { %1336 = vadd.xlane.f32.xlu0 %v1335_v36  ;;  %v1390_v36 = vrot.slane %v13554_v47, %v13621_v14 }
 0x6bf   :  { %v1328_v10 = vpop.xlane.xlu0 %1327 }
 0x6c0   :  { %v1339_v11 = vmul.f32 0.03125, %v1328_v10 }
 0x6c1   :  { %v1331_v3 = vpop.xlane.xlu1 %1330 }
 0x6c2   :  { %v13578_v27 = vsub.f32 %v1322_v59, %v1339_v11  ;;  %v1340_v41 = vmul.f32 0.03125, %v1331_v3 }
 0x6c3   :  { %v1334_v42 = vpop.xlane.xlu0 %1333 }
 0x6c4   :  { %v1344_v44 = vsub.f32 %v1323_v29, %v1340_v41  ;;  %v1341_v48 = vmul.f32 0.03125, %v1334_v42  ;;  %v1347_v28 = vmul.f32 %v13578_v27, %v13578_v27 }
 0x6c6   :  { %v13582_v26 = vsub.f32 %v1324_v5, %v1341_v48  ;;  %v1351_v51 = vsel %vm90_vm0, %v1347_v28, 0.0  ;;  %v1348_v52 = vmul.f32 %v1344_v44, %v1344_v44 }
 0x6c7   :  { %1352 = vadd.xlane.f32.xlu1 %v1351_v51  ;;  %v1337_v58 = vpop.xlane.xlu0 %1336 }
 0x6c8   :  { %v1342_v62 = vmul.f32 0.03125, %v1337_v58  ;;  %v1354_v53 = vsel %vm90_vm0, %v1348_v52, 0.0  ;;  %v1349_v4 = vmul.f32 %v13582_v26, %v13582_v26 }
 0x6c9   :  { %1355 = vadd.xlane.f32.xlu0 %v1354_v53 }
 0x6ca   :  { %v1346_v21 = vsub.f32 %v1325_v35, %v1342_v62  ;;  %v1357_v34 = vsel %vm90_vm0, %v1349_v4, 0.0 }
 0x6cb   :  { %1358 = vadd.xlane.f32.xlu1 %v1357_v34 }
 0x6cc   :  { %v1350_v54 = vmul.f32 %v1346_v21, %v1346_v21 }
 0x6ce   :  { %v1360_v60 = vsel %vm90_vm0, %v1350_v54, 0.0 }
 0x6cf   :  { %1361 = vadd.xlane.f32.xlu0 %v1360_v60 }
 0x70b   :  { %v11788_v57 = vpop.f32.mrb[36].mxu1 }
 0x70c   :  { %v1519_v1 = vadd.f32 %v11788_v57, %v13597_v39  ;;  %v1510_v32 = vpop.f32.mrb[37].mxu1 }
 0x70d   :  { %v1511_v56 = vadd.f32 %v1510_v32, %v13597_v39  ;;  %v11789_v24 = vpop.f32.mrb[38].mxu1 }
 0x70e   :  { %v1522_v45 = vadd.f32 %v11789_v24, %v13597_v39  ;;  %v1513_v33 = vpop.f32.mrb[39].mxu1 }
 0x70f   :  { %v1514_v17 = vadd.f32 %v1513_v33, %v13597_v39 }
 0x710   :  { %v12222_v18 = vpack.i.bf16 %v1522_v45, %v1519_v1  ;;  %v13613_v22 = vpack.c.bf16 %v1522_v45, %v1519_v1 }
 0x711   :  { %v12207_v37 = vpack.i.bf16 %v1514_v17, %v1511_v56  ;;  %v13603_v50 = vpack.c.bf16 %v1514_v17, %v1511_v56 }
 0x713   :  { %12208 = vrot.lane.b32.xlu1 %v12207_v37, %s13062_s30  ;;  %12213 = vrot.lane.b32.xlu0 %v12207_v37, %s13064_s15 }
 0x717   :  { %12218 = vrot.lane.b32.xlu1 %v12207_v37, %s13061_s29  ;;  %12228 = vrot.lane.b32.xlu0 %v12222_v18, %s13064_s15 }
 0x71b   :  { %12223 = vrot.lane.b32.xlu1 %v12222_v18, %s13062_s30  ;;  %1622 = vrot.lane.b32.xlu0 %v13603_v50, %s13066_s16 }
 0x71f   :  { %12233 = vrot.lane.b32.xlu1 %v12222_v18, %s13061_s29 }
 0x754   :  { %v1353_v6 = vpop.xlane.xlu1 %1352 }
 0x755   :  { %v1363_v7 = vmul.f32 0.03125, %v1353_v6 }
 0x756   :  { %v1356_v46 = vpop.xlane.xlu0 %1355 }
 0x757   :  { %v1367_v40 = vadd.f32 1e-05, %v1363_v7  ;;  %v1364_v38 = vmul.f32 0.03125, %v1356_v46 }
 0x758   :  { %v1359_v49 = vpop.xlane.xlu1 %1358 }
 0x759   :  { %12785 = vrsqrt.f32 %v1367_v40  ;;  %v1368_v25 = vadd.f32 1e-05, %v1364_v38  ;;  %v1365_v19 = vmul.f32 0.03125, %v1359_v49 }
 0x75b   :  { %12787 = vrsqrt.f32 %v1368_v25  ;;  %v1369_v20 = vadd.f32 1e-05, %v1365_v19 }
 0x75c   :  { %v1362_v63 = vpop.xlane.xlu0 %1361 }
 0x75d   :  { %12789 = vrsqrt.f32 %v1369_v20  ;;  %v1366_v55 = vmul.f32 0.03125, %v1362_v63 }
 0x75f   :  { %v1370_v59 = vadd.f32 1e-05, %v1366_v55 }
 0x761   :  { %12791 = vrsqrt.f32 %v1370_v59 }
 0x763   :  { %v12786_v29 = vpop.eup %12785 }
 0x764   :  { %v1375_v5 = vmul.f32 %v12786_v29, %v13578_v27 }
 0x765   :  { %v12788_v30 = vpop.eup %12787 }
 0x766   :  { %v1376_v2 = vmul.f32 %v12788_v30, %v1344_v44  ;;  %v1383_v35 = vmul.f32 %v1382_v23, %v1375_v5 }
 0x767   :  { %v12790_v8 = vpop.eup %12789 }
 0x768   :  { %v1377_v9 = vmul.f32 %v12790_v8, %v13582_v26  ;;  %v1384_v10 = vmul.f32 %v1382_v23, %v1376_v2  ;;  %v13627_v11 = vadd.f32 %v1390_v36, %v1383_v35 }
 0x76a   :  { %v13629_v3 = vadd.f32 %v1390_v36, %v1384_v10  ;;  %v1385_v42 = vmul.f32 %v1382_v23, %v1377_v9 }
 0x76b   :  { %v12792_v41 = vpop.eup %12791 }
 0x76c   :  { %v1378_v48 = vmul.f32 %v12792_v41, %v1346_v21  ;;  %v1403_v27 = vpack.c.bf16 %v13629_v3, %v13627_v11  ;;  %v13634_v44 = vadd.f32 %v1390_v36, %v1385_v42 }
 0x76e   :  { %v1386_v28 = vmul.f32 %v1382_v23, %v1378_v48  ;;  %11778 = vmatprep.mubr.msk.bf16.mxu0 %vm90_vm0, %v1403_v27 }
 0x770   :  { %v13636_v47 = vadd.f32 %v1390_v36, %v1386_v28 }
 0x772   :  { %v1404_v26 = vpack.c.bf16 %v13636_v47, %v13634_v44 }
 0x774   :  { %11779 = vmatmul.mubr.msk.bf16.vlgmr.msra.gmra.mrb[36].mxu0 %vm90_vm0, %v1404_v26 }
 0x775   :  { %11792 = vmatprep.mubr.msk.bf16.mxu0 %vm13065_vm1, %v13063_v31 }
 0x785   :  { %v12209_v51 = vpop.permute.xlu1 %12208  ;;  %v12214_v52 = vpop.permute.xlu0 %12213 }
 0x786   :  { %v12211_v58 = vunpack.i.h.bf16 %v12209_v51  ;;  %v12210_v62 = vunpack.i.l.bf16 %v12209_v51  ;;  %v12216_v54 = vunpack.i.h.bf16 %v12214_v52  ;;  %v12215_v60 = vunpack.i.l.bf16 %v12214_v52 }
 0x788   :  { %v13643_v53 = vpack.c.bf16 %v12211_v58, %v12210_v62  ;;  %v13649_v0 = vpack.c.bf16 %v12216_v54, %v12215_v60 }
 0x789   :  { %v12229_v4 = vpop.permute.xlu0 %12228  ;;  %v12219_v57 = vpop.permute.xlu1 %12218 }
 0x78a   :  { %1672 = vrot.lane.b32.xlu1 %v13643_v53, %s13066_s16  ;;  %v12221_v37 = vunpack.i.h.bf16 %v12219_v57  ;;  %v12220_v40 = vunpack.i.l.bf16 %v12219_v57  ;;  %v12231_v30 = vunpack.i.h.bf16 %v12229_v4  ;;  %v12230_v2 = vunpack.i.l.bf16 %v12229_v4 }
 0x78c   :  { %v13671_v59 = vpack.c.bf16 %v12221_v37, %v12220_v40  ;;  %v13690_v8 = vpack.c.bf16 %v12231_v30, %v12230_v2  ;;  %v13743_v2 = vld [vmem:[%s16380_s2 + $0x8] sm:$0xff] }
 0x78d   :  { %v1623_v21 = vpop.permute.xlu0 %1622  ;;  %v12224_v1 = vpop.permute.xlu1 %12223 }
 0x78e   :  { %v1628_v34 = vsel %vm197_vm2, %v1623_v21, 0  ;;  %1722 = vrot.lane.b32.xlu1 %v13649_v0, %s13066_s16  ;;  %v12225_v23 = vunpack.i.l.bf16 %v12224_v1 }
 0x78f   :  { %11791 = vmatpush3.bf16.xpose.msra.mxu0 %v1628_v34 }
 0x790   :  { %11802 = vmatprep.subr.bf16.mxu0 %v13063_v31 }
 0x791   :  { %v12234_v32 = vpop.permute.xlu1 %12233 }
 0x792   :  { %v12236_v29 = vunpack.i.h.bf16 %v12234_v32  ;;  %v12235_v5 = vunpack.i.l.bf16 %v12234_v32 }
 0x794   :  { %v13684_v36 = vpack.c.bf16 %v12236_v29, %v12235_v5  ;;  %v13733_v29 = vld [vmem:[%s16380_s2] sm:$0xff] }
 0x7fc   :  { %v1673_v56 = vpop.permute.xlu1 %1672 }
 0x7fd   :  { %v1678_v24 = vsel %vm197_vm2, %v1673_v56, 0 }
 0x7fe   :  { %11797 = vmatpush3.bf16.xpose.msra.mxu1 %v1678_v24 }
 0x7ff   :  { %11808 = vmatprep.subr.bf16.mxu1 %v13063_v31 }
 0x800   :  { %v1723_v17 = vpop.permute.xlu1 %1722 }
 0x801   :  { %v1728_v25 = vsel %vm197_vm2, %v1723_v17, 0 }
 0x847   :  { %v11780_v45 = vpop.f32.mrb[36].mxu0 }
 0x848   :  { %v1461_v33 = vpop.f32.mrb[37].mxu0  ;;  %v13656_v6 = vadd.f32 %v11780_v45, %v13597_v39 }
 0x849   :  { %v11781_v18 = vpop.f32.mrb[38].mxu0  ;;  %v1462_v38 = vadd.f32 %v1461_v33, %v13597_v39 }
 0x84a   :  { %v13659_v7 = vadd.f32 %v11781_v18, %v13597_v39  ;;  %v1464_v46 = vpop.f32.mrb[39].mxu0 }
 0x84b   :  { %v1465_v49 = vadd.f32 %v1464_v46, %v13597_v39  ;;  %v12226_v39 = vunpack.i.h.bf16 %v12224_v1 }
 0x84c   :  { %v1609_v19 = vpack.c.bf16 %v13659_v7, %v13656_v6  ;;  %v12252_v20 = vpack.i.bf16 %v13659_v7, %v13656_v6 }
 0x84d   :  { %v1605_v63 = vpack.c.bf16 %v1465_v49, %v1462_v38  ;;  %v12237_v55 = vpack.i.bf16 %v1465_v49, %v1462_v38  ;;  %v13682_v35 = vpack.c.bf16 %v12226_v39, %v12225_v23 }
 0x84f   :  { %12238 = vrot.lane.b32.xlu0 %v12237_v55, %s13062_s30  ;;  %11793 = vmatmul.mubr.msk.bf16.vlgmr.msra.gmra.mrb[40].mxu0 %vm197_vm2, %v1605_v63 }
 0x850   :  { %12243 = vrot.lane.b32.xlu1 %v12237_v55, %s13064_s15  ;;  %11803 = vmatpush3.bf16.xpose.msra.mxu0 %v1728_v25 }
 0x851   :  { %11804 = vmatprep.mubr.msk.bf16.mxu0 %vm13065_vm1, %v13063_v31  ;;  %11814 = vmatprep.subr.bf16.mxu0 %v13063_v31 }
 0x853   :  { %1772 = vrot.lane.b32.xlu0 %v13671_v59, %s13066_s16 }
 0x854   :  { %1822 = vrot.lane.b32.xlu1 %v13613_v22, %s13066_s16 }
 0x857   :  { %12248 = vrot.lane.b32.xlu0 %v12237_v55, %s13061_s29 }
 0x858   :  { %12253 = vrot.lane.b32.xlu1 %v12252_v20, %s13062_s30 }
 0x85b   :  { %1872 = vrot.lane.b32.xlu0 %v13682_v35, %s13066_s16 }
 0x85c   :  { %1972 = vrot.lane.b32.xlu1 %v13684_v36, %s13066_s16 }
 0x85f   :  { %1922 = vrot.lane.b32.xlu0 %v13690_v8, %s13066_s16 }
 0x860   :  { %12263 = vrot.lane.b32.xlu1 %v12252_v20, %s13061_s29 }
 0x863   :  { %12258 = vrot.lane.b32.xlu0 %v12252_v20, %s13064_s15 }
 0x864   :  { %2237 = vrot.lane.b32.xlu1 %v13603_v50, %s13067_s17 }
 0x8c1   :  { %v12239_v9 = vpop.permute.xlu0 %12238 }
 0x8c2   :  { %v12241_v10 = vunpack.i.h.bf16 %v12239_v9  ;;  %v12240_v41 = vunpack.i.l.bf16 %v12239_v9  ;;  %v12244_v42 = vpop.permute.xlu1 %12243 }
 0x8c3   :  { %v12246_v48 = vunpack.i.h.bf16 %v12244_v42  ;;  %v12245_v27 = vunpack.i.l.bf16 %v12244_v42 }
 0x8c4   :  { %v1606_v28 = vpack.c.bf16 %v12241_v10, %v12240_v41 }
 0x8c5   :  { %v1607_v26 = vpack.c.bf16 %v12246_v48, %v12245_v27  ;;  %v1773_v51 = vpop.permute.xlu0 %1772 }
 0x8c6   :  { %v1778_v52 = vsel %vm197_vm2, %v1773_v51, 0  ;;  %v1823_v58 = vpop.permute.xlu1 %1822  ;;  %11799 = vmatmul.mubr.msk.bf16.vlgmr.msra.gmra.mrb[40].mxu1 %vm197_vm2, %v1606_v28 }
 0x8c7   :  { %v1828_v62 = vsel %vm197_vm2, %v1823_v58, 0  ;;  %11805 = vmatmul.mubr.msk.bf16.vlgmr.msra.gmra.mrb[44].mxu0 %vm197_vm2, %v1607_v26  ;;  %11809 = vmatpush3.bf16.xpose.msra.mxu1 %v1778_v52 }
 0x8c8   :  { %11815 = vmatpush3.bf16.xpose.msra.mxu0 %v1828_v62  ;;  %11810 = vmatprep.mubr.msk.bf16.mxu1 %vm13065_vm1, %v13063_v31 }
 0x8c9   :  { %v12249_v50 = vpop.permute.xlu0 %12248  ;;  %11816 = vmatprep.mubr.msk.bf16.mxu0 %vm13065_vm1, %v13063_v31  ;;  %11820 = vmatprep.subr.bf16.mxu1 %v13063_v31 }
 0x8ca   :  { %v12251_v4 = vunpack.i.h.bf16 %v12249_v50  ;;  %v12250_v21 = vunpack.i.l.bf16 %v12249_v50  ;;  %v12254_v34 = vpop.permute.xlu1 %12253  ;;  %11826 = vmatprep.subr.bf16.mxu0 %v13063_v31 }
 0x8cb   :  { %v12256_v32 = vunpack.i.h.bf16 %v12254_v34  ;;  %v12255_v56 = vunpack.i.l.bf16 %v12254_v34 }
 0x8cc   :  { %v1608_v54 = vpack.c.bf16 %v12251_v4, %v12250_v21 }
 0x8cd   :  { %v1873_v60 = vpop.permute.xlu0 %1872  ;;  %v1610_v33 = vpack.c.bf16 %v12256_v32, %v12255_v56 }
 0x8ce   :  { %v1878_v57 = vsel %vm197_vm2, %v1873_v60, 0  ;;  %v1973_v1 = vpop.permute.xlu1 %1972  ;;  %11811 = vmatmul.mubr.msk.bf16.vlgmr.msra.gmra.mrb[44].mxu1 %vm197_vm2, %v1608_v54 }
 0x8cf   :  { %11817 = vmatmul.mubr.msk.bf16.vlgmr.msra.gmra.mrb[48].mxu0 %vm197_vm2, %v1609_v19  ;;  %11821 = vmatpush3.bf16.xpose.msra.mxu1 %v1878_v57  ;;  %v1978_v37 = vsel %vm197_vm2, %v1973_v1, 0 }
 0x8d0   :  { %11822 = vmatprep.mubr.msk.bf16.mxu1 %vm13065_vm1, %v13063_v31  ;;  %11832 = vmatprep.subr.bf16.mxu1 %v13063_v31 }
 0x8d1   :  { %v1923_v24 = vpop.permute.xlu0 %1922  ;;  %11828 = vmatprep.mubr.msk.bf16.mxu0 %vm13065_vm1, %v13063_v31 }
 0x8d2   :  { %v1928_v45 = vsel %vm197_vm2, %v1923_v24, 0  ;;  %v12264_v17 = vpop.permute.xlu1 %12263 }
 0x8d3   :  { %11827 = vmatpush3.bf16.xpose.msra.mxu0 %v1928_v45  ;;  %v12266_v46 = vunpack.i.h.bf16 %v12264_v17  ;;  %v12265_v40 = vunpack.i.l.bf16 %v12264_v17 }
 0x8d4   :  { %11838 = vmatprep.subr.bf16.mxu0 %v13063_v31 }
 0x8d5   :  { %v12259_v18 = vpop.permute.xlu0 %12258  ;;  %v1612_v25 = vpack.c.bf16 %v12266_v46, %v12265_v40 }
 0x8d6   :  { %v12261_v6 = vunpack.i.h.bf16 %v12259_v18  ;;  %v12260_v7 = vunpack.i.l.bf16 %v12259_v18  ;;  %11823 = vmatmul.mubr.msk.bf16.vlgmr.msra.gmra.mrb[48].mxu1 %vm197_vm2, %v1610_v33  ;;  %v2238_v49 = vpop.permute.xlu1 %2237 }
 0x8d7   :  { %11833 = vmatpush3.bf16.xpose.msra.mxu1 %v1978_v37  ;;  %11834 = vmatprep.mubr.msk.bf16.mxu1 %vm13065_vm1, %v13063_v31 }
 0x8d8   :  { %v1611_v38 = vpack.c.bf16 %v12261_v6, %v12260_v7  ;;  %11844 = vmatprep.subr.bf16.mxu1 %v13063_v31 }
 0x8da   :  { %11829 = vmatmul.mubr.msk.bf16.vlgmr.msra.gmra.mrb[52].mxu0 %vm197_vm2, %v1611_v38 }
 0x8db   :  { %11839 = vmatpush3.bf16.msra.mxu0 %v2238_v49  ;;  %11840 = vmatprep.mubr.msk.bf16.mxu0 %vm13065_vm1, %v13063_v31 }
 0x8dc   :  { %11850 = vmatprep.subr.bf16.mxu0 %v13063_v31 }
 0x8de   :  { %11835 = vmatmul.mubr.msk.bf16.vlgmr.msra.gmra.mrb[52].mxu1 %vm197_vm2, %v1612_v25 }
 0x8df   :  { %11846 = vmatprep.mubr.msk.bf16.mxu1 %vm13065_vm1, %v13063_v31 }
 0x922   :  { %v1664_v19 = vpop.f32.mrb[40].mxu0 }
 0x923   :  { %v2021_v20 = vmul.f32 0.35355338, %v1664_v19  ;;  %v11794_v63 = vpop.f32.mrb[41].mxu0 }
 0x924   :  { %v1667_v55 = vpop.f32.mrb[42].mxu0 }
 0x925   :  { %v2022_v39 = vmul.f32 0.35355338, %v1667_v55  ;;  %v11795_v23 = vpop.f32.mrb[43].mxu0  ;;  %v13736_v5 = vadd.f32 %v13733_v29, %v2021_v20 }
 0x927   :  { %v2053_v30 = vsel %vm627_vm3, %v13736_v5, -inf  ;;  %v13746_v9 = vadd.f32 %v13743_v2, %v2022_v39 }
 0x928   :  { %2054 = vmax.xlane.f32.xlu0 %v2053_v30 }
 0x929   :  { %v2056_v10 = vsel %vm627_vm3, %v13746_v9, -inf }
 0x92a   :  { %2057 = vmax.xlane.f32.xlu1 %v2056_v10 }
 0x999   :  { %v1714_v41 = vpop.f32.mrb[40].mxu1 }
 0x99a   :  { %v2023_v42 = vmul.f32 0.35355338, %v1714_v41  ;;  %v1764_v48 = vpop.f32.mrb[44].mxu0  ;;  %v11800_v27 = vpop.f32.mrb[41].mxu1 }
 0x99b   :  { %v2025_v28 = vmul.f32 0.35355338, %v1764_v48  ;;  %v11806_v26 = vpop.f32.mrb[45].mxu0  ;;  %v1717_v51 = vpop.f32.mrb[42].mxu1 }
 0x99c   :  { %v2024_v52 = vmul.f32 0.35355338, %v1717_v51  ;;  %v1767_v58 = vpop.f32.mrb[46].mxu0  ;;  %v11801_v62 = vpop.f32.mrb[43].mxu1  ;;  %v13751_v50 = vadd.f32 %v13733_v29, %v2023_v42 }
 0x99d   :  { %v2026_v4 = vmul.f32 0.35355338, %v1767_v58  ;;  %v11807_v21 = vpop.f32.mrb[47].mxu0  ;;  %v13754_v34 = vadd.f32 %v13733_v29, %v2025_v28 }
 0x99e   :  { %v2059_v54 = vsel %vm627_vm3, %v13751_v50, -inf  ;;  %v13759_v60 = vadd.f32 %v13743_v2, %v2024_v52 }
 0x99f   :  { %2060 = vmax.xlane.f32.xlu0 %v2059_v54  ;;  %v2065_v57 = vsel %vm627_vm3, %v13754_v34, -inf  ;;  %v13764_v32 = vadd.f32 %v13743_v2, %v2026_v4 }
 0x9a0   :  { %2066 = vmax.xlane.f32.xlu1 %v2065_v57  ;;  %v2062_v33 = vsel %vm627_vm3, %v13759_v60, -inf }
 0x9a1   :  { %v1814_v1 = vpop.f32.mrb[44].mxu1  ;;  %v2068_v49 = vsel %vm627_vm3, %v13764_v32, -inf }
 0x9a2   :  { %v2027_v56 = vmul.f32 0.35355338, %v1814_v1  ;;  %v1864_v24 = vpop.f32.mrb[48].mxu0  ;;  %v11812_v45 = vpop.f32.mrb[45].mxu1 }
 0x9a3   :  { %v2029_v17 = vmul.f32 0.35355338, %v1864_v24  ;;  %v11818_v18 = vpop.f32.mrb[49].mxu0  ;;  %v1817_v37 = vpop.f32.mrb[46].mxu1  ;;  %2063 = vmax.xlane.f32.xlu0 %v2062_v33 }
 0x9a4   :  { %v2028_v6 = vmul.f32 0.35355338, %v1817_v37  ;;  %v1867_v7 = vpop.f32.mrb[50].mxu0  ;;  %v11813_v46 = vpop.f32.mrb[47].mxu1  ;;  %v13769_v40 = vadd.f32 %v13733_v29, %v2027_v56 }
 0x9a5   :  { %v11819_v38 = vpop.f32.mrb[51].mxu0  ;;  %v2030_v25 = vmul.f32 0.35355338, %v1867_v7  ;;  %v13779_v63 = vadd.f32 %v13733_v29, %v2029_v17 }
 0x9a6   :  { %v2071_v19 = vsel %vm627_vm3, %v13769_v40, -inf  ;;  %v13776_v20 = vadd.f32 %v13743_v2, %v2028_v6 }
 0x9a7   :  { %2072 = vmax.xlane.f32.xlu1 %v2071_v19  ;;  %2069 = vmax.xlane.f32.xlu0 %v2068_v49  ;;  %v13782_v39 = vadd.f32 %v13743_v2, %v2030_v25  ;;  %v2077_v41 = vsel %vm627_vm3, %v13779_v63, -inf }
 0x9a8   :  { %v2074_v10 = vsel %vm627_vm3, %v13776_v20, -inf }
 0x9a9   :  { %v1914_v55 = vpop.f32.mrb[48].mxu1  ;;  %v2080_v4 = vsel %vm627_vm3, %v13782_v39, -inf }
 0x9aa   :  { %v2031_v23 = vmul.f32 0.35355338, %v1914_v55  ;;  %v11824_v30 = vpop.f32.mrb[49].mxu1 }
 0x9ab   :  { %v1917_v42 = vpop.f32.mrb[50].mxu1  ;;  %2075 = vmax.xlane.f32.xlu0 %v2074_v10  ;;  %2078 = vmax.xlane.f32.xlu1 %v2077_v41 }
 0x9ac   :  { %v13789_v48 = vadd.f32 %v13733_v29, %v2031_v23  ;;  %v2032_v27 = vmul.f32 0.35355338, %v1917_v42  ;;  %v11825_v28 = vpop.f32.mrb[51].mxu1 }
 0x9ad   :  { %v1964_v26 = vpop.f32.mrb[52].mxu0 }
 0x9ae   :  { %v13792_v51 = vadd.f32 %v13743_v2, %v2032_v27  ;;  %v2033_v52 = vmul.f32 0.35355338, %v1964_v26  ;;  %v11830_v58 = vpop.f32.mrb[53].mxu0  ;;  %v2083_v62 = vsel %vm627_vm3, %v13789_v48, -inf }
 0x9af   :  { %2084 = vmax.xlane.f32.xlu1 %v2083_v62  ;;  %2081 = vmax.xlane.f32.xlu0 %v2080_v4  ;;  %v1967_v21 = vpop.f32.mrb[54].mxu0 }
 0x9b0   :  { %v13799_v54 = vadd.f32 %v13733_v29, %v2033_v52  ;;  %v2034_v57 = vmul.f32 0.35355338, %v1967_v21  ;;  %v11831_v1 = vpop.f32.mrb[55].mxu0  ;;  %v2086_v17 = vsel %vm627_vm3, %v13792_v51, -inf }
 0x9b1   :  { %v2014_v56 = vpop.f32.mrb[52].mxu1 }
 0x9b2   :  { %v13802_v24 = vadd.f32 %v13743_v2, %v2034_v57  ;;  %v2035_v45 = vmul.f32 0.35355338, %v2014_v56  ;;  %v11836_v33 = vpop.f32.mrb[53].mxu1  ;;  %v2089_v18 = vsel %vm627_vm3, %v13799_v54, -inf }
 0x9b3   :  { %v2017_v37 = vpop.f32.mrb[54].mxu1  ;;  %2087 = vmax.xlane.f32.xlu0 %v2086_v17  ;;  %2090 = vmax.xlane.f32.xlu1 %v2089_v18 }
 0x9b4   :  { %v13809_v6 = vadd.f32 %v13733_v29, %v2035_v45  ;;  %v2036_v7 = vmul.f32 0.35355338, %v2017_v37  ;;  %v11837_v46 = vpop.f32.mrb[55].mxu1  ;;  %v2092_v25 = vsel %vm627_vm3, %v13802_v24, -inf }
 0x9b5   :  { %v2055_v29 = vpop.xlane.xlu0 %2054 }
 0x9b6   :  { %v13812_v38 = vadd.f32 %v13743_v2, %v2036_v7  ;;  %v2095_v49 = vsel %vm627_vm3, %v13809_v6, -inf  ;;  %v2101_v55 = vsub.f32 %v13736_v5, %v2055_v29 }
 0x9b7   :  { %2096 = vmax.xlane.f32.xlu1 %v2095_v49  ;;  %2093 = vmax.xlane.f32.xlu0 %v2092_v25  ;;  %v2058_v2 = vpop.xlane.xlu1 %2057 }
 0x9b8   :  { %v2098_v19 = vsel %vm627_vm3, %v13812_v38, -inf  ;;  %v2102_v23 = vsub.f32 %v13746_v9, %v2058_v2  ;;  %v2117_v30 = vmul.f32 1.442695, %v2101_v55 }
 0x9ba   :  { %12793 = vpow2.f32 %v2117_v30 }
 0x9bb   :  { %2099 = vmax.xlane.f32.xlu0 %v2098_v19 }
 0x9c8   :  { %2331 = vrot.lane.b32.xlu1 %v13649_v0, %s13067_s17  ;;  %v2119_v0 = vmul.f32 1.442695, %v2102_v23 }
 0x9ca   :  { %12795 = vpow2.f32 %v2119_v0 }
 0x9cc   :  { %2378 = vrot.lane.b32.xlu1 %v13671_v59, %s13067_s17  ;;  %v13832_v59 = vpop.eup %12793 }
 0x9d0   :  { %2472 = vrot.lane.b32.xlu1 %v13682_v35, %s13067_s17 }
 0x9d1   :  { %2284 = vrot.lane.b32.xlu0 %v13643_v53, %s13067_s17  ;;  %v2149_v53 = vsel %vm627_vm3, %v13832_v59, 0.0 }
 0x9d4   :  { %v13834_v10 = vpop.eup %12795 }
 0x9d5   :  { %2425 = vrot.lane.b32.xlu0 %v13613_v22, %s13067_s17  ;;  %v2152_v22 = vsel %vm627_vm3, %v13834_v10, 0.0 }
 0x9f4   :  { %2150 = vadd.xlane.f32.xlu1 %v2149_v53  ;;  %2153 = vadd.xlane.f32.xlu0 %v2152_v22 }
 0xa2c   :  { %v2061_v35 = vpop.xlane.xlu0 %2060 }
 0xa2d   :  { %v2103_v5 = vsub.f32 %v13751_v50, %v2061_v35  ;;  %v2067_v9 = vpop.xlane.xlu1 %2066 }
 0xa2e   :  { %v2105_v41 = vsub.f32 %v13754_v34, %v2067_v9 }
 0xa2f   :  { %v2121_v42 = vmul.f32 1.442695, %v2103_v5 }
 0xa30   :  { %v2125_v27 = vmul.f32 1.442695, %v2105_v41  ;;  %v2064_v28 = vpop.xlane.xlu0 %2063 }
 0xa31   :  { %12797 = vpow2.f32 %v2121_v42  ;;  %v2104_v26 = vsub.f32 %v13759_v60, %v2064_v28 }
 0xa32   :  { %12799 = vpow2.f32 %v2125_v27 }
 0xa33   :  { %v2123_v52 = vmul.f32 1.442695, %v2104_v26 }
 0xa34   :  { %v2073_v58 = vpop.xlane.xlu1 %2072  ;;  %v2070_v62 = vpop.xlane.xlu0 %2069 }
 0xa35   :  { %12801 = vpow2.f32 %v2123_v52  ;;  %v2107_v4 = vsub.f32 %v13769_v40, %v2073_v58  ;;  %v2106_v21 = vsub.f32 %v13764_v32, %v2070_v62 }
 0xa37   :  { %v2129_v57 = vmul.f32 1.442695, %v2107_v4  ;;  %v2127_v50 = vmul.f32 1.442695, %v2106_v21 }
 0xa38   :  { %v2076_v1 = vpop.xlane.xlu0 %2075  ;;  %v2079_v56 = vpop.xlane.xlu1 %2078 }
 0xa39   :  { %12803 = vpow2.f32 %v2129_v57  ;;  %v2108_v34 = vsub.f32 %v13776_v20, %v2076_v1  ;;  %v2109_v45 = vsub.f32 %v13779_v63, %v2079_v56 }
 0xa3a   :  { %12805 = vpow2.f32 %v2127_v50 }
 0xa3b   :  { %v13847_v60 = vpop.eup %12797  ;;  %v2131_v33 = vmul.f32 1.442695, %v2108_v34  ;;  %v2133_v17 = vmul.f32 1.442695, %v2109_v45 }
 0xa3c   :  { %v2085_v18 = vpop.xlane.xlu1 %2084  ;;  %v2082_v37 = vpop.xlane.xlu0 %2081  ;;  %v2155_v40 = vsel %vm627_vm3, %v13847_v60, 0.0 }
 0xa3d   :  { %v13851_v32 = vpop.eup %12799  ;;  %12807 = vpow2.f32 %v2131_v33  ;;  %v2111_v7 = vsub.f32 %v13789_v48, %v2085_v18  ;;  %v2110_v46 = vsub.f32 %v13782_v39, %v2082_v37  ;;  %2156 = vadd.xlane.f32.xlu1 %v2155_v40 }
 0xa3e   :  { %12809 = vpow2.f32 %v2133_v17  ;;  %v2161_v29 = vsel %vm627_vm3, %v13851_v32, 0.0 }
 0xa3f   :  { %v13855_v20 = vpop.eup %12801  ;;  %v2137_v63 = vmul.f32 1.442695, %v2111_v7  ;;  %v2135_v49 = vmul.f32 1.442695, %v2110_v46 }
 0xa40   :  { %v2088_v25 = vpop.xlane.xlu0 %2087  ;;  %v2091_v19 = vpop.xlane.xlu1 %2090  ;;  %v2158_v2 = vsel %vm627_vm3, %v13855_v20, 0.0 }
 0xa41   :  { %12811 = vpow2.f32 %v2137_v63  ;;  %v2112_v55 = vsub.f32 %v13792_v51, %v2088_v25  ;;  %v2113_v48 = vsub.f32 %v13799_v54, %v2091_v19  ;;  %2162 = vadd.xlane.f32.xlu1 %v2161_v29  ;;  %2159 = vadd.xlane.f32.xlu0 %v2158_v2 }
 0xa42   :  { %12813 = vpow2.f32 %v2135_v49 }
 0xa43   :  { %v13863_v39 = vpop.eup %12803  ;;  %v2139_v23 = vmul.f32 1.442695, %v2112_v55  ;;  %v2141_v30 = vmul.f32 1.442695, %v2113_v48 }
 0xa44   :  { %v13865_v0 = vpop.eup %12805  ;;  %v2097_v53 = vpop.xlane.xlu1 %2096  ;;  %v2167_v35 = vsel %vm627_vm3, %v13863_v39, 0.0 }
 0xa45   :  { %v2094_v22 = vpop.xlane.xlu0 %2093  ;;  %12815 = vpow2.f32 %v2139_v23  ;;  %v2115_v5 = vsub.f32 %v13809_v6, %v2097_v53  ;;  %2168 = vadd.xlane.f32.xlu1 %v2167_v35  ;;  %v2164_v54 = vsel %vm627_vm3, %v13865_v0, 0.0 }
 0xa46   :  { %v2114_v51 = vsub.f32 %v13802_v24, %v2094_v22  ;;  %12817 = vpow2.f32 %v2141_v30  ;;  %2165 = vadd.xlane.f32.xlu0 %v2164_v54 }
 0xa47   :  { %v13873_v9 = vpop.eup %12807  ;;  %v2145_v41 = vmul.f32 1.442695, %v2115_v5 }
 0xa48   :  { %v2143_v42 = vmul.f32 1.442695, %v2114_v51  ;;  %v13875_v27 = vpop.eup %12809  ;;  %v2170_v26 = vsel %vm627_vm3, %v13873_v9, 0.0  ;;  %v2332_v40 = vpop.permute.xlu1 %2331 }
 0xa49   :  { %v2100_v28 = vpop.xlane.xlu0 %2099  ;;  %12819 = vpow2.f32 %v2145_v41  ;;  %v2173_v24 = vsel %vm627_vm3, %v13875_v27, 0.0 }
 0xa4a   :  { %v2116_v6 = vsub.f32 %v13812_v38, %v2100_v28  ;;  %12821 = vpow2.f32 %v2143_v42  ;;  %2174 = vadd.xlane.f32.xlu1 %v2173_v24  ;;  %2171 = vadd.xlane.f32.xlu0 %v2170_v26 }
 0xa4b   :  { %v13882_v52 = vpop.eup %12811 }
 0xa4c   :  { %v2147_v58 = vmul.f32 1.442695, %v2116_v6  ;;  %v13884_v62 = vpop.eup %12813  ;;  %v2179_v21 = vsel %vm627_vm3, %v13882_v52, 0.0  ;;  %v2379_v7 = vpop.permute.xlu1 %2378 }
 0xa4d   :  { %v2285_v4 = vpop.permute.xlu0 %2284  ;;  %v2176_v57 = vsel %vm627_vm3, %v13884_v62, 0.0 }
 0xa4e   :  { %12823 = vpow2.f32 %v2147_v58  ;;  %11845 = vmatpush3.bf16.msra.mxu1 %v2285_v4  ;;  %2180 = vadd.xlane.f32.xlu1 %v2179_v21 }
 0xa4f   :  { %2177 = vadd.xlane.f32.xlu0 %v2176_v57  ;;  %v13890_v38 = vpop.eup %12815  ;;  %11856 = vmatprep.subr.bf16.mxu1 %v13063_v31 }
 0xa50   :  { %v13893_v50 = vpop.eup %12817  ;;  %v2182_v1 = vsel %vm627_vm3, %v13890_v38, 0.0  ;;  %v13915_v46 = vpop.permute.xlu1 %2472 }
 0xa51   :  { %v2185_v56 = vsel %vm627_vm3, %v13893_v50, 0.0  ;;  %v2426_v63 = vpop.permute.xlu0 %2425 }
 0xa52   :  { %2186 = vadd.xlane.f32.xlu1 %v2185_v56 }
 0xa53   :  { %2183 = vadd.xlane.f32.xlu0 %v2182_v1  ;;  %v13899_v34 = vpop.eup %12819 }
 0xa54   :  { %v13901_v45 = vpop.eup %12821  ;;  %v2191_v33 = vsel %vm627_vm3, %v13899_v34, 0.0 }
 0xa55   :  { %v2188_v17 = vsel %vm627_vm3, %v13901_v45, 0.0 }
 0xa56   :  { %2192 = vadd.xlane.f32.xlu1 %v2191_v33 }
 0xa57   :  { %2189 = vadd.xlane.f32.xlu0 %v2188_v17 }
 0xa58   :  { %v13907_v18 = vpop.eup %12823 }
 0xa59   :  { %v2194_v37 = vsel %vm627_vm3, %v13907_v18, 0.0 }
 0xa5b   :  { %2195 = vadd.xlane.f32.xlu0 %v2194_v37 }
 0xa67   :  { %2566 = vrot.lane.b32.xlu1 %v13684_v36, %s13067_s17 }
 0xa71   :  { %2519 = vrot.lane.b32.xlu0 %v13690_v8, %s13067_s17 }
 0xa81   :  { %v2151_v49 = vpop.xlane.xlu1 %2150  ;;  %v2154_v25 = vpop.xlane.xlu0 %2153 }
 0xa82   :  { %12825 = vrcp.f32 %v2151_v49 }
 0xa83   :  { %12827 = vrcp.f32 %v2154_v25 }
 0xa8c   :  { %v12826_v19 = vpop.eup %12825 }
 0xa8d   :  { %v12828_v29 = vpop.eup %12827  ;;  %v2198_v2 = vmul.f32 %v12826_v19, %v13832_v59 }
 0xa8e   :  { %v2200_v55 = vmul.f32 %v12828_v29, %v13834_v10 }
 0xa90   :  { %v2229_v48 = vpack.c.bf16 %v2200_v55, %v2198_v2 }
 0xa92   :  { %11841 = vmatmul.mubr.msk.bf16.vlgmr.msra.gmra.mrb[56].mxu0 %vm627_vm3, %v2229_v48 }
 0xa93   :  { %11851 = vmatpush3.bf16.msra.mxu0 %v2332_v40  ;;  %11852 = vmatprep.mubr.msk.bf16.mxu0 %vm13065_vm1, %v13063_v31 }
 0xa94   :  { %11862 = vmatprep.subr.bf16.mxu0 %v13063_v31 }
 0xaca   :  { %v2157_v36 = vpop.xlane.xlu1 %2156 }
 0xacb   :  { %12829 = vrcp.f32 %v2157_v36 }
 0xace   :  { %v2163_v8 = vpop.xlane.xlu1 %2162  ;;  %v2160_v23 = vpop.xlane.xlu0 %2159 }
 0xacf   :  { %12831 = vrcp.f32 %v2160_v23 }
 0xad0   :  { %12833 = vrcp.f32 %v2163_v8 }
 0xad2   :  { %v2169_v30 = vpop.xlane.xlu1 %2168 }
 0xad3   :  { %v2166_v53 = vpop.xlane.xlu0 %2165 }
 0xad4   :  { %12835 = vrcp.f32 %v2166_v53 }
 0xad5   :  { %12837 = vrcp.f32 %v2169_v30  ;;  %v12830_v22 = vpop.eup %12829 }
 0xad6   :  { %v2202_v5 = vmul.f32 %v12830_v22, %v13847_v60 }
 0xad7   :  { %v2175_v59 = vpop.xlane.xlu1 %2174  ;;  %v2172_v10 = vpop.xlane.xlu0 %2171 }
 0xad8   :  { %12839 = vrcp.f32 %v2172_v10 }
 0xad9   :  { %v12832_v35 = vpop.eup %12831  ;;  %12841 = vrcp.f32 %v2175_v59 }
 0xada   :  { %v2204_v51 = vmul.f32 %v12832_v35, %v13855_v20  ;;  %v12834_v42 = vpop.eup %12833 }
 0xadb   :  { %v2181_v54 = vpop.xlane.xlu1 %2180  ;;  %v2206_v6 = vmul.f32 %v12834_v42, %v13851_v32 }
 0xadc   :  { %v2178_v41 = vpop.xlane.xlu0 %2177  ;;  %v2230_v28 = vpack.c.bf16 %v2204_v51, %v2202_v5 }
 0xadd   :  { %12843 = vrcp.f32 %v2178_v41 }
 0xade   :  { %v12836_v26 = vpop.eup %12835  ;;  %12845 = vrcp.f32 %v2181_v54  ;;  %11847 = vmatmul.mubr.msk.bf16.vlgmr.msra.gmra.mrb[56].mxu1 %vm627_vm3, %v2230_v28 }
 0xadf   :  { %v2208_v24 = vmul.f32 %v12836_v26, %v13865_v0  ;;  %v2187_v58 = vpop.xlane.xlu1 %2186  ;;  %11857 = vmatpush3.bf16.msra.mxu1 %v2379_v7  ;;  %11858 = vmatprep.mubr.msk.bf16.mxu1 %vm13065_vm1, %v13063_v31  ;;  %v12838_v60 = vpop.eup %12837 }
 0xae0   :  { %v2184_v4 = vpop.xlane.xlu0 %2183  ;;  %11868 = vmatprep.subr.bf16.mxu1 %v13063_v31  ;;  %v2210_v0 = vmul.f32 %v12838_v60, %v13863_v39 }
 0xae1   :  { %12847 = vrcp.f32 %v2184_v4  ;;  %v2231_v20 = vpack.c.bf16 %v2208_v24, %v2206_v6  ;;  %v12453_v4 = vld [vmem:[%s16384_s6] sm:$0xff]  }
 0xae2   :  { %v12840_v21 = vpop.eup %12839  ;;  %12849 = vrcp.f32 %v2187_v58 }
 0xae3   :  { %v2193_v57 = vpop.xlane.xlu1 %2192  ;;  %11853 = vmatmul.mubr.msk.bf16.vlgmr.msra.gmra.mrb[60].mxu0 %vm627_vm3, %v2231_v20  ;;  %v2212_v1 = vmul.f32 %v12840_v21, %v13873_v9  ;;  %v12842_v56 = vpop.eup %12841 }
 0xae4   :  { %v2190_v32 = vpop.xlane.xlu0 %2189  ;;  %11863 = vmatpush3.bf16.msra.mxu0 %v2426_v63  ;;  %11864 = vmatprep.mubr.msk.bf16.mxu0 %vm13065_vm1, %v13063_v31  ;;  %v2214_v40 = vmul.f32 %v12842_v56, %v13875_v27 }
 0xae5   :  { %12851 = vrcp.f32 %v2190_v32  ;;  %11874 = vmatprep.subr.bf16.mxu0 %v13063_v31  ;;  %v2232_v33 = vpack.c.bf16 %v2212_v1, %v2210_v0  ;;  %v12454_v32 = vld [vmem:[%s16384_s6 + $0x8] sm:$0xff]  }
 0xae6   :  { %12853 = vrcp.f32 %v2193_v57 }
 0xae7   :  { %v12844_v17 = vpop.eup %12843  ;;  %11859 = vmatmul.mubr.msk.bf16.vlgmr.msra.gmra.mrb[60].mxu1 %vm627_vm3, %v2232_v33  ;;  %v2567_v48 = vpop.permute.xlu1 %2566 }
 0xae8   :  { %v2196_v37 = vpop.xlane.xlu0 %2195  ;;  %v2216_v7 = vmul.f32 %v12844_v17, %v13884_v62  ;;  %v12846_v39 = vpop.eup %12845  ;;  %11869 = vmatpush3.bf16.msra.mxu1 %v13915_v46  ;;  %11870 = vmatprep.mubr.msk.bf16.mxu1 %vm13065_vm1, %v13063_v31 }
 0xae9   :  { %12855 = vrcp.f32 %v2196_v37  ;;  %11880 = vmatprep.subr.bf16.mxu1 %v13063_v31  ;;  %v2218_v25 = vmul.f32 %v12846_v39, %v13882_v52 }
 0xaea   :  { %v2233_v9 = vpack.c.bf16 %v2216_v7, %v2214_v40 }
 0xaeb   :  { %v12848_v63 = vpop.eup %12847 }
 0xaec   :  { %v2520_v49 = vpop.permute.xlu0 %2519  ;;  %v2220_v27 = vmul.f32 %v12848_v63, %v13890_v38  ;;  %11865 = vmatmul.mubr.msk.bf16.vlgmr.msra.gmra.mrb[64].mxu0 %vm627_vm3, %v2233_v9  ;;  %v12850_v62 = vpop.eup %12849 }
 0xaed   :  { %11875 = vmatpush3.bf16.msra.mxu0 %v2520_v49  ;;  %11876 = vmatprep.mubr.msk.bf16.mxu0 %vm13065_vm1, %v13063_v31  ;;  %v2222_v2 = vmul.f32 %v12850_v62, %v13893_v50 }
 0xaee   :  { %v2234_v46 = vpack.c.bf16 %v2220_v27, %v2218_v25  ;;  %11886 = vmatprep.subr.bf16.mxu0 %v12453_v4 }
 0xaef   :  { %v12852_v19 = vpop.eup %12851 }
 0xaf0   :  { %v12854_v29 = vpop.eup %12853  ;;  %v2224_v55 = vmul.f32 %v12852_v19, %v13901_v45  ;;  %11871 = vmatmul.mubr.msk.bf16.vlgmr.msra.gmra.mrb[64].mxu1 %vm627_vm3, %v2234_v46 }
 0xaf1   :  { %11881 = vmatpush3.bf16.msra.mxu1 %v2567_v48  ;;  %11882 = vmatprep.mubr.msk.bf16.mxu1 %vm13065_vm1, %v13063_v31  ;;  %v2226_v36 = vmul.f32 %v12854_v29, %v13899_v34 }
 0xaf2   :  { %v2235_v38 = vpack.c.bf16 %v2224_v55, %v2222_v2 }
 0xaf3   :  { %v12856_v52 = vpop.eup %12855 }
 0xaf4   :  { %v2228_v8 = vmul.f32 %v12856_v52, %v13907_v18  ;;  %11877 = vmatmul.mubr.msk.bf16.vlgmr.msra.gmra.mrb[68].mxu0 %vm627_vm3, %v2235_v38 }
 0xaf5   :  { %11887 = vmatpush3.bf16.msra.mxu0 %v12453_v4 }
 0xaf6   :  { %v2236_v23 = vpack.c.bf16 %v2228_v8, %v2226_v36  ;;  %11888 = vmatprep.subr.bf16.mxu0 %v12454_v32 }
 0xaf8   :  { %11883 = vmatmul.mubr.msk.bf16.vlgmr.msra.gmra.mrb[68].mxu1 %vm627_vm3, %v2236_v23 }
 0xaf9   :  { %11889 = vmatpush3.bf16.msra.mxu0 %v12454_v32 }
 0xb65   :  { %v2277_v50 = vpop.f32.mrb[56].mxu0 }
 0xb66   :  { %v11842_v45 = vpop.f32.mrb[57].mxu0 }
 0xb67   :  { %v2280_v30 = vpop.f32.mrb[58].mxu0 }
 0xb68   :  { %v11843_v53 = vpop.f32.mrb[59].mxu0 }
 0xbb1   :  { %v2324_v59 = vpop.f32.mrb[56].mxu1 }
 0xbb2   :  { %v11848_v10 = vpop.f32.mrb[57].mxu1 }
 0xbb3   :  { %v2327_v22 = vpop.f32.mrb[58].mxu1 }
 0xbb4   :  { %v12267_v35 = vpack.i.bf16 %v2327_v22, %v2324_v59  ;;  %v11849_v5 = vpop.f32.mrb[59].mxu1 }
 0xbb6   :  { %v2371_v51 = vpop.f32.mrb[60].mxu0  ;;  %12268 = vrot.lane.b32.xlu0 %v12267_v35, %s13068_s22 }
 0xbb7   :  { %v11854_v34 = vpop.f32.mrb[61].mxu0 }
 0xbb8   :  { %v2374_v54 = vpop.f32.mrb[62].mxu0 }
 0xbb9   :  { %v12272_v18 = vpack.i.bf16 %v2374_v54, %v2371_v51  ;;  %v11855_v41 = vpop.f32.mrb[63].mxu0 }
 0xbba   :  { %v2418_v42 = vpop.f32.mrb[60].mxu1 }
 0xbbb   :  { %12273 = vrot.lane.b32.xlu1 %v12272_v18, %s13069_s23  ;;  %v11860_v28 = vpop.f32.mrb[61].mxu1 }
 0xbbc   :  { %v2421_v26 = vpop.f32.mrb[62].mxu1 }
 0xbbd   :  { %v12277_v6 = vpack.i.bf16 %v2421_v26, %v2418_v42  ;;  %v11861_v24 = vpop.f32.mrb[63].mxu1 }
 0xbbf   :  { %v2465_v58 = vpop.f32.mrb[64].mxu0  ;;  %12278 = vrot.lane.b32.xlu1 %v12277_v6, %s13070_s26 }
 0xbc0   :  { %v11866_v60 = vpop.f32.mrb[65].mxu0 }
 0xbc1   :  { %v2468_v20 = vpop.f32.mrb[66].mxu0  ;;  %v13987_v60 = vld [vmem:[%s16388_s10] sm:$0xff] }
 0xbc2   :  { %v11867_v21 = vpop.f32.mrb[67].mxu0 }
 0xbc3   :  { %v2512_v57 = vpop.f32.mrb[64].mxu1 }
 0xbc4   :  { %v11872_v0 = vpop.f32.mrb[65].mxu1 }
 0xbc5   :  { %v2515_v1 = vpop.f32.mrb[66].mxu1 }
 0xbc6   :  { %v12282_v56 = vpack.i.bf16 %v2515_v1, %v2512_v57  ;;  %v11873_v33 = vpop.f32.mrb[67].mxu1 }
 0xbc7   :  { %v2559_v17 = vpop.f32.mrb[68].mxu0 }
 0xbc8   :  { %12283 = vrot.lane.b32.xlu0 %v12282_v56, %s13068_s22  ;;  %v11878_v37 = vpop.f32.mrb[69].mxu0 }
 0xbc9   :  { %v2562_v40 = vpop.f32.mrb[70].mxu0 }
 0xbca   :  { %v12287_v7 = vpack.i.bf16 %v2562_v40, %v2559_v17  ;;  %v11879_v39 = vpop.f32.mrb[71].mxu0 }
 0xbcb   :  { %v2606_v9 = vpop.f32.mrb[68].mxu1 }
 0xbcc   :  { %v11884_v63 = vpop.f32.mrb[69].mxu1  ;;  %12288 = vrot.lane.b32.xlu0 %v12287_v7, %s13069_s23 }
 0xbcd   :  { %v2609_v49 = vpop.f32.mrb[70].mxu1 }
 0xbce   :  { %v12292_v25 = vpack.i.bf16 %v2609_v49, %v2606_v9  ;;  %v11885_v27 = vpop.f32.mrb[71].mxu1 }
 0xbd0   :  { %12293 = vrot.lane.b32.xlu1 %v12292_v25, %s13070_s26 }
 0xc28   :  { %v12269_v62 = vpop.permute.xlu0 %12268 }
 0xc29   :  { %v12271_v19 = vunpack.i.h.bf16 %v12269_v62  ;;  %v12270_v29 = vunpack.i.l.bf16 %v12269_v62 }
 0xc2b   :  { %v2637_v52 = vsel %vm197_vm2, %v2277_v50, %v12270_v29  ;;  %v2638_v38 = vsel %vm197_vm2, %v2280_v30, %v12271_v19 }
 0xc2d   :  { %v12274_v46 = vpop.permute.xlu1 %12273 }
 0xc2e   :  { %v12276_v2 = vunpack.i.h.bf16 %v12274_v46  ;;  %v12275_v55 = vunpack.i.l.bf16 %v12274_v46 }
 0xc30   :  { %v2640_v23 = vsel %vm627_vm3, %v2638_v38, %v12276_v2  ;;  %v2639_v45 = vsel %vm627_vm3, %v2637_v52, %v12275_v55 }
 0xc31   :  { %v12279_v48 = vpop.permute.xlu1 %12278 }
 0xc32   :  { %v12281_v36 = vunpack.i.h.bf16 %v12279_v48  ;;  %v12280_v8 = vunpack.i.l.bf16 %v12279_v48 }
 0xc34   :  { %v2641_v53 = vsel %vm1216_vm4, %v2639_v45, %v12280_v8  ;;  %v2642_v59 = vsel %vm1216_vm4, %v2640_v23, %v12281_v36 }
 0xc35   :  { %v2673_v10 = vpack.c.bf16 %v2642_v59, %v2641_v53  ;;  %v2818_v59 = vld [vmem:[%s16385_s7] sm:$0xff] }
 0xc37   :  { %11890 = vmatprep.mubr.msk.bf16.mxu0 %vm90_vm0, %v2673_v10  ;;  %v2826_v10 = vld [vmem:[%s16385_s7 + $0x40] sm:$0xff] }
 0xc3a   :  { %v12284_v22 = vpop.permute.xlu0 %12283 }
 0xc3b   :  { %v12286_v5 = vunpack.i.h.bf16 %v12284_v22  ;;  %v12285_v51 = vunpack.i.l.bf16 %v12284_v22  ;;  %v2819_v22 = vld [vmem:[%s16385_s7 + $0x8] sm:$0xff] }
 0xc3d   :  { %v2667_v54 = vsel %vm197_vm2, %v2465_v58, %v12285_v51  ;;  %v2668_v18 = vsel %vm197_vm2, %v2468_v20, %v12286_v5  ;;  %v2678_v58 = vrot.slane %v13987_v60, %v13591_v61  ;;  %v2827_v5 = vld [vmem:[%s16385_s7 + $0x48] sm:$0xff]  ;;  %v10324_v51 = vcombine.low %v2818_v59, %v2826_v10 }
 0xc3e   :  { %v12289_v35 = vpop.permute.xlu0 %12288 }
 0xc3f   :  { %v12291_v50 = vunpack.i.h.bf16 %v12289_v35  ;;  %v12290_v34 = vunpack.i.l.bf16 %v12289_v35  ;;  %v10325_v35 = vcombine.high %v2818_v59, %v2826_v10 }
 0xc41   :  { %v2670_v28 = vsel %vm627_vm3, %v2668_v18, %v12291_v50  ;;  %v2669_v26 = vsel %vm627_vm3, %v2667_v54, %v12290_v34  ;;  %v10326_v50 = vcombine.low %v2819_v22, %v2827_v5  ;;  %v10327_v34 = vcombine.high %v2819_v22, %v2827_v5  ;;  %3103 = vmatprep.subr.bf16.mxu1 %v10325_v35  ;;  %v2842_v54 = vld [vmem:[%s16385_s7 + $0xc0] sm:$0xff]  ;;  %v2835_v18 = vld [vmem:[%s16385_s7 + $0x88] sm:$0xff] }
 0xc42   :  { %v12294_v30 = vpop.permute.xlu1 %12293  ;;  %3104 = vmatpush1.bf16.msra.mxu1 %v10324_v51  ;;  %v2822_v51 = vld [vmem:[%s16385_s7 + $0x20] sm:$0xff] }
 0xc43   :  { %v12296_v41 = vunpack.i.h.bf16 %v12294_v30  ;;  %v12295_v42 = vunpack.i.l.bf16 %v12294_v30  ;;  %3156 = vmatprep.subr.bf16.mxu0 %v10327_v34  ;;  %v2834_v30 = vld [vmem:[%s16385_s7 + $0x80] sm:$0xff] }
 0xc45   :  { %v2671_v6 = vsel %vm1216_vm4, %v2669_v26, %v12295_v42  ;;  %v2672_v24 = vsel %vm1216_vm4, %v2670_v28, %v12296_v41  ;;  %v10341_v41 = vcombine.high %v2834_v30, %v2842_v54  ;;  %v2843_v42 = vld [vmem:[%s16385_s7 + $0xc8] sm:$0xff]  ;;  %v10340_v28 = vcombine.low %v2834_v30, %v2842_v54  ;;  %v2830_v30 = vld [vmem:[%s16385_s7 + $0x60] sm:$0xff] }
 0xc46   :  { %v2674_v4 = vpack.c.bf16 %v2672_v24, %v2671_v6  ;;  %v10342_v26 = vcombine.low %v2835_v18, %v2843_v42  ;;  %v10343_v6 = vcombine.high %v2835_v18, %v2843_v42  ;;  %v13071_v24 = vmov 0   ;;  %v2831_v54 = vld [vmem:[%s16385_s7 + $0x68] sm:$0xff] }
 0xc47   :  { %3105 = vmatprep.subr.bf16.mxu1 %v10341_v41  ;;  %3135 = vmatprep.mubr.bf16.mxu1 %v13071_v24 }
 0xc48   :  { %11891 = vmatmul.mubr.msk.bf16.vlgmr.msra.gmra.mrb[72].mxu0 %vm90_vm0, %v2674_v4  ;;  %3106 = vmatpush1.bf16.msra.mxu1 %v10340_v28  ;;  %v2820_v4 = vld [vmem:[%s16385_s7 + $0x10] sm:$0xff]  ;;  %v10333_v28 = vcombine.high %v2822_v51, %v2830_v30 }
 0xc49   :  { %3157 = vmatpush1.bf16.msra.mxu0 %v10326_v50  ;;  %3188 = vmatprep.mubr.bf16.mxu0 %v13071_v24 }
 0xc4a   :  { %3158 = vmatprep.subr.bf16.mxu0 %v10343_v6 }
 0xc4d   :  { %3159 = vmatpush1.bf16.msra.mxu0 %v10342_v26 }
 0xd1b   :  { %v11892_v20 = vpop.f32.mrb[72].mxu0 }
 0xd1c   :  { %v2731_v21 = vpop.f32.mrb[73].mxu0  ;;  %v2740_v57 = vadd.f32 %v11892_v20, %v2678_v58  ;;  %v2821_v20 = vld [vmem:[%s16385_s7 + $0x18] sm:$0xff] }
 0xd1d   :  { %v2732_v32 = vadd.f32 %v2731_v21, %v2678_v58  ;;  %v11893_v0 = vpop.f32.mrb[74].mxu0 }
 0xd1e   :  { %v2734_v1 = vpop.f32.mrb[75].mxu0  ;;  %v2748_v17 = vadd.f32 %v2740_v57, %v13634_v44  ;;  %v2743_v37 = vadd.f32 %v11893_v0, %v2678_v58  ;;  %v2829_v57 = vld [vmem:[%s16385_s7 + $0x58] sm:$0xff] }
 0xd1f   :  { %v2746_v56 = vadd.f32 %v2732_v32, %v13627_v11  ;;  %v2735_v33 = vadd.f32 %v2734_v1, %v2678_v58  ;;  %v2828_v58 = vld [vmem:[%s16385_s7 + $0x50] sm:$0xff]  ;;  %v10330_v0 = vcombine.low %v2821_v20, %v2829_v57  ;;  %v10331_v1 = vcombine.high %v2821_v20, %v2829_v57  ;;  %v2846_v20 = vld [vmem:[%s16385_s7 + $0xe0] sm:$0xff]  ;;  %v2847_v57 = vld [vmem:[%s16385_s7 + $0xe8] sm:$0xff] }
 0xd20   :  { %v2749_v9 = vadd.f32 %v2743_v37, %v13636_v47  ;;  %v2756_v63 = vsel %vm90_vm0, %v2748_v17, 0.0  ;;  %v10329_v21 = vcombine.high %v2820_v4, %v2828_v58  ;;  %v10328_v32 = vcombine.low %v2820_v4, %v2828_v58  ;;  %v2838_v58 = vld [vmem:[%s16385_s7 + $0xa0] sm:$0xff] }
 0xd21   :  { %v2747_v40 = vadd.f32 %v2735_v33, %v13629_v3  ;;  %v2750_v7 = vsel %vm90_vm0, %v2746_v56, 0.0  ;;  %3262 = vmatprep.subr.bf16.mxu0 %v10331_v1  ;;  %v10349_v1 = vcombine.high %v2838_v58, %v2846_v20 }
 0xd22   :  { %2751 = vadd.xlane.f32.xlu0 %v2750_v7  ;;  %v2759_v49 = vsel %vm90_vm0, %v2749_v9, 0.0  ;;  %3209 = vmatprep.subr.bf16.mxu1 %v10329_v21  ;;  %v2839_v21 = vld [vmem:[%s16385_s7 + $0xa8] sm:$0xff] }
 0xd23   :  { %v2753_v39 = vsel %vm90_vm0, %v2747_v40, 0.0 }
 0xd24   :  { %2754 = vadd.xlane.f32.xlu1 %v2753_v39 }
 0xd26   :  { %2757 = vadd.xlane.f32.xlu0 %v2756_v63 }
 0xd2a   :  { %2760 = vadd.xlane.f32.xlu0 %v2759_v49 }
 0xdaf   :  { %v2752_v11 = vpop.xlane.xlu0 %2751 }
 0xdb0   :  { %v2762_v25 = vmul.f32 0.03125, %v2752_v11 }
 0xdb1   :  { %v2755_v44 = vpop.xlane.xlu1 %2754 }
 0xdb2   :  { %v13999_v27 = vsub.f32 %v2746_v56, %v2762_v25  ;;  %v2763_v3 = vmul.f32 0.03125, %v2755_v44  ;;  %v14058_v25 = vsub.s32 4, %v13193_v15 }
 0xdb3   :  { %v2758_v62 = vpop.xlane.xlu0 %2757 }
 0xdb4   :  { %v14001_v46 = vsub.f32 %v2747_v40, %v2763_v3  ;;  %v2764_v19 = vmul.f32 0.03125, %v2758_v62  ;;  %v2770_v29 = vmul.f32 %v13999_v27, %v13999_v27  ;;  %v2805_v3 = vrot.slane %v13987_v60, %v14058_v25 }
 0xdb5   :  { %v14063_v62 = vsub.s32 5, %v13193_v15 }
 0xdb6   :  { %v14005_v47 = vsub.f32 %v2748_v17, %v2764_v19  ;;  %v2774_v2 = vsel %vm90_vm0, %v2770_v29, 0.0  ;;  %v2771_v55 = vmul.f32 %v14001_v46, %v14001_v46 }
 0xdb7   :  { %2775 = vadd.xlane.f32.xlu1 %v2774_v2  ;;  %v2761_v48 = vpop.xlane.xlu0 %2760 }
 0xdb8   :  { %v2765_v52 = vmul.f32 0.03125, %v2761_v48  ;;  %v2777_v38 = vsel %vm90_vm0, %v2771_v55, 0.0  ;;  %v2772_v36 = vmul.f32 %v14005_v47, %v14005_v47  ;;  %v2813_v55 = vrot.slane %v13987_v60, %v14063_v62  ;;  %v2837_v60 = vld [vmem:[%s16385_s7 + $0x98] sm:$0xff] }
 0xdb9   :  { %2778 = vadd.xlane.f32.xlu0 %v2777_v38 }
 0xdba   :  { %v14013_v8 = vsub.f32 %v2749_v9, %v2765_v52  ;;  %v2780_v23 = vsel %vm90_vm0, %v2772_v36, 0.0 }
 0xdbb   :  { %2781 = vadd.xlane.f32.xlu1 %v2780_v23  ;;  %v2836_v23 = vld [vmem:[%s16385_s7 + $0x90] sm:$0xff] }
 0xdbc   :  { %v2773_v45 = vmul.f32 %v14013_v8, %v14013_v8 }
 0xdbe   :  { %v2783_v53 = vsel %vm90_vm0, %v2773_v45, 0.0 }
 0xdbf   :  { %2784 = vadd.xlane.f32.xlu0 %v2783_v53 }
 0xe44   :  { %v2776_v56 = vpop.xlane.xlu1 %2775 }
 0xe45   :  { %v2786_v33 = vmul.f32 0.03125, %v2776_v56  ;;  %v10351_v56 = vcombine.high %v2839_v21, %v2847_v57 }
 0xe46   :  { %v2779_v17 = vpop.xlane.xlu0 %2778 }
 0xe47   :  { %v2790_v37 = vadd.f32 1e-05, %v2786_v33  ;;  %v2787_v40 = vmul.f32 0.03125, %v2779_v17  ;;  %v2824_v33 = vld [vmem:[%s16385_s7 + $0x30] sm:$0xff] }
 0xe48   :  { %v2782_v7 = vpop.xlane.xlu1 %2781  ;;  %v2832_v17 = vld [vmem:[%s16385_s7 + $0x70] sm:$0xff] }
 0xe49   :  { %12857 = vrsqrt.f32 %v2790_v37  ;;  %v2791_v39 = vadd.f32 1e-05, %v2787_v40  ;;  %v2788_v9 = vmul.f32 0.03125, %v2782_v7  ;;  %v2825_v37 = vld [vmem:[%s16385_s7 + $0x38] sm:$0xff]  ;;  %v10348_v7 = vcombine.low %v2838_v58, %v2846_v20  ;;  %v12478_v58 = vld [vmem:[%s16386_s8 + $0xa8] sm:$0xff]   ;;  %v12479_v20 = vld [vmem:[%s16386_s8 + $0x70] sm:$0xff]  }
 0xe4a   :  { %v2833_v40 = vld [vmem:[%s16385_s7 + $0x78] sm:$0xff] }
 0xe4b   :  { %12859 = vrsqrt.f32 %v2791_v39  ;;  %v2792_v63 = vadd.f32 1e-05, %v2788_v9  ;;  %v10350_v39 = vcombine.low %v2839_v21, %v2847_v57  ;;  %v10337_v9 = vcombine.high %v2824_v33, %v2832_v17  ;;  %v12480_v21 = vld [vmem:[%s16386_s8 + $0xf0] sm:$0xff]  }
 0xe4c   :  { %v2785_v49 = vpop.xlane.xlu0 %2784  ;;  %v12481_v57 = vld [vmem:[%s16386_s8 + $0x30] sm:$0xff]  }
 0xe4d   :  { %12861 = vrsqrt.f32 %v2792_v63  ;;  %v2789_v11 = vmul.f32 0.03125, %v2785_v49  ;;  %v10339_v63 = vcombine.high %v2825_v37, %v2833_v40  ;;  %v2840_v49 = vld [vmem:[%s16385_s7 + $0xb0] sm:$0xff] }
 0xe4f   :  { %v2793_v44 = vadd.f32 1e-05, %v2789_v11  ;;  %v2848_v11 = vld [vmem:[%s16385_s7 + $0xf0] sm:$0xff] }
 0xe51   :  { %12863 = vrsqrt.f32 %v2793_v44  ;;  %v2841_v44 = vld [vmem:[%s16385_s7 + $0xb8] sm:$0xff] }
 0xe53   :  { %v12858_v19 = vpop.eup %12857 }
 0xe54   :  { %v2798_v29 = vmul.f32 %v12858_v19, %v13999_v27  ;;  %v2844_v27 = vld [vmem:[%s16385_s7 + $0xd0] sm:$0xff]  ;;  %v10336_v19 = vcombine.low %v2824_v33, %v2832_v17  ;;  %v12486_v33 = vld [vmem:[%s16386_s8 + $0xb8] sm:$0xff]   ;;  %v12487_v17 = vld [vmem:[%s16386_s8 + $0x140] sm:$0xff]  }
 0xe55   :  { %v12860_v2 = vpop.eup %12859  ;;  %v10344_v41 = vcombine.low %v2836_v23, %v2844_v27 }
 0xe56   :  { %v2806_v48 = vmul.f32 %v2805_v3, %v2798_v29  ;;  %v2799_v52 = vmul.f32 %v12860_v2, %v14001_v46  ;;  %v2845_v46 = vld [vmem:[%s16385_s7 + $0xd8] sm:$0xff]  ;;  %v10338_v29 = vcombine.low %v2825_v37, %v2833_v40  ;;  %v10353_v2 = vcombine.high %v2840_v49, %v2848_v11  ;;  %v12488_v37 = vld [vmem:[%s16386_s8 + $0x1c0] sm:$0xff]  }
 0xe57   :  { %v12862_v38 = vpop.eup %12861  ;;  %v10347_v5 = vcombine.high %v2837_v60, %v2845_v46  ;;  %v10346_v42 = vcombine.low %v2837_v60, %v2845_v46  ;;  %v12460_v60 = vld [vmem:[%s16386_s8 + $0xc8] sm:$0xff]  }
 0xe58   :  { %v2807_v36 = vmul.f32 %v2805_v3, %v2799_v52  ;;  %v14072_v45 = vadd.f32 %v2813_v55, %v2806_v48  ;;  %v2800_v59 = vmul.f32 %v12862_v38, %v14005_v47  ;;  %v10345_v47 = vcombine.high %v2836_v23, %v2844_v27  ;;  %v12455_v38 = vld [vmem:[%s16386_s8 + $0x40] sm:$0xff]   ;;  %v12459_v27 = vld [vmem:[%s16386_s8 + $0x48] sm:$0xff]  }
 0xe59   :  { %v10352_v48 = vcombine.low %v2840_v49, %v2848_v11  ;;  %v12457_v23 = vld [vmem:[%s16386_s8] sm:$0xff]   ;;  %v12461_v46 = vld [vmem:[%s16386_s8 + $0x8] sm:$0xff]  }
 0xe5a   :  { %v14074_v53 = vadd.f32 %v2813_v55, %v2807_v36  ;;  %v2808_v50 = vmul.f32 %v2805_v3, %v2800_v59  ;;  %v12456_v36 = vld [vmem:[%s16386_s8 + $0xc0] sm:$0xff]  }
 0xe5b   :  { %v12864_v10 = vpop.eup %12863  ;;  %v12458_v59 = vld [vmem:[%s16386_s8 + $0x80] sm:$0xff]  }
 0xe5c   :  { %v14088_v22 = vpack.c.bf16 %v14074_v53, %v14072_v45  ;;  %v2801_v35 = vmul.f32 %v12864_v10, %v14013_v8  ;;  %v2823_v8 = vld [vmem:[%s16385_s7 + $0x28] sm:$0xff]  ;;  %v14111_v6 = vadd.f32 %v2813_v55, %v2808_v50  ;;  %v12468_v50 = vld [vmem:[%s16386_s8 + $0xd8] sm:$0xff]  }
 0xe5d   :  { %v10335_v26 = vcombine.high %v2823_v8, %v2831_v54  ;;  %v12462_v10 = vld [vmem:[%s16386_s8 + $0x88] sm:$0xff]  }
 0xe5e   :  { %v2809_v34 = vmul.f32 %v2805_v3, %v2801_v35  ;;  %10356 = vmatmul.mubr.msk.bf16.vlgmr.msra.gmra.mrb[72].mxu1 %vm90_vm0, %v14088_v22  ;;  %10358 = vmatmul.mubr.msk.bf16.vlgmr.msra.gmra.mrb[76].mxu0 %vm90_vm0, %v14088_v22  ;;  %v2849_v3 = vld [vmem:[%s16385_s7 + $0xf8] sm:$0xff]  ;;  %v12464_v35 = vld [vmem:[%s16386_s8 + $0xd0] sm:$0xff]   ;;  %v14298_v40 = vld [vmem:[%s16389_s11] ss:$2 sm:$0xff] }
 0xe5f   :  { %3145 = vmatprep.mubr.bf16.mxu1 %v13071_v24  ;;  %3198 = vmatprep.mubr.bf16.mxu0 %v13071_v24  ;;  %v10354_v52 = vcombine.low %v2841_v44, %v2849_v3 }
 0xe60   :  { %v14109_v18 = vadd.f32 %v2813_v55, %v2809_v34  ;;  %3210 = vmatpush1.bf16.msra.mxu1 %v10328_v32  ;;  %3263 = vmatpush1.bf16.msra.mxu0 %v10330_v0  ;;  %v10332_v32 = vcombine.low %v2822_v51, %v2830_v30  ;;  %v10334_v0 = vcombine.low %v2823_v8, %v2831_v54  ;;  %v12467_v51 = vld [vmem:[%s16386_s8 + $0x58] sm:$0xff]   ;;  %v12471_v8 = vld [vmem:[%s16386_s8 + $0x60] sm:$0xff]  }
 0xe61   :  { %3211 = vmatprep.subr.bf16.mxu1 %v10345_v47  ;;  %3264 = vmatprep.subr.bf16.mxu0 %v10347_v5  ;;  %v10355_v55 = vcombine.high %v2841_v44, %v2849_v3  ;;  %v12465_v47 = vld [vmem:[%s16386_s8 + $0x10] sm:$0xff]   ;;  %v12469_v34 = vld [vmem:[%s16386_s8 + $0x18] sm:$0xff]   ;;  %v12472_v54 = vld [vmem:[%s16386_s8 + $0xe0] sm:$0xff]  }
 0xe62   :  { %v14115_v4 = vpack.c.bf16 %v14109_v18, %v14111_v6  ;;  %v12466_v5 = vld [vmem:[%s16386_s8 + $0x90] sm:$0xff]   ;;  %v12470_v30 = vld [vmem:[%s16386_s8 + $0x98] sm:$0xff]  }
 0xe64   :  { %3212 = vmatpush1.bf16.msra.mxu1 %v10344_v41  ;;  %3265 = vmatpush1.bf16.msra.mxu0 %v10346_v42  ;;  %v12473_v41 = vld [vmem:[%s16386_s8 + $0x20] sm:$0xff]  }
 0xe65   :  { %3315 = vmatprep.subr.bf16.mxu1 %v10333_v28  ;;  %3368 = vmatprep.subr.bf16.mxu0 %v10335_v26  ;;  %v12474_v42 = vld [vmem:[%s16386_s8 + $0xa0] sm:$0xff]   ;;  %v12475_v28 = vld [vmem:[%s16386_s8 + $0x68] sm:$0xff]  }
 0xe66   :  { %10357 = vmatmul.mubr.msk.bf16.gmra.mrb[76].mxu1 %vm90_vm0, %v14115_v4  ;;  %10359 = vmatmul.mubr.msk.bf16.gmra.mrb[80].mxu0 %vm90_vm0, %v14115_v4  ;;  %v12476_v26 = vld [vmem:[%s16386_s8 + $0xe8] sm:$0xff]  }
 0xe67   :  { %3241 = vmatprep.mubr.bf16.mxu1 %v13071_v24  ;;  %3294 = vmatprep.mubr.bf16.mxu0 %v13071_v24 }
 0xe6e   :  { %10360 = vmatmul.mubr.msk.bf16.vlgmr.msra.gmra.mrb[80].mxu1 %vm90_vm0, %v14088_v22  ;;  %10362 = vmatmul.mubr.msk.bf16.vlgmr.msra.gmra.mrb[84].mxu0 %vm90_vm0, %v14088_v22 }
 0xe6f   :  { %3251 = vmatprep.mubr.bf16.mxu1 %v13071_v24  ;;  %3304 = vmatprep.mubr.bf16.mxu0 %v13071_v24 }
 0xe70   :  { %3316 = vmatpush1.bf16.msra.mxu1 %v10332_v32  ;;  %3369 = vmatpush1.bf16.msra.mxu0 %v10334_v0  ;;  %v12482_v32 = vld [vmem:[%s16386_s8 + $0xb0] sm:$0xff]   ;;  %v12483_v0 = vld [vmem:[%s16386_s8 + $0x78] sm:$0xff]  }
 0xe71   :  { %3317 = vmatprep.subr.bf16.mxu1 %v10349_v1  ;;  %3370 = vmatprep.subr.bf16.mxu0 %v10351_v56  ;;  %v12484_v1 = vld [vmem:[%s16386_s8 + $0xf8] sm:$0xff]  }
 0xe72   :  { %v12485_v56 = vld [vmem:[%s16386_s8 + $0x38] sm:$0xff]  }
 0xe74   :  { %3318 = vmatpush1.bf16.msra.mxu1 %v10348_v7  ;;  %3371 = vmatpush1.bf16.msra.mxu0 %v10350_v39  ;;  %v2860_v7 = vrot.slane %v14298_v40, %v13196_v16  ;;  %v2868_v39 = vrot.slane %v14298_v40, %v13616_v43 }
 0xe75   :  { %3421 = vmatprep.subr.bf16.mxu1 %v10337_v9  ;;  %3474 = vmatprep.subr.bf16.mxu0 %v10339_v63  ;;  %v2864_v9 = vrot.slane %v14298_v40, %v13591_v61  ;;  %v2872_v63 = vrot.slane %v14298_v40, %v13621_v14 }
 0xe76   :  { %10361 = vmatmul.mubr.msk.bf16.gmra.mrb[84].mxu1 %vm90_vm0, %v14115_v4  ;;  %10363 = vmatmul.mubr.msk.bf16.gmra.mrb[88].mxu0 %vm90_vm0, %v14115_v4 }
 0xe77   :  { %3347 = vmatprep.mubr.bf16.mxu1 %v13071_v24  ;;  %3400 = vmatprep.mubr.bf16.mxu0 %v13071_v24 }
 0xe7e   :  { %10364 = vmatmul.mubr.msk.bf16.vlgmr.msra.gmra.mrb[88].mxu1 %vm90_vm0, %v14088_v22  ;;  %10366 = vmatmul.mubr.msk.bf16.vlgmr.msra.gmra.mrb[92].mxu0 %vm90_vm0, %v14088_v22 }
 0xe7f   :  { %3357 = vmatprep.mubr.bf16.mxu1 %v13071_v24  ;;  %3410 = vmatprep.mubr.bf16.mxu0 %v13071_v24 }
 0xe80   :  { %3422 = vmatpush1.bf16.msra.mxu1 %v10336_v19  ;;  %3475 = vmatpush1.bf16.msra.mxu0 %v10338_v29 }
 0xe81   :  { %3423 = vmatprep.subr.bf16.mxu1 %v10353_v2  ;;  %3476 = vmatprep.subr.bf16.mxu0 %v10355_v55 }
 0xe84   :  { %3424 = vmatpush1.bf16.msra.mxu1 %v10352_v48  ;;  %3477 = vmatpush1.bf16.msra.mxu0 %v10354_v52 }
 0xe85   :  { %11126 = vmatprep.subr.bf16.mxu1 %v12455_v38  ;;  %11154 = vmatprep.subr.bf16.mxu0 %v12456_v36 }
 0xe86   :  { %10365 = vmatmul.mubr.msk.bf16.gmra.mrb[92].mxu1 %vm90_vm0, %v14115_v4  ;;  %10367 = vmatmul.mubr.msk.bf16.gmra.mrb[96].mxu0 %vm90_vm0, %v14115_v4 }
 0xe87   :  { %3453 = vmatprep.mubr.bf16.mxu1 %v13071_v24  ;;  %3506 = vmatprep.mubr.bf16.mxu0 %v13071_v24 }
 0xe8e   :  { %10368 = vmatmul.mubr.msk.bf16.vlgmr.msra.gmra.mrb[96].mxu1 %vm90_vm0, %v14088_v22  ;;  %10370 = vmatmul.mubr.msk.bf16.vlgmr.msra.gmra.mrb[100].mxu0 %vm90_vm0, %v14088_v22  ;;  %v12463_v22 = vld [vmem:[%s16386_s8 + $0x50] sm:$0xff]  }
 0xe8f   :  { %3463 = vmatprep.mubr.bf16.mxu1 %v13071_v24  ;;  %3516 = vmatprep.mubr.bf16.mxu0 %v13071_v24 }
 0xe90   :  { %11127 = vmatpush3.bf16.msra.mxu1 %v12457_v23  ;;  %11155 = vmatpush3.bf16.msra.mxu0 %v12458_v59 }
 0xe91   :  { %11128 = vmatprep.subr.bf16.mxu1 %v12459_v27  ;;  %11156 = vmatprep.subr.bf16.mxu0 %v12460_v60 }
 0xe94   :  { %11129 = vmatpush3.bf16.msra.mxu1 %v12461_v46  ;;  %11157 = vmatpush3.bf16.msra.mxu0 %v12462_v10  ;;  %v14309_v46 = vsub.s32 6, %v13193_v15 }
 0xe95   :  { %11130 = vmatprep.subr.bf16.mxu1 %v12463_v22  ;;  %11158 = vmatprep.subr.bf16.mxu0 %v12464_v35 }
 0xe96   :  { %10369 = vmatmul.mubr.msk.bf16.gmra.mrb[100].mxu1 %vm90_vm0, %v14115_v4  ;;  %10371 = vmatmul.mubr.msk.bf16.gmra.mrb[104].mxu0 %vm90_vm0, %v14115_v4  ;;  %v12477_v4 = vld [vmem:[%s16386_s8 + $0x28] sm:$0xff]  }
 0xe98   :  { %11131 = vmatpush3.bf16.msra.mxu1 %v12465_v47  ;;  %11159 = vmatpush3.bf16.msra.mxu0 %v12466_v5 }
 0xe99   :  { %11132 = vmatprep.subr.bf16.mxu1 %v12467_v51  ;;  %11160 = vmatprep.subr.bf16.mxu0 %v12468_v50 }
 0xe9c   :  { %11133 = vmatpush3.bf16.msra.mxu1 %v12469_v34  ;;  %11161 = vmatpush3.bf16.msra.mxu0 %v12470_v30 }
 0xe9d   :  { %11134 = vmatprep.subr.bf16.mxu1 %v12471_v8  ;;  %11162 = vmatprep.subr.bf16.mxu0 %v12472_v54 }
 0xea0   :  { %11135 = vmatpush3.bf16.msra.mxu1 %v12473_v41  ;;  %11163 = vmatpush3.bf16.msra.mxu0 %v12474_v42 }
 0xea1   :  { %11136 = vmatprep.subr.bf16.mxu1 %v12475_v28  ;;  %11164 = vmatprep.subr.bf16.mxu0 %v12476_v26  ;;  %v12489_v26 = vld [vmem:[%s16386_s8 + $0x100] sm:$0xff]  }
 0xea4   :  { %11137 = vmatpush3.bf16.msra.mxu1 %v12477_v4  ;;  %11165 = vmatpush3.bf16.msra.mxu0 %v12478_v58  ;;  %v12490_v4 = vld [vmem:[%s16386_s8 + $0x180] sm:$0xff]   ;;  %v14318_v58 = vsub.s32 7, %v13193_v15 }
 0xea5   :  { %11138 = vmatprep.subr.bf16.mxu1 %v12479_v20  ;;  %11166 = vmatprep.subr.bf16.mxu0 %v12480_v21 }
 0xea8   :  { %11139 = vmatpush3.bf16.msra.mxu1 %v12481_v57  ;;  %11167 = vmatpush3.bf16.msra.mxu0 %v12482_v32 }
 0xea9   :  { %11140 = vmatprep.subr.bf16.mxu1 %v12483_v0  ;;  %11168 = vmatprep.subr.bf16.mxu0 %v12484_v1  ;;  %v12491_v0 = vld [vmem:[%s16386_s8 + $0x148] sm:$0xff]  }
 0xeaa   :  { %v12492_v1 = vld [vmem:[%s16386_s8 + $0x1c8] sm:$0xff]  }
 0xeac   :  { %11141 = vmatpush3.bf16.msra.mxu1 %v12485_v56  ;;  %11169 = vmatpush3.bf16.msra.mxu0 %v12486_v33  ;;  %v14328_v56 = vrot.slane %v14298_v40, %v14058_v25 }
 0xead   :  { %11182 = vmatprep.subr.bf16.mxu1 %v12487_v17  ;;  %11210 = vmatprep.subr.bf16.mxu0 %v12488_v37 }
 0xf31   :  { %v3137_v49 = vpop.f32.mrb[72].mxu1  ;;  %v3190_v11 = vpop.f32.mrb[76].mxu0 }
 0xf32   :  { %v3138_v44 = vadd.f32 %v3137_v49, %v2860_v7  ;;  %v3191_v3 = vadd.f32 %v3190_v11, %v2868_v39  ;;  %v3139_v19 = vpop.f32.mrb[73].mxu1  ;;  %v3192_v29 = vpop.f32.mrb[77].mxu0  ;;  %v14332_v49 = vrot.slane %v14298_v40, %v14309_v46 }
 0xf33   :  { %v3140_v2 = vadd.f32 %v3139_v19, %v2864_v9  ;;  %v3193_v55 = vadd.f32 %v3192_v29, %v2872_v63  ;;  %v3141_v48 = vpop.f32.mrb[74].mxu1  ;;  %v3194_v52 = vpop.f32.mrb[78].mxu0  ;;  %v14336_v29 = vrot.slane %v14298_v40, %v14063_v62 }
 0xf34   :  { %v3142_v38 = vadd.f32 %v3141_v48, %v2860_v7  ;;  %v3195_v36 = vadd.f32 %v3194_v52, %v2868_v39  ;;  %v3143_v23 = vpop.f32.mrb[75].mxu1  ;;  %v3196_v59 = vpop.f32.mrb[79].mxu0  ;;  %v3527_v10 = vmax.f32 %v3138_v44, 0.0  ;;  %v3529_v22 = vmax.f32 %v3191_v3, 0.0  ;;  %v12493_v48 = vld [vmem:[%s16386_s8 + $0x108] sm:$0xff]  }
 0xf35   :  { %v3144_v27 = vadd.f32 %v3143_v23, %v2864_v9  ;;  %v3197_v60 = vadd.f32 %v3196_v59, %v2872_v63  ;;  %v3528_v5 = vmax.f32 %v3140_v2, 0.0  ;;  %v3530_v51 = vmax.f32 %v3193_v55, 0.0 }
 0xf36   :  { %v3543_v35 = vmax.f32 %v3142_v38, 0.0  ;;  %v3545_v47 = vmax.f32 %v3195_v36, 0.0 }
 0xf37   :  { %v3544_v50 = vmax.f32 %v3144_v27, 0.0  ;;  %v3546_v34 = vmax.f32 %v3197_v60, 0.0 }
 0xf38   :  { %v3847_v30 = vpack.c.bf16 %v3543_v35, %v3527_v10  ;;  %v3849_v8 = vpack.c.bf16 %v3545_v47, %v3529_v22 }
 0xf39   :  { %v3848_v54 = vpack.c.bf16 %v3544_v50, %v3528_v5  ;;  %v3850_v41 = vpack.c.bf16 %v3546_v34, %v3530_v51  ;;  %v3147_v42 = vpop.f32.mrb[76].mxu1  ;;  %v3200_v28 = vpop.f32.mrb[80].mxu0  ;;  %v12497_v50 = vld [vmem:[%s16386_s8 + $0x110] sm:$0xff]  }
 0xf3a   :  { %v3148_v20 = vadd.f32 %v3147_v42, %v2860_v7  ;;  %v3201_v21 = vadd.f32 %v3200_v28, %v2868_v39  ;;  %v3149_v57 = vpop.f32.mrb[77].mxu1  ;;  %v3202_v32 = vpop.f32.mrb[81].mxu0  ;;  %v12498_v34 = vld [vmem:[%s16386_s8 + $0x190] sm:$0xff]   ;;  %v12499_v42 = vld [vmem:[%s16386_s8 + $0x158] sm:$0xff]  }
 0xf3b   :  { %v3150_v33 = vadd.f32 %v3149_v57, %v2864_v9  ;;  %v3203_v17 = vadd.f32 %v3202_v32, %v2872_v63  ;;  %v3151_v15 = vpop.f32.mrb[78].mxu1  ;;  %v3204_v37 = vpop.f32.mrb[82].mxu0  ;;  %4683 = vmatprep.mubr.bf16.mxu1 %v3848_v54  ;;  %4732 = vmatprep.mubr.bf16.mxu0 %v3850_v41  ;;  %v12500_v28 = vld [vmem:[%s16386_s8 + $0x1d8] sm:$0xff]  }
 0xf3c   :  { %v3152_v11 = vadd.f32 %v3151_v15, %v2860_v7  ;;  %v3205_v44 = vadd.f32 %v3204_v37, %v2868_v39  ;;  %v3153_v3 = vpop.f32.mrb[79].mxu1  ;;  %v3206_v19 = vpop.f32.mrb[83].mxu0  ;;  %4684 = vmatmul.mubr.bf16.vlgmr.msra.gmra.mrb[104].mxu1 %v3847_v30  ;;  %4733 = vmatmul.mubr.bf16.vlgmr.msra.gmra.mrb[108].mxu0 %v3849_v8  ;;  %v12494_v7 = vld [vmem:[%s16386_s8 + $0x188] sm:$0xff]   ;;  %v14346_v39 = vrot.slane %v14298_v40, %v14318_v58  ;;  %v3559_v52 = vmax.f32 %v3148_v20, 0.0  ;;  %v12501_v15 = vld [vmem:[%s16386_s8 + $0x118] sm:$0xff]  }
 0xf3d   :  { %v3154_v2 = vadd.f32 %v3153_v3, %v2864_v9  ;;  %v3207_v55 = vadd.f32 %v3206_v19, %v2872_v63  ;;  %11183 = vmatpush3.bf16.msra.mxu1 %v12489_v26  ;;  %11211 = vmatpush3.bf16.msra.mxu0 %v12490_v4  ;;  %v3561_v38 = vmax.f32 %v3201_v21, 0.0  ;;  %v12495_v9 = vld [vmem:[%s16386_s8 + $0x150] sm:$0xff]   ;;  %v3560_v59 = vmax.f32 %v3150_v33, 0.0  ;;  %v12502_v37 = vld [vmem:[%s16386_s8 + $0x198] sm:$0xff]  }
 0xf3e   :  { %v3575_v36 = vmax.f32 %v3152_v11, 0.0  ;;  %v3577_v23 = vmax.f32 %v3205_v44, 0.0  ;;  %11184 = vmatprep.subr.bf16.mxu1 %v12491_v0  ;;  %11212 = vmatprep.subr.bf16.mxu0 %v12492_v1  ;;  %v12496_v63 = vld [vmem:[%s16386_s8 + $0x1d0] sm:$0xff]   ;;  %v3562_v27 = vmax.f32 %v3203_v17, 0.0 }
 0xf3f   :  { %v3576_v60 = vmax.f32 %v3154_v2, 0.0  ;;  %v3578_v10 = vmax.f32 %v3207_v55, 0.0  ;;  %v12503_v2 = vld [vmem:[%s16386_s8 + $0x160] sm:$0xff]  }
 0xf40   :  { %v3863_v40 = vpack.c.bf16 %v3575_v36, %v3559_v52  ;;  %v3865_v22 = vpack.c.bf16 %v3577_v23, %v3561_v38  ;;  %v12504_v55 = vld [vmem:[%s16386_s8 + $0x1e0] sm:$0xff]  }
 0xf41   :  { %v3864_v35 = vpack.c.bf16 %v3576_v60, %v3560_v59  ;;  %v3866_v47 = vpack.c.bf16 %v3578_v10, %v3562_v27  ;;  %11185 = vmatpush3.bf16.msra.mxu1 %v12493_v48  ;;  %11213 = vmatpush3.bf16.msra.mxu0 %v12494_v7  ;;  %v3243_v5 = vpop.f32.mrb[80].mxu1  ;;  %v3296_v51 = vpop.f32.mrb[84].mxu0  ;;  %v12505_v10 = vld [vmem:[%s16386_s8 + $0x120] sm:$0xff]  }
 0xf42   :  { %v3244_v30 = vadd.f32 %v3243_v5, %v14328_v56  ;;  %v3297_v8 = vadd.f32 %v3296_v51, %v14332_v49  ;;  %v3245_v54 = vpop.f32.mrb[81].mxu1  ;;  %v3298_v41 = vpop.f32.mrb[85].mxu0  ;;  %11186 = vmatprep.subr.bf16.mxu1 %v12495_v9  ;;  %11214 = vmatprep.subr.bf16.mxu0 %v12496_v63  ;;  %v14393_v9 = vld [vmem:[%s16389_s11 + $0x10] ss:$2 sm:$0xff]  ;;  %v12507_v51 = vld [vmem:[%s16386_s8 + $0x168] sm:$0xff]  }
 0xf43   :  { %v3246_v26 = vadd.f32 %v3245_v54, %v14336_v29  ;;  %v3299_v4 = vadd.f32 %v3298_v41, %v14346_v39  ;;  %v3247_v20 = vpop.f32.mrb[82].mxu1  ;;  %v3300_v21 = vpop.f32.mrb[86].mxu0  ;;  %4691 = vmatprep.mubr.bf16.mxu1 %v3864_v35  ;;  %4740 = vmatprep.mubr.bf16.mxu0 %v3866_v47  ;;  %v14413_v41 = vrot.slane %v14393_v9, %v13196_v16 }
 0xf44   :  { %v3248_v57 = vadd.f32 %v3247_v20, %v14328_v56  ;;  %v3301_v32 = vadd.f32 %v3300_v21, %v14332_v49  ;;  %v3249_v0 = vpop.f32.mrb[83].mxu1  ;;  %v3302_v1 = vpop.f32.mrb[87].mxu0  ;;  %4692 = vmatmul.mubr.bf16.gmra.mrb[108].mxu1 %v3863_v40  ;;  %4741 = vmatmul.mubr.bf16.gmra.mrb[112].mxu0 %v3865_v22  ;;  %v3531_v11 = vmax.f32 %v3244_v30, 0.0  ;;  %v3533_v44 = vmax.f32 %v3297_v8, 0.0  ;;  %v12506_v40 = vld [vmem:[%s16386_s8 + $0x1a0] sm:$0xff]  }
 0xf45   :  { %v3250_v33 = vadd.f32 %v3249_v0, %v14336_v29  ;;  %v3303_v17 = vadd.f32 %v3302_v1, %v14346_v39  ;;  %11187 = vmatpush3.bf16.msra.mxu1 %v12497_v50  ;;  %11215 = vmatpush3.bf16.msra.mxu0 %v12498_v34  ;;  %v3532_v48 = vmax.f32 %v3246_v26, 0.0  ;;  %v3534_v7 = vmax.f32 %v3299_v4, 0.0  ;;  %v12508_v50 = vld [vmem:[%s16386_s8 + $0x1e8] sm:$0xff]  }
 0xf46   :  { %v3547_v3 = vmax.f32 %v3248_v57, 0.0  ;;  %v3549_v19 = vmax.f32 %v3301_v32, 0.0  ;;  %11188 = vmatprep.subr.bf16.mxu1 %v12499_v42  ;;  %11216 = vmatprep.subr.bf16.mxu0 %v12500_v28  ;;  %v14419_v20 = vrot.slane %v14393_v9, %v13616_v43  ;;  %v14423_v21 = vrot.slane %v14393_v9, %v13591_v61 }
 0xf47   :  { %v3548_v52 = vmax.f32 %v3250_v33, 0.0  ;;  %v3550_v38 = vmax.f32 %v3303_v17, 0.0  ;;  %v14435_v0 = vrot.slane %v14393_v9, %v13621_v14 }
 0xf48   :  { %v14386_v36 = vpack.c.bf16 %v3547_v3, %v3531_v11  ;;  %v14388_v23 = vpack.c.bf16 %v3549_v19, %v3533_v44 }
 0xf49   :  { %v3852_v63 = vpack.c.bf16 %v3548_v52, %v3532_v48  ;;  %v3854_v59 = vpack.c.bf16 %v3550_v38, %v3534_v7  ;;  %11189 = vmatpush3.bf16.msra.mxu1 %v12501_v15  ;;  %11217 = vmatpush3.bf16.msra.mxu0 %v12502_v37  ;;  %v3253_v27 = vpop.f32.mrb[84].mxu1  ;;  %v3306_v60 = vpop.f32.mrb[88].mxu0  ;;  %v12512_v15 = vld [vmem:[%s16386_s8 + $0x1f0] sm:$0xff]  }
 0xf4a   :  { %v3254_v22 = vadd.f32 %v3253_v27, %v14328_v56  ;;  %v3307_v35 = vadd.f32 %v3306_v60, %v14332_v49  ;;  %v3255_v47 = vpop.f32.mrb[85].mxu1  ;;  %v3308_v5 = vpop.f32.mrb[89].mxu0  ;;  %11190 = vmatprep.subr.bf16.mxu1 %v12503_v2  ;;  %11218 = vmatprep.subr.bf16.mxu0 %v12504_v55  ;;  %v12513_v38 = vld [vmem:[%s16386_s8 + $0x130] sm:$0xff]  }
 0xf4b   :  { %v3256_v34 = vadd.f32 %v3255_v47, %v14336_v29  ;;  %v3309_v30 = vadd.f32 %v3308_v5, %v14346_v39  ;;  %v3257_v8 = vpop.f32.mrb[86].mxu1  ;;  %v3310_v54 = vpop.f32.mrb[90].mxu0  ;;  %4781 = vmatprep.mubr.bf16.mxu1 %v3852_v63  ;;  %4830 = vmatprep.mubr.bf16.mxu0 %v3854_v59  ;;  %v12514_v63 = vld [vmem:[%s16386_s8 + $0x1b0] sm:$0xff]  }
 0xf4c   :  { %v3258_v42 = vadd.f32 %v3257_v8, %v14328_v56  ;;  %v3311_v28 = vadd.f32 %v3310_v54, %v14332_v49  ;;  %v3259_v26 = vpop.f32.mrb[87].mxu1  ;;  %v3312_v4 = vpop.f32.mrb[91].mxu0  ;;  %v12509_v56 = vld [vmem:[%s16386_s8 + $0x128] sm:$0xff]   ;;  %v3563_v1 = vmax.f32 %v3254_v22, 0.0  ;;  %v3565_v33 = vmax.f32 %v3307_v35, 0.0  ;;  %v12516_v22 = vld [vmem:[%s16386_s8 + $0x1f8] sm:$0xff]  }
 0xf4d   :  { %v3260_v57 = vadd.f32 %v3259_v26, %v14336_v29  ;;  %v3313_v32 = vadd.f32 %v3312_v4, %v14346_v39  ;;  %11191 = vmatpush3.bf16.msra.mxu1 %v12505_v10  ;;  %11219 = vmatpush3.bf16.msra.mxu0 %v12506_v40  ;;  %v12510_v49 = vld [vmem:[%s16386_s8 + $0x1a8] sm:$0xff]   ;;  %v12511_v39 = vld [vmem:[%s16386_s8 + $0x170] sm:$0xff]   ;;  %v3564_v37 = vmax.f32 %v3256_v34, 0.0  ;;  %v3566_v11 = vmax.f32 %v3309_v30, 0.0  ;;  %v12515_v40 = vld [vmem:[%s16386_s8 + $0x178] sm:$0xff]  }
 0xf4e   :  { %v3579_v17 = vmax.f32 %v3258_v42, 0.0  ;;  %v3581_v29 = vmax.f32 %v3311_v28, 0.0  ;;  %11192 = vmatprep.subr.bf16.mxu1 %v12507_v51  ;;  %11220 = vmatprep.subr.bf16.mxu0 %v12508_v50  ;;  %v12517_v28 = vld [vmem:[%s16386_s8 + $0x138] sm:$0xff]  }
 0xf4f   :  { %v3580_v44 = vmax.f32 %v3260_v57, 0.0  ;;  %v3582_v3 = vmax.f32 %v3313_v32, 0.0  ;;  %v12518_v26 = vld [vmem:[%s16386_s8 + $0x1b8] sm:$0xff]  }
 0xf50   :  { %v14443_v19 = vpack.c.bf16 %v3579_v17, %v3563_v1  ;;  %v14445_v2 = vpack.c.bf16 %v3581_v29, %v3565_v33  ;;  %v12520_v1 = vld [vmem:[%s16386_s8 + $0x2c0] sm:$0xff]  }
 0xf51   :  { %v14447_v55 = vpack.c.bf16 %v3580_v44, %v3564_v37  ;;  %v14449_v48 = vpack.c.bf16 %v3582_v3, %v3566_v11  ;;  %11193 = vmatpush3.bf16.msra.mxu1 %v12509_v56  ;;  %11221 = vmatpush3.bf16.msra.mxu0 %v12510_v49  ;;  %v3349_v7 = vpop.f32.mrb[88].mxu1  ;;  %v3402_v52 = vpop.f32.mrb[92].mxu0  ;;  %v12519_v49 = vld [vmem:[%s16386_s8 + $0x240] sm:$0xff]  }
 0xf52   :  { %v3350_v59 = vadd.f32 %v3349_v7, %v14413_v41  ;;  %v3403_v27 = vadd.f32 %v3402_v52, %v14419_v20  ;;  %v3351_v60 = vpop.f32.mrb[89].mxu1  ;;  %v3404_v10 = vpop.f32.mrb[93].mxu0  ;;  %11194 = vmatprep.subr.bf16.mxu1 %v12511_v39  ;;  %11222 = vmatprep.subr.bf16.mxu0 %v12512_v15 }
 0xf53   :  { %v3352_v35 = vadd.f32 %v3351_v60, %v14423_v21  ;;  %v3405_v47 = vadd.f32 %v3404_v10, %v14435_v0  ;;  %v3353_v5 = vpop.f32.mrb[90].mxu1  ;;  %v3406_v51 = vpop.f32.mrb[94].mxu0  ;;  %v12522_v60 = vld [vmem:[%s16386_s8 + $0x280] sm:$0xff]  }
 0xf54   :  { %v3354_v50 = vadd.f32 %v3353_v5, %v14413_v41  ;;  %v3407_v34 = vadd.f32 %v3406_v51, %v14419_v20  ;;  %v3355_v30 = vpop.f32.mrb[91].mxu1  ;;  %v3408_v8 = vpop.f32.mrb[95].mxu0  ;;  %v3535_v4 = vmax.f32 %v3350_v59, 0.0  ;;  %v3537_v57 = vmax.f32 %v3403_v27, 0.0  ;;  %v12521_v27 = vld [vmem:[%s16386_s8 + $0x200] sm:$0xff]   ;;  %v12524_v5 = vld [vmem:[%s16386_s8 + $0x2c8] sm:$0xff]  }
 0xf55   :  { %v3356_v54 = vadd.f32 %v3355_v30, %v14423_v21  ;;  %v3409_v42 = vadd.f32 %v3408_v8, %v14435_v0  ;;  %11195 = vmatpush3.bf16.msra.mxu1 %v12513_v38  ;;  %11223 = vmatpush3.bf16.msra.mxu0 %v12514_v63  ;;  %v3536_v33 = vmax.f32 %v3352_v35, 0.0  ;;  %v3538_v17 = vmax.f32 %v3405_v47, 0.0  ;;  %v12523_v47 = vld [vmem:[%s16386_s8 + $0x248] sm:$0xff]  }
 0xf56   :  { %v3551_v32 = vmax.f32 %v3354_v50, 0.0  ;;  %v3553_v56 = vmax.f32 %v3407_v34, 0.0  ;;  %11196 = vmatprep.subr.bf16.mxu1 %v12515_v40  ;;  %11224 = vmatprep.subr.bf16.mxu0 %v12516_v22  ;;  %v14509_v51 = vrot.slane %v14393_v9, %v14058_v25  ;;  %v14513_v50 = vrot.slane %v14393_v9, %v14309_v46 }
 0xf57   :  { %v3552_v29 = vmax.f32 %v3356_v54, 0.0  ;;  %v3554_v39 = vmax.f32 %v3409_v42, 0.0  ;;  %v14521_v42 = vrot.slane %v14393_v9, %v14063_v62 }
 0xf58   :  { %v14483_v15 = vpack.c.bf16 %v3551_v32, %v3535_v4  ;;  %v14485_v37 = vpack.c.bf16 %v3553_v56, %v3537_v57  ;;  %v12528_v56 = vld [vmem:[%s16386_s8 + $0x2d0] sm:$0xff]  }
 0xf59   :  { %v14487_v11 = vpack.c.bf16 %v3552_v29, %v3536_v33  ;;  %v14489_v44 = vpack.c.bf16 %v3554_v39, %v3538_v17  ;;  %11197 = vmatpush3.bf16.msra.mxu1 %v12517_v28  ;;  %11225 = vmatpush3.bf16.msra.mxu0 %v12518_v26  ;;  %v3359_v3 = vpop.f32.mrb[92].mxu1  ;;  %v3412_v7 = vpop.f32.mrb[96].mxu0 }
 0xf5a   :  { %v3360_v52 = vadd.f32 %v3359_v3, %v14413_v41  ;;  %v3413_v38 = vadd.f32 %v3412_v7, %v14419_v20  ;;  %v3361_v63 = vpop.f32.mrb[93].mxu1  ;;  %v3414_v59 = vpop.f32.mrb[97].mxu0  ;;  %11238 = vmatprep.subr.bf16.mxu1 %v12519_v49  ;;  %11266 = vmatprep.subr.bf16.mxu0 %v12520_v1 }
 0xf5b   :  { %v3362_v10 = vadd.f32 %v3361_v63, %v14423_v21  ;;  %v3415_v40 = vadd.f32 %v3414_v59, %v14435_v0  ;;  %v3363_v22 = vpop.f32.mrb[94].mxu1  ;;  %v3416_v35 = vpop.f32.mrb[98].mxu0  ;;  %v12529_v63 = vld [vmem:[%s16386_s8 + $0x210] sm:$0xff]  }
 0xf5c   :  { %v3364_v34 = vadd.f32 %v3363_v22, %v14413_v41  ;;  %v3417_v30 = vadd.f32 %v3416_v35, %v14419_v20  ;;  %4782 = vmatmul.mubr.bf16.vlgmr.msra.gmra.mrb[112].mxu1 %v14386_v36  ;;  %4831 = vmatmul.mubr.bf16.vlgmr.msra.gmra.mrb[116].mxu0 %v14388_v23  ;;  %v3365_v8 = vpop.f32.mrb[95].mxu1  ;;  %v3418_v54 = vpop.f32.mrb[99].mxu0  ;;  %v14529_v41 = vrot.slane %v14393_v9, %v14318_v58  ;;  %v3567_v36 = vmax.f32 %v3360_v52, 0.0  ;;  %v12527_v9 = vld [vmem:[%s16386_s8 + $0x250] sm:$0xff]   ;;  %v12531_v22 = vld [vmem:[%s16386_s8 + $0x258] sm:$0xff]  }
 0xf5d   :  { %v3366_v28 = vadd.f32 %v3365_v8, %v14423_v21  ;;  %v3419_v26 = vadd.f32 %v3418_v54, %v14435_v0  ;;  %4789 = vmatprep.mubr.bf16.mxu1 %v14447_v55  ;;  %4838 = vmatprep.mubr.bf16.mxu0 %v14449_v48  ;;  %v3569_v23 = vmax.f32 %v3413_v38, 0.0  ;;  %v12525_v21 = vld [vmem:[%s16386_s8 + $0x208] sm:$0xff]   ;;  %v3568_v55 = vmax.f32 %v3362_v10, 0.0  ;;  %v12530_v59 = vld [vmem:[%s16386_s8 + $0x290] sm:$0xff]   ;;  %v12532_v35 = vld [vmem:[%s16386_s8 + $0x2d8] sm:$0xff]  }
 0xf5e   :  { %v3583_v20 = vmax.f32 %v3364_v34, 0.0  ;;  %v3585_v4 = vmax.f32 %v3417_v30, 0.0  ;;  %11239 = vmatpush3.bf16.msra.mxu1 %v12521_v27  ;;  %11267 = vmatpush3.bf16.msra.mxu0 %v12522_v60  ;;  %v12526_v0 = vld [vmem:[%s16386_s8 + $0x288] sm:$0xff]   ;;  %v3570_v48 = vmax.f32 %v3415_v40, 0.0 }
 0xf5f   :  { %v3584_v57 = vmax.f32 %v3366_v28, 0.0  ;;  %v3586_v32 = vmax.f32 %v3419_v26, 0.0  ;;  %11240 = vmatprep.subr.bf16.mxu1 %v12523_v47  ;;  %11268 = vmatprep.subr.bf16.mxu0 %v12524_v5 }
 0xf60   :  { %v14543_v49 = vpack.c.bf16 %v3583_v20, %v3567_v36  ;;  %v14545_v1 = vpack.c.bf16 %v3585_v4, %v3569_v23 }
 0xf61   :  { %v14547_v33 = vpack.c.bf16 %v3584_v57, %v3568_v55  ;;  %v14549_v17 = vpack.c.bf16 %v3586_v32, %v3570_v48  ;;  %v3455_v29 = vpop.f32.mrb[96].mxu1  ;;  %v3508_v39 = vpop.f32.mrb[100].mxu0 }
 0xf62   :  { %11241 = vmatpush3.bf16.msra.mxu1 %v12525_v21  ;;  %11269 = vmatpush3.bf16.msra.mxu0 %v12526_v0  ;;  %v3456_v3 = vadd.f32 %v3455_v29, %v14509_v51  ;;  %v3509_v7 = vadd.f32 %v3508_v39, %v14513_v50  ;;  %v3457_v52 = vpop.f32.mrb[97].mxu1  ;;  %v3510_v38 = vpop.f32.mrb[101].mxu0  ;;  %v12536_v0 = vld [vmem:[%s16386_s8 + $0x2e0] sm:$0xff]  }
 0xf63   :  { %v3458_v27 = vadd.f32 %v3457_v52, %v14521_v42  ;;  %v3511_v60 = vadd.f32 %v3510_v38, %v14529_v41  ;;  %v3459_v10 = vpop.f32.mrb[98].mxu1  ;;  %v3512_v40 = vpop.f32.mrb[102].mxu0  ;;  %11242 = vmatprep.subr.bf16.mxu1 %v12527_v9  ;;  %11270 = vmatprep.subr.bf16.mxu0 %v12528_v56  ;;  %v12537_v52 = vld [vmem:[%s16386_s8 + $0x220] sm:$0xff]  }
 0xf64   :  { %v3460_v47 = vadd.f32 %v3459_v10, %v14509_v51  ;;  %v3513_v5 = vadd.f32 %v3512_v40, %v14513_v50  ;;  %4790 = vmatmul.mubr.bf16.gmra.mrb[116].mxu1 %v14443_v19  ;;  %4839 = vmatmul.mubr.bf16.gmra.mrb[120].mxu0 %v14445_v2  ;;  %v3461_v34 = vpop.f32.mrb[99].mxu1  ;;  %v3514_v30 = vpop.f32.mrb[103].mxu0  ;;  %v3539_v28 = vmax.f32 %v3456_v3, 0.0  ;;  %v3541_v26 = vmax.f32 %v3509_v7, 0.0  ;;  %v12533_v19 = vld [vmem:[%s16386_s8 + $0x218] sm:$0xff]   ;;  %v12538_v38 = vld [vmem:[%s16386_s8 + $0x2a0] sm:$0xff]  }
 0xf65   :  { %v3462_v8 = vadd.f32 %v3461_v34, %v14521_v42  ;;  %v3515_v54 = vadd.f32 %v3514_v30, %v14529_v41  ;;  %4879 = vmatprep.mubr.bf16.mxu1 %v14487_v11  ;;  %4928 = vmatprep.mubr.bf16.mxu0 %v14489_v44  ;;  %v12534_v2 = vld [vmem:[%s16386_s8 + $0x298] sm:$0xff]   ;;  %v3540_v20 = vmax.f32 %v3458_v27, 0.0  ;;  %v3542_v4 = vmax.f32 %v3511_v60, 0.0  ;;  %v12535_v44 = vld [vmem:[%s16386_s8 + $0x260] sm:$0xff]   ;;  %v12539_v10 = vld [vmem:[%s16386_s8 + $0x268] sm:$0xff]  }
 0xf66   :  { %v3555_v36 = vmax.f32 %v3460_v47, 0.0  ;;  %v3557_v23 = vmax.f32 %v3513_v5, 0.0  ;;  %11243 = vmatpush3.bf16.msra.mxu1 %v12529_v63  ;;  %11271 = vmatpush3.bf16.msra.mxu0 %v12530_v59  ;;  %v12540_v40 = vld [vmem:[%s16386_s8 + $0x2e8] sm:$0xff]  }
 0xf67   :  { %v3556_v21 = vmax.f32 %v3462_v8, 0.0  ;;  %v3558_v11 = vmax.f32 %v3515_v54, 0.0  ;;  %11244 = vmatprep.subr.bf16.mxu1 %v12531_v22  ;;  %11272 = vmatprep.subr.bf16.mxu0 %v12532_v35 }
 0xf68   :  { %v14587_v55 = vpack.c.bf16 %v3555_v36, %v3539_v28  ;;  %v14589_v48 = vpack.c.bf16 %v3557_v23, %v3541_v26  ;;  %v12541_v36 = vld [vmem:[%s16386_s8 + $0x228] sm:$0xff]  }
 0xf69   :  { %v14591_v57 = vpack.c.bf16 %v3556_v21, %v3540_v20  ;;  %v14593_v32 = vpack.c.bf16 %v3558_v11, %v3542_v4  ;;  %v3465_v9 = vpop.f32.mrb[100].mxu1  ;;  %v3518_v56 = vpop.f32.mrb[104].mxu0 }
 0xf6a   :  { %11245 = vmatpush3.bf16.msra.mxu1 %v12533_v19  ;;  %11273 = vmatpush3.bf16.msra.mxu0 %v12534_v2  ;;  %v3466_v29 = vadd.f32 %v3465_v9, %v14509_v51  ;;  %v3519_v39 = vadd.f32 %v3518_v56, %v14513_v50  ;;  %v3467_v3 = vpop.f32.mrb[101].mxu1  ;;  %v3520_v7 = vpop.f32.mrb[105].mxu0  ;;  %v12544_v2 = vld [vmem:[%s16386_s8 + $0x2f0] sm:$0xff]   ;;  %v12547_v9 = vld [vmem:[%s16386_s8 + $0x278] sm:$0xff]  }
 0xf6b   :  { %v3468_v63 = vadd.f32 %v3467_v3, %v14521_v42  ;;  %v3521_v59 = vadd.f32 %v3520_v7, %v14529_v41  ;;  %v3469_v27 = vpop.f32.mrb[102].mxu1  ;;  %v3522_v60 = vpop.f32.mrb[106].mxu0  ;;  %11246 = vmatprep.subr.bf16.mxu1 %v12535_v44  ;;  %11274 = vmatprep.subr.bf16.mxu0 %v12536_v0  ;;  %v12545_v44 = vld [vmem:[%s16386_s8 + $0x230] sm:$0xff]   ;;  %v12548_v56 = vld [vmem:[%s16386_s8 + $0x2f8] sm:$0xff]   ;;  %v12551_v3 = vld [vmem:[%s16386_s8 + $0x340] sm:$0xff]  }
 0xf6c   :  { %v3470_v22 = vadd.f32 %v3469_v27, %v14509_v51  ;;  %v3523_v35 = vadd.f32 %v3522_v60, %v14513_v50  ;;  %v3471_v47 = vpop.f32.mrb[103].mxu1  ;;  %v3524_v5 = vpop.f32.mrb[107].mxu0  ;;  %v3571_v8 = vmax.f32 %v3466_v29, 0.0  ;;  %v3573_v54 = vmax.f32 %v3519_v39, 0.0  ;;  %v12542_v51 = vld [vmem:[%s16386_s8 + $0x2a8] sm:$0xff]   ;;  %v12546_v0 = vld [vmem:[%s16386_s8 + $0x2b0] sm:$0xff]  }
 0xf6d   :  { %v3472_v34 = vadd.f32 %v3471_v47, %v14521_v42  ;;  %v3525_v30 = vadd.f32 %v3524_v5, %v14529_v41  ;;  %v3572_v50 = vmax.f32 %v3468_v63, 0.0  ;;  %v3574_v23 = vmax.f32 %v3521_v59, 0.0  ;;  %v12543_v41 = vld [vmem:[%s16386_s8 + $0x270] sm:$0xff]   ;;  %v12549_v29 = vld [vmem:[%s16386_s8 + $0x238] sm:$0xff]   ;;  %v12552_v7 = vld [vmem:[%s16386_s8 + $0x3c0] sm:$0xff]  }
 0xf6e   :  { %v3587_v28 = vmax.f32 %v3470_v22, 0.0  ;;  %v3589_v26 = vmax.f32 %v3523_v35, 0.0  ;;  %11247 = vmatpush3.bf16.msra.mxu1 %v12537_v52  ;;  %11275 = vmatpush3.bf16.msra.mxu0 %v12538_v38  ;;  %v12550_v39 = vld [vmem:[%s16386_s8 + $0x2b8] sm:$0xff]   ;;  %v12553_v52 = vld [vmem:[%s16386_s8 + $0x300] sm:$0xff]   ;;  %v12555_v63 = vld [vmem:[%s16386_s8 + $0x348] sm:$0xff]  }
 0xf6f   :  { %v3588_v19 = vmax.f32 %v3472_v34, 0.0  ;;  %v3590_v42 = vmax.f32 %v3525_v30, 0.0  ;;  %11248 = vmatprep.subr.bf16.mxu1 %v12539_v10  ;;  %11276 = vmatprep.subr.bf16.mxu0 %v12540_v40  ;;  %v12554_v38 = vld [vmem:[%s16386_s8 + $0x380] sm:$0xff]   ;;  %v12556_v59 = vld [vmem:[%s16386_s8 + $0x3c8] sm:$0xff]   ;;  %v12563_v10 = vld [vmem:[%s16386_s8 + $0x358] sm:$0xff]  }
 0xf70   :  { %v14627_v20 = vpack.c.bf16 %v3587_v28, %v3571_v8  ;;  %v14629_v4 = vpack.c.bf16 %v3589_v26, %v3573_v54  ;;  %v12557_v27 = vld [vmem:[%s16386_s8 + $0x308] sm:$0xff]   ;;  %v12564_v40 = vld [vmem:[%s16386_s8 + $0x3d8] sm:$0xff]   ;;  %v12575_v8 = vld [vmem:[%s16386_s8 + $0x370] sm:$0xff]  }
 0xf71   :  { %v14631_v21 = vpack.c.bf16 %v3588_v19, %v3572_v50  ;;  %v14633_v11 = vpack.c.bf16 %v3590_v42, %v3574_v23  ;;  %v12558_v60 = vld [vmem:[%s16386_s8 + $0x388] sm:$0xff]   ;;  %v12565_v22 = vld [vmem:[%s16386_s8 + $0x318] sm:$0xff]   ;;  %v12576_v54 = vld [vmem:[%s16386_s8 + $0x3f0] sm:$0xff]  }
 0xf72   :  { %11249 = vmatpush3.bf16.msra.mxu1 %v12541_v36  ;;  %11277 = vmatpush3.bf16.msra.mxu0 %v12542_v51  ;;  %v12566_v35 = vld [vmem:[%s16386_s8 + $0x398] sm:$0xff]   ;;  %v12571_v47 = vld [vmem:[%s16386_s8 + $0x368] sm:$0xff]   ;;  %v12577_v28 = vld [vmem:[%s16386_s8 + $0x330] sm:$0xff]  }
 0xf73   :  { %11250 = vmatprep.subr.bf16.mxu1 %v12543_v41  ;;  %11278 = vmatprep.subr.bf16.mxu0 %v12544_v2  ;;  %v12572_v5 = vld [vmem:[%s16386_s8 + $0x3e8] sm:$0xff]   ;;  %v12578_v26 = vld [vmem:[%s16386_s8 + $0x3b0] sm:$0xff]   ;;  %v12579_v36 = vld [vmem:[%s16386_s8 + $0x378] sm:$0xff]  }
 0xf74   :  { %v12573_v34 = vld [vmem:[%s16386_s8 + $0x328] sm:$0xff]   ;;  %v12580_v51 = vld [vmem:[%s16386_s8 + $0x3f8] sm:$0xff]  }
 0xf75   :  { %v12574_v30 = vld [vmem:[%s16386_s8 + $0x3a8] sm:$0xff]   ;;  %v12581_v50 = vld [vmem:[%s16386_s8 + $0x338] sm:$0xff]  }
 0xf76   :  { %11251 = vmatpush3.bf16.msra.mxu1 %v12545_v44  ;;  %11279 = vmatpush3.bf16.msra.mxu0 %v12546_v0  ;;  %v12582_v23 = vld [vmem:[%s16386_s8 + $0x3b8] sm:$0xff]   ;;  %v10372_v41 = vld [vmem:[%s16388_s10 + $0x8] ss:$0 sm:$0xff] }
 0xf77   :  { %11252 = vmatprep.subr.bf16.mxu1 %v12547_v9  ;;  %11280 = vmatprep.subr.bf16.mxu0 %v12548_v56 }
 0xf7a   :  { %11253 = vmatpush3.bf16.msra.mxu1 %v12549_v29  ;;  %11281 = vmatpush3.bf16.msra.mxu0 %v12550_v39 }
 0xf7b   :  { %11294 = vmatprep.subr.bf16.mxu1 %v12551_v3  ;;  %11322 = vmatprep.subr.bf16.mxu0 %v12552_v7 }
 0xf7d   :  { %4880 = vmatmul.mubr.bf16.vlgmr.msra.gmra.mrb[120].mxu1 %v14483_v15  ;;  %4929 = vmatmul.mubr.bf16.vlgmr.msra.gmra.mrb[124].mxu0 %v14485_v37  ;;  %v12559_v15 = vld [vmem:[%s16386_s8 + $0x350] sm:$0xff]  }
 0xf7e   :  { %4887 = vmatprep.mubr.bf16.mxu1 %v14547_v33  ;;  %4936 = vmatprep.mubr.bf16.mxu0 %v14549_v17  ;;  %v12560_v37 = vld [vmem:[%s16386_s8 + $0x3d0] sm:$0xff]  }
 0xf7f   :  { %11295 = vmatpush3.bf16.msra.mxu1 %v12553_v52  ;;  %11323 = vmatpush3.bf16.msra.mxu0 %v12554_v38  ;;  %v12561_v33 = vld [vmem:[%s16386_s8 + $0x310] sm:$0xff]  }
 0xf80   :  { %11296 = vmatprep.subr.bf16.mxu1 %v12555_v63  ;;  %11324 = vmatprep.subr.bf16.mxu0 %v12556_v59  ;;  %v12562_v17 = vld [vmem:[%s16386_s8 + $0x390] sm:$0xff]  }
 0xf83   :  { %11297 = vmatpush3.bf16.msra.mxu1 %v12557_v27  ;;  %11325 = vmatpush3.bf16.msra.mxu0 %v12558_v60 }
 0xf84   :  { %11298 = vmatprep.subr.bf16.mxu1 %v12559_v15  ;;  %11326 = vmatprep.subr.bf16.mxu0 %v12560_v37 }
 0xf85   :  { %4888 = vmatmul.mubr.bf16.gmra.mrb[124].mxu1 %v14543_v49  ;;  %4937 = vmatmul.mubr.bf16.gmra.mrb[128].mxu0 %v14545_v1  ;;  %v12567_v49 = vld [vmem:[%s16386_s8 + $0x360] sm:$0xff]  }
 0xf86   :  { %4977 = vmatprep.mubr.bf16.mxu1 %v14591_v57  ;;  %5026 = vmatprep.mubr.bf16.mxu0 %v14593_v32  ;;  %v12568_v1 = vld [vmem:[%s16386_s8 + $0x3e0] sm:$0xff]  }
 0xf87   :  { %11299 = vmatpush3.bf16.msra.mxu1 %v12561_v33  ;;  %11327 = vmatpush3.bf16.msra.mxu0 %v12562_v17  ;;  %v12569_v57 = vld [vmem:[%s16386_s8 + $0x320] sm:$0xff]  }
 0xf88   :  { %11300 = vmatprep.subr.bf16.mxu1 %v12563_v10  ;;  %11328 = vmatprep.subr.bf16.mxu0 %v12564_v40  ;;  %v12570_v32 = vld [vmem:[%s16386_s8 + $0x3a0] sm:$0xff]  }
 0xf8b   :  { %11301 = vmatpush3.bf16.msra.mxu1 %v12565_v22  ;;  %11329 = vmatpush3.bf16.msra.mxu0 %v12566_v35 }
 0xf8c   :  { %11302 = vmatprep.subr.bf16.mxu1 %v12567_v49  ;;  %11330 = vmatprep.subr.bf16.mxu0 %v12568_v1 }
 0xf8f   :  { %11303 = vmatpush3.bf16.msra.mxu1 %v12569_v57  ;;  %11331 = vmatpush3.bf16.msra.mxu0 %v12570_v32 }
 0xf90   :  { %11304 = vmatprep.subr.bf16.mxu1 %v12571_v47  ;;  %11332 = vmatprep.subr.bf16.mxu0 %v12572_v5 }
 0xf93   :  { %11305 = vmatpush3.bf16.msra.mxu1 %v12573_v34  ;;  %11333 = vmatpush3.bf16.msra.mxu0 %v12574_v30 }
 0xf94   :  { %11306 = vmatprep.subr.bf16.mxu1 %v12575_v8  ;;  %11334 = vmatprep.subr.bf16.mxu0 %v12576_v54 }
 0xf97   :  { %11307 = vmatpush3.bf16.msra.mxu1 %v12577_v28  ;;  %11335 = vmatpush3.bf16.msra.mxu0 %v12578_v26 }
 0xf98   :  { %11308 = vmatprep.subr.bf16.mxu1 %v12579_v36  ;;  %11336 = vmatprep.subr.bf16.mxu0 %v12580_v51 }
 0xf9b   :  { %11309 = vmatpush3.bf16.msra.mxu1 %v12581_v50  ;;  %11337 = vmatpush3.bf16.msra.mxu0 %v12582_v23 }
 0xf9c   :  { %11902 = vmatprep.subr.bf16.mxu0 %v13063_v31 }
 0xf9e   :  { %4978 = vmatmul.mubr.bf16.vlgmr.msra.gmra.mrb[128].mxu1 %v14587_v55  ;;  %5027 = vmatmul.mubr.bf16.vlgmr.msra.gmra.mrb[132].mxu0 %v14589_v48 }
 0xf9f   :  { %4985 = vmatprep.mubr.bf16.mxu1 %v14631_v21  ;;  %5034 = vmatprep.mubr.bf16.mxu0 %v14633_v11 }
 0xfa6   :  { %4986 = vmatmul.mubr.bf16.gmra.mrb[132].mxu1 %v14627_v20  ;;  %5035 = vmatmul.mubr.bf16.gmra.mrb[136].mxu0 %v14629_v4 }
 0xfa7   :  { %11904 = vmatprep.mubr.msk.bf16.mxu0 %vm13065_vm1, %v13063_v31 }
0x100f   :  { %v11142_v19 = vpop.f32.mrb[104].mxu1  ;;  %v11170_v42 = vpop.f32.mrb[108].mxu0 }
0x1010   :  { %v11143_v55 = vpop.f32.mrb[105].mxu1  ;;  %v11171_v2 = vpop.f32.mrb[109].mxu0 }
0x1011   :  { %v11144_v48 = vadd.f32 %v11143_v55, %v11142_v19  ;;  %v11172_v44 = vadd.f32 %v11171_v2, %v11170_v42  ;;  %v11145_v21 = vpop.f32.mrb[106].mxu1  ;;  %v11173_v0 = vpop.f32.mrb[110].mxu0 }
0x1012   :  { %v11146_v11 = vpop.f32.mrb[107].mxu1  ;;  %v11174_v9 = vpop.f32.mrb[111].mxu0 }
0x1013   :  { %v4686_v20 = vadd.f32 %v11144_v48, %v10372_v41  ;;  %v11147_v56 = vadd.f32 %v11146_v11, %v11145_v21  ;;  %v11175_v4 = vadd.f32 %v11174_v9, %v11173_v0 }
0x1015   :  { %v4735_v29 = vadd.f32 %v11172_v44, %v4686_v20  ;;  %v4689_v39 = vadd.f32 %v11147_v56, %v10372_v41 }
0x1017   :  { %v4738_v3 = vadd.f32 %v11175_v4, %v4689_v39  ;;  %v11148_v7 = vpop.f32.mrb[108].mxu1  ;;  %v11176_v52 = vpop.f32.mrb[112].mxu0 }
0x1018   :  { %v11149_v38 = vpop.f32.mrb[109].mxu1  ;;  %v11177_v63 = vpop.f32.mrb[113].mxu0 }
0x1019   :  { %v11150_v59 = vadd.f32 %v11149_v38, %v11148_v7  ;;  %v11178_v27 = vadd.f32 %v11177_v63, %v11176_v52  ;;  %v11151_v60 = vpop.f32.mrb[110].mxu1  ;;  %v11179_v15 = vpop.f32.mrb[114].mxu0 }
0x101a   :  { %v11152_v37 = vpop.f32.mrb[111].mxu1  ;;  %v11180_v33 = vpop.f32.mrb[115].mxu0 }
0x101b   :  { %v4694_v17 = vadd.f32 %v11150_v59, %v10372_v41  ;;  %v11153_v10 = vadd.f32 %v11152_v37, %v11151_v60  ;;  %v11181_v40 = vadd.f32 %v11180_v33, %v11179_v15 }
0x101d   :  { %v4743_v22 = vadd.f32 %v11178_v27, %v4694_v17  ;;  %v4697_v35 = vadd.f32 %v11153_v10, %v10372_v41 }
0x101f   :  { %v4746_v49 = vadd.f32 %v11181_v40, %v4697_v35 }
0x102f   :  { %v11198_v1 = vpop.f32.mrb[112].mxu1  ;;  %v11226_v57 = vpop.f32.mrb[116].mxu0 }
0x1030   :  { %v11199_v32 = vpop.f32.mrb[113].mxu1  ;;  %v11227_v47 = vpop.f32.mrb[117].mxu0 }
0x1031   :  { %v11200_v5 = vadd.f32 %v11199_v32, %v11198_v1  ;;  %v11228_v34 = vadd.f32 %v11227_v47, %v11226_v57  ;;  %v11201_v30 = vpop.f32.mrb[114].mxu1  ;;  %v11229_v8 = vpop.f32.mrb[118].mxu0 }
0x1032   :  { %v11202_v54 = vpop.f32.mrb[115].mxu1  ;;  %v11230_v28 = vpop.f32.mrb[119].mxu0 }
0x1033   :  { %v4784_v26 = vadd.f32 %v11200_v5, %v4735_v29  ;;  %v11203_v36 = vadd.f32 %v11202_v54, %v11201_v30  ;;  %v11231_v51 = vadd.f32 %v11230_v28, %v11229_v8 }
0x1035   :  { %v4833_v50 = vadd.f32 %v11228_v34, %v4784_v26  ;;  %v4787_v23 = vadd.f32 %v11203_v36, %v4738_v3 }
0x1037   :  { %v4836_v19 = vadd.f32 %v11231_v51, %v4787_v23  ;;  %v11204_v42 = vpop.f32.mrb[116].mxu1  ;;  %v11232_v55 = vpop.f32.mrb[120].mxu0 }
0x1038   :  { %v11205_v41 = vpop.f32.mrb[117].mxu1  ;;  %v11233_v2 = vpop.f32.mrb[121].mxu0 }
0x1039   :  { %v11206_v48 = vadd.f32 %v11205_v41, %v11204_v42  ;;  %v11234_v44 = vadd.f32 %v11233_v2, %v11232_v55  ;;  %v11207_v21 = vpop.f32.mrb[118].mxu1  ;;  %v11235_v0 = vpop.f32.mrb[122].mxu0 }
0x103a   :  { %v11208_v11 = vpop.f32.mrb[119].mxu1  ;;  %v11236_v9 = vpop.f32.mrb[123].mxu0 }
0x103b   :  { %v4792_v20 = vadd.f32 %v11206_v48, %v4743_v22  ;;  %v11209_v56 = vadd.f32 %v11208_v11, %v11207_v21  ;;  %v11237_v4 = vadd.f32 %v11236_v9, %v11235_v0 }
0x103d   :  { %v4841_v39 = vadd.f32 %v11234_v44, %v4792_v20  ;;  %v4795_v29 = vadd.f32 %v11209_v56, %v4746_v49 }
0x103f   :  { %v4844_v7 = vadd.f32 %v11237_v4, %v4795_v29 }
0x1050   :  { %v11254_v52 = vpop.f32.mrb[120].mxu1  ;;  %v11282_v38 = vpop.f32.mrb[124].mxu0 }
0x1051   :  { %v11255_v3 = vpop.f32.mrb[121].mxu1  ;;  %v11283_v63 = vpop.f32.mrb[125].mxu0 }
0x1052   :  { %v11256_v59 = vadd.f32 %v11255_v3, %v11254_v52  ;;  %v11284_v27 = vadd.f32 %v11283_v63, %v11282_v38  ;;  %v11257_v60 = vpop.f32.mrb[122].mxu1  ;;  %v11285_v15 = vpop.f32.mrb[126].mxu0 }
0x1053   :  { %v11258_v37 = vpop.f32.mrb[123].mxu1  ;;  %v11286_v33 = vpop.f32.mrb[127].mxu0 }
0x1054   :  { %v4882_v17 = vadd.f32 %v11256_v59, %v4833_v50  ;;  %v11259_v10 = vadd.f32 %v11258_v37, %v11257_v60  ;;  %v11287_v40 = vadd.f32 %v11286_v33, %v11285_v15 }
0x1056   :  { %v4931_v35 = vadd.f32 %v11284_v27, %v4882_v17  ;;  %v4885_v22 = vadd.f32 %v11259_v10, %v4836_v19 }
0x1058   :  { %v4934_v1 = vadd.f32 %v11287_v40, %v4885_v22  ;;  %v11260_v57 = vpop.f32.mrb[124].mxu1  ;;  %v11288_v32 = vpop.f32.mrb[128].mxu0 }
0x1059   :  { %v11261_v49 = vpop.f32.mrb[125].mxu1  ;;  %v11289_v47 = vpop.f32.mrb[129].mxu0 }
0x105a   :  { %v11262_v5 = vadd.f32 %v11261_v49, %v11260_v57  ;;  %v11290_v34 = vadd.f32 %v11289_v47, %v11288_v32  ;;  %v11263_v30 = vpop.f32.mrb[126].mxu1  ;;  %v11291_v8 = vpop.f32.mrb[130].mxu0 }
0x105b   :  { %v11264_v54 = vpop.f32.mrb[127].mxu1  ;;  %v11292_v28 = vpop.f32.mrb[131].mxu0 }
0x105c   :  { %v4890_v26 = vadd.f32 %v11262_v5, %v4841_v39  ;;  %v11265_v36 = vadd.f32 %v11264_v54, %v11263_v30  ;;  %v11293_v51 = vadd.f32 %v11292_v28, %v11291_v8 }
0x105e   :  { %v4939_v23 = vadd.f32 %v11290_v34, %v4890_v26  ;;  %v4893_v50 = vadd.f32 %v11265_v36, %v4844_v7 }
0x1060   :  { %v4942_v42 = vadd.f32 %v11293_v51, %v4893_v50 }
0x1071   :  { %v11310_v55 = vpop.f32.mrb[128].mxu1  ;;  %v11338_v41 = vpop.f32.mrb[132].mxu0 }
0x1072   :  { %v11311_v19 = vpop.f32.mrb[129].mxu1  ;;  %v11339_v2 = vpop.f32.mrb[133].mxu0 }
0x1073   :  { %v11312_v48 = vadd.f32 %v11311_v19, %v11310_v55  ;;  %v11340_v44 = vadd.f32 %v11339_v2, %v11338_v41  ;;  %v11313_v21 = vpop.f32.mrb[130].mxu1  ;;  %v11341_v0 = vpop.f32.mrb[134].mxu0 }
0x1074   :  { %v11314_v11 = vpop.f32.mrb[131].mxu1  ;;  %v11342_v9 = vpop.f32.mrb[135].mxu0 }
0x1075   :  { %v4980_v20 = vadd.f32 %v11312_v48, %v4931_v35  ;;  %v11315_v56 = vadd.f32 %v11314_v11, %v11313_v21  ;;  %v11343_v4 = vadd.f32 %v11342_v9, %v11341_v0  ;;  %v12583_v11 = vld [vmem:[%s16381_s3 + $0x10] sm:$0xff]   ;;  %v12584_v9 = vld [vmem:[%s16381_s3 + $0x18] sm:$0xff]  }
0x1076   :  { %11894 = vmatprep.subr.bf16.mxu1 %v12583_v11 }
0x1077   :  { %v5029_v29 = vadd.f32 %v11340_v44, %v4980_v20  ;;  %v4983_v39 = vadd.f32 %v11315_v56, %v4934_v1  ;;  %11895 = vmatpush3.bf16.msra.mxu1 %v12583_v11 }
0x1078   :  { %11896 = vmatprep.subr.bf16.mxu1 %v12584_v9 }
0x1079   :  { %v5032_v52 = vadd.f32 %v11343_v4, %v4983_v39  ;;  %v11316_v38 = vpop.f32.mrb[132].mxu1  ;;  %v11344_v3 = vpop.f32.mrb[136].mxu0  ;;  %v5043_v7 = vadd.f32 %v5029_v29, %v14072_v45 }
0x107a   :  { %v11317_v63 = vpop.f32.mrb[133].mxu1  ;;  %v11345_v59 = vpop.f32.mrb[137].mxu0 }
0x107b   :  { %v11318_v27 = vadd.f32 %v11317_v63, %v11316_v38  ;;  %v11346_v60 = vadd.f32 %v11345_v59, %v11344_v3  ;;  %v11319_v15 = vpop.f32.mrb[134].mxu1  ;;  %v11347_v37 = vpop.f32.mrb[138].mxu0  ;;  %v5047_v33 = vsel %vm90_vm0, %v5043_v7, 0.0  ;;  %v5044_v17 = vadd.f32 %v5032_v52, %v14074_v53  ;;  %11897 = vmatpush3.bf16.msra.mxu1 %v12584_v9 }
0x107c   :  { %v11320_v10 = vpop.f32.mrb[135].mxu1  ;;  %v11348_v40 = vpop.f32.mrb[139].mxu0  ;;  %5048 = vadd.xlane.f32.xlu1 %v5047_v33  ;;  %11908 = vmatprep.subr.bf16.mxu1 %v13063_v31 }
0x107d   :  { %v4988_v35 = vadd.f32 %v11318_v27, %v4939_v23  ;;  %v11321_v22 = vadd.f32 %v11320_v10, %v11319_v15  ;;  %v11349_v1 = vadd.f32 %v11348_v40, %v11347_v37  ;;  %v5050_v57 = vsel %vm90_vm0, %v5044_v17, 0.0 }
0x107e   :  { %5051 = vadd.xlane.f32.xlu0 %v5050_v57 }
0x107f   :  { %v5037_v45 = vadd.f32 %v11346_v60, %v4988_v35  ;;  %v4991_v32 = vadd.f32 %v11321_v22, %v4942_v42  ;;  %v13029_v60 = vld [vmem:[%s16388_s10] sm:$0xff] }
0x1080   :  { %v5102_v15 = vrot.slane %v13029_v60, %v14309_v46  ;;  %v5110_v35 = vrot.slane %v13029_v60, %v14318_v58 }
0x1081   :  { %v5040_v49 = vadd.f32 %v11349_v1, %v4991_v32  ;;  %v5045_v47 = vadd.f32 %v5037_v45, %v14111_v6 }
0x1083   :  { %v5053_v5 = vsel %vm90_vm0, %v5045_v47, 0.0  ;;  %v5046_v34 = vadd.f32 %v5040_v49, %v14109_v18 }
0x1084   :  { %5054 = vadd.xlane.f32.xlu1 %v5053_v5 }
0x1085   :  { %v5056_v53 = vsel %vm90_vm0, %v5046_v34, 0.0 }
0x1086   :  { %5057 = vadd.xlane.f32.xlu0 %v5056_v53 }
0x1109   :  { %v5049_v30 = vpop.xlane.xlu1 %5048 }
0x110a   :  { %v5059_v8 = vmul.f32 0.03125, %v5049_v30 }
0x110b   :  { %v5052_v54 = vpop.xlane.xlu0 %5051 }
0x110c   :  { %v5063_v28 = vsub.f32 %v5043_v7, %v5059_v8  ;;  %v5060_v26 = vmul.f32 0.03125, %v5052_v54 }
0x110e   :  { %v5064_v36 = vsub.f32 %v5044_v17, %v5060_v26  ;;  %v5067_v51 = vmul.f32 %v5063_v28, %v5063_v28 }
0x1110   :  { %v5071_v23 = vsel %vm90_vm0, %v5067_v51, 0.0  ;;  %v5068_v50 = vmul.f32 %v5064_v36, %v5064_v36 }
0x1111   :  { %5072 = vadd.xlane.f32.xlu1 %v5071_v23  ;;  %v5055_v6 = vpop.xlane.xlu1 %5054 }
0x1112   :  { %v5061_v42 = vmul.f32 0.03125, %v5055_v6  ;;  %v5074_v55 = vsel %vm90_vm0, %v5068_v50, 0.0 }
0x1113   :  { %5075 = vadd.xlane.f32.xlu0 %v5074_v55  ;;  %v5058_v18 = vpop.xlane.xlu0 %5057 }
0x1114   :  { %v5065_v41 = vsub.f32 %v5045_v47, %v5061_v42  ;;  %v5062_v19 = vmul.f32 0.03125, %v5058_v18 }
0x1116   :  { %v5066_v2 = vsub.f32 %v5046_v34, %v5062_v19  ;;  %v5069_v48 = vmul.f32 %v5065_v41, %v5065_v41 }
0x1118   :  { %v5077_v44 = vsel %vm90_vm0, %v5069_v48, 0.0  ;;  %v5070_v21 = vmul.f32 %v5066_v2, %v5066_v2 }
0x1119   :  { %5078 = vadd.xlane.f32.xlu1 %v5077_v44 }
0x111a   :  { %v5080_v0 = vsel %vm90_vm0, %v5070_v21, 0.0 }
0x111b   :  { %5081 = vadd.xlane.f32.xlu0 %v5080_v0 }
0x119e   :  { %v5073_v20 = vpop.xlane.xlu1 %5072 }
0x119f   :  { %v5083_v56 = vmul.f32 0.03125, %v5073_v20 }
0x11a0   :  { %v5076_v4 = vpop.xlane.xlu0 %5075 }
0x11a1   :  { %v5087_v29 = vadd.f32 1e-05, %v5083_v56  ;;  %v5084_v39 = vmul.f32 0.03125, %v5076_v4 }
0x11a3   :  { %12865 = vrsqrt.f32 %v5087_v29  ;;  %v5088_v52 = vadd.f32 1e-05, %v5084_v39 }
0x11a5   :  { %12867 = vrsqrt.f32 %v5088_v52 }
0x11a6   :  { %v5079_v38 = vpop.xlane.xlu1 %5078 }
0x11a7   :  { %v5085_v3 = vmul.f32 0.03125, %v5079_v38 }
0x11a8   :  { %v5082_v7 = vpop.xlane.xlu0 %5081 }
0x11a9   :  { %v5089_v63 = vadd.f32 1e-05, %v5085_v3  ;;  %v5086_v59 = vmul.f32 0.03125, %v5082_v7 }
0x11ab   :  { %12869 = vrsqrt.f32 %v5089_v63  ;;  %v5090_v27 = vadd.f32 1e-05, %v5086_v59 }
0x11ad   :  { %v12866_v37 = vpop.eup %12865  ;;  %12871 = vrsqrt.f32 %v5090_v27 }
0x11ae   :  { %v5095_v33 = vmul.f32 %v12866_v37, %v5063_v28  ;;  %v10503_v28 = vld [vmem:[%s16387_s9 + $0x2] sm:$0x3] }
0x11af   :  { %v12868_v17 = vpop.eup %12867  ;;  %v5135_v26 = vrot.slane %v10503_v28, %v13196_v16 }
0x11b0   :  { %v5096_v10 = vmul.f32 %v12868_v17, %v5064_v36  ;;  %v5103_v40 = vmul.f32 %v5102_v15, %v5095_v33 }
0x11b2   :  { %v5104_v22 = vmul.f32 %v5102_v15, %v5096_v10  ;;  %v14793_v1 = vadd.f32 %v5110_v35, %v5103_v40 }
0x11b4   :  { %v14795_v57 = vadd.f32 %v5110_v35, %v5104_v22 }
0x11b5   :  { %v12870_v45 = vpop.eup %12869 }
0x11b6   :  { %v5097_v32 = vmul.f32 %v12870_v45, %v5065_v41  ;;  %v5130_v49 = vpack.c.bf16 %v14795_v57, %v14793_v1 }
0x11b7   :  { %v12872_v47 = vpop.eup %12871 }
0x11b8   :  { %v5105_v5 = vmul.f32 %v5102_v15, %v5097_v32  ;;  %v5098_v34 = vmul.f32 %v12872_v47, %v5066_v2  ;;  %11898 = vmatprep.mubr.msk.bf16.mxu1 %vm90_vm0, %v5130_v49 }
0x11ba   :  { %v5106_v53 = vmul.f32 %v5102_v15, %v5098_v34  ;;  %v14800_v30 = vadd.f32 %v5110_v35, %v5105_v5 }
0x11bc   :  { %v14802_v8 = vadd.f32 %v5110_v35, %v5106_v53 }
0x11be   :  { %v5131_v54 = vpack.c.bf16 %v14802_v8, %v14800_v30 }
0x11c0   :  { %11899 = vmatmul.mubr.msk.bf16.vlgmr.msra.gmra.mrb[136].mxu1 %vm90_vm0, %v5131_v54 }
0x11c1   :  { %11910 = vmatprep.mubr.msk.bf16.mxu1 %vm13065_vm1, %v13063_v31 }
0x1293   :  { %v11900_v36 = vpop.f32.mrb[136].mxu1 }
0x1294   :  { %v5188_v51 = vpop.f32.mrb[137].mxu1  ;;  %v5197_v50 = vadd.f32 %v11900_v36, %v5135_v26 }
0x1295   :  { %v11901_v23 = vpop.f32.mrb[138].mxu1  ;;  %v5189_v55 = vadd.f32 %v5188_v51, %v5135_v26 }
0x1296   :  { %v5200_v6 = vadd.f32 %v11901_v23, %v5135_v26  ;;  %v5191_v42 = vpop.f32.mrb[139].mxu1 }
0x1297   :  { %v5192_v18 = vadd.f32 %v5191_v42, %v5135_v26 }
0x1298   :  { %v12317_v41 = vpack.i.bf16 %v5200_v6, %v5197_v50  ;;  %v14813_v19 = vpack.c.bf16 %v5200_v6, %v5197_v50 }
0x1299   :  { %v12302_v2 = vpack.i.bf16 %v5192_v18, %v5189_v55  ;;  %v5243_v48 = vpack.c.bf16 %v5192_v18, %v5189_v55 }
0x129b   :  { %12303 = vrot.lane.b32.xlu0 %v12302_v2, %s13064_s15  ;;  %12298 = vrot.lane.b32.xlu1 %v12302_v2, %s13062_s30 }
0x129f   :  { %12318 = vrot.lane.b32.xlu0 %v12317_v41, %s13064_s15  ;;  %12308 = vrot.lane.b32.xlu1 %v12302_v2, %s13061_s29  ;;  %v14900_v2 = vld [vmem:[%s16380_s2] sm:$0xff] }
0x12a3   :  { %12313 = vrot.lane.b32.xlu1 %v12317_v41, %s13062_s30  ;;  %5252 = vrot.lane.b32.xlu0 %v5243_v48, %s13066_s16 }
0x12a7   :  { %12323 = vrot.lane.b32.xlu1 %v12317_v41, %s13061_s29 }
0x130d   :  { %v12304_v44 = vpop.permute.xlu0 %12303  ;;  %v12299_v21 = vpop.permute.xlu1 %12298 }
0x130e   :  { %v12306_v0 = vunpack.i.h.bf16 %v12304_v44  ;;  %v12305_v11 = vunpack.i.l.bf16 %v12304_v44  ;;  %v12301_v9 = vunpack.i.h.bf16 %v12299_v21  ;;  %v12300_v20 = vunpack.i.l.bf16 %v12299_v21 }
0x1310   :  { %v14822_v56 = vpack.c.bf16 %v12306_v0, %v12305_v11  ;;  %v14824_v4 = vpack.c.bf16 %v12301_v9, %v12300_v20  ;;  %v14908_v0 = vld [vmem:[%s16380_s2 + $0x8] sm:$0xff] }
0x1311   :  { %v12319_v29 = vpop.permute.xlu0 %12318  ;;  %v12309_v39 = vpop.permute.xlu1 %12308 }
0x1312   :  { %v12311_v52 = vunpack.i.h.bf16 %v12309_v39  ;;  %v12310_v38 = vunpack.i.l.bf16 %v12309_v39  ;;  %5302 = vrot.lane.b32.xlu1 %v14824_v4, %s13066_s16  ;;  %5352 = vrot.lane.b32.xlu0 %v14822_v56, %s13066_s16  ;;  %v12321_v3 = vunpack.i.h.bf16 %v12319_v29  ;;  %v12320_v7 = vunpack.i.l.bf16 %v12319_v29 }
0x1314   :  { %v14830_v63 = vpack.c.bf16 %v12311_v52, %v12310_v38  ;;  %v14837_v33 = vpack.c.bf16 %v12321_v3, %v12320_v7 }
0x1315   :  { %v12314_v59 = vpop.permute.xlu1 %12313  ;;  %v5253_v27 = vpop.permute.xlu0 %5252 }
0x1316   :  { %v12316_v60 = vunpack.i.h.bf16 %v12314_v59  ;;  %v12315_v15 = vunpack.i.l.bf16 %v12314_v59  ;;  %v5258_v37 = vsel %vm197_vm2, %v5253_v27, 0  ;;  %5402 = vrot.lane.b32.xlu1 %v14830_v63, %s13066_s16  ;;  %5452 = vrot.lane.b32.xlu0 %v14813_v19, %s13066_s16 }
0x1317   :  { %11903 = vmatpush3.bf16.xpose.msra.mxu0 %v5258_v37 }
0x1318   :  { %v14839_v17 = vpack.c.bf16 %v12316_v60, %v12315_v15  ;;  %11914 = vmatprep.subr.bf16.mxu0 %v13063_v31 }
0x1319   :  { %v12324_v10 = vpop.permute.xlu1 %12323 }
0x131a   :  { %v12326_v40 = vunpack.i.h.bf16 %v12324_v10  ;;  %v12325_v35 = vunpack.i.l.bf16 %v12324_v10  ;;  %5502 = vrot.lane.b32.xlu1 %v14839_v17, %s13066_s16  ;;  %5552 = vrot.lane.b32.xlu0 %v14837_v33, %s13066_s16 }
0x131c   :  { %v14846_v22 = vpack.c.bf16 %v12326_v40, %v12325_v35 }
0x131e   :  { %5602 = vrot.lane.b32.xlu1 %v14846_v22, %s13066_s16  ;;  %11905 = vmatmul.mubr.msk.bf16.vlgmr.msra.gmra.mrb[140].mxu0 %vm197_vm2, %v5243_v48 }
0x131f   :  { %11916 = vmatprep.mubr.msk.bf16.mxu0 %vm13065_vm1, %v13063_v31 }
0x1322   :  { %5867 = vrot.lane.b32.xlu1 %v5243_v48, %s13067_s17 }
0x1384   :  { %v5303_v45 = vpop.permute.xlu1 %5302  ;;  %v5353_v32 = vpop.permute.xlu0 %5352 }
0x1385   :  { %v5308_v49 = vsel %vm197_vm2, %v5303_v45, 0  ;;  %v5358_v47 = vsel %vm197_vm2, %v5353_v32, 0 }
0x1386   :  { %11909 = vmatpush3.bf16.xpose.msra.mxu1 %v5308_v49  ;;  %11915 = vmatpush3.bf16.xpose.msra.mxu0 %v5358_v47 }
0x1387   :  { %11920 = vmatprep.subr.bf16.mxu1 %v13063_v31  ;;  %11926 = vmatprep.subr.bf16.mxu0 %v13063_v31 }
0x1388   :  { %v5403_v5 = vpop.permute.xlu1 %5402  ;;  %v5453_v34 = vpop.permute.xlu0 %5452 }
0x1389   :  { %v5408_v53 = vsel %vm197_vm2, %v5403_v5, 0  ;;  %v5458_v54 = vsel %vm197_vm2, %v5453_v34, 0 }
0x138c   :  { %v5503_v28 = vpop.permute.xlu1 %5502  ;;  %v5553_v26 = vpop.permute.xlu0 %5552 }
0x138d   :  { %11911 = vmatmul.mubr.msk.bf16.vlgmr.msra.gmra.mrb[140].mxu1 %vm197_vm2, %v14824_v4  ;;  %11917 = vmatmul.mubr.msk.bf16.vlgmr.msra.gmra.mrb[144].mxu0 %vm197_vm2, %v14822_v56  ;;  %v5508_v36 = vsel %vm197_vm2, %v5503_v28, 0  ;;  %v5558_v51 = vsel %vm197_vm2, %v5553_v26, 0 }
0x138e   :  { %11921 = vmatpush3.bf16.xpose.msra.mxu1 %v5408_v53  ;;  %11927 = vmatpush3.bf16.xpose.msra.mxu0 %v5458_v54 }
0x138f   :  { %11922 = vmatprep.mubr.msk.bf16.mxu1 %vm13065_vm1, %v13063_v31  ;;  %11928 = vmatprep.mubr.msk.bf16.mxu0 %vm13065_vm1, %v13063_v31 }
0x1390   :  { %11932 = vmatprep.subr.bf16.mxu1 %v13063_v31  ;;  %11938 = vmatprep.subr.bf16.mxu0 %v13063_v31  ;;  %v5603_v23 = vpop.permute.xlu1 %5602 }
0x1391   :  { %v5608_v50 = vsel %vm197_vm2, %v5603_v23, 0 }
0x1394   :  { %v5868_v6 = vpop.permute.xlu1 %5867 }
0x1395   :  { %11923 = vmatmul.mubr.msk.bf16.vlgmr.msra.gmra.mrb[144].mxu1 %vm197_vm2, %v14830_v63  ;;  %11929 = vmatmul.mubr.msk.bf16.vlgmr.msra.gmra.mrb[148].mxu0 %vm197_vm2, %v14813_v19 }
0x1396   :  { %11933 = vmatpush3.bf16.xpose.msra.mxu1 %v5508_v36  ;;  %11939 = vmatpush3.bf16.xpose.msra.mxu0 %v5558_v51 }
0x1397   :  { %11934 = vmatprep.mubr.msk.bf16.mxu1 %vm13065_vm1, %v13063_v31  ;;  %11940 = vmatprep.mubr.msk.bf16.mxu0 %vm13065_vm1, %v13063_v31 }
0x1398   :  { %11944 = vmatprep.subr.bf16.mxu1 %v13063_v31  ;;  %11950 = vmatprep.subr.bf16.mxu0 %v13063_v31 }
0x139d   :  { %11935 = vmatmul.mubr.msk.bf16.vlgmr.msra.gmra.mrb[148].mxu1 %vm197_vm2, %v14839_v17  ;;  %11941 = vmatmul.mubr.msk.bf16.vlgmr.msra.gmra.mrb[152].mxu0 %vm197_vm2, %v14837_v33 }
0x139e   :  { %11945 = vmatpush3.bf16.xpose.msra.mxu1 %v5608_v50  ;;  %11951 = vmatpush3.bf16.msra.mxu0 %v5868_v6 }
0x139f   :  { %11946 = vmatprep.mubr.msk.bf16.mxu1 %vm13065_vm1, %v13063_v31  ;;  %11956 = vmatprep.subr.bf16.mxu1 %v13063_v31 }
0x13a0   :  { %11952 = vmatprep.mubr.msk.bf16.mxu0 %vm13065_vm1, %v13063_v31  ;;  %11962 = vmatprep.subr.bf16.mxu0 %v13063_v31 }
0x13a5   :  { %11947 = vmatmul.mubr.msk.bf16.vlgmr.msra.gmra.mrb[152].mxu1 %vm197_vm2, %v14846_v22 }
0x13a6   :  { %11958 = vmatprep.mubr.msk.bf16.mxu1 %vm13065_vm1, %v13063_v31 }
0x13f1   :  { %v5294_v42 = vpop.f32.mrb[140].mxu0 }
0x13f2   :  { %v5651_v55 = vmul.f32 0.35355338, %v5294_v42  ;;  %v11906_v18 = vpop.f32.mrb[141].mxu0 }
0x13f3   :  { %v5297_v41 = vpop.f32.mrb[142].mxu0 }
0x13f4   :  { %v14903_v48 = vadd.f32 %v14900_v2, %v5651_v55  ;;  %v5652_v44 = vmul.f32 0.35355338, %v5297_v41  ;;  %v11907_v21 = vpop.f32.mrb[143].mxu0 }
0x13f6   :  { %v14911_v11 = vadd.f32 %v14908_v0, %v5652_v44  ;;  %v5683_v9 = vsel %vm627_vm3, %v14903_v48, -inf }
0x13f7   :  { %5684 = vmax.xlane.f32.xlu0 %v5683_v9 }
0x13f8   :  { %v5686_v20 = vsel %vm627_vm3, %v14911_v11, -inf }
0x13f9   :  { %5687 = vmax.xlane.f32.xlu1 %v5686_v20 }
0x1460   :  { %v5344_v29 = vpop.f32.mrb[140].mxu1  ;;  %v5394_v39 = vpop.f32.mrb[144].mxu0 }
0x1461   :  { %v5653_v52 = vmul.f32 0.35355338, %v5344_v29  ;;  %v5655_v38 = vmul.f32 0.35355338, %v5394_v39  ;;  %v11912_v3 = vpop.f32.mrb[141].mxu1  ;;  %v11918_v7 = vpop.f32.mrb[145].mxu0 }
0x1462   :  { %v5347_v59 = vpop.f32.mrb[142].mxu1  ;;  %v5397_v27 = vpop.f32.mrb[146].mxu0 }
0x1463   :  { %v14918_v60 = vadd.f32 %v14900_v2, %v5653_v52  ;;  %v14921_v15 = vadd.f32 %v14900_v2, %v5655_v38  ;;  %v5654_v37 = vmul.f32 0.35355338, %v5347_v59  ;;  %v11913_v10 = vpop.f32.mrb[143].mxu1  ;;  %v11919_v40 = vpop.f32.mrb[147].mxu0  ;;  %v5656_v45 = vmul.f32 0.35355338, %v5397_v27 }
0x1465   :  { %v14924_v35 = vadd.f32 %v14908_v0, %v5654_v37  ;;  %v5689_v32 = vsel %vm627_vm3, %v14918_v60, -inf  ;;  %v5695_v49 = vsel %vm627_vm3, %v14921_v15, -inf  ;;  %v14933_v53 = vadd.f32 %v14908_v0, %v5656_v45 }
0x1466   :  { %5690 = vmax.xlane.f32.xlu0 %v5689_v32  ;;  %5696 = vmax.xlane.f32.xlu1 %v5695_v49 }
0x1467   :  { %v5692_v34 = vsel %vm627_vm3, %v14924_v35, -inf  ;;  %v5698_v9 = vsel %vm627_vm3, %v14933_v53, -inf }
0x1468   :  { %v5444_v47 = vpop.f32.mrb[144].mxu1  ;;  %v5494_v5 = vpop.f32.mrb[148].mxu0 }
0x1469   :  { %v5657_v54 = vmul.f32 0.35355338, %v5444_v47  ;;  %v5659_v28 = vmul.f32 0.35355338, %v5494_v5  ;;  %v11924_v26 = vpop.f32.mrb[145].mxu1  ;;  %v11930_v36 = vpop.f32.mrb[149].mxu0 }
0x146a   :  { %v5447_v51 = vpop.f32.mrb[146].mxu1  ;;  %5693 = vmax.xlane.f32.xlu0 %v5692_v34  ;;  %v5497_v23 = vpop.f32.mrb[150].mxu0 }
0x146b   :  { %v14936_v50 = vadd.f32 %v14900_v2, %v5657_v54  ;;  %v5658_v6 = vmul.f32 0.35355338, %v5447_v51  ;;  %v11925_v42 = vpop.f32.mrb[147].mxu1  ;;  %v11931_v55 = vpop.f32.mrb[151].mxu0  ;;  %v14939_v18 = vadd.f32 %v14900_v2, %v5659_v28  ;;  %v5660_v41 = vmul.f32 0.35355338, %v5497_v23 }
0x146d   :  { %v14942_v44 = vadd.f32 %v14908_v0, %v5658_v6  ;;  %v5701_v21 = vsel %vm627_vm3, %v14936_v50, -inf  ;;  %v14949_v20 = vadd.f32 %v14908_v0, %v5660_v41  ;;  %v5707_v38 = vsel %vm627_vm3, %v14939_v18, -inf }
0x146e   :  { %5702 = vmax.xlane.f32.xlu1 %v5701_v21  ;;  %5699 = vmax.xlane.f32.xlu0 %v5698_v9 }
0x146f   :  { %v5704_v52 = vsel %vm627_vm3, %v14942_v44, -inf  ;;  %v5710_v47 = vsel %vm627_vm3, %v14949_v20, -inf }
0x1470   :  { %v5544_v29 = vpop.f32.mrb[148].mxu1  ;;  %v5594_v39 = vpop.f32.mrb[152].mxu0 }
0x1471   :  { %v5661_v3 = vmul.f32 0.35355338, %v5544_v29  ;;  %v5663_v7 = vmul.f32 0.35355338, %v5594_v39  ;;  %v11936_v59 = vpop.f32.mrb[149].mxu1  ;;  %v11942_v27 = vpop.f32.mrb[153].mxu0 }
0x1472   :  { %v5547_v37 = vpop.f32.mrb[150].mxu1  ;;  %5705 = vmax.xlane.f32.xlu0 %v5704_v52  ;;  %5708 = vmax.xlane.f32.xlu1 %v5707_v38  ;;  %v5597_v10 = vpop.f32.mrb[154].mxu0 }
0x1473   :  { %v14956_v40 = vadd.f32 %v14900_v2, %v5661_v3  ;;  %v5662_v45 = vmul.f32 0.35355338, %v5547_v37  ;;  %v11937_v32 = vpop.f32.mrb[151].mxu1  ;;  %v11943_v49 = vpop.f32.mrb[155].mxu0  ;;  %v14961_v5 = vadd.f32 %v14900_v2, %v5663_v7  ;;  %v5664_v54 = vmul.f32 0.35355338, %v5597_v10 }
0x1475   :  { %v14964_v34 = vadd.f32 %v14908_v0, %v5662_v45  ;;  %v5713_v28 = vsel %vm627_vm3, %v14956_v40, -inf  ;;  %v14969_v36 = vadd.f32 %v14908_v0, %v5664_v54  ;;  %v5719_v42 = vsel %vm627_vm3, %v14961_v5, -inf }
0x1476   :  { %5714 = vmax.xlane.f32.xlu1 %v5713_v28  ;;  %5711 = vmax.xlane.f32.xlu0 %v5710_v47 }
0x1477   :  { %v5716_v6 = vsel %vm627_vm3, %v14964_v34, -inf  ;;  %v5722_v52 = vsel %vm627_vm3, %v14969_v36, -inf }
0x1478   :  { %v5644_v26 = vpop.f32.mrb[152].mxu1 }
0x1479   :  { %v5665_v51 = vmul.f32 0.35355338, %v5644_v26  ;;  %v11948_v23 = vpop.f32.mrb[153].mxu1 }
0x147a   :  { %v5647_v55 = vpop.f32.mrb[154].mxu1  ;;  %5717 = vmax.xlane.f32.xlu0 %v5716_v6  ;;  %5720 = vmax.xlane.f32.xlu1 %v5719_v42 }
0x147b   :  { %v14976_v41 = vadd.f32 %v14900_v2, %v5665_v51  ;;  %v5666_v21 = vmul.f32 0.35355338, %v5647_v55  ;;  %v11949_v9 = vpop.f32.mrb[155].mxu1 }
0x147d   :  { %v14979_v29 = vadd.f32 %v14908_v0, %v5666_v21  ;;  %v5725_v39 = vsel %vm627_vm3, %v14976_v41, -inf }
0x147e   :  { %5726 = vmax.xlane.f32.xlu1 %v5725_v39  ;;  %5723 = vmax.xlane.f32.xlu0 %v5722_v52 }
0x147f   :  { %v5728_v38 = vsel %vm627_vm3, %v14979_v29, -inf }
0x1482   :  { %5729 = vmax.xlane.f32.xlu0 %v5728_v38 }
0x1484   :  { %v5685_v2 = vpop.xlane.xlu0 %5684 }
0x1485   :  { %v5731_v3 = vsub.f32 %v14903_v48, %v5685_v2 }
0x1486   :  { %v5688_v0 = vpop.xlane.xlu1 %5687 }
0x1487   :  { %v5732_v7 = vsub.f32 %v14911_v11, %v5688_v0  ;;  %v5747_v59 = vmul.f32 1.442695, %v5731_v3 }
0x1489   :  { %12873 = vpow2.f32 %v5747_v59 }
0x148f   :  { %5961 = vrot.lane.b32.xlu1 %v14822_v56, %s13067_s17  ;;  %v5749_v56 = vmul.f32 1.442695, %v5732_v7 }
0x1491   :  { %12875 = vpow2.f32 %v5749_v56 }
0x1493   :  { %6008 = vrot.lane.b32.xlu1 %v14830_v63, %s13067_s17  ;;  %v14999_v63 = vpop.eup %12873 }
0x1497   :  { %6102 = vrot.lane.b32.xlu1 %v14839_v17, %s13067_s17 }
0x1498   :  { %5914 = vrot.lane.b32.xlu0 %v14824_v4, %s13067_s17 }
0x149b   :  { %v15001_v27 = vpop.eup %12875 }
0x149c   :  { %6055 = vrot.lane.b32.xlu0 %v14813_v19, %s13067_s17  ;;  %v5782_v4 = vsel %vm627_vm3, %v15001_v27, 0.0  ;;  %v5779_v19 = vsel %vm627_vm3, %v14999_v63, 0.0 }
0x14bb   :  { %5783 = vadd.xlane.f32.xlu0 %v5782_v4  ;;  %5780 = vadd.xlane.f32.xlu1 %v5779_v19 }
0x14f3   :  { %v5697_v17 = vpop.xlane.xlu1 %5696  ;;  %v5691_v48 = vpop.xlane.xlu0 %5690 }
0x14f4   :  { %v5735_v11 = vsub.f32 %v14921_v15, %v5697_v17  ;;  %v5733_v37 = vsub.f32 %v14918_v60, %v5691_v48 }
0x14f6   :  { %v5751_v10 = vmul.f32 1.442695, %v5733_v37  ;;  %v5755_v45 = vmul.f32 1.442695, %v5735_v11 }
0x14f7   :  { %v5694_v32 = vpop.xlane.xlu0 %5693 }
0x14f8   :  { %v5734_v49 = vsub.f32 %v14924_v35, %v5694_v32  ;;  %12877 = vpow2.f32 %v5751_v10 }
0x14f9   :  { %12879 = vpow2.f32 %v5755_v45 }
0x14fa   :  { %v5753_v47 = vmul.f32 1.442695, %v5734_v49 }
0x14fb   :  { %v5703_v54 = vpop.xlane.xlu1 %5702  ;;  %v5700_v28 = vpop.xlane.xlu0 %5699 }
0x14fc   :  { %12881 = vpow2.f32 %v5753_v47  ;;  %v5737_v26 = vsub.f32 %v14936_v50, %v5703_v54  ;;  %v5736_v51 = vsub.f32 %v14933_v53, %v5700_v28 }
0x14fe   :  { %v5759_v23 = vmul.f32 1.442695, %v5737_v26  ;;  %v5757_v6 = vmul.f32 1.442695, %v5736_v51 }
0x14ff   :  { %v5709_v15 = vpop.xlane.xlu1 %5708  ;;  %v5706_v42 = vpop.xlane.xlu0 %5705 }
0x1500   :  { %12883 = vpow2.f32 %v5759_v23  ;;  %v5739_v60 = vsub.f32 %v14939_v18, %v5709_v15  ;;  %v5738_v55 = vsub.f32 %v14942_v44, %v5706_v42 }
0x1501   :  { %12885 = vpow2.f32 %v5757_v6 }
0x1502   :  { %v5763_v35 = vmul.f32 1.442695, %v5739_v60  ;;  %v5761_v21 = vmul.f32 1.442695, %v5738_v55  ;;  %v15014_v9 = vpop.eup %12877 }
0x1503   :  { %v5715_v39 = vpop.xlane.xlu1 %5714  ;;  %v5712_v52 = vpop.xlane.xlu0 %5711  ;;  %v5785_v38 = vsel %vm627_vm3, %v15014_v9, 0.0 }
0x1504   :  { %12887 = vpow2.f32 %v5763_v35  ;;  %v5741_v50 = vsub.f32 %v14956_v40, %v5715_v39  ;;  %v5740_v53 = vsub.f32 %v14949_v20, %v5712_v52  ;;  %v15020_v2 = vpop.eup %12879  ;;  %5786 = vadd.xlane.f32.xlu1 %v5785_v38 }
0x1505   :  { %12889 = vpow2.f32 %v5761_v21  ;;  %v5791_v56 = vsel %vm627_vm3, %v15020_v2, 0.0 }
0x1506   :  { %v15022_v18 = vpop.eup %12881  ;;  %v5767_v44 = vmul.f32 1.442695, %v5741_v50  ;;  %v5765_v0 = vmul.f32 1.442695, %v5740_v53 }
0x1507   :  { %v5721_v3 = vpop.xlane.xlu1 %5720  ;;  %v5718_v7 = vpop.xlane.xlu0 %5717  ;;  %v5788_v59 = vsel %vm627_vm3, %v15022_v18, 0.0 }
0x1508   :  { %12891 = vpow2.f32 %v5767_v44  ;;  %v5743_v40 = vsub.f32 %v14961_v5, %v5721_v3  ;;  %v5742_v20 = vsub.f32 %v14964_v34, %v5718_v7  ;;  %5789 = vadd.xlane.f32.xlu0 %v5788_v59  ;;  %5792 = vadd.xlane.f32.xlu1 %v5791_v56 }
0x1509   :  { %12893 = vpow2.f32 %v5765_v0 }
0x150a   :  { %v15030_v4 = vpop.eup %12883  ;;  %v5771_v19 = vmul.f32 1.442695, %v5743_v40  ;;  %v5769_v17 = vmul.f32 1.442695, %v5742_v20 }
0x150b   :  { %v15032_v48 = vpop.eup %12885  ;;  %v5727_v11 = vpop.xlane.xlu1 %5726  ;;  %v5797_v10 = vsel %vm627_vm3, %v15030_v4, 0.0 }
0x150c   :  { %v5724_v37 = vpop.xlane.xlu0 %5723  ;;  %12895 = vpow2.f32 %v5771_v19  ;;  %v5745_v5 = vsub.f32 %v14976_v41, %v5727_v11  ;;  %v5794_v45 = vsel %vm627_vm3, %v15032_v48, 0.0  ;;  %5798 = vadd.xlane.f32.xlu1 %v5797_v10 }
0x150d   :  { %v5744_v34 = vsub.f32 %v14969_v36, %v5724_v37  ;;  %12897 = vpow2.f32 %v5769_v17  ;;  %5795 = vadd.xlane.f32.xlu0 %v5794_v45 }
0x150e   :  { %v15040_v32 = vpop.eup %12887  ;;  %v5775_v49 = vmul.f32 1.442695, %v5745_v5 }
0x150f   :  { %v5773_v47 = vmul.f32 1.442695, %v5744_v34  ;;  %v15042_v54 = vpop.eup %12889  ;;  %v5803_v26 = vsel %vm627_vm3, %v15040_v32, 0.0  ;;  %v5962_v0 = vpop.permute.xlu1 %5961 }
0x1510   :  { %v5730_v28 = vpop.xlane.xlu0 %5729  ;;  %12899 = vpow2.f32 %v5775_v49  ;;  %v5800_v36 = vsel %vm627_vm3, %v15042_v54, 0.0  ;;  %5804 = vadd.xlane.f32.xlu1 %v5803_v26 }
0x1511   :  { %v5746_v41 = vsub.f32 %v14979_v29, %v5730_v28  ;;  %12901 = vpow2.f32 %v5773_v47  ;;  %5801 = vadd.xlane.f32.xlu0 %v5800_v36 }
0x1512   :  { %v15049_v51 = vpop.eup %12891 }
0x1513   :  { %v5777_v23 = vmul.f32 1.442695, %v5746_v41  ;;  %v15051_v6 = vpop.eup %12893  ;;  %v5809_v42 = vsel %vm627_vm3, %v15049_v51, 0.0  ;;  %v6009_v3 = vpop.permute.xlu1 %6008 }
0x1514   :  { %v5915_v15 = vpop.permute.xlu0 %5914  ;;  %v5806_v60 = vsel %vm627_vm3, %v15051_v6, 0.0  ;;  %5810 = vadd.xlane.f32.xlu1 %v5809_v42 }
0x1515   :  { %12903 = vpow2.f32 %v5777_v23  ;;  %11957 = vmatpush3.bf16.msra.mxu1 %v5915_v15  ;;  %5807 = vadd.xlane.f32.xlu0 %v5806_v60 }
0x1516   :  { %v15057_v29 = vpop.eup %12895  ;;  %11968 = vmatprep.subr.bf16.mxu1 %v13063_v31 }
0x1517   :  { %v15060_v55 = vpop.eup %12897  ;;  %v5815_v35 = vsel %vm627_vm3, %v15057_v29, 0.0  ;;  %v15082_v7 = vpop.permute.xlu1 %6102 }
0x1518   :  { %v5812_v21 = vsel %vm627_vm3, %v15060_v55, 0.0  ;;  %5816 = vadd.xlane.f32.xlu1 %v5815_v35  ;;  %v6056_v59 = vpop.permute.xlu0 %6055 }
0x1519   :  { %5813 = vadd.xlane.f32.xlu0 %v5812_v21 }
0x151a   :  { %v15066_v39 = vpop.eup %12899 }
0x151b   :  { %v15068_v52 = vpop.eup %12901  ;;  %v5821_v50 = vsel %vm627_vm3, %v15066_v39, 0.0 }
0x151c   :  { %v5818_v53 = vsel %vm627_vm3, %v15068_v52, 0.0  ;;  %5822 = vadd.xlane.f32.xlu1 %v5821_v50 }
0x151d   :  { %5819 = vadd.xlane.f32.xlu0 %v5818_v53 }
0x151f   :  { %v15074_v38 = vpop.eup %12903 }
0x1520   :  { %v5824_v44 = vsel %vm627_vm3, %v15074_v38, 0.0 }
0x1521   :  { %5825 = vadd.xlane.f32.xlu0 %v5824_v44 }
0x152d   :  { %6196 = vrot.lane.b32.xlu1 %v14846_v22, %s13067_s17 }
0x1537   :  { %6149 = vrot.lane.b32.xlu0 %v14837_v33, %s13067_s17 }
0x1548   :  { %v5781_v40 = vpop.xlane.xlu1 %5780  ;;  %v5784_v20 = vpop.xlane.xlu0 %5783 }
0x1549   :  { %12905 = vrcp.f32 %v5781_v40 }
0x154a   :  { %12907 = vrcp.f32 %v5784_v20 }
0x1553   :  { %v12906_v56 = vpop.eup %12905 }
0x1554   :  { %v12908_v19 = vpop.eup %12907  ;;  %v5828_v17 = vmul.f32 %v12906_v56, %v14999_v63 }
0x1555   :  { %v5830_v11 = vmul.f32 %v12908_v19, %v15001_v27 }
0x1557   :  { %v5859_v37 = vpack.c.bf16 %v5830_v11, %v5828_v17 }
0x1559   :  { %11953 = vmatmul.mubr.msk.bf16.vlgmr.msra.gmra.mrb[156].mxu0 %vm627_vm3, %v5859_v37 }
0x155a   :  { %11963 = vmatpush3.bf16.msra.mxu0 %v5962_v0  ;;  %11964 = vmatprep.mubr.msk.bf16.mxu0 %vm13065_vm1, %v13063_v31 }
0x155b   :  { %11974 = vmatprep.subr.bf16.mxu0 %v13063_v31 }
0x1591   :  { %v5787_v33 = vpop.xlane.xlu1 %5786 }
0x1592   :  { %12909 = vrcp.f32 %v5787_v33 }
0x1595   :  { %v5790_v22 = vpop.xlane.xlu0 %5789  ;;  %v5793_v10 = vpop.xlane.xlu1 %5792 }
0x1596   :  { %12911 = vrcp.f32 %v5790_v22 }
0x1597   :  { %12913 = vrcp.f32 %v5793_v10 }
0x1599   :  { %v5799_v5 = vpop.xlane.xlu1 %5798 }
0x159a   :  { %v5796_v34 = vpop.xlane.xlu0 %5795 }
0x159b   :  { %12915 = vrcp.f32 %v5796_v34 }
0x159c   :  { %v12910_v63 = vpop.eup %12909  ;;  %12917 = vrcp.f32 %v5799_v5 }
0x159d   :  { %v5805_v27 = vpop.xlane.xlu1 %5804  ;;  %v5832_v47 = vmul.f32 %v12910_v63, %v15014_v9 }
0x159e   :  { %v5802_v45 = vpop.xlane.xlu0 %5801 }
0x159f   :  { %12919 = vrcp.f32 %v5802_v45 }
0x15a0   :  { %v12912_v49 = vpop.eup %12911  ;;  %12921 = vrcp.f32 %v5805_v27 }
0x15a1   :  { %v5834_v28 = vmul.f32 %v12912_v49, %v15022_v18  ;;  %v5811_v26 = vpop.xlane.xlu1 %5810  ;;  %v12914_v23 = vpop.eup %12913 }
0x15a2   :  { %v5808_v41 = vpop.xlane.xlu0 %5807  ;;  %v5836_v9 = vmul.f32 %v12914_v23, %v15020_v2 }
0x15a3   :  { %v5860_v36 = vpack.c.bf16 %v5834_v28, %v5832_v47  ;;  %12923 = vrcp.f32 %v5808_v41 }
0x15a4   :  { %12925 = vrcp.f32 %v5811_v26 }
0x15a5   :  { %11959 = vmatmul.mubr.msk.bf16.vlgmr.msra.gmra.mrb[156].mxu1 %vm627_vm3, %v5860_v36  ;;  %v12916_v15 = vpop.eup %12915  ;;  %v5817_v42 = vpop.xlane.xlu1 %5816 }
0x15a6   :  { %11969 = vmatpush3.bf16.msra.mxu1 %v6009_v3  ;;  %v5814_v60 = vpop.xlane.xlu0 %5813  ;;  %11970 = vmatprep.mubr.msk.bf16.mxu1 %vm13065_vm1, %v13063_v31  ;;  %v5838_v18 = vmul.f32 %v12916_v15, %v15032_v48  ;;  %v12918_v35 = vpop.eup %12917 }
0x15a7   :  { %11980 = vmatprep.subr.bf16.mxu1 %v13063_v31  ;;  %12927 = vrcp.f32 %v5814_v60  ;;  %v5840_v0 = vmul.f32 %v12918_v35, %v15030_v4 }
0x15a8   :  { %v5861_v21 = vpack.c.bf16 %v5838_v18, %v5836_v9  ;;  %12929 = vrcp.f32 %v5817_v42 }
0x15a9   :  { %v12920_v50 = vpop.eup %12919  ;;  %v5823_v53 = vpop.xlane.xlu1 %5822 }
0x15aa   :  { %v5820_v44 = vpop.xlane.xlu0 %5819  ;;  %v5842_v3 = vmul.f32 %v12920_v50, %v15042_v54  ;;  %11965 = vmatmul.mubr.msk.bf16.vlgmr.msra.gmra.mrb[160].mxu0 %vm627_vm3, %v5861_v21  ;;  %v12922_v40 = vpop.eup %12921 }
0x15ab   :  { %11975 = vmatpush3.bf16.msra.mxu0 %v6056_v59  ;;  %12931 = vrcp.f32 %v5820_v44  ;;  %11976 = vmatprep.mubr.msk.bf16.mxu0 %vm13065_vm1, %v13063_v31  ;;  %v5844_v56 = vmul.f32 %v12922_v40, %v15040_v32 }
0x15ac   :  { %12933 = vrcp.f32 %v5823_v53  ;;  %v5862_v2 = vpack.c.bf16 %v5842_v3, %v5840_v0  ;;  %11986 = vmatprep.subr.bf16.mxu0 %v13063_v31  ;;  %v12585_v53 = vld [vmem:[%s16383_s5 + $0x10] sm:$0xff]  }
0x15ad   :  { %v12924_v48 = vpop.eup %12923  ;;  %v6197_v5 = vpop.permute.xlu1 %6196 }
0x15ae   :  { %v5826_v20 = vpop.xlane.xlu0 %5825  ;;  %v5846_v4 = vmul.f32 %v12924_v48, %v15051_v6  ;;  %11971 = vmatmul.mubr.msk.bf16.vlgmr.msra.gmra.mrb[160].mxu1 %vm627_vm3, %v5862_v2  ;;  %v12926_v54 = vpop.eup %12925  ;;  %v12586_v2 = vld [vmem:[%s16383_s5 + $0x18] sm:$0xff]  }
0x15af   :  { %12935 = vrcp.f32 %v5826_v20  ;;  %11981 = vmatpush3.bf16.msra.mxu1 %v15082_v7  ;;  %11982 = vmatprep.mubr.msk.bf16.mxu1 %vm13065_vm1, %v13063_v31  ;;  %v5848_v11 = vmul.f32 %v12926_v54, %v15049_v51 }
0x15b0   :  { %v5863_v59 = vpack.c.bf16 %v5846_v4, %v5844_v56  ;;  %11992 = vmatprep.subr.bf16.mxu1 %v13063_v31 }
0x15b1   :  { %v12928_v19 = vpop.eup %12927 }
0x15b2   :  { %v6150_v17 = vpop.permute.xlu0 %6149  ;;  %v5850_v32 = vmul.f32 %v12928_v19, %v15060_v55  ;;  %11977 = vmatmul.mubr.msk.bf16.vlgmr.msra.gmra.mrb[164].mxu0 %vm627_vm3, %v5863_v59  ;;  %v12930_v6 = vpop.eup %12929 }
0x15b3   :  { %11987 = vmatpush3.bf16.msra.mxu0 %v6150_v17  ;;  %11988 = vmatprep.mubr.msk.bf16.mxu0 %vm13065_vm1, %v13063_v31  ;;  %v5852_v22 = vmul.f32 %v12930_v6, %v15057_v29 }
0x15b4   :  { %v5864_v7 = vpack.c.bf16 %v5850_v32, %v5848_v11  ;;  %11998 = vmatprep.subr.bf16.mxu0 %v12585_v53 }
0x15b5   :  { %v12932_v37 = vpop.eup %12931 }
0x15b6   :  { %v12934_v33 = vpop.eup %12933  ;;  %v5854_v10 = vmul.f32 %v12932_v37, %v15068_v52  ;;  %11983 = vmatmul.mubr.msk.bf16.vlgmr.msra.gmra.mrb[164].mxu1 %vm627_vm3, %v5864_v7 }
0x15b7   :  { %11993 = vmatpush3.bf16.msra.mxu1 %v6197_v5  ;;  %11994 = vmatprep.mubr.msk.bf16.mxu1 %vm13065_vm1, %v13063_v31  ;;  %v5856_v34 = vmul.f32 %v12934_v33, %v15066_v39 }
0x15b8   :  { %v5865_v55 = vpack.c.bf16 %v5854_v10, %v5852_v22 }
0x15b9   :  { %v12936_v51 = vpop.eup %12935 }
0x15ba   :  { %v5858_v63 = vmul.f32 %v12936_v51, %v15074_v38  ;;  %11989 = vmatmul.mubr.msk.bf16.vlgmr.msra.gmra.mrb[168].mxu0 %vm627_vm3, %v5865_v55 }
0x15bb   :  { %11999 = vmatpush3.bf16.msra.mxu0 %v12585_v53 }
0x15bc   :  { %v5866_v27 = vpack.c.bf16 %v5858_v63, %v5856_v34  ;;  %12000 = vmatprep.subr.bf16.mxu0 %v12586_v2 }
0x15be   :  { %11995 = vmatmul.mubr.msk.bf16.vlgmr.msra.gmra.mrb[168].mxu1 %vm627_vm3, %v5866_v27 }
0x15bf   :  { %12001 = vmatpush3.bf16.msra.mxu0 %v12586_v2 }
0x162c   :  { %v5907_v29 = vpop.f32.mrb[156].mxu0 }
0x162d   :  { %v11954_v52 = vpop.f32.mrb[157].mxu0 }
0x162e   :  { %v5910_v45 = vpop.f32.mrb[158].mxu0 }
0x162f   :  { %v11955_v49 = vpop.f32.mrb[159].mxu0 }
0x1678   :  { %v5954_v47 = vpop.f32.mrb[156].mxu1 }
0x1679   :  { %v11960_v28 = vpop.f32.mrb[157].mxu1 }
0x167a   :  { %v5957_v26 = vpop.f32.mrb[158].mxu1 }
0x167b   :  { %v12327_v41 = vpack.i.bf16 %v5957_v26, %v5954_v47  ;;  %v11961_v36 = vpop.f32.mrb[159].mxu1 }
0x167d   :  { %12328 = vrot.lane.b32.xlu0 %v12327_v41, %s13068_s22  ;;  %v6001_v23 = vpop.f32.mrb[160].mxu0 }
0x167e   :  { %v11966_v39 = vpop.f32.mrb[161].mxu0 }
0x167f   :  { %v6004_v15 = vpop.f32.mrb[162].mxu0 }
0x1680   :  { %v12332_v38 = vpack.i.bf16 %v6004_v15, %v6001_v23  ;;  %v11967_v42 = vpop.f32.mrb[163].mxu0 }
0x1681   :  { %v6048_v60 = vpop.f32.mrb[160].mxu1 }
0x1682   :  { %12333 = vrot.lane.b32.xlu1 %v12332_v38, %s13069_s23  ;;  %v11972_v9 = vpop.f32.mrb[161].mxu1 }
0x1683   :  { %v6051_v18 = vpop.f32.mrb[162].mxu1 }
0x1684   :  { %v12337_v35 = vpack.i.bf16 %v6051_v18, %v6048_v60  ;;  %v11973_v21 = vpop.f32.mrb[163].mxu1 }
0x1685   :  { %v6095_v50 = vpop.f32.mrb[164].mxu0 }
0x1686   :  { %12338 = vrot.lane.b32.xlu1 %v12337_v35, %s13070_s26  ;;  %v11978_v44 = vpop.f32.mrb[165].mxu0 }
0x1687   :  { %v6098_v0 = vpop.f32.mrb[166].mxu0 }
0x1688   :  { %v11979_v3 = vpop.f32.mrb[167].mxu0 }
0x1689   :  { %v6142_v40 = vpop.f32.mrb[164].mxu1 }
0x168a   :  { %v11984_v48 = vpop.f32.mrb[165].mxu1 }
0x168b   :  { %v6145_v20 = vpop.f32.mrb[166].mxu1 }
0x168c   :  { %v12342_v56 = vpack.i.bf16 %v6145_v20, %v6142_v40  ;;  %v11985_v4 = vpop.f32.mrb[167].mxu1 }
0x168d   :  { %v6189_v54 = vpop.f32.mrb[168].mxu0 }
0x168e   :  { %12343 = vrot.lane.b32.xlu0 %v12342_v56, %s13068_s22  ;;  %v11990_v59 = vpop.f32.mrb[169].mxu0 }
0x168f   :  { %v6192_v19 = vpop.f32.mrb[170].mxu0 }
0x1690   :  { %v12347_v17 = vpack.i.bf16 %v6192_v19, %v6189_v54  ;;  %v11991_v11 = vpop.f32.mrb[171].mxu0 }
0x1691   :  { %v6236_v32 = vpop.f32.mrb[168].mxu1 }
0x1692   :  { %v11996_v6 = vpop.f32.mrb[169].mxu1  ;;  %12348 = vrot.lane.b32.xlu0 %v12347_v17, %s13069_s23 }
0x1693   :  { %v6239_v7 = vpop.f32.mrb[170].mxu1 }
0x1694   :  { %v12352_v37 = vpack.i.bf16 %v6239_v7, %v6236_v32  ;;  %v11997_v33 = vpop.f32.mrb[171].mxu1 }
0x1696   :  { %12353 = vrot.lane.b32.xlu1 %v12352_v37, %s13070_s26 }
0x16ef   :  { %v12329_v22 = vpop.permute.xlu0 %12328 }
0x16f0   :  { %v12331_v5 = vunpack.i.h.bf16 %v12329_v22  ;;  %v12330_v51 = vunpack.i.l.bf16 %v12329_v22 }
0x16f2   :  { %v6268_v27 = vsel %vm197_vm2, %v5910_v45, %v12331_v5  ;;  %v6267_v52 = vsel %vm197_vm2, %v5907_v29, %v12330_v51 }
0x16f4   :  { %v12334_v10 = vpop.permute.xlu1 %12333 }
0x16f5   :  { %v12336_v55 = vunpack.i.h.bf16 %v12334_v10  ;;  %v12335_v34 = vunpack.i.l.bf16 %v12334_v10 }
0x16f7   :  { %v6269_v28 = vsel %vm627_vm3, %v6267_v52, %v12335_v34  ;;  %v6270_v26 = vsel %vm627_vm3, %v6268_v27, %v12336_v55 }
0x16f8   :  { %v12339_v63 = vpop.permute.xlu1 %12338 }
0x16f9   :  { %v12341_v49 = vunpack.i.h.bf16 %v12339_v63  ;;  %v12340_v47 = vunpack.i.l.bf16 %v12339_v63 }
0x16fb   :  { %v6271_v41 = vsel %vm1216_vm4, %v6269_v28, %v12340_v47  ;;  %v6272_v36 = vsel %vm1216_vm4, %v6270_v26, %v12341_v49 }
0x16fc   :  { %v6303_v23 = vpack.c.bf16 %v6272_v36, %v6271_v41 }
0x16fe   :  { %12002 = vmatprep.mubr.msk.bf16.mxu0 %vm90_vm0, %v6303_v23 }
0x1700   :  { %v12344_v39 = vpop.permute.xlu0 %12343 }
0x1701   :  { %v12346_v38 = vunpack.i.h.bf16 %v12344_v39  ;;  %v12345_v42 = vunpack.i.l.bf16 %v12344_v39 }
0x1703   :  { %v6298_v9 = vsel %vm197_vm2, %v6098_v0, %v12346_v38  ;;  %v6297_v18 = vsel %vm197_vm2, %v6095_v50, %v12345_v42  ;;  %v15156_v50 = vld [vmem:[%s16388_s10 + $0x10] sm:$0xff]  ;;  %v13032_v38 = vld [vmem:[%s16387_s9 + $0x2] sm:$0x3] }
0x1704   :  { %v12349_v15 = vpop.permute.xlu0 %12348  ;;  %v6308_v0 = vrot.slane %v15156_v50, %v13196_v16  ;;  %v15188_v42 = vrot.slane %v13032_v38, %v13591_v61 }
0x1705   :  { %v12351_v45 = vunpack.i.h.bf16 %v12349_v15  ;;  %v12350_v60 = vunpack.i.l.bf16 %v12349_v15 }
0x1707   :  { %v6299_v53 = vsel %vm627_vm3, %v6297_v18, %v12350_v60  ;;  %v6300_v44 = vsel %vm627_vm3, %v6298_v9, %v12351_v45 }
0x1708   :  { %v12354_v29 = vpop.permute.xlu1 %12353 }
0x1709   :  { %v12356_v35 = vunpack.i.h.bf16 %v12354_v29  ;;  %v12355_v21 = vunpack.i.l.bf16 %v12354_v29 }
0x170b   :  { %v6301_v3 = vsel %vm1216_vm4, %v6299_v53, %v12355_v21  ;;  %v6302_v40 = vsel %vm1216_vm4, %v6300_v44, %v12356_v35 }
0x170c   :  { %v6304_v2 = vpack.c.bf16 %v6302_v40, %v6301_v3 }
0x170e   :  { %12003 = vmatmul.mubr.msk.bf16.vlgmr.msra.gmra.mrb[172].mxu0 %vm90_vm0, %v6304_v2 }
0x170f   :  { %12018 = vmatprep.mubr.msk.bf16.mxu0 %vm90_vm0, %v13183_v12 }
0x17e1   :  { %v12004_v48 = vpop.f32.mrb[172].mxu0 }
0x17e2   :  { %v6361_v20 = vpop.f32.mrb[173].mxu0  ;;  %v6370_v56 = vadd.f32 %v12004_v48, %v6308_v0 }
0x17e3   :  { %v6362_v4 = vadd.f32 %v6361_v20, %v6308_v0  ;;  %v12005_v54 = vpop.f32.mrb[174].mxu0 }
0x17e4   :  { %v6364_v59 = vpop.f32.mrb[175].mxu0  ;;  %v6378_v11 = vadd.f32 %v6370_v56, %v14800_v30  ;;  %v6373_v12 = vadd.f32 %v12005_v54, %v6308_v0 }
0x17e5   :  { %v6376_v19 = vadd.f32 %v6362_v4, %v14793_v1  ;;  %v6365_v17 = vadd.f32 %v6364_v59, %v6308_v0  ;;  %v12587_v1 = vld [vmem:[%s16382_s4 + $0x10] sm:$0xff]  }
0x17e6   :  { %v6379_v37 = vadd.f32 %v6373_v12, %v14802_v8  ;;  %v6386_v33 = vsel %vm90_vm0, %v6378_v11, 0.0  ;;  %12014 = vmatprep.subr.bf16.mxu0 %v12587_v1  ;;  %12006 = vmatprep.subr.bf16.mxu1 %v12587_v1 }
0x17e7   :  { %v6377_v32 = vadd.f32 %v6365_v17, %v14795_v57  ;;  %v6380_v6 = vsel %vm90_vm0, %v6376_v19, 0.0  ;;  %v12588_v57 = vld [vmem:[%s16382_s4 + $0x18] sm:$0xff]   ;;  %12015 = vmatpush3.bf16.msra.mxu0 %v12587_v1  ;;  %12007 = vmatpush3.bf16.msra.mxu1 %v12587_v1 }
0x17e8   :  { %6381 = vadd.xlane.f32.xlu0 %v6380_v6  ;;  %v6389_v22 = vsel %vm90_vm0, %v6379_v37, 0.0  ;;  %12016 = vmatprep.subr.bf16.mxu0 %v12588_v57  ;;  %v6435_v6 = vrot.slane %v15156_v50, %v13616_v43 }
0x17e9   :  { %v6383_v7 = vsel %vm90_vm0, %v6377_v32, 0.0  ;;  %12008 = vmatprep.subr.bf16.mxu1 %v12588_v57 }
0x17ea   :  { %6384 = vadd.xlane.f32.xlu1 %v6383_v7 }
0x17eb   :  { %12017 = vmatpush3.bf16.msra.mxu0 %v12588_v57  ;;  %12009 = vmatpush3.bf16.msra.mxu1 %v12588_v57  ;;  %v6443_v57 = vrot.slane %v15156_v50, %v13621_v14 }
0x17ec   :  { %6387 = vadd.xlane.f32.xlu0 %v6386_v33  ;;  %12022 = vmatprep.subr.bf16.mxu1 %v13063_v31 }
0x17ed   :  { %12028 = vmatprep.subr.bf16.mxu0 %v13063_v31 }
0x17ee   :  { %12019 = vmatmul.mubr.msk.bf16.vlgmr.msra.gmra.mrb[176].mxu0 %vm90_vm0, %v13187_v13 }
0x17ef   :  { %12030 = vmatprep.mubr.msk.bf16.mxu0 %vm13065_vm1, %v13063_v31 }
0x17f0   :  { %6390 = vadd.xlane.f32.xlu0 %v6389_v22 }
0x1875   :  { %v6382_v30 = vpop.xlane.xlu0 %6381 }
0x1876   :  { %v6392_v8 = vmul.f32 0.03125, %v6382_v30 }
0x1877   :  { %v6385_v10 = vpop.xlane.xlu1 %6384 }
0x1878   :  { %v6396_v5 = vsub.f32 %v6376_v19, %v6392_v8  ;;  %v6393_v51 = vmul.f32 0.03125, %v6385_v10 }
0x1879   :  { %v6388_v55 = vpop.xlane.xlu0 %6387 }
0x187a   :  { %v6397_v34 = vsub.f32 %v6377_v32, %v6393_v51  ;;  %v6394_v63 = vmul.f32 0.03125, %v6388_v55  ;;  %v6400_v27 = vmul.f32 %v6396_v5, %v6396_v5 }
0x187c   :  { %v6398_v52 = vsub.f32 %v6378_v11, %v6394_v63  ;;  %v6404_v49 = vsel %vm90_vm0, %v6400_v27, 0.0  ;;  %v6401_v47 = vmul.f32 %v6397_v34, %v6397_v34 }
0x187d   :  { %6405 = vadd.xlane.f32.xlu1 %v6404_v49  ;;  %v6391_v28 = vpop.xlane.xlu0 %6390 }
0x187e   :  { %v6395_v26 = vmul.f32 0.03125, %v6391_v28  ;;  %v6407_v13 = vsel %vm90_vm0, %v6401_v47, 0.0  ;;  %v6402_v41 = vmul.f32 %v6398_v52, %v6398_v52 }
0x187f   :  { %6408 = vadd.xlane.f32.xlu0 %v6407_v13 }
0x1880   :  { %v6399_v36 = vsub.f32 %v6379_v37, %v6395_v26  ;;  %v6410_v23 = vsel %vm90_vm0, %v6402_v41, 0.0 }
0x1881   :  { %6411 = vadd.xlane.f32.xlu1 %v6410_v23 }
0x1882   :  { %v6403_v39 = vmul.f32 %v6399_v36, %v6399_v36 }
0x1884   :  { %v6413_v15 = vsel %vm90_vm0, %v6403_v39, 0.0 }
0x1885   :  { %6414 = vadd.xlane.f32.xlu0 %v6413_v15 }
0x18c1   :  { %v12020_v45 = vpop.f32.mrb[176].mxu0 }
0x18c2   :  { %v6574_v60 = vadd.f32 %v12020_v45, %v15188_v42  ;;  %v6565_v29 = vpop.f32.mrb[177].mxu0 }
0x18c3   :  { %v6566_v9 = vadd.f32 %v6565_v29, %v15188_v42  ;;  %v12021_v18 = vpop.f32.mrb[178].mxu0 }
0x18c4   :  { %v6577_v35 = vadd.f32 %v12021_v18, %v15188_v42  ;;  %v6568_v21 = vpop.f32.mrb[179].mxu0 }
0x18c5   :  { %v6569_v53 = vadd.f32 %v6568_v21, %v15188_v42 }
0x18c6   :  { %v12372_v44 = vpack.i.bf16 %v6577_v35, %v6574_v60  ;;  %v15204_v2 = vpack.c.bf16 %v6577_v35, %v6574_v60 }
0x18c7   :  { %v12357_v3 = vpack.i.bf16 %v6569_v53, %v6566_v9  ;;  %v15194_v40 = vpack.c.bf16 %v6569_v53, %v6566_v9 }
0x18c9   :  { %12358 = vrot.lane.b32.xlu1 %v12357_v3, %s13062_s30  ;;  %12363 = vrot.lane.b32.xlu0 %v12357_v3, %s13064_s15 }
0x18cd   :  { %12368 = vrot.lane.b32.xlu1 %v12357_v3, %s13061_s29  ;;  %12378 = vrot.lane.b32.xlu0 %v12372_v44, %s13064_s15 }
0x18d1   :  { %12373 = vrot.lane.b32.xlu1 %v12372_v44, %s13062_s30  ;;  %6677 = vrot.lane.b32.xlu0 %v15194_v40, %s13066_s16 }
0x18d5   :  { %12383 = vrot.lane.b32.xlu1 %v12372_v44, %s13061_s29 }
0x190a   :  { %v6406_v0 = vpop.xlane.xlu1 %6405 }
0x190b   :  { %v6416_v48 = vmul.f32 0.03125, %v6406_v0 }
0x190c   :  { %v6409_v20 = vpop.xlane.xlu0 %6408 }
0x190d   :  { %v6420_v56 = vadd.f32 1e-05, %v6416_v48  ;;  %v6417_v4 = vmul.f32 0.03125, %v6409_v20 }
0x190e   :  { %v6412_v54 = vpop.xlane.xlu1 %6411 }
0x190f   :  { %12937 = vrsqrt.f32 %v6420_v56  ;;  %v6421_v59 = vadd.f32 1e-05, %v6417_v4  ;;  %v6418_v19 = vmul.f32 0.03125, %v6412_v54 }
0x1911   :  { %12939 = vrsqrt.f32 %v6421_v59  ;;  %v6422_v17 = vadd.f32 1e-05, %v6418_v19 }
0x1912   :  { %v6415_v11 = vpop.xlane.xlu0 %6414 }
0x1913   :  { %12941 = vrsqrt.f32 %v6422_v17  ;;  %v6419_v12 = vmul.f32 0.03125, %v6415_v11 }
0x1915   :  { %v6423_v32 = vadd.f32 1e-05, %v6419_v12 }
0x1917   :  { %12943 = vrsqrt.f32 %v6423_v32 }
0x1919   :  { %v12938_v7 = vpop.eup %12937 }
0x191a   :  { %v6428_v37 = vmul.f32 %v12938_v7, %v6396_v5 }
0x191b   :  { %v12940_v33 = vpop.eup %12939 }
0x191c   :  { %v6429_v22 = vmul.f32 %v12940_v33, %v6397_v34  ;;  %v6436_v1 = vmul.f32 %v6435_v6, %v6428_v37 }
0x191d   :  { %v12942_v30 = vpop.eup %12941 }
0x191e   :  { %v6430_v8 = vmul.f32 %v12942_v30, %v6398_v52  ;;  %v6437_v10 = vmul.f32 %v6435_v6, %v6429_v22  ;;  %v15210_v51 = vadd.f32 %v6443_v57, %v6436_v1 }
0x1920   :  { %v15212_v55 = vadd.f32 %v6443_v57, %v6437_v10  ;;  %v6438_v27 = vmul.f32 %v6435_v6, %v6430_v8 }
0x1921   :  { %v12944_v63 = vpop.eup %12943 }
0x1922   :  { %v6431_v49 = vmul.f32 %v12944_v63, %v6399_v36  ;;  %v6458_v47 = vpack.c.bf16 %v15212_v55, %v15210_v51  ;;  %v15217_v34 = vadd.f32 %v6443_v57, %v6438_v27 }
0x1924   :  { %v6439_v5 = vmul.f32 %v6435_v6, %v6431_v49  ;;  %12010 = vmatprep.mubr.msk.bf16.mxu1 %vm90_vm0, %v6458_v47 }
0x1926   :  { %v15219_v28 = vadd.f32 %v6443_v57, %v6439_v5 }
0x1928   :  { %v6459_v50 = vpack.c.bf16 %v15219_v28, %v15217_v34 }
0x192a   :  { %12011 = vmatmul.mubr.msk.bf16.vlgmr.msra.gmra.mrb[172].mxu1 %vm90_vm0, %v6459_v50 }
0x192b   :  { %12024 = vmatprep.mubr.msk.bf16.mxu1 %vm13065_vm1, %v13063_v31 }
0x193b   :  { %v12359_v52 = vpop.permute.xlu1 %12358  ;;  %v12364_v26 = vpop.permute.xlu0 %12363 }
0x193c   :  { %v12361_v13 = vunpack.i.h.bf16 %v12359_v52  ;;  %v12360_v41 = vunpack.i.l.bf16 %v12359_v52  ;;  %v12366_v36 = vunpack.i.h.bf16 %v12364_v26  ;;  %v12365_v23 = vunpack.i.l.bf16 %v12364_v26 }
0x193e   :  { %v15226_v39 = vpack.c.bf16 %v12361_v13, %v12360_v41  ;;  %v15228_v38 = vpack.c.bf16 %v12366_v36, %v12365_v23 }
0x193f   :  { %v12379_v15 = vpop.permute.xlu0 %12378  ;;  %v12369_v29 = vpop.permute.xlu1 %12368 }
0x1940   :  { %6727 = vrot.lane.b32.xlu1 %v15226_v39, %s13066_s16  ;;  %v12371_v48 = vunpack.i.h.bf16 %v12369_v29  ;;  %v12370_v54 = vunpack.i.l.bf16 %v12369_v29  ;;  %v12381_v57 = vunpack.i.h.bf16 %v12379_v15  ;;  %v12380_v30 = vunpack.i.l.bf16 %v12379_v15 }
0x1942   :  { %v15254_v7 = vpack.c.bf16 %v12371_v48, %v12370_v54  ;;  %v15273_v10 = vpack.c.bf16 %v12381_v57, %v12380_v30 }
0x1943   :  { %v6678_v45 = vpop.permute.xlu0 %6677  ;;  %v12374_v9 = vpop.permute.xlu1 %12373 }
0x1944   :  { %v6683_v60 = vsel %vm197_vm2, %v6678_v45, 0  ;;  %6777 = vrot.lane.b32.xlu1 %v15228_v38, %s13066_s16  ;;  %v12375_v37 = vunpack.i.l.bf16 %v12374_v9 }
0x1945   :  { %12023 = vmatpush3.bf16.xpose.msra.mxu1 %v6683_v60 }
0x1946   :  { %12034 = vmatprep.subr.bf16.mxu1 %v13063_v31 }
0x1947   :  { %v12384_v18 = vpop.permute.xlu1 %12383 }
0x1948   :  { %v12386_v33 = vunpack.i.h.bf16 %v12384_v18  ;;  %v12385_v22 = vunpack.i.l.bf16 %v12384_v18 }
0x194a   :  { %v15267_v8 = vpack.c.bf16 %v12386_v33, %v12385_v22  ;;  %v15316_v33 = vld [vmem:[%s16380_s2] sm:$0xff] }
0x19b2   :  { %v6728_v35 = vpop.permute.xlu1 %6727 }
0x19b3   :  { %v6733_v21 = vsel %vm197_vm2, %v6728_v35, 0 }
0x19b4   :  { %12029 = vmatpush3.bf16.xpose.msra.mxu0 %v6733_v21 }
0x19b5   :  { %12040 = vmatprep.subr.bf16.mxu0 %v13063_v31 }
0x19b6   :  { %v6778_v3 = vpop.permute.xlu1 %6777 }
0x19b7   :  { %v6783_v17 = vsel %vm197_vm2, %v6778_v3, 0 }
0x19fd   :  { %v12012_v53 = vpop.f32.mrb[172].mxu1 }
0x19fe   :  { %v6516_v44 = vpop.f32.mrb[173].mxu1  ;;  %v15239_v20 = vadd.f32 %v12012_v53, %v15188_v42 }
0x19ff   :  { %v12013_v0 = vpop.f32.mrb[174].mxu1  ;;  %v6517_v59 = vadd.f32 %v6516_v44, %v15188_v42 }
0x1a00   :  { %v15242_v56 = vadd.f32 %v12013_v0, %v15188_v42  ;;  %v6519_v4 = vpop.f32.mrb[175].mxu1 }
0x1a01   :  { %v6520_v19 = vadd.f32 %v6519_v4, %v15188_v42  ;;  %v12376_v42 = vunpack.i.h.bf16 %v12374_v9 }
0x1a02   :  { %v6664_v11 = vpack.c.bf16 %v15242_v56, %v15239_v20  ;;  %v12402_v12 = vpack.i.bf16 %v15242_v56, %v15239_v20 }
0x1a03   :  { %v6660_v32 = vpack.c.bf16 %v6520_v19, %v6517_v59  ;;  %v12387_v6 = vpack.i.bf16 %v6520_v19, %v6517_v59  ;;  %v15265_v1 = vpack.c.bf16 %v12376_v42, %v12375_v37 }
0x1a05   :  { %12388 = vrot.lane.b32.xlu0 %v12387_v6, %s13062_s30  ;;  %12025 = vmatmul.mubr.msk.bf16.vlgmr.msra.gmra.mrb[176].mxu1 %vm197_vm2, %v6660_v32 }
0x1a06   :  { %12393 = vrot.lane.b32.xlu1 %v12387_v6, %s13064_s15  ;;  %12035 = vmatpush3.bf16.xpose.msra.mxu1 %v6783_v17 }
0x1a07   :  { %12036 = vmatprep.mubr.msk.bf16.mxu1 %vm13065_vm1, %v13063_v31  ;;  %12046 = vmatprep.subr.bf16.mxu1 %v13063_v31 }
0x1a09   :  { %6827 = vrot.lane.b32.xlu0 %v15254_v7, %s13066_s16 }
0x1a0a   :  { %6877 = vrot.lane.b32.xlu1 %v15204_v2, %s13066_s16 }
0x1a0d   :  { %12398 = vrot.lane.b32.xlu0 %v12387_v6, %s13061_s29 }
0x1a0e   :  { %12403 = vrot.lane.b32.xlu1 %v12402_v12, %s13062_s30 }
0x1a11   :  { %6927 = vrot.lane.b32.xlu0 %v15265_v1, %s13066_s16 }
0x1a12   :  { %7027 = vrot.lane.b32.xlu1 %v15267_v8, %s13066_s16 }
0x1a15   :  { %6977 = vrot.lane.b32.xlu0 %v15273_v10, %s13066_s16 }
0x1a16   :  { %12413 = vrot.lane.b32.xlu1 %v12402_v12, %s13061_s29  ;;  %s13072_s29 = smov [#allocation2]  }
0x1a17   :  { %s10262_s30 = sshll.u32 %s13072_s29, 4  ;;  %s10263_s30 = int_to_ptr.vmem [resolvable:$true] %s10262_s30 }
0x1a18   :  { %p13042_p1 = scmp.lt.s32.totalorder %s10263_s30, %s10263_s30 }
0x1a19   :  { %12408 = vrot.lane.b32.xlu0 %v12402_v12, %s13064_s15  ;;  %s13037_s15 = scalar_lea.vmem %s10263_s30, 512 }
0x1a1a   :  { %7292 = vrot.lane.b32.xlu1 %v15194_v40, %s13067_s17  ;;  %p13038_p0 = scmp.ne.s32.totalorder %s10263_s30, %s13037_s15  ;;  %p13043_p2 = scmp.lt.s32.totalorder %s13037_s15, %s13037_s15 }
0x1a1c   :  { %p13044_p3 = por %p13043_p2, %p13042_p1 }
0x1a1e   :  { %p13045_p4 = pnand %p13044_p3, %p13038_p0 }
0x1a77   :  { %v12389_v63 = vpop.permute.xlu0 %12388 }
0x1a78   :  { %v12391_v27 = vunpack.i.h.bf16 %v12389_v63  ;;  %v12390_v49 = vunpack.i.l.bf16 %v12389_v63  ;;  %v12394_v47 = vpop.permute.xlu1 %12393  ;;  %v15324_v63 = vld [vmem:[%s16380_s2 + $0x8] sm:$0xff] }
0x1a79   :  { %v12396_v5 = vunpack.i.h.bf16 %v12394_v47  ;;  %v12395_v50 = vunpack.i.l.bf16 %v12394_v47 }
0x1a7a   :  { %v6661_v52 = vpack.c.bf16 %v12391_v27, %v12390_v49 }
0x1a7b   :  { %v6662_v26 = vpack.c.bf16 %v12396_v5, %v12395_v50  ;;  %v6828_v13 = vpop.permute.xlu0 %6827 }
0x1a7c   :  { %v6833_v41 = vsel %vm197_vm2, %v6828_v13, 0  ;;  %v6878_v36 = vpop.permute.xlu1 %6877  ;;  %12031 = vmatmul.mubr.msk.bf16.vlgmr.msra.gmra.mrb[180].mxu0 %vm197_vm2, %v6661_v52 }
0x1a7d   :  { %v6883_v23 = vsel %vm197_vm2, %v6878_v36, 0  ;;  %12037 = vmatmul.mubr.msk.bf16.vlgmr.msra.gmra.mrb[180].mxu1 %vm197_vm2, %v6662_v26  ;;  %12041 = vmatpush3.bf16.xpose.msra.mxu0 %v6833_v41 }
0x1a7e   :  { %12047 = vmatpush3.bf16.xpose.msra.mxu1 %v6883_v23  ;;  %12042 = vmatprep.mubr.msk.bf16.mxu0 %vm13065_vm1, %v13063_v31 }
0x1a7f   :  { %v12399_v40 = vpop.permute.xlu0 %12398  ;;  %12048 = vmatprep.mubr.msk.bf16.mxu1 %vm13065_vm1, %v13063_v31  ;;  %12052 = vmatprep.subr.bf16.mxu0 %v13063_v31 }
0x1a80   :  { %v12401_v15 = vunpack.i.h.bf16 %v12399_v40  ;;  %v12400_v45 = vunpack.i.l.bf16 %v12399_v40  ;;  %v12404_v60 = vpop.permute.xlu1 %12403  ;;  %12058 = vmatprep.subr.bf16.mxu1 %v13063_v31 }
0x1a81   :  { %v12406_v21 = vunpack.i.h.bf16 %v12404_v60  ;;  %v12405_v53 = vunpack.i.l.bf16 %v12404_v60 }
0x1a82   :  { %v6663_v29 = vpack.c.bf16 %v12401_v15, %v12400_v45 }
0x1a83   :  { %v6928_v9 = vpop.permute.xlu0 %6927  ;;  %v6665_v0 = vpack.c.bf16 %v12406_v21, %v12405_v53 }
0x1a84   :  { %v6933_v18 = vsel %vm197_vm2, %v6928_v9, 0  ;;  %v7028_v35 = vpop.permute.xlu1 %7027  ;;  %12043 = vmatmul.mubr.msk.bf16.vlgmr.msra.gmra.mrb[184].mxu0 %vm197_vm2, %v6663_v29 }
0x1a85   :  { %12049 = vmatmul.mubr.msk.bf16.vlgmr.msra.gmra.mrb[184].mxu1 %vm197_vm2, %v6664_v11  ;;  %12053 = vmatpush3.bf16.xpose.msra.mxu0 %v6933_v18  ;;  %v7033_v56 = vsel %vm197_vm2, %v7028_v35, 0 }
0x1a86   :  { %12054 = vmatprep.mubr.msk.bf16.mxu0 %vm13065_vm1, %v13063_v31  ;;  %12064 = vmatprep.subr.bf16.mxu0 %v13063_v31 }
0x1a87   :  { %v6978_v44 = vpop.permute.xlu0 %6977  ;;  %12060 = vmatprep.mubr.msk.bf16.mxu1 %vm13065_vm1, %v13063_v31 }
0x1a88   :  { %v6983_v3 = vsel %vm197_vm2, %v6978_v44, 0  ;;  %v12414_v48 = vpop.permute.xlu1 %12413 }
0x1a89   :  { %12059 = vmatpush3.bf16.xpose.msra.mxu1 %v6983_v3  ;;  %v12416_v59 = vunpack.i.h.bf16 %v12414_v48  ;;  %v12415_v19 = vunpack.i.l.bf16 %v12414_v48 }
0x1a8a   :  { %12070 = vmatprep.subr.bf16.mxu1 %v13063_v31 }
0x1a8b   :  { %v12409_v20 = vpop.permute.xlu0 %12408  ;;  %v6667_v12 = vpack.c.bf16 %v12416_v59, %v12415_v19 }
0x1a8c   :  { %v12411_v4 = vunpack.i.h.bf16 %v12409_v20  ;;  %v12410_v54 = vunpack.i.l.bf16 %v12409_v20  ;;  %12055 = vmatmul.mubr.msk.bf16.vlgmr.msra.gmra.mrb[188].mxu0 %vm197_vm2, %v6665_v0  ;;  %v7293_v11 = vpop.permute.xlu1 %7292 }
0x1a8d   :  { %12065 = vmatpush3.bf16.xpose.msra.mxu0 %v7033_v56  ;;  %12066 = vmatprep.mubr.msk.bf16.mxu0 %vm13065_vm1, %v13063_v31 }
0x1a8e   :  { %v6666_v17 = vpack.c.bf16 %v12411_v4, %v12410_v54  ;;  %12076 = vmatprep.subr.bf16.mxu0 %v13063_v31 }
0x1a90   :  { %12061 = vmatmul.mubr.msk.bf16.vlgmr.msra.gmra.mrb[188].mxu1 %vm197_vm2, %v6666_v17 }
0x1a91   :  { %12071 = vmatpush3.bf16.msra.mxu1 %v7293_v11  ;;  %12072 = vmatprep.mubr.msk.bf16.mxu1 %vm13065_vm1, %v13063_v31 }
0x1a92   :  { %12082 = vmatprep.subr.bf16.mxu1 %v13063_v31 }
0x1a94   :  { %12067 = vmatmul.mubr.msk.bf16.vlgmr.msra.gmra.mrb[192].mxu0 %vm197_vm2, %v6667_v12 }
0x1a95   :  { %12078 = vmatprep.mubr.msk.bf16.mxu0 %vm13065_vm1, %v13063_v31 }
0x1ad8   :  { %v6719_v32 = vpop.f32.mrb[176].mxu1 }
0x1ad9   :  { %v7076_v6 = vmul.f32 0.35355338, %v6719_v32  ;;  %v12026_v42 = vpop.f32.mrb[177].mxu1 }
0x1ada   :  { %v6722_v37 = vpop.f32.mrb[178].mxu1 }
0x1adb   :  { %v15319_v22 = vadd.f32 %v15316_v33, %v7076_v6  ;;  %v7077_v57 = vmul.f32 0.35355338, %v6722_v37  ;;  %v12027_v30 = vpop.f32.mrb[179].mxu1 }
0x1add   :  { %v15327_v27 = vadd.f32 %v15324_v63, %v7077_v57  ;;  %v7108_v49 = vsel %vm627_vm3, %v15319_v22, -inf }
0x1ade   :  { %7109 = vmax.xlane.f32.xlu0 %v7108_v49 }
0x1adf   :  { %v7111_v47 = vsel %vm627_vm3, %v15327_v27, -inf }
0x1ae0   :  { %7112 = vmax.xlane.f32.xlu1 %v7111_v47 }
0x1b4f   :  { %v6769_v5 = vpop.f32.mrb[180].mxu0 }
0x1b50   :  { %v7078_v50 = vmul.f32 0.35355338, %v6769_v5  ;;  %v6819_v52 = vpop.f32.mrb[180].mxu1  ;;  %v12032_v26 = vpop.f32.mrb[181].mxu0 }
0x1b51   :  { %v7080_v13 = vmul.f32 0.35355338, %v6819_v52  ;;  %v12038_v41 = vpop.f32.mrb[181].mxu1  ;;  %v6772_v36 = vpop.f32.mrb[182].mxu0 }
0x1b52   :  { %v15334_v23 = vadd.f32 %v15316_v33, %v7078_v50  ;;  %v7079_v40 = vmul.f32 0.35355338, %v6772_v36  ;;  %v6822_v15 = vpop.f32.mrb[182].mxu1  ;;  %v12033_v45 = vpop.f32.mrb[183].mxu0 }
0x1b53   :  { %v15337_v60 = vadd.f32 %v15316_v33, %v7080_v13  ;;  %v7081_v29 = vmul.f32 0.35355338, %v6822_v15  ;;  %v12039_v9 = vpop.f32.mrb[183].mxu1 }
0x1b54   :  { %v15340_v18 = vadd.f32 %v15324_v63, %v7079_v40  ;;  %v7114_v35 = vsel %vm627_vm3, %v15334_v23, -inf }
0x1b55   :  { %7115 = vmax.xlane.f32.xlu0 %v7114_v35  ;;  %v7120_v21 = vsel %vm627_vm3, %v15337_v60, -inf  ;;  %v15347_v53 = vadd.f32 %v15324_v63, %v7081_v29 }
0x1b56   :  { %7121 = vmax.xlane.f32.xlu1 %v7120_v21  ;;  %v7117_v20 = vsel %vm627_vm3, %v15340_v18, -inf }
0x1b57   :  { %v6869_v44 = vpop.f32.mrb[184].mxu0  ;;  %v7123_v32 = vsel %vm627_vm3, %v15347_v53, -inf }
0x1b58   :  { %v7082_v3 = vmul.f32 0.35355338, %v6869_v44  ;;  %v6919_v0 = vpop.f32.mrb[184].mxu1  ;;  %v12044_v48 = vpop.f32.mrb[185].mxu0 }
0x1b59   :  { %v7084_v56 = vmul.f32 0.35355338, %v6919_v0  ;;  %v12050_v4 = vpop.f32.mrb[185].mxu1  ;;  %v6872_v54 = vpop.f32.mrb[186].mxu0  ;;  %7118 = vmax.xlane.f32.xlu0 %v7117_v20 }
0x1b5a   :  { %v15352_v59 = vadd.f32 %v15316_v33, %v7082_v3  ;;  %v7083_v19 = vmul.f32 0.35355338, %v6872_v54  ;;  %v6922_v17 = vpop.f32.mrb[186].mxu1  ;;  %v12045_v11 = vpop.f32.mrb[187].mxu0 }
0x1b5b   :  { %v12051_v12 = vpop.f32.mrb[187].mxu1  ;;  %v15357_v6 = vadd.f32 %v15316_v33, %v7084_v56  ;;  %v7085_v37 = vmul.f32 0.35355338, %v6922_v17 }
0x1b5c   :  { %v15360_v42 = vadd.f32 %v15324_v63, %v7083_v19  ;;  %v7126_v57 = vsel %vm627_vm3, %v15352_v59, -inf }
0x1b5d   :  { %7127 = vmax.xlane.f32.xlu1 %v7126_v57  ;;  %7124 = vmax.xlane.f32.xlu0 %v7123_v32  ;;  %v15365_v49 = vadd.f32 %v15324_v63, %v7085_v37  ;;  %v7132_v52 = vsel %vm627_vm3, %v15357_v6, -inf }
0x1b5e   :  { %v7129_v50 = vsel %vm627_vm3, %v15360_v42, -inf }
0x1b5f   :  { %v6969_v30 = vpop.f32.mrb[188].mxu0  ;;  %v7135_v35 = vsel %vm627_vm3, %v15365_v49, -inf }
0x1b60   :  { %v7086_v47 = vmul.f32 0.35355338, %v6969_v30  ;;  %v12056_v5 = vpop.f32.mrb[189].mxu0 }
0x1b61   :  { %v6972_v26 = vpop.f32.mrb[190].mxu0  ;;  %7130 = vmax.xlane.f32.xlu0 %v7129_v50  ;;  %7133 = vmax.xlane.f32.xlu1 %v7132_v52 }
0x1b62   :  { %v15372_v13 = vadd.f32 %v15316_v33, %v7086_v47  ;;  %v7087_v41 = vmul.f32 0.35355338, %v6972_v26  ;;  %v12057_v36 = vpop.f32.mrb[191].mxu0 }
0x1b63   :  { %v7019_v40 = vpop.f32.mrb[188].mxu1 }
0x1b64   :  { %v15375_v15 = vadd.f32 %v15324_v63, %v7087_v41  ;;  %v7088_v45 = vmul.f32 0.35355338, %v7019_v40  ;;  %v12062_v29 = vpop.f32.mrb[189].mxu1  ;;  %v7138_v9 = vsel %vm627_vm3, %v15372_v13, -inf }
0x1b65   :  { %7139 = vmax.xlane.f32.xlu1 %v7138_v9  ;;  %7136 = vmax.xlane.f32.xlu0 %v7135_v35  ;;  %v7022_v21 = vpop.f32.mrb[190].mxu1 }
0x1b66   :  { %v15382_v44 = vadd.f32 %v15316_v33, %v7088_v45  ;;  %v7089_v3 = vmul.f32 0.35355338, %v7022_v21  ;;  %v12063_v0 = vpop.f32.mrb[191].mxu1  ;;  %v7141_v54 = vsel %vm627_vm3, %v15375_v15, -inf }
0x1b67   :  { %v7069_v48 = vpop.f32.mrb[192].mxu0 }
0x1b68   :  { %v15385_v20 = vadd.f32 %v15324_v63, %v7089_v3  ;;  %v7090_v56 = vmul.f32 0.35355338, %v7069_v48  ;;  %v12068_v4 = vpop.f32.mrb[193].mxu0  ;;  %v7144_v19 = vsel %vm627_vm3, %v15382_v44, -inf }
0x1b69   :  { %v7072_v17 = vpop.f32.mrb[194].mxu0  ;;  %7142 = vmax.xlane.f32.xlu0 %v7141_v54  ;;  %7145 = vmax.xlane.f32.xlu1 %v7144_v19 }
0x1b6a   :  { %v15392_v11 = vadd.f32 %v15316_v33, %v7090_v56  ;;  %v7091_v12 = vmul.f32 0.35355338, %v7072_v17  ;;  %v12069_v32 = vpop.f32.mrb[195].mxu0  ;;  %v7147_v30 = vsel %vm627_vm3, %v15385_v20, -inf }
0x1b6b   :  { %v7110_v33 = vpop.xlane.xlu0 %7109 }
0x1b6c   :  { %v15395_v37 = vadd.f32 %v15324_v63, %v7091_v12  ;;  %v7150_v57 = vsel %vm627_vm3, %v15392_v11, -inf  ;;  %v7156_v5 = vsub.f32 %v15319_v22, %v7110_v33 }
0x1b6d   :  { %7151 = vmax.xlane.f32.xlu1 %v7150_v57  ;;  %7148 = vmax.xlane.f32.xlu0 %v7147_v30  ;;  %v7113_v63 = vpop.xlane.xlu1 %7112 }
0x1b6e   :  { %v7153_v47 = vsel %vm627_vm3, %v15395_v37, -inf  ;;  %v7157_v50 = vsub.f32 %v15327_v27, %v7113_v63  ;;  %v7172_v52 = vmul.f32 1.442695, %v7156_v5 }
0x1b70   :  { %12945 = vpow2.f32 %v7172_v52 }
0x1b71   :  { %7154 = vmax.xlane.f32.xlu0 %v7153_v47 }
0x1b7e   :  { %7386 = vrot.lane.b32.xlu1 %v15228_v38, %s13067_s17  ;;  %v7174_v38 = vmul.f32 1.442695, %v7157_v50 }
0x1b80   :  { %12947 = vpow2.f32 %v7174_v38 }
0x1b82   :  { %7433 = vrot.lane.b32.xlu1 %v15254_v7, %s13067_s17  ;;  %v15415_v7 = vpop.eup %12945 }
0x1b86   :  { %7527 = vrot.lane.b32.xlu1 %v15265_v1, %s13067_s17 }
0x1b87   :  { %7339 = vrot.lane.b32.xlu0 %v15226_v39, %s13067_s17  ;;  %v7204_v39 = vsel %vm627_vm3, %v15415_v7, 0.0 }
0x1b8a   :  { %v15417_v26 = vpop.eup %12947 }
0x1b8b   :  { %7480 = vrot.lane.b32.xlu0 %v15204_v2, %s13067_s17  ;;  %v7207_v2 = vsel %vm627_vm3, %v15417_v26, 0.0 }
0x1baa   :  { %7205 = vadd.xlane.f32.xlu1 %v7204_v39  ;;  %7208 = vadd.xlane.f32.xlu0 %v7207_v2 }
0x1be2   :  { %v7116_v1 = vpop.xlane.xlu0 %7115 }
0x1be3   :  { %v7158_v22 = vsub.f32 %v15334_v23, %v7116_v1  ;;  %v7122_v27 = vpop.xlane.xlu1 %7121 }
0x1be4   :  { %v7160_v41 = vsub.f32 %v15337_v60, %v7122_v27 }
0x1be5   :  { %v7176_v36 = vmul.f32 1.442695, %v7158_v22 }
0x1be6   :  { %v7180_v40 = vmul.f32 1.442695, %v7160_v41  ;;  %v7119_v45 = vpop.xlane.xlu0 %7118 }
0x1be7   :  { %12949 = vpow2.f32 %v7176_v36  ;;  %v7159_v29 = vsub.f32 %v15340_v18, %v7119_v45 }
0x1be8   :  { %12951 = vpow2.f32 %v7180_v40 }
0x1be9   :  { %v7178_v9 = vmul.f32 1.442695, %v7159_v29 }
0x1bea   :  { %v7128_v35 = vpop.xlane.xlu1 %7127  ;;  %v7125_v21 = vpop.xlane.xlu0 %7124 }
0x1beb   :  { %12953 = vpow2.f32 %v7178_v9  ;;  %v7162_v3 = vsub.f32 %v15352_v59, %v7128_v35  ;;  %v7161_v0 = vsub.f32 %v15347_v53, %v7125_v21 }
0x1bed   :  { %v7184_v48 = vmul.f32 1.442695, %v7162_v3  ;;  %v7182_v23 = vmul.f32 1.442695, %v7161_v0 }
0x1bee   :  { %v7131_v56 = vpop.xlane.xlu0 %7130  ;;  %v7134_v4 = vpop.xlane.xlu1 %7133 }
0x1bef   :  { %12955 = vpow2.f32 %v7184_v48  ;;  %v7163_v60 = vsub.f32 %v15360_v42, %v7131_v56  ;;  %v7164_v54 = vsub.f32 %v15357_v6, %v7134_v4 }
0x1bf0   :  { %12957 = vpow2.f32 %v7182_v23 }
0x1bf1   :  { %v15430_v18 = vpop.eup %12949  ;;  %v7186_v19 = vmul.f32 1.442695, %v7163_v60  ;;  %v7188_v17 = vmul.f32 1.442695, %v7164_v54 }
0x1bf2   :  { %v7140_v12 = vpop.xlane.xlu1 %7139  ;;  %v7137_v32 = vpop.xlane.xlu0 %7136  ;;  %v7210_v59 = vsel %vm627_vm3, %v15430_v18, 0.0 }
0x1bf3   :  { %v15434_v53 = vpop.eup %12951  ;;  %12959 = vpow2.f32 %v7186_v19  ;;  %v7166_v57 = vsub.f32 %v15372_v13, %v7140_v12  ;;  %v7165_v30 = vsub.f32 %v15365_v49, %v7137_v32  ;;  %7211 = vadd.xlane.f32.xlu1 %v7210_v59 }
0x1bf4   :  { %12961 = vpow2.f32 %v7188_v17  ;;  %v7216_v5 = vsel %vm627_vm3, %v15434_v53, 0.0 }
0x1bf5   :  { %v15438_v6 = vpop.eup %12953  ;;  %v7192_v42 = vmul.f32 1.442695, %v7166_v57  ;;  %v7190_v47 = vmul.f32 1.442695, %v7165_v30 }
0x1bf6   :  { %v7143_v33 = vpop.xlane.xlu0 %7142  ;;  %v7146_v63 = vpop.xlane.xlu1 %7145  ;;  %v7213_v50 = vsel %vm627_vm3, %v15438_v6, 0.0 }
0x1bf7   :  { %12963 = vpow2.f32 %v7192_v42  ;;  %v7167_v52 = vsub.f32 %v15375_v15, %v7143_v33  ;;  %v7168_v13 = vsub.f32 %v15382_v44, %v7146_v63  ;;  %7217 = vadd.xlane.f32.xlu1 %v7216_v5  ;;  %7214 = vadd.xlane.f32.xlu0 %v7213_v50 }
0x1bf8   :  { %12965 = vpow2.f32 %v7190_v47 }
0x1bf9   :  { %v15446_v49 = vpop.eup %12955  ;;  %v7194_v38 = vmul.f32 1.442695, %v7167_v52  ;;  %v7196_v39 = vmul.f32 1.442695, %v7168_v13 }
0x1bfa   :  { %v15448_v2 = vpop.eup %12957  ;;  %v7152_v1 = vpop.xlane.xlu1 %7151  ;;  %v7222_v27 = vsel %vm627_vm3, %v15446_v49, 0.0 }
0x1bfb   :  { %v7149_v22 = vpop.xlane.xlu0 %7148  ;;  %12967 = vpow2.f32 %v7194_v38  ;;  %v7170_v41 = vsub.f32 %v15392_v11, %v7152_v1  ;;  %7223 = vadd.xlane.f32.xlu1 %v7222_v27  ;;  %v7219_v44 = vsel %vm627_vm3, %v15448_v2, 0.0 }
0x1bfc   :  { %v7169_v15 = vsub.f32 %v15385_v20, %v7149_v22  ;;  %12969 = vpow2.f32 %v7196_v39  ;;  %7220 = vadd.xlane.f32.xlu0 %v7219_v44 }
0x1bfd   :  { %v15456_v36 = vpop.eup %12959  ;;  %v7200_v40 = vmul.f32 1.442695, %v7170_v41 }
0x1bfe   :  { %v7198_v45 = vmul.f32 1.442695, %v7169_v15  ;;  %v15458_v29 = vpop.eup %12961  ;;  %v7225_v35 = vsel %vm627_vm3, %v15456_v36, 0.0  ;;  %v7387_v30 = vpop.permute.xlu1 %7386 }
0x1bff   :  { %v7155_v9 = vpop.xlane.xlu0 %7154  ;;  %12971 = vpow2.f32 %v7200_v40  ;;  %v7228_v20 = vsel %vm627_vm3, %v15458_v29, 0.0 }
0x1c00   :  { %v7171_v11 = vsub.f32 %v15395_v37, %v7155_v9  ;;  %12973 = vpow2.f32 %v7198_v45  ;;  %7229 = vadd.xlane.f32.xlu1 %v7228_v20  ;;  %7226 = vadd.xlane.f32.xlu0 %v7225_v35 }
0x1c01   :  { %v15465_v21 = vpop.eup %12963 }
0x1c02   :  { %v7202_v3 = vmul.f32 1.442695, %v7171_v11  ;;  %v15467_v0 = vpop.eup %12965  ;;  %v7234_v23 = vsel %vm627_vm3, %v15465_v21, 0.0  ;;  %v7434_v42 = vpop.permute.xlu1 %7433 }
0x1c03   :  { %v7340_v48 = vpop.permute.xlu0 %7339  ;;  %v7231_v56 = vsel %vm627_vm3, %v15467_v0, 0.0 }
0x1c04   :  { %12975 = vpow2.f32 %v7202_v3  ;;  %12077 = vmatpush3.bf16.msra.mxu0 %v7340_v48  ;;  %7235 = vadd.xlane.f32.xlu1 %v7234_v23 }
0x1c05   :  { %7232 = vadd.xlane.f32.xlu0 %v7231_v56  ;;  %v15473_v37 = vpop.eup %12967  ;;  %12088 = vmatprep.subr.bf16.mxu0 %v13063_v31 }
0x1c06   :  { %v15476_v4 = vpop.eup %12969  ;;  %v7237_v60 = vsel %vm627_vm3, %v15473_v37, 0.0  ;;  %v15498_v47 = vpop.permute.xlu1 %7527 }
0x1c07   :  { %v7240_v54 = vsel %vm627_vm3, %v15476_v4, 0.0  ;;  %v7481_v33 = vpop.permute.xlu0 %7480 }
0x1c08   :  { %7241 = vadd.xlane.f32.xlu1 %v7240_v54 }
0x1c09   :  { %7238 = vadd.xlane.f32.xlu0 %v7237_v60  ;;  %v15482_v19 = vpop.eup %12971 }
0x1c0a   :  { %v15484_v17 = vpop.eup %12973  ;;  %v7246_v12 = vsel %vm627_vm3, %v15482_v19, 0.0 }
0x1c0b   :  { %v7243_v32 = vsel %vm627_vm3, %v15484_v17, 0.0 }
0x1c0c   :  { %7247 = vadd.xlane.f32.xlu1 %v7246_v12 }
0x1c0d   :  { %7244 = vadd.xlane.f32.xlu0 %v7243_v32 }
0x1c0e   :  { %v15490_v59 = vpop.eup %12975 }
0x1c0f   :  { %v7249_v57 = vsel %vm627_vm3, %v15490_v59, 0.0 }
0x1c11   :  { %7250 = vadd.xlane.f32.xlu0 %v7249_v57 }
0x1c1d   :  { %7621 = vrot.lane.b32.xlu1 %v15267_v8, %s13067_s17 }
0x1c27   :  { %7574 = vrot.lane.b32.xlu0 %v15273_v10, %s13067_s17 }
0x1c37   :  { %v7206_v63 = vpop.xlane.xlu1 %7205  ;;  %v7209_v5 = vpop.xlane.xlu0 %7208 }
0x1c38   :  { %12977 = vrcp.f32 %v7206_v63 }
0x1c39   :  { %12979 = vrcp.f32 %v7209_v5 }
0x1c42   :  { %v12978_v50 = vpop.eup %12977 }
0x1c43   :  { %v12980_v52 = vpop.eup %12979  ;;  %v7253_v13 = vmul.f32 %v12978_v50, %v15415_v7 }
0x1c44   :  { %v7255_v38 = vmul.f32 %v12980_v52, %v15417_v26 }
0x1c46   :  { %v7284_v39 = vpack.c.bf16 %v7255_v38, %v7253_v13 }
0x1c48   :  { %12073 = vmatmul.mubr.msk.bf16.vlgmr.msra.gmra.mrb[192].mxu1 %vm627_vm3, %v7284_v39 }
0x1c49   :  { %12083 = vmatpush3.bf16.msra.mxu1 %v7387_v30  ;;  %12084 = vmatprep.mubr.msk.bf16.mxu1 %vm13065_vm1, %v13063_v31 }
0x1c4a   :  { %12094 = vmatprep.subr.bf16.mxu1 %v13063_v31 }
0x1c80   :  { %v7212_v8 = vpop.xlane.xlu1 %7211 }
0x1c81   :  { %12981 = vrcp.f32 %v7212_v8 }
0x1c84   :  { %v7218_v10 = vpop.xlane.xlu1 %7217  ;;  %v7215_v1 = vpop.xlane.xlu0 %7214 }
0x1c85   :  { %12983 = vrcp.f32 %v7215_v1 }
0x1c86   :  { %12985 = vrcp.f32 %v7218_v10 }
0x1c88   :  { %v7224_v22 = vpop.xlane.xlu1 %7223 }
0x1c89   :  { %v7221_v27 = vpop.xlane.xlu0 %7220 }
0x1c8a   :  { %12987 = vrcp.f32 %v7221_v27 }
0x1c8b   :  { %12989 = vrcp.f32 %v7224_v22  ;;  %v12982_v41 = vpop.eup %12981 }
0x1c8c   :  { %v7257_v44 = vmul.f32 %v12982_v41, %v15430_v18 }
0x1c8d   :  { %v7230_v7 = vpop.xlane.xlu1 %7229  ;;  %v7227_v26 = vpop.xlane.xlu0 %7226 }
0x1c8e   :  { %12991 = vrcp.f32 %v7227_v26 }
0x1c8f   :  { %v12984_v15 = vpop.eup %12983  ;;  %12993 = vrcp.f32 %v7230_v7 }
0x1c90   :  { %v7259_v40 = vmul.f32 %v12984_v15, %v15438_v6  ;;  %v12986_v35 = vpop.eup %12985 }
0x1c91   :  { %v7236_v45 = vpop.xlane.xlu1 %7235  ;;  %v7261_v3 = vmul.f32 %v12986_v35, %v15434_v53 }
0x1c92   :  { %v7233_v9 = vpop.xlane.xlu0 %7232  ;;  %v7285_v11 = vpack.c.bf16 %v7259_v40, %v7257_v44 }
0x1c93   :  { %12995 = vrcp.f32 %v7233_v9 }
0x1c94   :  { %v12988_v20 = vpop.eup %12987  ;;  %12997 = vrcp.f32 %v7236_v45  ;;  %12079 = vmatmul.mubr.msk.bf16.vlgmr.msra.gmra.mrb[196].mxu0 %vm627_vm3, %v7285_v11 }
0x1c95   :  { %v7263_v48 = vmul.f32 %v12988_v20, %v15448_v2  ;;  %v7242_v23 = vpop.xlane.xlu1 %7241  ;;  %12089 = vmatpush3.bf16.msra.mxu0 %v7434_v42  ;;  %12090 = vmatprep.mubr.msk.bf16.mxu0 %vm13065_vm1, %v13063_v31  ;;  %v12990_v18 = vpop.eup %12989 }
0x1c96   :  { %v7239_v56 = vpop.xlane.xlu0 %7238  ;;  %12100 = vmatprep.subr.bf16.mxu0 %v13063_v31  ;;  %v7265_v2 = vmul.f32 %v12990_v18, %v15446_v49  ;;  %v12589_v18 = vld [vmem:[%s16384_s6 + $0x10] sm:$0xff]  }
0x1c97   :  { %12999 = vrcp.f32 %v7239_v56  ;;  %v7286_v6 = vpack.c.bf16 %v7263_v48, %v7261_v3 }
0x1c98   :  { %v12992_v60 = vpop.eup %12991  ;;  %13001 = vrcp.f32 %v7242_v23 }
0x1c99   :  { %v7248_v54 = vpop.xlane.xlu1 %7247  ;;  %12085 = vmatmul.mubr.msk.bf16.vlgmr.msra.gmra.mrb[196].mxu1 %vm627_vm3, %v7286_v6  ;;  %v7267_v12 = vmul.f32 %v12992_v60, %v15456_v36  ;;  %v12994_v32 = vpop.eup %12993 }
0x1c9a   :  { %v7245_v53 = vpop.xlane.xlu0 %7244  ;;  %12095 = vmatpush3.bf16.msra.mxu1 %v7481_v33  ;;  %12096 = vmatprep.mubr.msk.bf16.mxu1 %vm13065_vm1, %v13063_v31  ;;  %v7269_v63 = vmul.f32 %v12994_v32, %v15458_v29 }
0x1c9b   :  { %13003 = vrcp.f32 %v7245_v53  ;;  %12106 = vmatprep.subr.bf16.mxu1 %v13063_v31  ;;  %v7287_v57 = vpack.c.bf16 %v7267_v12, %v7265_v2  ;;  %v12590_v2 = vld [vmem:[%s16384_s6 + $0x18] sm:$0xff]  }
0x1c9c   :  { %13005 = vrcp.f32 %v7248_v54 }
0x1c9d   :  { %v12996_v30 = vpop.eup %12995  ;;  %12091 = vmatmul.mubr.msk.bf16.vlgmr.msra.gmra.mrb[200].mxu0 %vm627_vm3, %v7287_v57  ;;  %v7622_v10 = vpop.permute.xlu1 %7621 }
0x1c9e   :  { %v7251_v42 = vpop.xlane.xlu0 %7250  ;;  %v7271_v5 = vmul.f32 %v12996_v30, %v15467_v0  ;;  %v12998_v49 = vpop.eup %12997  ;;  %12101 = vmatpush3.bf16.msra.mxu0 %v15498_v47  ;;  %12102 = vmatprep.mubr.msk.bf16.mxu0 %vm13065_vm1, %v13063_v31 }
0x1c9f   :  { %13007 = vrcp.f32 %v7251_v42  ;;  %12112 = vmatprep.subr.bf16.mxu0 %v13063_v31  ;;  %v7273_v52 = vmul.f32 %v12998_v49, %v15465_v21 }
0x1ca0   :  { %v7288_v36 = vpack.c.bf16 %v7271_v5, %v7269_v63 }
0x1ca1   :  { %v13000_v33 = vpop.eup %12999 }
0x1ca2   :  { %v7575_v50 = vpop.permute.xlu0 %7574  ;;  %v7275_v29 = vmul.f32 %v13000_v33, %v15473_v37  ;;  %12097 = vmatmul.mubr.msk.bf16.vlgmr.msra.gmra.mrb[200].mxu1 %vm627_vm3, %v7288_v36  ;;  %v13002_v0 = vpop.eup %13001 }
0x1ca3   :  { %12107 = vmatpush3.bf16.msra.mxu1 %v7575_v50  ;;  %12108 = vmatprep.mubr.msk.bf16.mxu1 %vm13065_vm1, %v13063_v31  ;;  %v7277_v39 = vmul.f32 %v13002_v0, %v15476_v4 }
0x1ca4   :  { %v7289_v47 = vpack.c.bf16 %v7275_v29, %v7273_v52  ;;  %12118 = vmatprep.subr.bf16.mxu1 %v12589_v18 }
0x1ca5   :  { %v13004_v13 = vpop.eup %13003 }
0x1ca6   :  { %v13006_v38 = vpop.eup %13005  ;;  %v7279_v8 = vmul.f32 %v13004_v13, %v15484_v17  ;;  %12103 = vmatmul.mubr.msk.bf16.vlgmr.msra.gmra.mrb[204].mxu0 %vm627_vm3, %v7289_v47 }
0x1ca7   :  { %12113 = vmatpush3.bf16.msra.mxu0 %v7622_v10  ;;  %12114 = vmatprep.mubr.msk.bf16.mxu0 %vm13065_vm1, %v13063_v31  ;;  %v7281_v1 = vmul.f32 %v13006_v38, %v15482_v19 }
0x1ca8   :  { %v7290_v37 = vpack.c.bf16 %v7279_v8, %v7277_v39 }
0x1ca9   :  { %v13008_v21 = vpop.eup %13007 }
0x1caa   :  { %v7283_v22 = vmul.f32 %v13008_v21, %v15490_v59  ;;  %12109 = vmatmul.mubr.msk.bf16.vlgmr.msra.gmra.mrb[204].mxu1 %vm627_vm3, %v7290_v37 }
0x1cab   :  { %12119 = vmatpush3.bf16.msra.mxu1 %v12589_v18 }
0x1cac   :  { %v7291_v27 = vpack.c.bf16 %v7283_v22, %v7281_v1  ;;  %12120 = vmatprep.subr.bf16.mxu1 %v12590_v2 }
0x1cae   :  { %12115 = vmatmul.mubr.msk.bf16.vlgmr.msra.gmra.mrb[208].mxu0 %vm627_vm3, %v7291_v27 }
0x1caf   :  { %8192 = vmatprep.mubr.bf16.mxu0 %v13071_v24  ;;  %12121 = vmatpush3.bf16.msra.mxu1 %v12590_v2 }
0x1d1b   :  { %v7332_v4 = vpop.f32.mrb[192].mxu1 }
0x1d1c   :  { %v12074_v17 = vpop.f32.mrb[193].mxu1 }
0x1d1d   :  { %v7335_v7 = vpop.f32.mrb[194].mxu1 }
0x1d1e   :  { %v12075_v26 = vpop.f32.mrb[195].mxu1 }
0x1d67   :  { %v7379_v41 = vpop.f32.mrb[196].mxu0 }
0x1d68   :  { %v12080_v15 = vpop.f32.mrb[197].mxu0 }
0x1d69   :  { %v7382_v31 = vpop.f32.mrb[198].mxu0 }
0x1d6a   :  { %v12417_v44 = vpack.i.bf16 %v7382_v31, %v7379_v41  ;;  %v12081_v40 = vpop.f32.mrb[199].mxu0 }
0x1d6c   :  { %v7426_v45 = vpop.f32.mrb[196].mxu1  ;;  %12418 = vrot.lane.b32.xlu0 %v12417_v44, %s13068_s22 }
0x1d6d   :  { %v12086_v19 = vpop.f32.mrb[197].mxu1 }
0x1d6e   :  { %v7429_v59 = vpop.f32.mrb[198].mxu1 }
0x1d6f   :  { %v12422_v9 = vpack.i.bf16 %v7429_v59, %v7426_v45  ;;  %v12087_v35 = vpop.f32.mrb[199].mxu1 }
0x1d70   :  { %v7473_v11 = vpop.f32.mrb[200].mxu0 }
0x1d71   :  { %12423 = vrot.lane.b32.xlu1 %v12422_v9, %s13069_s23  ;;  %v12092_v20 = vpop.f32.mrb[201].mxu0 }
0x1d72   :  { %v7476_v3 = vpop.f32.mrb[202].mxu0 }
0x1d73   :  { %v12427_v48 = vpack.i.bf16 %v7476_v3, %v7473_v11  ;;  %v12093_v23 = vpop.f32.mrb[203].mxu0 }
0x1d75   :  { %v7520_v56 = vpop.f32.mrb[200].mxu1  ;;  %12428 = vrot.lane.b32.xlu1 %v12427_v48, %s13070_s26 }
0x1d76   :  { %v12098_v6 = vpop.f32.mrb[201].mxu1 }
0x1d77   :  { %v7523_v60 = vpop.f32.mrb[202].mxu1 }
0x1d78   :  { %v12099_v54 = vpop.f32.mrb[203].mxu1 }
0x1d79   :  { %v7567_v53 = vpop.f32.mrb[204].mxu0 }
0x1d7a   :  { %v12104_v12 = vpop.f32.mrb[205].mxu0 }
0x1d7b   :  { %v7570_v32 = vpop.f32.mrb[206].mxu0 }
0x1d7c   :  { %v12432_v57 = vpack.i.bf16 %v7570_v32, %v7567_v53  ;;  %v12105_v30 = vpop.f32.mrb[207].mxu0 }
0x1d7d   :  { %v7614_v42 = vpop.f32.mrb[204].mxu1 }
0x1d7e   :  { %12433 = vrot.lane.b32.xlu0 %v12432_v57, %s13068_s22  ;;  %v12110_v63 = vpop.f32.mrb[205].mxu1 }
0x1d7f   :  { %v7617_v5 = vpop.f32.mrb[206].mxu1 }
0x1d80   :  { %v12437_v49 = vpack.i.bf16 %v7617_v5, %v7614_v42  ;;  %v12111_v36 = vpop.f32.mrb[207].mxu1 }
0x1d81   :  { %v7661_v33 = vpop.f32.mrb[208].mxu0 }
0x1d82   :  { %v12116_v50 = vpop.f32.mrb[209].mxu0  ;;  %12438 = vrot.lane.b32.xlu0 %v12437_v49, %s13069_s23 }
0x1d83   :  { %v7664_v52 = vpop.f32.mrb[210].mxu0 }
0x1d84   :  { %v12442_v29 = vpack.i.bf16 %v7664_v52, %v7661_v33  ;;  %v12117_v0 = vpop.f32.mrb[211].mxu0 }
0x1d86   :  { %12443 = vrot.lane.b32.xlu1 %v12442_v29, %s13070_s26 }
0x1dde   :  { %v12419_v47 = vpop.permute.xlu0 %12418 }
0x1ddf   :  { %v12421_v38 = vunpack.i.h.bf16 %v12419_v47  ;;  %v12420_v39 = vunpack.i.l.bf16 %v12419_v47 }
0x1de1   :  { %v7692_v37 = vsel %vm197_vm2, %v7332_v4, %v12420_v39  ;;  %v7693_v1 = vsel %vm197_vm2, %v7335_v7, %v12421_v38 }
0x1de3   :  { %v12424_v13 = vpop.permute.xlu1 %12423 }
0x1de4   :  { %v12426_v8 = vunpack.i.h.bf16 %v12424_v13  ;;  %v12425_v10 = vunpack.i.l.bf16 %v12424_v13 }
0x1de6   :  { %v7695_v17 = vsel %vm627_vm3, %v7693_v1, %v12426_v8  ;;  %v7694_v26 = vsel %vm627_vm3, %v7692_v37, %v12425_v10 }
0x1de7   :  { %v12429_v21 = vpop.permute.xlu1 %12428 }
0x1de8   :  { %v12431_v22 = vunpack.i.h.bf16 %v12429_v21  ;;  %v12430_v27 = vunpack.i.l.bf16 %v12429_v21 }
0x1dea   :  { %v7696_v41 = vsel %vm1216_vm4, %v7694_v26, %v12430_v27  ;;  %v7697_v15 = vsel %vm1216_vm4, %v7695_v17, %v12431_v22 }
0x1deb   :  { %v7728_v31 = vpack.c.bf16 %v7697_v15, %v7696_v41 }
0x1ded   :  { %12122 = vmatprep.mubr.msk.bf16.mxu1 %vm90_vm0, %v7728_v31  ;;  %v10570_v31 = vld [vmem:[%s16385_s7 + $0x100] sm:$0xff] }
0x1df0   :  { %v12434_v44 = vpop.permute.xlu0 %12433 }
0x1df1   :  { %v12436_v45 = vunpack.i.h.bf16 %v12434_v44  ;;  %v12435_v19 = vunpack.i.l.bf16 %v12434_v44  ;;  %v10578_v44 = vld [vmem:[%s16385_s7 + $0x140] sm:$0xff] }
0x1df3   :  { %v7722_v9 = vsel %vm197_vm2, %v7520_v56, %v12435_v19  ;;  %v7723_v35 = vsel %vm197_vm2, %v7523_v60, %v12436_v45  ;;  %v15572_v56 = vld [vmem:[%s16388_s10 + $0x10] sm:$0xff]  ;;  %v10605_v45 = vcombine.high %v10570_v31, %v10578_v44  ;;  %v10579_v19 = vld [vmem:[%s16385_s7 + $0x148] sm:$0xff] }
0x1df4   :  { %v12439_v40 = vpop.permute.xlu0 %12438  ;;  %v7733_v60 = vrot.slane %v15572_v56, %v13591_v61 }
0x1df5   :  { %v12441_v4 = vunpack.i.h.bf16 %v12439_v40  ;;  %v12440_v59 = vunpack.i.l.bf16 %v12439_v40  ;;  %v10571_v40 = vld [vmem:[%s16385_s7 + $0x108] sm:$0xff]  ;;  %8160 = vmatprep.subr.bf16.mxu0 %v10605_v45  ;;  %v10574_v45 = vld [vmem:[%s16385_s7 + $0x120] sm:$0xff] }
0x1df7   :  { %v7725_v3 = vsel %vm627_vm3, %v7723_v35, %v12441_v4  ;;  %v7724_v48 = vsel %vm627_vm3, %v7722_v9, %v12440_v59  ;;  %v10604_v4 = vcombine.low %v10570_v31, %v10578_v44  ;;  %v10606_v59 = vcombine.low %v10571_v40, %v10579_v19  ;;  %v10586_v9 = vld [vmem:[%s16385_s7 + $0x180] sm:$0xff] }
0x1df8   :  { %v12444_v7 = vpop.permute.xlu1 %12443  ;;  %v10594_v35 = vld [vmem:[%s16385_s7 + $0x1c0] sm:$0xff] }
0x1df9   :  { %v12446_v11 = vunpack.i.h.bf16 %v12444_v7  ;;  %v12445_v20 = vunpack.i.l.bf16 %v12444_v7  ;;  %v10607_v7 = vcombine.high %v10571_v40, %v10579_v19  ;;  %8161 = vmatpush1.bf16.msra.mxu0 %v10604_v4 }
0x1dfb   :  { %v7726_v23 = vsel %vm1216_vm4, %v7724_v48, %v12445_v20  ;;  %v7727_v18 = vsel %vm1216_vm4, %v7725_v3, %v12446_v11  ;;  %8213 = vmatprep.subr.bf16.mxu1 %v10607_v7  ;;  %v10587_v11 = vld [vmem:[%s16385_s7 + $0x188] sm:$0xff]  ;;  %v10621_v20 = vcombine.high %v10586_v9, %v10594_v35  ;;  %v10620_v48 = vcombine.low %v10586_v9, %v10594_v35 }
0x1dfc   :  { %v7729_v6 = vpack.c.bf16 %v7727_v18, %v7726_v23  ;;  %v10595_v3 = vld [vmem:[%s16385_s7 + $0x1c8] sm:$0xff] }
0x1dfd   :  { %v10622_v23 = vcombine.low %v10587_v11, %v10595_v3  ;;  %v10623_v18 = vcombine.high %v10587_v11, %v10595_v3  ;;  %8162 = vmatprep.subr.bf16.mxu0 %v10621_v20  ;;  %v10583_v7 = vld [vmem:[%s16385_s7 + $0x168] sm:$0xff] }
0x1dfe   :  { %12123 = vmatmul.mubr.msk.bf16.vlgmr.msra.gmra.mrb[208].mxu1 %vm90_vm0, %v7729_v6  ;;  %8163 = vmatpush1.bf16.msra.mxu0 %v10620_v48  ;;  %v10572_v6 = vld [vmem:[%s16385_s7 + $0x110] sm:$0xff] }
0x1dff   :  { %8245 = vmatprep.mubr.bf16.mxu1 %v13071_v24  ;;  %8214 = vmatpush1.bf16.msra.mxu1 %v10606_v59  ;;  %v10582_v59 = vld [vmem:[%s16385_s7 + $0x160] sm:$0xff] }
0x1e00   :  { %8215 = vmatprep.subr.bf16.mxu1 %v10623_v18  ;;  %v10613_v20 = vcombine.high %v10574_v45, %v10582_v59  ;;  %v10590_v18 = vld [vmem:[%s16385_s7 + $0x1a0] sm:$0xff] }
0x1e03   :  { %8216 = vmatpush1.bf16.msra.mxu1 %v10622_v23 }
0x1ed1   :  { %v12124_v54 = vpop.f32.mrb[208].mxu1 }
0x1ed2   :  { %v7786_v53 = vpop.f32.mrb[209].mxu1  ;;  %v7795_v2 = vadd.f32 %v12124_v54, %v7733_v60  ;;  %v10573_v54 = vld [vmem:[%s16385_s7 + $0x118] sm:$0xff] }
0x1ed3   :  { %v7787_v12 = vadd.f32 %v7786_v53, %v7733_v60  ;;  %v12125_v32 = vpop.f32.mrb[210].mxu1 }
0x1ed4   :  { %v7789_v57 = vpop.f32.mrb[211].mxu1  ;;  %v7803_v63 = vadd.f32 %v7795_v2, %v15217_v34  ;;  %v7798_v5 = vadd.f32 %v12125_v32, %v7733_v60  ;;  %v10581_v2 = vld [vmem:[%s16385_s7 + $0x158] sm:$0xff] }
0x1ed5   :  { %v7801_v30 = vadd.f32 %v7787_v12, %v15210_v51  ;;  %v7790_v42 = vadd.f32 %v7789_v57, %v7733_v60  ;;  %v10580_v60 = vld [vmem:[%s16385_s7 + $0x150] sm:$0xff]  ;;  %v10610_v32 = vcombine.low %v10573_v54, %v10581_v2  ;;  %v10611_v57 = vcombine.high %v10573_v54, %v10581_v2  ;;  %v10599_v54 = vld [vmem:[%s16385_s7 + $0x1e8] sm:$0xff] }
0x1ed6   :  { %v7804_v50 = vadd.f32 %v7798_v5, %v15219_v28  ;;  %v7811_v52 = vsel %vm90_vm0, %v7803_v63, 0.0  ;;  %v10609_v53 = vcombine.high %v10572_v6, %v10580_v60  ;;  %v10608_v12 = vcombine.low %v10572_v6, %v10580_v60  ;;  %v10598_v6 = vld [vmem:[%s16385_s7 + $0x1e0] sm:$0xff]  ;;  %v10591_v60 = vld [vmem:[%s16385_s7 + $0x1a8] sm:$0xff] }
0x1ed7   :  { %v7802_v49 = vadd.f32 %v7790_v42, %v15212_v55  ;;  %v7805_v36 = vsel %vm90_vm0, %v7801_v30, 0.0  ;;  %8319 = vmatprep.subr.bf16.mxu1 %v10611_v57  ;;  %v10576_v57 = vld [vmem:[%s16385_s7 + $0x130] sm:$0xff] }
0x1ed8   :  { %7806 = vadd.xlane.f32.xlu0 %v7805_v36  ;;  %v7814_v29 = vsel %vm90_vm0, %v7804_v50, 0.0  ;;  %8266 = vmatprep.subr.bf16.mxu0 %v10609_v53  ;;  %v10612_v53 = vcombine.low %v10574_v45, %v10582_v59  ;;  %v12606_v45 = vld [vmem:[%s16386_s8 + $0x498] sm:$0xff]   ;;  %v12609_v59 = vld [vmem:[%s16386_s8 + $0x420] sm:$0xff]  }
0x1ed9   :  { %v7808_v33 = vsel %vm90_vm0, %v7802_v49, 0.0 }
0x1eda   :  { %7809 = vadd.xlane.f32.xlu1 %v7808_v33 }
0x1edc   :  { %7812 = vadd.xlane.f32.xlu0 %v7811_v52 }
0x1ee0   :  { %7815 = vadd.xlane.f32.xlu0 %v7814_v29 }
0x1f65   :  { %v7807_v51 = vpop.xlane.xlu0 %7806 }
0x1f66   :  { %v7817_v0 = vmul.f32 0.03125, %v7807_v51 }
0x1f67   :  { %v7810_v34 = vpop.xlane.xlu1 %7809 }
0x1f68   :  { %v15584_v47 = vsub.f32 %v7801_v30, %v7817_v0  ;;  %v7818_v55 = vmul.f32 0.03125, %v7810_v34  ;;  %v7860_v34 = vrot.slane %v15572_v56, %v14058_v25 }
0x1f69   :  { %v7813_v13 = vpop.xlane.xlu0 %7812 }
0x1f6a   :  { %v15586_v38 = vsub.f32 %v7802_v49, %v7818_v55  ;;  %v7819_v39 = vmul.f32 0.03125, %v7813_v13  ;;  %v7825_v8 = vmul.f32 %v15584_v47, %v15584_v47 }
0x1f6c   :  { %v15590_v28 = vsub.f32 %v7803_v63, %v7819_v39  ;;  %v7829_v10 = vsel %vm90_vm0, %v7825_v8, 0.0  ;;  %v7826_v21 = vmul.f32 %v15586_v38, %v15586_v38  ;;  %v7868_v8 = vrot.slane %v15572_v56, %v14063_v62  ;;  %v10589_v56 = vld [vmem:[%s16385_s7 + $0x198] sm:$0xff] }
0x1f6d   :  { %7830 = vadd.xlane.f32.xlu1 %v7829_v10  ;;  %v7816_v37 = vpop.xlane.xlu0 %7815 }
0x1f6e   :  { %v7820_v1 = vmul.f32 0.03125, %v7816_v37  ;;  %v7832_v22 = vsel %vm90_vm0, %v7826_v21, 0.0  ;;  %v7827_v27 = vmul.f32 %v15590_v28, %v15590_v28 }
0x1f6f   :  { %7833 = vadd.xlane.f32.xlu0 %v7832_v22  ;;  %v10588_v22 = vld [vmem:[%s16385_s7 + $0x190] sm:$0xff] }
0x1f70   :  { %v15598_v17 = vsub.f32 %v7804_v50, %v7820_v1  ;;  %v7835_v26 = vsel %vm90_vm0, %v7827_v27, 0.0 }
0x1f71   :  { %7836 = vadd.xlane.f32.xlu1 %v7835_v26 }
0x1f72   :  { %v7828_v41 = vmul.f32 %v15598_v17, %v15598_v17 }
0x1f74   :  { %v7838_v15 = vsel %vm90_vm0, %v7828_v41, 0.0 }
0x1f75   :  { %7839 = vadd.xlane.f32.xlu0 %v7838_v15 }
0x1ffa   :  { %v7831_v30 = vpop.xlane.xlu1 %7830 }
0x1ffb   :  { %v7841_v42 = vmul.f32 0.03125, %v7831_v30  ;;  %v10584_v30 = vld [vmem:[%s16385_s7 + $0x170] sm:$0xff] }
0x1ffc   :  { %v7834_v63 = vpop.xlane.xlu0 %7833 }
0x1ffd   :  { %v7845_v5 = vadd.f32 1e-05, %v7841_v42  ;;  %v7842_v49 = vmul.f32 0.03125, %v7834_v63  ;;  %v10577_v42 = vld [vmem:[%s16385_s7 + $0x138] sm:$0xff] }
0x1ffe   :  { %v7837_v36 = vpop.xlane.xlu1 %7836  ;;  %v10585_v63 = vld [vmem:[%s16385_s7 + $0x178] sm:$0xff] }
0x1fff   :  { %13009 = vrsqrt.f32 %v7845_v5  ;;  %v7846_v33 = vadd.f32 1e-05, %v7842_v49  ;;  %v7843_v50 = vmul.f32 0.03125, %v7837_v36  ;;  %v10628_v5 = vcombine.low %v10590_v18, %v10598_v6 }
0x2000   :  { %v10630_v49 = vcombine.low %v10591_v60, %v10599_v54  ;;  %v10617_v36 = vcombine.high %v10576_v57, %v10584_v30 }
0x2001   :  { %13011 = vrsqrt.f32 %v7846_v33  ;;  %v7847_v52 = vadd.f32 1e-05, %v7843_v50  ;;  %v10619_v33 = vcombine.high %v10577_v42, %v10585_v63  ;;  %v10592_v50 = vld [vmem:[%s16385_s7 + $0x1b0] sm:$0xff] }
0x2002   :  { %v7840_v29 = vpop.xlane.xlu0 %7839 }
0x2003   :  { %13013 = vrsqrt.f32 %v7847_v52  ;;  %v7844_v51 = vmul.f32 0.03125, %v7840_v29  ;;  %v10600_v52 = vld [vmem:[%s16385_s7 + $0x1f0] sm:$0xff]  ;;  %v10593_v29 = vld [vmem:[%s16385_s7 + $0x1b8] sm:$0xff] }
0x2005   :  { %v7848_v0 = vadd.f32 1e-05, %v7844_v51  ;;  %v10601_v51 = vld [vmem:[%s16385_s7 + $0x1f8] sm:$0xff] }
0x2007   :  { %13015 = vrsqrt.f32 %v7848_v0  ;;  %v10616_v0 = vcombine.low %v10576_v57, %v10584_v30  ;;  %v15875_v57 = vld [vmem:[%s16389_s11 + $0x1] ss:$2 sm:$0xff] }
0x2008   :  { %v7917_v30 = vrot.slane %v15875_v57, %v13196_v16 }
0x2009   :  { %v13010_v55 = vpop.eup %13009 }
0x200a   :  { %v7853_v13 = vmul.f32 %v13010_v55, %v15584_v47  ;;  %v10596_v47 = vld [vmem:[%s16385_s7 + $0x1d0] sm:$0xff]  ;;  %v10633_v55 = vcombine.high %v10592_v50, %v10600_v52 }
0x200b   :  { %v13012_v39 = vpop.eup %13011  ;;  %v10624_v35 = vcombine.low %v10588_v22, %v10596_v47 }
0x200c   :  { %v7861_v10 = vmul.f32 %v7860_v34, %v7853_v13  ;;  %v7854_v21 = vmul.f32 %v13012_v39, %v15586_v38  ;;  %v10597_v38 = vld [vmem:[%s16385_s7 + $0x1d8] sm:$0xff]  ;;  %v10635_v13 = vcombine.high %v10593_v29, %v10601_v51  ;;  %v10632_v39 = vcombine.low %v10592_v50, %v10600_v52 }
0x200d   :  { %v13014_v37 = vpop.eup %13013  ;;  %v10627_v40 = vcombine.high %v10589_v56, %v10597_v38  ;;  %v10626_v11 = vcombine.low %v10589_v56, %v10597_v38  ;;  %v12598_v56 = vld [vmem:[%s16386_s8 + $0x488] sm:$0xff]   ;;  %v12599_v38 = vld [vmem:[%s16386_s8 + $0x450] sm:$0xff]  }
0x200e   :  { %v7862_v1 = vmul.f32 %v7860_v34, %v7854_v21  ;;  %v15649_v27 = vadd.f32 %v7868_v8, %v7861_v10  ;;  %v7855_v41 = vmul.f32 %v13014_v37, %v15590_v28  ;;  %v10625_v28 = vcombine.high %v10588_v22, %v10596_v47  ;;  %v12591_v10 = vld [vmem:[%s16386_s8 + $0x440] sm:$0xff]   ;;  %v12595_v22 = vld [vmem:[%s16386_s8 + $0x448] sm:$0xff]  }
0x200f   :  { %v12592_v21 = vld [vmem:[%s16386_s8 + $0x4c0] sm:$0xff]   ;;  %v12597_v47 = vld [vmem:[%s16386_s8 + $0x408] sm:$0xff]  }
0x2010   :  { %v15651_v26 = vadd.f32 %v7868_v8, %v7862_v1  ;;  %v7863_v19 = vmul.f32 %v7860_v34, %v7855_v41  ;;  %v12593_v37 = vld [vmem:[%s16386_s8 + $0x400] sm:$0xff]   ;;  %v12596_v41 = vld [vmem:[%s16386_s8 + $0x4c8] sm:$0xff]  }
0x2011   :  { %v13016_v15 = vpop.eup %13015  ;;  %v12594_v1 = vld [vmem:[%s16386_s8 + $0x480] sm:$0xff]  }
0x2012   :  { %v15665_v31 = vpack.c.bf16 %v15651_v26, %v15649_v27  ;;  %v7856_v44 = vmul.f32 %v13016_v15, %v15598_v17  ;;  %v10575_v17 = vld [vmem:[%s16385_s7 + $0x128] sm:$0xff]  ;;  %v15688_v48 = vadd.f32 %v7868_v8, %v7863_v19  ;;  %v12601_v15 = vld [vmem:[%s16386_s8 + $0x410] sm:$0xff]   ;;  %v12607_v19 = vld [vmem:[%s16386_s8 + $0x460] sm:$0xff]  }
0x2013   :  { %v10615_v3 = vcombine.high %v10575_v17, %v10583_v7  ;;  %v10614_v2 = vcombine.low %v10575_v17, %v10583_v7  ;;  %v12610_v17 = vld [vmem:[%s16386_s8 + $0x4a0] sm:$0xff]   ;;  %v12611_v7 = vld [vmem:[%s16386_s8 + $0x468] sm:$0xff]  }
0x2014   :  { %v7864_v4 = vmul.f32 %v7860_v34, %v7856_v44  ;;  %10636 = vmatmul.mubr.msk.bf16.vlgmr.msra.gmra.mrb[212].mxu0 %vm90_vm0, %v15665_v31  ;;  %10638 = vmatmul.mubr.msk.bf16.vlgmr.msra.gmra.mrb[212].mxu1 %vm90_vm0, %v15665_v31  ;;  %v10618_v34 = vcombine.low %v10577_v42, %v10585_v63  ;;  %v12603_v44 = vld [vmem:[%s16386_s8 + $0x458] sm:$0xff]   ;;  %v7925_v42 = vrot.slane %v15875_v57, %v13616_v43 }
0x2015   :  { %8202 = vmatprep.mubr.bf16.mxu0 %v13071_v24  ;;  %8255 = vmatprep.mubr.bf16.mxu1 %v13071_v24  ;;  %v7921_v63 = vrot.slane %v15875_v57, %v13591_v61 }
0x2016   :  { %v15686_v9 = vadd.f32 %v7868_v8, %v7864_v4  ;;  %8267 = vmatpush1.bf16.msra.mxu0 %v10608_v12  ;;  %8320 = vmatpush1.bf16.msra.mxu1 %v10610_v32  ;;  %v10629_v12 = vcombine.high %v10590_v18, %v10598_v6  ;;  %v10631_v32 = vcombine.high %v10591_v60, %v10599_v54  ;;  %v12608_v4 = vld [vmem:[%s16386_s8 + $0x4e0] sm:$0xff]   ;;  %v12617_v18 = vld [vmem:[%s16386_s8 + $0x430] sm:$0xff]   ;;  %v12619_v60 = vld [vmem:[%s16386_s8 + $0x478] sm:$0xff]  }
0x2017   :  { %8268 = vmatprep.subr.bf16.mxu0 %v10625_v28  ;;  %8321 = vmatprep.subr.bf16.mxu1 %v10627_v40  ;;  %v10634_v8 = vcombine.low %v10593_v29, %v10601_v51  ;;  %v12604_v28 = vld [vmem:[%s16386_s8 + $0x4d8] sm:$0xff]   ;;  %v12618_v6 = vld [vmem:[%s16386_s8 + $0x4b0] sm:$0xff]  }
0x2018   :  { %v15692_v23 = vpack.c.bf16 %v15686_v9, %v15688_v48  ;;  %v12605_v40 = vld [vmem:[%s16386_s8 + $0x418] sm:$0xff]  }
0x2019   :  { %v12620_v54 = vld [vmem:[%s16386_s8 + $0x4f8] sm:$0xff]  }
0x201a   :  { %8269 = vmatpush1.bf16.msra.mxu0 %v10624_v35  ;;  %8322 = vmatpush1.bf16.msra.mxu1 %v10626_v11  ;;  %v12612_v35 = vld [vmem:[%s16386_s8 + $0x4e8] sm:$0xff]  }
0x201b   :  { %8372 = vmatprep.subr.bf16.mxu0 %v10613_v20  ;;  %8425 = vmatprep.subr.bf16.mxu1 %v10615_v3  ;;  %v12613_v11 = vld [vmem:[%s16386_s8 + $0x428] sm:$0xff]   ;;  %v12615_v3 = vld [vmem:[%s16386_s8 + $0x470] sm:$0xff]  }
0x201c   :  { %10637 = vmatmul.mubr.msk.bf16.gmra.mrb[216].mxu0 %vm90_vm0, %v15692_v23  ;;  %10639 = vmatmul.mubr.msk.bf16.gmra.mrb[216].mxu1 %vm90_vm0, %v15692_v23  ;;  %v12614_v20 = vld [vmem:[%s16386_s8 + $0x4a8] sm:$0xff]  }
0x201d   :  { %8298 = vmatprep.mubr.bf16.mxu0 %v13071_v24  ;;  %8351 = vmatprep.mubr.bf16.mxu1 %v13071_v24 }
0x2024   :  { %10640 = vmatmul.mubr.msk.bf16.vlgmr.msra.gmra.mrb[220].mxu0 %vm90_vm0, %v15665_v31  ;;  %10642 = vmatmul.mubr.msk.bf16.vlgmr.msra.gmra.mrb[220].mxu1 %vm90_vm0, %v15665_v31 }
0x2025   :  { %8308 = vmatprep.mubr.bf16.mxu0 %v13071_v24  ;;  %8361 = vmatprep.mubr.bf16.mxu1 %v13071_v24 }
0x2026   :  { %8373 = vmatpush1.bf16.msra.mxu0 %v10612_v53  ;;  %8426 = vmatpush1.bf16.msra.mxu1 %v10614_v2  ;;  %v12621_v53 = vld [vmem:[%s16386_s8 + $0x438] sm:$0xff]  }
0x2027   :  { %8374 = vmatprep.subr.bf16.mxu0 %v10629_v12  ;;  %8427 = vmatprep.subr.bf16.mxu1 %v10631_v32  ;;  %v12622_v2 = vld [vmem:[%s16386_s8 + $0x4b8] sm:$0xff]   ;;  %v12623_v12 = vld [vmem:[%s16386_s8 + $0x540] sm:$0xff]  }
0x2028   :  { %v12624_v32 = vld [vmem:[%s16386_s8 + $0x5c0] sm:$0xff]  }
0x202a   :  { %8375 = vmatpush1.bf16.msra.mxu0 %v10628_v5  ;;  %8428 = vmatpush1.bf16.msra.mxu1 %v10630_v49  ;;  %v7929_v5 = vrot.slane %v15875_v57, %v13621_v14 }
0x202b   :  { %8478 = vmatprep.subr.bf16.mxu0 %v10617_v36  ;;  %8531 = vmatprep.subr.bf16.mxu1 %v10619_v33 }
0x202c   :  { %10641 = vmatmul.mubr.msk.bf16.gmra.mrb[224].mxu0 %vm90_vm0, %v15692_v23  ;;  %10643 = vmatmul.mubr.msk.bf16.gmra.mrb[224].mxu1 %vm90_vm0, %v15692_v23 }
0x202d   :  { %8404 = vmatprep.mubr.bf16.mxu0 %v13071_v24  ;;  %8457 = vmatprep.mubr.bf16.mxu1 %v13071_v24 }
0x2034   :  { %10644 = vmatmul.mubr.msk.bf16.vlgmr.msra.gmra.mrb[228].mxu0 %vm90_vm0, %v15665_v31  ;;  %10646 = vmatmul.mubr.msk.bf16.vlgmr.msra.gmra.mrb[228].mxu1 %vm90_vm0, %v15665_v31 }
0x2035   :  { %8414 = vmatprep.mubr.bf16.mxu0 %v13071_v24  ;;  %8467 = vmatprep.mubr.bf16.mxu1 %v13071_v24 }
0x2036   :  { %8479 = vmatpush1.bf16.msra.mxu0 %v10616_v0  ;;  %8532 = vmatpush1.bf16.msra.mxu1 %v10618_v34 }
0x2037   :  { %8480 = vmatprep.subr.bf16.mxu0 %v10633_v55  ;;  %8533 = vmatprep.subr.bf16.mxu1 %v10635_v13 }
0x203a   :  { %8481 = vmatpush1.bf16.msra.mxu0 %v10632_v39  ;;  %8534 = vmatpush1.bf16.msra.mxu1 %v10634_v8 }
0x203b   :  { %11434 = vmatprep.subr.bf16.mxu0 %v12591_v10  ;;  %11462 = vmatprep.subr.bf16.mxu1 %v12592_v21 }
0x203c   :  { %10645 = vmatmul.mubr.msk.bf16.gmra.mrb[232].mxu0 %vm90_vm0, %v15692_v23  ;;  %10647 = vmatmul.mubr.msk.bf16.gmra.mrb[232].mxu1 %vm90_vm0, %v15692_v23 }
0x203d   :  { %8510 = vmatprep.mubr.bf16.mxu0 %v13071_v24  ;;  %8563 = vmatprep.mubr.bf16.mxu1 %v13071_v24 }
0x2044   :  { %10648 = vmatmul.mubr.msk.bf16.vlgmr.msra.gmra.mrb[236].mxu0 %vm90_vm0, %v15665_v31  ;;  %10650 = vmatmul.mubr.msk.bf16.vlgmr.msra.gmra.mrb[236].mxu1 %vm90_vm0, %v15665_v31  ;;  %v12602_v31 = vld [vmem:[%s16386_s8 + $0x490] sm:$0xff]  }
0x2045   :  { %8520 = vmatprep.mubr.bf16.mxu0 %v13071_v24  ;;  %8573 = vmatprep.mubr.bf16.mxu1 %v13071_v24  ;;  %v12600_v24 = vld [vmem:[%s16386_s8 + $0x4d0] sm:$0xff]  }
0x2046   :  { %11435 = vmatpush3.bf16.msra.mxu0 %v12593_v37  ;;  %11463 = vmatpush3.bf16.msra.mxu1 %v12594_v1 }
0x2047   :  { %11436 = vmatprep.subr.bf16.mxu0 %v12595_v22  ;;  %11464 = vmatprep.subr.bf16.mxu1 %v12596_v41 }
0x204a   :  { %11437 = vmatpush3.bf16.msra.mxu0 %v12597_v47  ;;  %11465 = vmatpush3.bf16.msra.mxu1 %v12598_v56 }
0x204b   :  { %11438 = vmatprep.subr.bf16.mxu0 %v12599_v38  ;;  %11466 = vmatprep.subr.bf16.mxu1 %v12600_v24 }
0x204c   :  { %10649 = vmatmul.mubr.msk.bf16.gmra.mrb[240].mxu0 %vm90_vm0, %v15692_v23  ;;  %10651 = vmatmul.mubr.msk.bf16.gmra.mrb[240].mxu1 %vm90_vm0, %v15692_v23  ;;  %v12616_v23 = vld [vmem:[%s16386_s8 + $0x4f0] sm:$0xff]  }
0x204e   :  { %11439 = vmatpush3.bf16.msra.mxu0 %v12601_v15  ;;  %11467 = vmatpush3.bf16.msra.mxu1 %v12602_v31 }
0x204f   :  { %11440 = vmatprep.subr.bf16.mxu0 %v12603_v44  ;;  %11468 = vmatprep.subr.bf16.mxu1 %v12604_v28 }
0x2052   :  { %11441 = vmatpush3.bf16.msra.mxu0 %v12605_v40  ;;  %11469 = vmatpush3.bf16.msra.mxu1 %v12606_v45 }
0x2053   :  { %11442 = vmatprep.subr.bf16.mxu0 %v12607_v19  ;;  %11470 = vmatprep.subr.bf16.mxu1 %v12608_v4  ;;  %v12625_v4 = vld [vmem:[%s16386_s8 + $0x500] sm:$0xff]  }
0x2056   :  { %11443 = vmatpush3.bf16.msra.mxu0 %v12609_v59  ;;  %11471 = vmatpush3.bf16.msra.mxu1 %v12610_v17  ;;  %v12626_v59 = vld [vmem:[%s16386_s8 + $0x580] sm:$0xff]  }
0x2057   :  { %11444 = vmatprep.subr.bf16.mxu0 %v12611_v7  ;;  %11472 = vmatprep.subr.bf16.mxu1 %v12612_v35 }
0x205a   :  { %11445 = vmatpush3.bf16.msra.mxu0 %v12613_v11  ;;  %11473 = vmatpush3.bf16.msra.mxu1 %v12614_v20  ;;  %v12627_v20 = vld [vmem:[%s16386_s8 + $0x548] sm:$0xff]  }
0x205b   :  { %11446 = vmatprep.subr.bf16.mxu0 %v12615_v3  ;;  %11474 = vmatprep.subr.bf16.mxu1 %v12616_v23  ;;  %v12628_v3 = vld [vmem:[%s16386_s8 + $0x5c8] sm:$0xff]   ;;  %v15899_v23 = vrot.slane %v15875_v57, %v14058_v25 }
0x205e   :  { %11447 = vmatpush3.bf16.msra.mxu0 %v12617_v18  ;;  %11475 = vmatpush3.bf16.msra.mxu1 %v12618_v6 }
0x205f   :  { %11448 = vmatprep.subr.bf16.mxu0 %v12619_v60  ;;  %11476 = vmatprep.subr.bf16.mxu1 %v12620_v54 }
0x2062   :  { %11449 = vmatpush3.bf16.msra.mxu0 %v12621_v53  ;;  %11477 = vmatpush3.bf16.msra.mxu1 %v12622_v2  ;;  %v15903_v53 = vrot.slane %v15875_v57, %v14309_v46 }
0x2063   :  { %11490 = vmatprep.subr.bf16.mxu0 %v12623_v12  ;;  %11518 = vmatprep.subr.bf16.mxu1 %v12624_v32 }
0x20e7   :  { %v8194_v49 = vpop.f32.mrb[212].mxu0  ;;  %v8247_v36 = vpop.f32.mrb[212].mxu1 }
0x20e8   :  { %v8195_v33 = vadd.f32 %v8194_v49, %v7917_v30  ;;  %v8248_v50 = vadd.f32 %v8247_v36, %v7925_v42  ;;  %v8196_v52 = vpop.f32.mrb[213].mxu0  ;;  %v8249_v29 = vpop.f32.mrb[213].mxu1  ;;  %v15907_v36 = vrot.slane %v15875_v57, %v14063_v62 }
0x20e9   :  { %v8197_v51 = vadd.f32 %v8196_v52, %v7921_v63  ;;  %v8250_v0 = vadd.f32 %v8249_v29, %v7929_v5  ;;  %v8198_v34 = vpop.f32.mrb[214].mxu0  ;;  %v8251_v55 = vpop.f32.mrb[214].mxu1  ;;  %v12629_v52 = vld [vmem:[%s16386_s8 + $0x508] sm:$0xff]  }
0x20ea   :  { %v8199_v13 = vadd.f32 %v8198_v34, %v7917_v30  ;;  %v8252_v39 = vadd.f32 %v8251_v55, %v7925_v42  ;;  %v8200_v8 = vpop.f32.mrb[215].mxu0  ;;  %v8253_v10 = vpop.f32.mrb[215].mxu1  ;;  %v8584_v1 = vmax.f32 %v8195_v33, 0.0  ;;  %v8586_v22 = vmax.f32 %v8248_v50, 0.0 }
0x20eb   :  { %v8201_v21 = vadd.f32 %v8200_v8, %v7921_v63  ;;  %v8254_v37 = vadd.f32 %v8253_v10, %v7929_v5  ;;  %v8585_v56 = vmax.f32 %v8197_v51, 0.0  ;;  %v8587_v38 = vmax.f32 %v8250_v0, 0.0 }
0x20ec   :  { %v8600_v41 = vmax.f32 %v8199_v13, 0.0  ;;  %v8602_v47 = vmax.f32 %v8252_v39, 0.0 }
0x20ed   :  { %v8601_v24 = vmax.f32 %v8201_v21, 0.0  ;;  %v8603_v15 = vmax.f32 %v8254_v37, 0.0 }
0x20ee   :  { %v8905_v31 = vpack.c.bf16 %v8600_v41, %v8584_v1  ;;  %v8907_v44 = vpack.c.bf16 %v8602_v47, %v8586_v22  ;;  %v12633_v41 = vld [vmem:[%s16386_s8 + $0x510] sm:$0xff]  }
0x20ef   :  { %v8906_v28 = vpack.c.bf16 %v8601_v24, %v8585_v56  ;;  %v8908_v40 = vpack.c.bf16 %v8603_v15, %v8587_v38  ;;  %v8204_v45 = vpop.f32.mrb[216].mxu0  ;;  %v8257_v19 = vpop.f32.mrb[216].mxu1  ;;  %v12634_v47 = vld [vmem:[%s16386_s8 + $0x590] sm:$0xff]  }
0x20f0   :  { %v8205_v17 = vadd.f32 %v8204_v45, %v7917_v30  ;;  %v8258_v7 = vadd.f32 %v8257_v19, %v7925_v42  ;;  %v8206_v35 = vpop.f32.mrb[217].mxu0  ;;  %v8259_v11 = vpop.f32.mrb[217].mxu1 }
0x20f1   :  { %v8207_v18 = vadd.f32 %v8206_v35, %v7921_v63  ;;  %v8260_v6 = vadd.f32 %v8259_v11, %v7929_v5  ;;  %v8208_v60 = vpop.f32.mrb[218].mxu0  ;;  %v8261_v54 = vpop.f32.mrb[218].mxu1  ;;  %9741 = vmatprep.mubr.bf16.mxu0 %v8906_v28  ;;  %9790 = vmatprep.mubr.bf16.mxu1 %v8908_v40 }
0x20f2   :  { %v8209_v2 = vadd.f32 %v8208_v60, %v7917_v30  ;;  %v8262_v12 = vadd.f32 %v8261_v54, %v7925_v42  ;;  %v8210_v32 = vpop.f32.mrb[219].mxu0  ;;  %v8263_v49 = vpop.f32.mrb[219].mxu1  ;;  %9742 = vmatmul.mubr.bf16.vlgmr.msra.gmra.mrb[244].mxu0 %v8905_v31  ;;  %9791 = vmatmul.mubr.bf16.vlgmr.msra.gmra.mrb[244].mxu1 %v8907_v44  ;;  %v12630_v30 = vld [vmem:[%s16386_s8 + $0x588] sm:$0xff]   ;;  %v15917_v42 = vrot.slane %v15875_v57, %v14318_v58  ;;  %v8616_v29 = vmax.f32 %v8205_v17, 0.0  ;;  %v12635_v31 = vld [vmem:[%s16386_s8 + $0x558] sm:$0xff]  }
0x20f3   :  { %v8211_v33 = vadd.f32 %v8210_v32, %v7921_v63  ;;  %v8264_v50 = vadd.f32 %v8263_v49, %v7929_v5  ;;  %11491 = vmatpush3.bf16.msra.mxu0 %v12625_v4  ;;  %11519 = vmatpush3.bf16.msra.mxu1 %v12626_v59  ;;  %v8618_v51 = vmax.f32 %v8258_v7, 0.0  ;;  %v12631_v63 = vld [vmem:[%s16386_s8 + $0x550] sm:$0xff]   ;;  %v8617_v55 = vmax.f32 %v8207_v18, 0.0  ;;  %v12636_v44 = vld [vmem:[%s16386_s8 + $0x5d8] sm:$0xff]  }
0x20f4   :  { %v8632_v0 = vmax.f32 %v8209_v2, 0.0  ;;  %v8634_v34 = vmax.f32 %v8262_v12, 0.0  ;;  %11492 = vmatprep.subr.bf16.mxu0 %v12627_v20  ;;  %11520 = vmatprep.subr.bf16.mxu1 %v12628_v3  ;;  %v12632_v5 = vld [vmem:[%s16386_s8 + $0x5d0] sm:$0xff]   ;;  %v8619_v13 = vmax.f32 %v8260_v6, 0.0  ;;  %v12637_v20 = vld [vmem:[%s16386_s8 + $0x518] sm:$0xff]   ;;  %v12639_v2 = vld [vmem:[%s16386_s8 + $0x560] sm:$0xff]  }
0x20f5   :  { %v8633_v39 = vmax.f32 %v8211_v33, 0.0  ;;  %v8635_v8 = vmax.f32 %v8264_v50, 0.0  ;;  %v12638_v3 = vld [vmem:[%s16386_s8 + $0x598] sm:$0xff]   ;;  %v12640_v12 = vld [vmem:[%s16386_s8 + $0x5e0] sm:$0xff]  }
0x20f6   :  { %v8921_v57 = vpack.c.bf16 %v8632_v0, %v8616_v29  ;;  %v8923_v10 = vpack.c.bf16 %v8634_v34, %v8618_v51  ;;  %v15964_v29 = vld [vmem:[%s16389_s11 + $0x11] ss:$2 sm:$0xff] }
0x20f7   :  { %v8922_v21 = vpack.c.bf16 %v8633_v39, %v8617_v55  ;;  %v8924_v37 = vpack.c.bf16 %v8635_v8, %v8619_v13  ;;  %11493 = vmatpush3.bf16.msra.mxu0 %v12629_v52  ;;  %11521 = vmatpush3.bf16.msra.mxu1 %v12630_v30  ;;  %v8300_v1 = vpop.f32.mrb[220].mxu0  ;;  %v8353_v22 = vpop.f32.mrb[220].mxu1  ;;  %v12642_v55 = vld [vmem:[%s16386_s8 + $0x5a0] sm:$0xff]  }
0x20f8   :  { %v8301_v56 = vadd.f32 %v8300_v1, %v15899_v23  ;;  %v8354_v38 = vadd.f32 %v8353_v22, %v15903_v53  ;;  %v8302_v24 = vpop.f32.mrb[221].mxu0  ;;  %v8355_v15 = vpop.f32.mrb[221].mxu1  ;;  %11494 = vmatprep.subr.bf16.mxu0 %v12631_v63  ;;  %11522 = vmatprep.subr.bf16.mxu1 %v12632_v5  ;;  %v12641_v5 = vld [vmem:[%s16386_s8 + $0x520] sm:$0xff]  }
0x20f9   :  { %v8303_v28 = vadd.f32 %v8302_v24, %v15907_v36  ;;  %v8356_v40 = vadd.f32 %v8355_v15, %v15917_v42  ;;  %v8304_v45 = vpop.f32.mrb[222].mxu0  ;;  %v8357_v19 = vpop.f32.mrb[222].mxu1  ;;  %9749 = vmatprep.mubr.bf16.mxu0 %v8922_v21  ;;  %9798 = vmatprep.mubr.bf16.mxu1 %v8924_v37  ;;  %v12644_v21 = vld [vmem:[%s16386_s8 + $0x5e8] sm:$0xff]  }
0x20fa   :  { %v8305_v4 = vadd.f32 %v8304_v45, %v15899_v23  ;;  %v8358_v59 = vadd.f32 %v8357_v19, %v15903_v53  ;;  %v8306_v17 = vpop.f32.mrb[223].mxu0  ;;  %v8359_v7 = vpop.f32.mrb[223].mxu1  ;;  %9750 = vmatmul.mubr.bf16.gmra.mrb[248].mxu0 %v8921_v57  ;;  %9799 = vmatmul.mubr.bf16.gmra.mrb[248].mxu1 %v8923_v10  ;;  %v8588_v18 = vmax.f32 %v8301_v56, 0.0  ;;  %v8590_v6 = vmax.f32 %v8354_v38, 0.0  ;;  %v12643_v10 = vld [vmem:[%s16386_s8 + $0x568] sm:$0xff]   ;;  %v12648_v19 = vld [vmem:[%s16386_s8 + $0x5f0] sm:$0xff]  }
0x20fb   :  { %v8307_v35 = vadd.f32 %v8306_v17, %v15907_v36  ;;  %v8360_v11 = vadd.f32 %v8359_v7, %v15917_v42  ;;  %11495 = vmatpush3.bf16.msra.mxu0 %v12633_v41  ;;  %11523 = vmatpush3.bf16.msra.mxu1 %v12634_v47  ;;  %v8589_v32 = vmax.f32 %v8303_v28, 0.0  ;;  %v8591_v49 = vmax.f32 %v8356_v40, 0.0 }
0x20fc   :  { %v8604_v60 = vmax.f32 %v8305_v4, 0.0  ;;  %v8606_v54 = vmax.f32 %v8358_v59, 0.0  ;;  %11496 = vmatprep.subr.bf16.mxu0 %v12635_v31  ;;  %11524 = vmatprep.subr.bf16.mxu1 %v12636_v44  ;;  %v15984_v47 = vrot.slane %v15964_v29, %v13196_v16  ;;  %v15990_v31 = vrot.slane %v15964_v29, %v13616_v43  ;;  %v12645_v16 = vld [vmem:[%s16386_s8 + $0x528] sm:$0xff]  }
0x20fd   :  { %v8605_v33 = vmax.f32 %v8307_v35, 0.0  ;;  %v8607_v50 = vmax.f32 %v8360_v11, 0.0  ;;  %v15994_v44 = vrot.slane %v15964_v29, %v13591_v61  ;;  %v16006_v43 = vrot.slane %v15964_v29, %v13621_v14 }
0x20fe   :  { %v15957_v52 = vpack.c.bf16 %v8604_v60, %v8588_v18  ;;  %v15959_v30 = vpack.c.bf16 %v8606_v54, %v8590_v6  ;;  %v12649_v6 = vld [vmem:[%s16386_s8 + $0x530] sm:$0xff]  }
0x20ff   :  { %v8910_v51 = vpack.c.bf16 %v8605_v33, %v8589_v32  ;;  %v8912_v0 = vpack.c.bf16 %v8607_v50, %v8591_v49  ;;  %11497 = vmatpush3.bf16.msra.mxu0 %v12637_v20  ;;  %11525 = vmatpush3.bf16.msra.mxu1 %v12638_v3  ;;  %v8310_v34 = vpop.f32.mrb[224].mxu0  ;;  %v8363_v63 = vpop.f32.mrb[224].mxu1  ;;  %v12650_v60 = vld [vmem:[%s16386_s8 + $0x5b0] sm:$0xff]   ;;  %v12651_v49 = vld [vmem:[%s16386_s8 + $0x578] sm:$0xff]  }
0x2100   :  { %v8311_v13 = vadd.f32 %v8310_v34, %v15899_v23  ;;  %v8364_v39 = vadd.f32 %v8363_v63, %v15903_v53  ;;  %v8312_v8 = vpop.f32.mrb[225].mxu0  ;;  %v8365_v57 = vpop.f32.mrb[225].mxu1  ;;  %11498 = vmatprep.subr.bf16.mxu0 %v12639_v2  ;;  %11526 = vmatprep.subr.bf16.mxu1 %v12640_v12  ;;  %v12652_v33 = vld [vmem:[%s16386_s8 + $0x5f8] sm:$0xff]  }
0x2101   :  { %v8313_v37 = vadd.f32 %v8312_v8, %v15907_v36  ;;  %v8366_v1 = vadd.f32 %v8365_v57, %v15917_v42  ;;  %v8314_v22 = vpop.f32.mrb[226].mxu0  ;;  %v8367_v41 = vpop.f32.mrb[226].mxu1  ;;  %9839 = vmatprep.mubr.bf16.mxu0 %v8910_v51  ;;  %9888 = vmatprep.mubr.bf16.mxu1 %v8912_v0  ;;  %v12653_v57 = vld [vmem:[%s16386_s8 + $0x538] sm:$0xff]  }
0x2102   :  { %v8315_v56 = vadd.f32 %v8314_v22, %v15899_v23  ;;  %v8368_v38 = vadd.f32 %v8367_v41, %v15903_v53  ;;  %v8316_v24 = vpop.f32.mrb[227].mxu0  ;;  %v8369_v15 = vpop.f32.mrb[227].mxu1  ;;  %v12646_v23 = vld [vmem:[%s16386_s8 + $0x5a8] sm:$0xff]   ;;  %v8620_v61 = vmax.f32 %v8311_v13, 0.0  ;;  %v8622_v53 = vmax.f32 %v8364_v39, 0.0  ;;  %v12655_v41 = vld [vmem:[%s16386_s8 + $0x640] sm:$0xff]  }
0x2103   :  { %v8317_v28 = vadd.f32 %v8316_v24, %v15907_v36  ;;  %v8370_v40 = vadd.f32 %v8369_v15, %v15917_v42  ;;  %11499 = vmatpush3.bf16.msra.mxu0 %v12641_v5  ;;  %11527 = vmatpush3.bf16.msra.mxu1 %v12642_v55  ;;  %v12647_v42 = vld [vmem:[%s16386_s8 + $0x570] sm:$0xff]   ;;  %v8621_v4 = vmax.f32 %v8313_v37, 0.0  ;;  %v8623_v59 = vmax.f32 %v8366_v1, 0.0 }
0x2104   :  { %v8636_v45 = vmax.f32 %v8315_v56, 0.0  ;;  %v8638_v36 = vmax.f32 %v8368_v38, 0.0  ;;  %11500 = vmatprep.subr.bf16.mxu0 %v12643_v10  ;;  %11528 = vmatprep.subr.bf16.mxu1 %v12644_v21  ;;  %v12654_v10 = vld [vmem:[%s16386_s8 + $0x5b8] sm:$0xff]   ;;  %v12656_v56 = vld [vmem:[%s16386_s8 + $0x6c0] sm:$0xff]  }
0x2105   :  { %v8637_v17 = vmax.f32 %v8317_v28, 0.0  ;;  %v8639_v7 = vmax.f32 %v8370_v40, 0.0 }
0x2106   :  { %v16014_v14 = vpack.c.bf16 %v8636_v45, %v8620_v61  ;;  %v16016_v35 = vpack.c.bf16 %v8638_v36, %v8622_v53 }
0x2107   :  { %v16018_v11 = vpack.c.bf16 %v8637_v17, %v8621_v4  ;;  %v16020_v20 = vpack.c.bf16 %v8639_v7, %v8623_v59  ;;  %11501 = vmatpush3.bf16.msra.mxu0 %v12645_v16  ;;  %11529 = vmatpush3.bf16.msra.mxu1 %v12646_v23  ;;  %v8406_v3 = vpop.f32.mrb[228].mxu0  ;;  %v8459_v18 = vpop.f32.mrb[228].mxu1  ;;  %v12657_v59 = vld [vmem:[%s16386_s8 + $0x600] sm:$0xff]  }
0x2108   :  { %v8407_v54 = vadd.f32 %v8406_v3, %v15984_v47  ;;  %v8460_v2 = vadd.f32 %v8459_v18, %v15990_v31  ;;  %v8408_v12 = vpop.f32.mrb[229].mxu0  ;;  %v8461_v32 = vpop.f32.mrb[229].mxu1  ;;  %11502 = vmatprep.subr.bf16.mxu0 %v12647_v42  ;;  %11530 = vmatprep.subr.bf16.mxu1 %v12648_v19  ;;  %v12658_v17 = vld [vmem:[%s16386_s8 + $0x680] sm:$0xff]  }
0x2109   :  { %v8409_v50 = vadd.f32 %v8408_v12, %v15994_v44  ;;  %v8462_v51 = vadd.f32 %v8461_v32, %v16006_v43  ;;  %v8410_v0 = vpop.f32.mrb[230].mxu0  ;;  %v8463_v34 = vpop.f32.mrb[230].mxu1  ;;  %v16084_v12 = vrot.slane %v15964_v29, %v14309_v46 }
0x210a   :  { %v8411_v63 = vadd.f32 %v8410_v0, %v15984_v47  ;;  %v8464_v5 = vadd.f32 %v8463_v34, %v15990_v31  ;;  %v8412_v55 = vpop.f32.mrb[231].mxu0  ;;  %v8465_v13 = vpop.f32.mrb[231].mxu1  ;;  %v8592_v21 = vmax.f32 %v8407_v54, 0.0  ;;  %v8594_v37 = vmax.f32 %v8460_v2, 0.0  ;;  %v12660_v54 = vld [vmem:[%s16386_s8 + $0x6c8] sm:$0xff]  }
0x210b   :  { %v8413_v39 = vadd.f32 %v8412_v55, %v15994_v44  ;;  %v8466_v8 = vadd.f32 %v8465_v13, %v16006_v43  ;;  %11503 = vmatpush3.bf16.msra.mxu0 %v12649_v6  ;;  %11531 = vmatpush3.bf16.msra.mxu1 %v12650_v60  ;;  %v8593_v38 = vmax.f32 %v8409_v50, 0.0  ;;  %v8595_v24 = vmax.f32 %v8462_v51, 0.0  ;;  %v12659_v60 = vld [vmem:[%s16386_s8 + $0x648] sm:$0xff]  }
0x210c   :  { %v8608_v1 = vmax.f32 %v8411_v63, 0.0  ;;  %v8610_v22 = vmax.f32 %v8464_v5, 0.0  ;;  %11504 = vmatprep.subr.bf16.mxu0 %v12651_v49  ;;  %11532 = vmatprep.subr.bf16.mxu1 %v12652_v33  ;;  %v16080_v2 = vrot.slane %v15964_v29, %v14058_v25  ;;  %v16092_v51 = vrot.slane %v15964_v29, %v14063_v62  ;;  %v12661_v62 = vld [vmem:[%s16386_s8 + $0x608] sm:$0xff]   ;;  %v12664_v5 = vld [vmem:[%s16386_s8 + $0x6d0] sm:$0xff]  }
0x210d   :  { %v8609_v15 = vmax.f32 %v8413_v39, 0.0  ;;  %v8611_v28 = vmax.f32 %v8466_v8, 0.0 }
0x210e   :  { %v16054_v40 = vpack.c.bf16 %v8608_v1, %v8592_v21  ;;  %v16056_v16 = vpack.c.bf16 %v8610_v22, %v8594_v37 }
0x210f   :  { %v16058_v23 = vpack.c.bf16 %v8609_v15, %v8593_v38  ;;  %v16060_v61 = vpack.c.bf16 %v8611_v28, %v8595_v24  ;;  %11505 = vmatpush3.bf16.msra.mxu0 %v12653_v57  ;;  %11533 = vmatpush3.bf16.msra.mxu1 %v12654_v10  ;;  %v8416_v53 = vpop.f32.mrb[232].mxu0  ;;  %v8469_v45 = vpop.f32.mrb[232].mxu1 }
0x2110   :  { %v8417_v36 = vadd.f32 %v8416_v53, %v15984_v47  ;;  %v8470_v42 = vadd.f32 %v8469_v45, %v15990_v31  ;;  %v8418_v19 = vpop.f32.mrb[233].mxu0  ;;  %v8471_v4 = vpop.f32.mrb[233].mxu1  ;;  %11546 = vmatprep.subr.bf16.mxu0 %v12655_v41  ;;  %11574 = vmatprep.subr.bf16.mxu1 %v12656_v56  ;;  %v12665_v41 = vld [vmem:[%s16386_s8 + $0x610] sm:$0xff]   ;;  %v12667_v53 = vld [vmem:[%s16386_s8 + $0x658] sm:$0xff]  }
0x2111   :  { %v8419_v7 = vadd.f32 %v8418_v19, %v15994_v44  ;;  %v8472_v3 = vadd.f32 %v8471_v4, %v16006_v43  ;;  %v8420_v18 = vpop.f32.mrb[234].mxu0  ;;  %v8473_v6 = vpop.f32.mrb[234].mxu1  ;;  %v12666_v56 = vld [vmem:[%s16386_s8 + $0x690] sm:$0xff]   ;;  %v12668_v45 = vld [vmem:[%s16386_s8 + $0x6d8] sm:$0xff]  }
0x2112   :  { %v8421_v32 = vadd.f32 %v8420_v18, %v15984_v47  ;;  %v8474_v49 = vadd.f32 %v8473_v6, %v15990_v31  ;;  %9840 = vmatmul.mubr.bf16.vlgmr.msra.gmra.mrb[252].mxu0 %v15957_v52  ;;  %9889 = vmatmul.mubr.bf16.vlgmr.msra.gmra.mrb[252].mxu1 %v15959_v30  ;;  %v8422_v33 = vpop.f32.mrb[235].mxu0  ;;  %v8475_v50 = vpop.f32.mrb[235].mxu1  ;;  %v16100_v47 = vrot.slane %v15964_v29, %v14318_v58  ;;  %v8624_v52 = vmax.f32 %v8417_v36, 0.0  ;;  %v12663_v29 = vld [vmem:[%s16386_s8 + $0x650] sm:$0xff]  }
0x2113   :  { %v8423_v25 = vadd.f32 %v8422_v33, %v15994_v44  ;;  %v8476_v0 = vadd.f32 %v8475_v50, %v16006_v43  ;;  %9847 = vmatprep.mubr.bf16.mxu0 %v16018_v11  ;;  %9896 = vmatprep.mubr.bf16.mxu1 %v16020_v20  ;;  %v8626_v30 = vmax.f32 %v8470_v42, 0.0  ;;  %v12662_v44 = vld [vmem:[%s16386_s8 + $0x688] sm:$0xff]   ;;  %v8625_v43 = vmax.f32 %v8419_v7, 0.0 }
0x2114   :  { %v8640_v31 = vmax.f32 %v8421_v32, 0.0  ;;  %v8642_v34 = vmax.f32 %v8474_v49, 0.0  ;;  %11547 = vmatpush3.bf16.msra.mxu0 %v12657_v59  ;;  %11575 = vmatpush3.bf16.msra.mxu1 %v12658_v17  ;;  %v8627_v11 = vmax.f32 %v8472_v3, 0.0  ;;  %v12672_v49 = vld [vmem:[%s16386_s8 + $0x6e0] sm:$0xff]  }
0x2115   :  { %v8641_v20 = vmax.f32 %v8423_v25, 0.0  ;;  %v8643_v63 = vmax.f32 %v8476_v0, 0.0  ;;  %11548 = vmatprep.subr.bf16.mxu0 %v12659_v60  ;;  %11576 = vmatprep.subr.bf16.mxu1 %v12660_v54 }
0x2116   :  { %v16114_v55 = vpack.c.bf16 %v8640_v31, %v8624_v52  ;;  %v16116_v13 = vpack.c.bf16 %v8642_v34, %v8626_v30 }
0x2117   :  { %v16118_v39 = vpack.c.bf16 %v8641_v20, %v8625_v43  ;;  %v16120_v8 = vpack.c.bf16 %v8643_v63, %v8627_v11  ;;  %v8512_v57 = vpop.f32.mrb[236].mxu0  ;;  %v8565_v10 = vpop.f32.mrb[236].mxu1  ;;  %v12673_v43 = vld [vmem:[%s16386_s8 + $0x620] sm:$0xff]  }
0x2118   :  { %11549 = vmatpush3.bf16.msra.mxu0 %v12661_v62  ;;  %11577 = vmatpush3.bf16.msra.mxu1 %v12662_v44  ;;  %v8513_v21 = vadd.f32 %v8512_v57, %v16080_v2  ;;  %v8566_v37 = vadd.f32 %v8565_v10, %v16084_v12  ;;  %v8514_v1 = vpop.f32.mrb[237].mxu0  ;;  %v8567_v22 = vpop.f32.mrb[237].mxu1  ;;  %v12674_v11 = vld [vmem:[%s16386_s8 + $0x6a0] sm:$0xff]   ;;  %v12675_v57 = vld [vmem:[%s16386_s8 + $0x668] sm:$0xff]  }
0x2119   :  { %v8515_v38 = vadd.f32 %v8514_v1, %v16092_v51  ;;  %v8568_v24 = vadd.f32 %v8567_v22, %v16100_v47  ;;  %v8516_v15 = vpop.f32.mrb[238].mxu0  ;;  %v8569_v28 = vpop.f32.mrb[238].mxu1  ;;  %11550 = vmatprep.subr.bf16.mxu0 %v12663_v29  ;;  %11578 = vmatprep.subr.bf16.mxu1 %v12664_v5  ;;  %v12676_v10 = vld [vmem:[%s16386_s8 + $0x6e8] sm:$0xff]  }
0x211a   :  { %v8517_v36 = vadd.f32 %v8516_v15, %v16080_v2  ;;  %v8570_v42 = vadd.f32 %v8569_v28, %v16084_v12  ;;  %9848 = vmatmul.mubr.bf16.gmra.mrb[0].mxu0 %v16014_v14  ;;  %9897 = vmatmul.mubr.bf16.gmra.mrb[0].mxu1 %v16016_v35  ;;  %v8518_v19 = vpop.f32.mrb[239].mxu0  ;;  %v8571_v4 = vpop.f32.mrb[239].mxu1  ;;  %v8596_v7 = vmax.f32 %v8513_v21, 0.0  ;;  %v8598_v3 = vmax.f32 %v8566_v37, 0.0  ;;  %v12669_v14 = vld [vmem:[%s16386_s8 + $0x618] sm:$0xff]  }
0x211b   :  { %v8519_v59 = vadd.f32 %v8518_v19, %v16092_v51  ;;  %v8572_v17 = vadd.f32 %v8571_v4, %v16100_v47  ;;  %9937 = vmatprep.mubr.bf16.mxu0 %v16058_v23  ;;  %9986 = vmatprep.mubr.bf16.mxu1 %v16060_v61  ;;  %v12670_v35 = vld [vmem:[%s16386_s8 + $0x698] sm:$0xff]   ;;  %v8597_v60 = vmax.f32 %v8515_v38, 0.0  ;;  %v8599_v54 = vmax.f32 %v8568_v24, 0.0  ;;  %v12671_v61 = vld [vmem:[%s16386_s8 + $0x660] sm:$0xff]  }
0x211c   :  { %v8612_v18 = vmax.f32 %v8517_v36, 0.0  ;;  %v8614_v6 = vmax.f32 %v8570_v42, 0.0  ;;  %11551 = vmatpush3.bf16.msra.mxu0 %v12665_v41  ;;  %11579 = vmatpush3.bf16.msra.mxu1 %v12666_v56  ;;  %v12680_v42 = vld [vmem:[%s16386_s8 + $0x6f0] sm:$0xff]  }
0x211d   :  { %v8613_v32 = vmax.f32 %v8519_v59, 0.0  ;;  %v8615_v23 = vmax.f32 %v8572_v17, 0.0  ;;  %11552 = vmatprep.subr.bf16.mxu0 %v12667_v53  ;;  %11580 = vmatprep.subr.bf16.mxu1 %v12668_v45  ;;  %v12677_v53 = vld [vmem:[%s16386_s8 + $0x628] sm:$0xff]  }
0x211e   :  { %v16158_v33 = vpack.c.bf16 %v8612_v18, %v8596_v7  ;;  %v16160_v50 = vpack.c.bf16 %v8614_v6, %v8598_v3  ;;  %v12681_v7 = vld [vmem:[%s16386_s8 + $0x630] sm:$0xff]   ;;  %v12683_v18 = vld [vmem:[%s16386_s8 + $0x678] sm:$0xff]  }
0x211f   :  { %v16162_v25 = vpack.c.bf16 %v8613_v32, %v8597_v60  ;;  %v16164_v0 = vpack.c.bf16 %v8615_v23, %v8599_v54  ;;  %v8522_v52 = vpop.f32.mrb[240].mxu0  ;;  %v8575_v30 = vpop.f32.mrb[240].mxu1  ;;  %v12682_v3 = vld [vmem:[%s16386_s8 + $0x6b0] sm:$0xff]   ;;  %v12684_v6 = vld [vmem:[%s16386_s8 + $0x6f8] sm:$0xff]   ;;  %v12687_v60 = vld [vmem:[%s16386_s8 + $0x740] sm:$0xff]  }
0x2120   :  { %11553 = vmatpush3.bf16.msra.mxu0 %v12669_v14  ;;  %11581 = vmatpush3.bf16.msra.mxu1 %v12670_v35  ;;  %v8523_v31 = vadd.f32 %v8522_v52, %v16080_v2  ;;  %v8576_v34 = vadd.f32 %v8575_v30, %v16084_v12  ;;  %v8524_v62 = vpop.f32.mrb[241].mxu0  ;;  %v8577_v44 = vpop.f32.mrb[241].mxu1  ;;  %v12685_v14 = vld [vmem:[%s16386_s8 + $0x638] sm:$0xff]   ;;  %v12688_v54 = vld [vmem:[%s16386_s8 + $0x7c0] sm:$0xff]   ;;  %v12693_v52 = vld [vmem:[%s16386_s8 + $0x708] sm:$0xff]  }
0x2121   :  { %v8525_v20 = vadd.f32 %v8524_v62, %v16092_v51  ;;  %v8578_v63 = vadd.f32 %v8577_v44, %v16100_v47  ;;  %v8526_v29 = vpop.f32.mrb[242].mxu0  ;;  %v8579_v5 = vpop.f32.mrb[242].mxu1  ;;  %11554 = vmatprep.subr.bf16.mxu0 %v12671_v61  ;;  %11582 = vmatprep.subr.bf16.mxu1 %v12672_v49  ;;  %v12686_v35 = vld [vmem:[%s16386_s8 + $0x6b8] sm:$0xff]   ;;  %v12689_v32 = vld [vmem:[%s16386_s8 + $0x700] sm:$0xff]   ;;  %v12691_v61 = vld [vmem:[%s16386_s8 + $0x748] sm:$0xff]  }
0x2122   :  { %v8527_v21 = vadd.f32 %v8526_v29, %v16080_v2  ;;  %v8580_v37 = vadd.f32 %v8579_v5, %v16084_v12  ;;  %v8528_v1 = vpop.f32.mrb[243].mxu0  ;;  %v8581_v22 = vpop.f32.mrb[243].mxu1  ;;  %v8628_v38 = vmax.f32 %v8523_v31, 0.0  ;;  %v8630_v24 = vmax.f32 %v8576_v34, 0.0  ;;  %v12678_v2 = vld [vmem:[%s16386_s8 + $0x6a8] sm:$0xff]   ;;  %v12690_v23 = vld [vmem:[%s16386_s8 + $0x780] sm:$0xff]  }
0x2123   :  { %v8529_v41 = vadd.f32 %v8528_v1, %v16092_v51  ;;  %v8582_v56 = vadd.f32 %v8581_v22, %v16100_v47  ;;  %v8629_v12 = vmax.f32 %v8525_v20, 0.0  ;;  %v8631_v45 = vmax.f32 %v8578_v63, 0.0  ;;  %v12679_v47 = vld [vmem:[%s16386_s8 + $0x670] sm:$0xff]   ;;  %v12692_v49 = vld [vmem:[%s16386_s8 + $0x7c8] sm:$0xff]   ;;  %v12699_v31 = vld [vmem:[%s16386_s8 + $0x758] sm:$0xff]  }
0x2124   :  { %v8644_v15 = vmax.f32 %v8527_v21, 0.0  ;;  %v8646_v28 = vmax.f32 %v8580_v37, 0.0  ;;  %11555 = vmatpush3.bf16.msra.mxu0 %v12673_v43  ;;  %11583 = vmatpush3.bf16.msra.mxu1 %v12674_v11  ;;  %v12694_v30 = vld [vmem:[%s16386_s8 + $0x788] sm:$0xff]   ;;  %v12700_v34 = vld [vmem:[%s16386_s8 + $0x7d8] sm:$0xff]   ;;  %v12711_v29 = vld [vmem:[%s16386_s8 + $0x770] sm:$0xff]  }
0x2125   :  { %v8645_v36 = vmax.f32 %v8529_v41, 0.0  ;;  %v8647_v51 = vmax.f32 %v8582_v56, 0.0  ;;  %11556 = vmatprep.subr.bf16.mxu0 %v12675_v57  ;;  %11584 = vmatprep.subr.bf16.mxu1 %v12676_v10  ;;  %v12701_v62 = vld [vmem:[%s16386_s8 + $0x718] sm:$0xff]   ;;  %v12707_v43 = vld [vmem:[%s16386_s8 + $0x768] sm:$0xff]   ;;  %v12712_v5 = vld [vmem:[%s16386_s8 + $0x7f0] sm:$0xff]  }
0x2126   :  { %v16198_v19 = vpack.c.bf16 %v8644_v15, %v8628_v38  ;;  %v16200_v4 = vpack.c.bf16 %v8646_v28, %v8630_v24  ;;  %v12702_v44 = vld [vmem:[%s16386_s8 + $0x798] sm:$0xff]   ;;  %v12708_v11 = vld [vmem:[%s16386_s8 + $0x7e8] sm:$0xff]   ;;  %v12713_v57 = vld [vmem:[%s16386_s8 + $0x730] sm:$0xff]  }
0x2127   :  { %v16202_v59 = vpack.c.bf16 %v8645_v36, %v8629_v12  ;;  %v16204_v17 = vpack.c.bf16 %v8647_v51, %v8631_v45  ;;  %v12709_v20 = vld [vmem:[%s16386_s8 + $0x728] sm:$0xff]   ;;  %v12714_v10 = vld [vmem:[%s16386_s8 + $0x7b0] sm:$0xff]   ;;  %v12715_v21 = vld [vmem:[%s16386_s8 + $0x778] sm:$0xff]  }
0x2128   :  { %11557 = vmatpush3.bf16.msra.mxu0 %v12677_v53  ;;  %11585 = vmatpush3.bf16.msra.mxu1 %v12678_v2  ;;  %v12710_v63 = vld [vmem:[%s16386_s8 + $0x7a8] sm:$0xff]   ;;  %v12716_v37 = vld [vmem:[%s16386_s8 + $0x7f8] sm:$0xff]  }
0x2129   :  { %11558 = vmatprep.subr.bf16.mxu0 %v12679_v47  ;;  %11586 = vmatprep.subr.bf16.mxu1 %v12680_v42  ;;  %v12717_v1 = vld [vmem:[%s16386_s8 + $0x738] sm:$0xff]  }
0x212a   :  { %v12718_v22 = vld [vmem:[%s16386_s8 + $0x7b8] sm:$0xff]  }
0x212b   :  { %v10908_v38 = vld [vmem:[%s16388_s10 + $0x18] ss:$0 sm:$0xff] }
0x212c   :  { %11559 = vmatpush3.bf16.msra.mxu0 %v12681_v7  ;;  %11587 = vmatpush3.bf16.msra.mxu1 %v12682_v3 }
0x212d   :  { %11560 = vmatprep.subr.bf16.mxu0 %v12683_v18  ;;  %11588 = vmatprep.subr.bf16.mxu1 %v12684_v6 }
0x2130   :  { %11561 = vmatpush3.bf16.msra.mxu0 %v12685_v14  ;;  %11589 = vmatpush3.bf16.msra.mxu1 %v12686_v35 }
0x2131   :  { %11602 = vmatprep.subr.bf16.mxu0 %v12687_v60  ;;  %11630 = vmatprep.subr.bf16.mxu1 %v12688_v54 }
0x2133   :  { %9938 = vmatmul.mubr.bf16.vlgmr.msra.gmra.mrb[4].mxu0 %v16054_v40  ;;  %9987 = vmatmul.mubr.bf16.vlgmr.msra.gmra.mrb[4].mxu1 %v16056_v16  ;;  %v12695_v40 = vld [vmem:[%s16386_s8 + $0x750] sm:$0xff]  }
0x2134   :  { %9945 = vmatprep.mubr.bf16.mxu0 %v16118_v39  ;;  %9994 = vmatprep.mubr.bf16.mxu1 %v16120_v8  ;;  %v12696_v16 = vld [vmem:[%s16386_s8 + $0x7d0] sm:$0xff]  }
0x2135   :  { %11603 = vmatpush3.bf16.msra.mxu0 %v12689_v32  ;;  %11631 = vmatpush3.bf16.msra.mxu1 %v12690_v23  ;;  %v12697_v39 = vld [vmem:[%s16386_s8 + $0x710] sm:$0xff]  }
0x2136   :  { %11604 = vmatprep.subr.bf16.mxu0 %v12691_v61  ;;  %11632 = vmatprep.subr.bf16.mxu1 %v12692_v49  ;;  %v12698_v8 = vld [vmem:[%s16386_s8 + $0x790] sm:$0xff]  }
0x2139   :  { %11605 = vmatpush3.bf16.msra.mxu0 %v12693_v52  ;;  %11633 = vmatpush3.bf16.msra.mxu1 %v12694_v30 }
0x213a   :  { %11606 = vmatprep.subr.bf16.mxu0 %v12695_v40  ;;  %11634 = vmatprep.subr.bf16.mxu1 %v12696_v16 }
0x213b   :  { %9946 = vmatmul.mubr.bf16.gmra.mrb[8].mxu0 %v16114_v55  ;;  %9995 = vmatmul.mubr.bf16.gmra.mrb[8].mxu1 %v16116_v13  ;;  %v12703_v55 = vld [vmem:[%s16386_s8 + $0x760] sm:$0xff]  }
0x213c   :  { %10035 = vmatprep.mubr.bf16.mxu0 %v16162_v25  ;;  %10084 = vmatprep.mubr.bf16.mxu1 %v16164_v0  ;;  %v12704_v13 = vld [vmem:[%s16386_s8 + $0x7e0] sm:$0xff]  }
0x213d   :  { %11607 = vmatpush3.bf16.msra.mxu0 %v12697_v39  ;;  %11635 = vmatpush3.bf16.msra.mxu1 %v12698_v8  ;;  %v12705_v25 = vld [vmem:[%s16386_s8 + $0x720] sm:$0xff]  }
0x213e   :  { %11608 = vmatprep.subr.bf16.mxu0 %v12699_v31  ;;  %11636 = vmatprep.subr.bf16.mxu1 %v12700_v34  ;;  %v12706_v0 = vld [vmem:[%s16386_s8 + $0x7a0] sm:$0xff]  }
0x2141   :  { %11609 = vmatpush3.bf16.msra.mxu0 %v12701_v62  ;;  %11637 = vmatpush3.bf16.msra.mxu1 %v12702_v44 }
0x2142   :  { %11610 = vmatprep.subr.bf16.mxu0 %v12703_v55  ;;  %11638 = vmatprep.subr.bf16.mxu1 %v12704_v13 }
0x2145   :  { %11611 = vmatpush3.bf16.msra.mxu0 %v12705_v25  ;;  %11639 = vmatpush3.bf16.msra.mxu1 %v12706_v0 }
0x2146   :  { %11612 = vmatprep.subr.bf16.mxu0 %v12707_v43  ;;  %11640 = vmatprep.subr.bf16.mxu1 %v12708_v11 }
0x2149   :  { %11613 = vmatpush3.bf16.msra.mxu0 %v12709_v20  ;;  %11641 = vmatpush3.bf16.msra.mxu1 %v12710_v63 }
0x214a   :  { %11614 = vmatprep.subr.bf16.mxu0 %v12711_v29  ;;  %11642 = vmatprep.subr.bf16.mxu1 %v12712_v5 }
0x214d   :  { %11615 = vmatpush3.bf16.msra.mxu0 %v12713_v57  ;;  %11643 = vmatpush3.bf16.msra.mxu1 %v12714_v10 }
0x214e   :  { %11616 = vmatprep.subr.bf16.mxu0 %v12715_v21  ;;  %11644 = vmatprep.subr.bf16.mxu1 %v12716_v37 }
0x2151   :  { %11617 = vmatpush3.bf16.msra.mxu0 %v12717_v1  ;;  %11645 = vmatpush3.bf16.msra.mxu1 %v12718_v22 }
0x2154   :  { %10036 = vmatmul.mubr.bf16.vlgmr.msra.gmra.mrb[12].mxu0 %v16158_v33  ;;  %10085 = vmatmul.mubr.bf16.vlgmr.msra.gmra.mrb[12].mxu1 %v16160_v50 }
0x2155   :  { %10043 = vmatprep.mubr.bf16.mxu0 %v16202_v59  ;;  %10092 = vmatprep.mubr.bf16.mxu1 %v16204_v17 }
0x215c   :  { %10044 = vmatmul.mubr.bf16.gmra.mrb[16].mxu0 %v16198_v19  ;;  %10093 = vmatmul.mubr.bf16.gmra.mrb[16].mxu1 %v16200_v4 }
0x21c5   :  { %v11450_v41 = vpop.f32.mrb[244].mxu0  ;;  %v11478_v56 = vpop.f32.mrb[244].mxu1 }
0x21c6   :  { %v11451_v24 = vpop.f32.mrb[245].mxu0  ;;  %v11479_v15 = vpop.f32.mrb[245].mxu1 }
0x21c7   :  { %v11452_v28 = vadd.f32 %v11451_v24, %v11450_v41  ;;  %v11480_v33 = vadd.f32 %v11479_v15, %v11478_v56  ;;  %v11453_v53 = vpop.f32.mrb[246].mxu0  ;;  %v11481_v50 = vpop.f32.mrb[246].mxu1 }
0x21c8   :  { %v11454_v2 = vpop.f32.mrb[247].mxu0  ;;  %v11482_v12 = vpop.f32.mrb[247].mxu1 }
0x21c9   :  { %v9744_v45 = vadd.f32 %v11452_v28, %v10908_v38  ;;  %v11455_v36 = vadd.f32 %v11454_v2, %v11453_v53  ;;  %v11483_v51 = vadd.f32 %v11482_v12, %v11481_v50 }
0x21cb   :  { %v9793_v47 = vadd.f32 %v11480_v33, %v9744_v45  ;;  %v9747_v42 = vadd.f32 %v11455_v36, %v10908_v38 }
0x21cd   :  { %v9796_v19 = vadd.f32 %v11483_v51, %v9747_v42  ;;  %v11456_v4 = vpop.f32.mrb[248].mxu0  ;;  %v11484_v59 = vpop.f32.mrb[248].mxu1 }
0x21ce   :  { %v11457_v17 = vpop.f32.mrb[249].mxu0  ;;  %v11485_v7 = vpop.f32.mrb[249].mxu1 }
0x21cf   :  { %v11458_v3 = vadd.f32 %v11457_v17, %v11456_v4  ;;  %v11486_v18 = vadd.f32 %v11485_v7, %v11484_v59  ;;  %v11459_v6 = vpop.f32.mrb[250].mxu0  ;;  %v11487_v14 = vpop.f32.mrb[250].mxu1 }
0x21d0   :  { %v11460_v35 = vpop.f32.mrb[251].mxu0  ;;  %v11488_v60 = vpop.f32.mrb[251].mxu1 }
0x21d1   :  { %v9752_v54 = vadd.f32 %v11458_v3, %v10908_v38  ;;  %v11461_v32 = vadd.f32 %v11460_v35, %v11459_v6  ;;  %v11489_v23 = vadd.f32 %v11488_v60, %v11487_v14 }
0x21d3   :  { %v9801_v61 = vadd.f32 %v11486_v18, %v9752_v54  ;;  %v9755_v49 = vadd.f32 %v11461_v32, %v10908_v38 }
0x21d5   :  { %v9804_v52 = vadd.f32 %v11489_v23, %v9755_v49 }
0x21e5   :  { %v11506_v30 = vpop.f32.mrb[252].mxu0  ;;  %v11534_v40 = vpop.f32.mrb[252].mxu1 }
0x21e6   :  { %v11507_v16 = vpop.f32.mrb[253].mxu0  ;;  %v11535_v39 = vpop.f32.mrb[253].mxu1 }
0x21e7   :  { %v11508_v8 = vadd.f32 %v11507_v16, %v11506_v30  ;;  %v11536_v31 = vadd.f32 %v11535_v39, %v11534_v40  ;;  %v11509_v34 = vpop.f32.mrb[254].mxu0  ;;  %v11537_v62 = vpop.f32.mrb[254].mxu1 }
0x21e8   :  { %v11510_v44 = vpop.f32.mrb[255].mxu0  ;;  %v11538_v55 = vpop.f32.mrb[255].mxu1 }
0x21e9   :  { %v9842_v13 = vadd.f32 %v11508_v8, %v9793_v47  ;;  %v11511_v25 = vadd.f32 %v11510_v44, %v11509_v34  ;;  %v11539_v0 = vadd.f32 %v11538_v55, %v11537_v62 }
0x21eb   :  { %v9891_v43 = vadd.f32 %v11536_v31, %v9842_v13  ;;  %v9845_v11 = vadd.f32 %v11511_v25, %v9796_v19 }
0x21ed   :  { %v9894_v20 = vadd.f32 %v11539_v0, %v9845_v11  ;;  %v11512_v63 = vpop.f32.mrb[0].mxu0  ;;  %v11540_v29 = vpop.f32.mrb[0].mxu1 }
0x21ee   :  { %v11513_v5 = vpop.f32.mrb[1].mxu0  ;;  %v11541_v57 = vpop.f32.mrb[1].mxu1 }
0x21ef   :  { %v11514_v10 = vadd.f32 %v11513_v5, %v11512_v63  ;;  %v11542_v21 = vadd.f32 %v11541_v57, %v11540_v29  ;;  %v11515_v37 = vpop.f32.mrb[2].mxu0  ;;  %v11543_v1 = vpop.f32.mrb[2].mxu1 }
0x21f0   :  { %v11516_v22 = vpop.f32.mrb[3].mxu0  ;;  %v11544_v41 = vpop.f32.mrb[3].mxu1 }
0x21f1   :  { %v9850_v56 = vadd.f32 %v11514_v10, %v9801_v61  ;;  %v11517_v38 = vadd.f32 %v11516_v22, %v11515_v37  ;;  %v11545_v24 = vadd.f32 %v11544_v41, %v11543_v1 }
0x21f3   :  { %v9899_v15 = vadd.f32 %v11542_v21, %v9850_v56  ;;  %v9853_v28 = vadd.f32 %v11517_v38, %v9804_v52 }
0x21f5   :  { %v9902_v33 = vadd.f32 %v11545_v24, %v9853_v28 }
0x2206   :  { %v11562_v53 = vpop.f32.mrb[4].mxu0  ;;  %v11590_v50 = vpop.f32.mrb[4].mxu1 }
0x2207   :  { %v11563_v2 = vpop.f32.mrb[5].mxu0  ;;  %v11591_v12 = vpop.f32.mrb[5].mxu1 }
0x2208   :  { %v11564_v45 = vadd.f32 %v11563_v2, %v11562_v53  ;;  %v11592_v36 = vadd.f32 %v11591_v12, %v11590_v50  ;;  %v11565_v51 = vpop.f32.mrb[6].mxu0  ;;  %v11593_v47 = vpop.f32.mrb[6].mxu1 }
0x2209   :  { %v11566_v42 = vpop.f32.mrb[7].mxu0  ;;  %v11594_v19 = vpop.f32.mrb[7].mxu1 }
0x220a   :  { %v9940_v4 = vadd.f32 %v11564_v45, %v9891_v43  ;;  %v11567_v59 = vadd.f32 %v11566_v42, %v11565_v51  ;;  %v11595_v17 = vadd.f32 %v11594_v19, %v11593_v47 }
0x220c   :  { %v9989_v7 = vadd.f32 %v11592_v36, %v9940_v4  ;;  %v9943_v3 = vadd.f32 %v11567_v59, %v9894_v20 }
0x220e   :  { %v9992_v18 = vadd.f32 %v11595_v17, %v9943_v3  ;;  %v11568_v6 = vpop.f32.mrb[8].mxu0  ;;  %v11596_v14 = vpop.f32.mrb[8].mxu1 }
0x220f   :  { %v11569_v35 = vpop.f32.mrb[9].mxu0  ;;  %v11597_v60 = vpop.f32.mrb[9].mxu1 }
0x2210   :  { %v11570_v54 = vadd.f32 %v11569_v35, %v11568_v6  ;;  %v11598_v32 = vadd.f32 %v11597_v60, %v11596_v14  ;;  %v11571_v23 = vpop.f32.mrb[10].mxu0  ;;  %v11599_v61 = vpop.f32.mrb[10].mxu1 }
0x2211   :  { %v11572_v49 = vpop.f32.mrb[11].mxu0  ;;  %v11600_v52 = vpop.f32.mrb[11].mxu1 }
0x2212   :  { %v9948_v30 = vadd.f32 %v11570_v54, %v9899_v15  ;;  %v11573_v40 = vadd.f32 %v11572_v49, %v11571_v23  ;;  %v11601_v16 = vadd.f32 %v11600_v52, %v11599_v61 }
0x2214   :  { %v9997_v39 = vadd.f32 %v11598_v32, %v9948_v30  ;;  %v9951_v8 = vadd.f32 %v11573_v40, %v9902_v33 }
0x2216   :  { %v10000_v31 = vadd.f32 %v11601_v16, %v9951_v8  ;;  %v12719_v8 = vld [vmem:[%s16390_s12] sm:$0xff]  }
0x2217   :  { %12126 = vmatprep.subr.bf16.mxu0 %v12719_v8 }
0x2218   :  { %12127 = vmatpush3.bf16.msra.mxu0 %v12719_v8 }
0x2227   :  { %v11618_v34 = vpop.f32.mrb[12].mxu0  ;;  %v11646_v62 = vpop.f32.mrb[12].mxu1 }
0x2228   :  { %v11619_v44 = vpop.f32.mrb[13].mxu0  ;;  %v11647_v55 = vpop.f32.mrb[13].mxu1 }
0x2229   :  { %v11620_v13 = vadd.f32 %v11619_v44, %v11618_v34  ;;  %v11648_v25 = vadd.f32 %v11647_v55, %v11646_v62  ;;  %v11621_v0 = vpop.f32.mrb[14].mxu0  ;;  %v11649_v43 = vpop.f32.mrb[14].mxu1 }
0x222a   :  { %v11622_v11 = vpop.f32.mrb[15].mxu0  ;;  %v11650_v20 = vpop.f32.mrb[15].mxu1 }
0x222b   :  { %v10038_v63 = vadd.f32 %v11620_v13, %v9989_v7  ;;  %v11623_v29 = vadd.f32 %v11622_v11, %v11621_v0  ;;  %v11651_v5 = vadd.f32 %v11650_v20, %v11649_v43 }
0x222d   :  { %v10087_v57 = vadd.f32 %v11648_v25, %v10038_v63  ;;  %v10041_v10 = vadd.f32 %v11623_v29, %v9992_v18 }
0x222f   :  { %v10090_v21 = vadd.f32 %v11651_v5, %v10041_v10  ;;  %v11624_v37 = vpop.f32.mrb[16].mxu0  ;;  %v11652_v1 = vpop.f32.mrb[16].mxu1  ;;  %v10101_v22 = vadd.f32 %v10087_v57, %v15649_v27  ;;  %v13036_v5 = vld [vmem:[%s16388_s10 + $0x10] sm:$0xff] }
0x2230   :  { %v11625_v41 = vpop.f32.mrb[17].mxu0  ;;  %v11653_v56 = vpop.f32.mrb[17].mxu1  ;;  %v10160_v57 = vrot.slane %v13036_v5, %v14309_v46 }
0x2231   :  { %v11626_v38 = vadd.f32 %v11625_v41, %v11624_v37  ;;  %v11654_v24 = vadd.f32 %v11653_v56, %v11652_v1  ;;  %v11627_v15 = vpop.f32.mrb[18].mxu0  ;;  %v11655_v28 = vpop.f32.mrb[18].mxu1  ;;  %v10105_v33 = vsel %vm90_vm0, %v10101_v22, 0.0  ;;  %v10102_v53 = vadd.f32 %v10090_v21, %v15651_v26 }
0x2232   :  { %v11628_v50 = vpop.f32.mrb[19].mxu0  ;;  %v11656_v2 = vpop.f32.mrb[19].mxu1  ;;  %10106 = vadd.xlane.f32.xlu1 %v10105_v33 }
0x2233   :  { %v10046_v12 = vadd.f32 %v11626_v38, %v9997_v39  ;;  %v11629_v45 = vadd.f32 %v11628_v50, %v11627_v15  ;;  %v11657_v36 = vadd.f32 %v11656_v2, %v11655_v28  ;;  %v10108_v51 = vsel %vm90_vm0, %v10102_v53, 0.0 }
0x2234   :  { %10109 = vadd.xlane.f32.xlu0 %v10108_v51 }
0x2235   :  { %v10095_v27 = vadd.f32 %v11654_v24, %v10046_v12  ;;  %v10049_v47 = vadd.f32 %v11629_v45, %v10000_v31  ;;  %v12720_v31 = vld [vmem:[%s16390_s12 + $0x8] sm:$0xff]  }
0x2236   :  { %12128 = vmatprep.subr.bf16.mxu0 %v12720_v31 }
0x2237   :  { %v10098_v42 = vadd.f32 %v11657_v36, %v10049_v47  ;;  %v10103_v19 = vadd.f32 %v10095_v27, %v15688_v48  ;;  %12129 = vmatpush3.bf16.msra.mxu0 %v12720_v31 }
0x2239   :  { %v10111_v4 = vsel %vm90_vm0, %v10103_v19, 0.0  ;;  %v10104_v59 = vadd.f32 %v10098_v42, %v15686_v9 }
0x223a   :  { %10112 = vadd.xlane.f32.xlu1 %v10111_v4 }
0x223b   :  { %v10114_v26 = vsel %vm90_vm0, %v10104_v59, 0.0 }
0x223c   :  { %10115 = vadd.xlane.f32.xlu0 %v10114_v26 }
0x22bf   :  { %v10107_v17 = vpop.xlane.xlu1 %10106 }
0x22c0   :  { %v10117_v7 = vmul.f32 0.03125, %v10107_v17 }
0x22c1   :  { %v10110_v3 = vpop.xlane.xlu0 %10109 }
0x22c2   :  { %v10121_v18 = vsub.f32 %v10101_v22, %v10117_v7  ;;  %v10118_v6 = vmul.f32 0.03125, %v10110_v3  ;;  %v10168_v22 = vrot.slane %v13036_v5, %v14318_v58  ;;  %v11037_v58 = vld [vmem:[%s16391_s13] ss:$0 sm:$0xff] }
0x22c4   :  { %v10122_v14 = vsub.f32 %v10102_v53, %v10118_v6  ;;  %v10125_v35 = vmul.f32 %v10121_v18, %v10121_v18 }
0x22c6   :  { %v10129_v60 = vsel %vm90_vm0, %v10125_v35, 0.0  ;;  %v10126_v54 = vmul.f32 %v10122_v14, %v10122_v14 }
0x22c7   :  { %10130 = vadd.xlane.f32.xlu1 %v10129_v60  ;;  %v10113_v48 = vpop.xlane.xlu1 %10112 }
0x22c8   :  { %v10119_v32 = vmul.f32 0.03125, %v10113_v48  ;;  %v10132_v23 = vsel %vm90_vm0, %v10126_v54, 0.0 }
0x22c9   :  { %10133 = vadd.xlane.f32.xlu0 %v10132_v23  ;;  %v10116_v9 = vpop.xlane.xlu0 %10115 }
0x22ca   :  { %v10123_v61 = vsub.f32 %v10103_v19, %v10119_v32  ;;  %v10120_v49 = vmul.f32 0.03125, %v10116_v9 }
0x22cc   :  { %v10124_v52 = vsub.f32 %v10104_v59, %v10120_v49  ;;  %v10127_v30 = vmul.f32 %v10123_v61, %v10123_v61 }
0x22ce   :  { %v10135_v40 = vsel %vm90_vm0, %v10127_v30, 0.0  ;;  %v10128_v16 = vmul.f32 %v10124_v52, %v10124_v52 }
0x22cf   :  { %10136 = vadd.xlane.f32.xlu1 %v10135_v40 }
0x22d0   :  { %v10138_v39 = vsel %vm90_vm0, %v10128_v16, 0.0 }
0x22d1   :  { %10139 = vadd.xlane.f32.xlu0 %v10138_v39 }
0x2354   :  { %v10131_v34 = vpop.xlane.xlu1 %10130 }
0x2355   :  { %v10141_v62 = vmul.f32 0.03125, %v10131_v34 }
0x2356   :  { %v10134_v44 = vpop.xlane.xlu0 %10133 }
0x2357   :  { %v10145_v55 = vadd.f32 1e-05, %v10141_v62  ;;  %v10142_v13 = vmul.f32 0.03125, %v10134_v44 }
0x2359   :  { %13017 = vrsqrt.f32 %v10145_v55  ;;  %v10146_v25 = vadd.f32 1e-05, %v10142_v13 }
0x235b   :  { %13019 = vrsqrt.f32 %v10146_v25 }
0x235c   :  { %v10137_v0 = vpop.xlane.xlu1 %10136 }
0x235d   :  { %v10143_v43 = vmul.f32 0.03125, %v10137_v0 }
0x235e   :  { %v10140_v11 = vpop.xlane.xlu0 %10139 }
0x235f   :  { %v10147_v20 = vadd.f32 1e-05, %v10143_v43  ;;  %v10144_v63 = vmul.f32 0.03125, %v10140_v11 }
0x2361   :  { %13021 = vrsqrt.f32 %v10147_v20  ;;  %v10148_v29 = vadd.f32 1e-05, %v10144_v63 }
0x2363   :  { %v13018_v10 = vpop.eup %13017  ;;  %13023 = vrsqrt.f32 %v10148_v29 }
0x2364   :  { %v10153_v21 = vmul.f32 %v13018_v10, %v10121_v18 }
0x2365   :  { %v13020_v37 = vpop.eup %13019 }
0x2366   :  { %v10154_v1 = vmul.f32 %v13020_v37, %v10122_v14  ;;  %v10161_v41 = vmul.f32 %v10160_v57, %v10153_v21 }
0x2368   :  { %v10162_v56 = vmul.f32 %v10160_v57, %v10154_v1  ;;  %v10169_v38 = vadd.f32 %v10168_v22, %v10161_v41 }
0x236a   :  { %v10170_v24 = vadd.f32 %v10168_v22, %v10162_v56 }
0x236b   :  { %v13022_v15 = vpop.eup %13021 }
0x236c   :  { %v10155_v28 = vmul.f32 %v13022_v15, %v10123_v61  ;;  %v10177_v33 = vpack.c.bf16 %v10170_v24, %v10169_v38 }
0x236d   :  { %v13024_v53 = vpop.eup %13023 }
0x236e   :  { %v10163_v50 = vmul.f32 %v10160_v57, %v10155_v28  ;;  %v10156_v2 = vmul.f32 %v13024_v53, %v10124_v52  ;;  %12130 = vmatprep.mubr.msk.bf16.mxu0 %vm90_vm0, %v10177_v33 }
0x2370   :  { %v10164_v46 = vmul.f32 %v10160_v57, %v10156_v2  ;;  %v10171_v12 = vadd.f32 %v10168_v22, %v10163_v50 }
0x2372   :  { %v10172_v45 = vadd.f32 %v10168_v22, %v10164_v46 }
0x2374   :  { %v10178_v36 = vpack.c.bf16 %v10172_v45, %v10171_v12 }
0x2376   :  { %12131 = vmatmul.mubr.msk.bf16.vlgmr.msra.gmra.mrb[20].mxu0 %vm90_vm0, %v10178_v36 }
0x2449   :  { %v12132_v51 = vpop.f32.mrb[20].mxu0 }
0x244a   :  { %v10247_v27 = vadd.f32 %v12132_v51, %v11037_v58  ;;  %v10238_v47 = vpop.f32.mrb[21].mxu0 }
0x244b   :  { %v10239_v42 = vadd.f32 %v11037_v58, %v10238_v47  ;;  %v12133_v19 = vpop.f32.mrb[22].mxu0 }
0x244c   :  { %10255 = vst [vmem:[#allocation2 + $0x10] sm:$0xff] %v10247_v27  ;;  %v10250_v4 = vadd.f32 %v12133_v19, %v11037_v58  ;;  %v10241_v59 = vpop.f32.mrb[23].mxu0 }
0x244d   :  { %10253 = vst [vmem:[#allocation2] sm:$0xff] %v10239_v42  ;;  %v10242_v26 = vadd.f32 %v11037_v58, %v10241_v59 }
0x244e   :  { %10256 = vst [vmem:[#allocation2 + $0x18] sm:$0xff] %v10250_v4 }
0x244f   :  { %10254 = vst [vmem:[#allocation2 + $0x8] sm:$0xff] %v10242_v26 }
0x2450   :  { %13048 = shalt.err (!%p13045_p4)
}
0x2451   :  { %s13049_s7 = scalar_lea.hbm %s16392_s14, 512 }
0x2452   :  { %p13050_p5 = scmp.ne.s32.totalorder %s16392_s14, %s13049_s7  ;;  %p13053_p6 = scmp.lt.u32.totalorder %s13049_s7, %s16392_s14 }
0x2454   :  { %p13055_p7 = pnand %p13053_p6, %p13050_p5 }
0x2456   :  { %13058 = shalt.err (!%p13055_p7)
}
0x2457   :  { %s13073_s23 = smov 128  }
0x2458   :  { %10268 = dma.vmem_to_hbm [thread:$0]  %s10263_s30, 512, %s16392_s14, [#allocation3], %s13073_s23, %s13073_s23, %s13068_s22  }
0x2459   :  { %13059 = dma.done.wait [#allocation3], 512  }
0x245a   :  { %13060 = vsyncadd [#allocation3], 4294966784 }
0x245b   :  { %10272 = vsyncpa [#allocation3], 1 }

</bundles_post_ra>
